<compile_context>
chip_gen: v6e
topology: v6e:2x2x1
jax: 0.10.0
libtpu: 0.0.40
codegen_flags: <defaults>
</compile_context>

<pallas_src>
import functools

import jax
import jax.numpy as jnp
from jax.experimental import pallas as pl
from jax.experimental.pallas import tpu as pltpu


# ----------------------------- Pallas kernel -------------------------------
def _encoder_kernel(x_ref, init_ref, a_ref, wx_ref, wsg_ref, wsu_ref, b_ref,
                    hseq_ref, hfin_ref, xbuf,
                    *, cheb_k, num_layers, hidden, seq_len):
    """Fused AGCRNN encoder for one batch row (grid=(B,)).

    x_ref    : (1, T, N, H)   layer-0 input, channel-padded to H, f32
    init_ref : (1, L, N, H)   per-layer initial hidden states
    a_ref    : (N, N)         support
    wx_ref   : (L, K*H, 3H)   x-side weights, columns = [z | r | u]
    wsg_ref  : (L, K*H, 2H)   state-side gate weights, columns = [z | r]
    wsu_ref  : (L, K*H,  H)   state-side candidate weights
    b_ref    : (L, 1, 3H)     biases, columns = [b_z | b_r | b_u]
    hseq_ref : (1, T, N, H)   OUT: last layer's sequence
    hfin_ref : (1, L, N, H)   OUT: final state of every layer
    xbuf     : VMEM (2, T, N, H) scratch: ping-pong buffer holding the current
               layer's input sequence (only used for L >= 2).
    """
    H = hidden
    A = a_ref[...]                                   # [N, N], resident

    def cheb_concat(v):
        # [T_0 v | T_1 v | ... | T_{K-1} v] stacked along the contraction axis.
        # T_0 = I, T_1 = A, T_k = 2A T_{k-1} - T_{k-2} (2x folded in, no 2A input).
        terms = [v, jnp.dot(A, v, preferred_element_type=jnp.float32)]
        for _ in range(2, cheb_k):
            terms.append(
                2.0 * jnp.dot(A, terms[-1], preferred_element_type=jnp.float32)
                - terms[-2])
        return jnp.concatenate(terms, axis=-1)        # [N, K*dim]

    for l in range(num_layers):                       # static layer loop
        is_first = (l == 0)
        is_last = (l == num_layers - 1)
        wx = wx_ref[l]                                # [K*H, 3H]
        wsg = wsg_ref[l]                              # [K*H, 2H]
        wsu = wsu_ref[l]                              # [K*H,  H]
        bias = b_ref[l]                               # [1, 3H]
        st = init_ref[0, l]                           # [N, H] f32

        # Static (unrolled) time loop: T is small; the recurrence serializes
        # the steps anyway and unrolling gives the LLO scheduler full
        # visibility. TODO(synk): switch to lax.fori_loop for very long T.
        for t in range(seq_len):
            x_t = x_ref[0, t] if is_first else xbuf[(l - 1) % 2, t]   # [N, H]

            tx = cheb_concat(x_t)                     # [N, K*H]  (shared by gate & cand.)
            ts = cheb_concat(st)                      # [N, K*H]

            # x-side contribution to [z | r | u] in ONE dot, bias folded in.
            zru = jnp.dot(tx, wx, preferred_element_type=jnp.float32) + bias   # [N, 3H]
            # state-side contribution to [z | r] in one dot.
            zr_s = jnp.dot(ts, wsg, preferred_element_type=jnp.float32)        # [N, 2H]

            z = jax.nn.sigmoid(zru[:, :H] + zr_s[:, :H])
            r = jax.nn.sigmoid(zru[:, H:2 * H] + zr_s[:, H:])

            # candidate: only the state-side Chebyshev chain is recomputed.
            tzs = cheb_concat(z * st)                                           # [N, K*H]
            hc = jnp.tanh(zru[:, 2 * H:]
                          + jnp.dot(tzs, wsu, preferred_element_type=jnp.float32))

            st = r * st + (1.0 - r) * hc              # [N, H]

            if is_last:
                hseq_ref[0, t] = st.astype(hseq_ref.dtype)
            else:
                xbuf[l % 2, t] = st                   # feed the next layer

        hfin_ref[0, l] = st.astype(hfin_ref.dtype)


# ------------------------------- wrapper ------------------------------------
def agcrnn_encoder_forward(x, init_states, support, layer_params, cheb_k):
    """AGCRNN_Encoder.forward.

    x            : [B, T, N, Din]
    init_states  : list of L arrays [B, N, H]
    support      : [N, N]
    layer_params : list of L tuples (w_gate [K*(din+H), 2H], b_gate [2H],
                                     w_update [K*(din+H), H], b_update [H])
                   (din = Din for layer 0, H afterwards)
    returns (h_seq [B, T, N, H], [final state per layer, each [B, N, H]])
    """
    B, T, N, Din = x.shape
    H = init_states[0].shape[-1]
    L = len(layer_params)
    K = cheb_k
    assert K >= 2, "kernel assumes cheb_k >= 2 (T_0 and T_1 terms)"
    assert Din <= H, "layer-0 dim_in is padded up to the hidden dim"  # AGCRN always has dim_in <= dim_out

    def split_layer(wg, bg, wu, bu, din):
        C = din + H
        assert wg.shape == (K * C, 2 * H) and wu.shape == (K * C, H)
        wg3 = wg.reshape(K, C, 2 * H).astype(jnp.float32)
        wu3 = wu.reshape(K, C, H).astype(jnp.float32)
        # x-side rows, columns merged to [z | r | u]; pad rows din -> H with zeros.
        wx = jnp.concatenate([wg3[:, :din, :], wu3[:, :din, :]], axis=-1)  # [K, din, 3H]
        if din < H:
            wx = jnp.pad(wx, ((0, 0), (0, H - din), (0, 0)))
        wx = wx.reshape(K * H, 3 * H)
        wsg = wg3[:, din:, :].reshape(K * H, 2 * H)      # state-side [z | r]
        wsu = wu3[:, din:, :].reshape(K * H, H)          # state-side u
        bias = jnp.concatenate(
            [bg.astype(jnp.float32), bu.astype(jnp.float32)]).reshape(1, 3 * H)
        return wx, wsg, wsu, bias

    wx_l, wsg_l, wsu_l, b_l = [], [], [], []
    for i, (wg, bg, wu, bu) in enumerate(layer_params):
        din = Din if i == 0 else H
        a_, b_, c_, d_ = split_layer(wg, bg, wu, bu, din)
        wx_l.append(a_); wsg_l.append(b_); wsu_l.append(c_); b_l.append(d_)
    wx = jnp.stack(wx_l)                                  # [L, K*H, 3H]
    wsg = jnp.stack(wsg_l)                                # [L, K*H, 2H]
    wsu = jnp.stack(wsu_l)                                # [L, K*H,  H]
    bias = jnp.stack(b_l)                                 # [L, 1, 3H]

    init = jnp.stack([s.astype(jnp.float32) for s in init_states], axis=1)  # [B, L, N, H]
    x_pad = jnp.pad(x.astype(jnp.float32),
                    ((0, 0), (0, 0), (0, 0), (0, H - Din)))                 # [B, T, N, H]
    A = support.astype(jnp.float32)

    kernel = functools.partial(_encoder_kernel, cheb_k=K, num_layers=L,
                               hidden=H, seq_len=T)

    const2 = lambda b: (0, 0)
    const3 = lambda b: (0, 0, 0)
    row4 = lambda b: (b, 0, 0, 0)

    hseq, hfin = pl.pallas_call(
        kernel,
        out_shape=(jax.ShapeDtypeStruct((B, T, N, H), jnp.float32),
                   jax.ShapeDtypeStruct((B, L, N, H), jnp.float32)),
        grid_spec=pltpu.PrefetchScalarGridSpec(
            num_scalar_prefetch=0,
            grid=(B,),
            in_specs=[
                pl.BlockSpec((1, T, N, H), row4),                 # x (padded)
                pl.BlockSpec((1, L, N, H), row4),                 # init states
                pl.BlockSpec((N, N), const2),                     # support A
                pl.BlockSpec((L, K * H, 3 * H), const3),          # Wx [z|r|u]
                pl.BlockSpec((L, K * H, 2 * H), const3),          # Ws [z|r]
                pl.BlockSpec((L, K * H, H), const3),              # Ws u
                pl.BlockSpec((L, 1, 3 * H), const3),              # bias [z|r|u]
            ],
            out_specs=[
                pl.BlockSpec((1, T, N, H), row4),                 # last-layer sequence
                pl.BlockSpec((1, L, N, H), row4),                 # per-layer final state
            ],
            scratch_shapes=[pltpu.VMEM((2, T, N, H), jnp.float32)],
        ),
        compiler_params=pltpu.CompilerParams(
            dimension_semantics=("parallel",)),                   # B -> megacore on v7x
    )(x_pad, init, A, wx, wsg, wsu, bias)

    return hseq, [hfin[:, i] for i in range(L)]


# ----------------------- pure-JAX reference (for checking) ------------------
def _agcn_ref(x, A, W, b, cheb_k):
    N = A.shape[0]
    Ts = [jnp.eye(N, dtype=jnp.float32), A]
    for _ in range(2, cheb_k):
        Ts.append(2.0 * A @ Ts[-1] - Ts[-2])
    xg = jnp.concatenate([jnp.einsum('nm,bmc->bnc', T, x) for T in Ts], axis=-1)
    return jnp.einsum('bni,io->bno', xg, W) + b


def _cell_ref(x, state, A, wg, bg, wu, bu, cheb_k, H):
    inp = jnp.concatenate([x, state], axis=-1)
    z_r = jax.nn.sigmoid(_agcn_ref(inp, A, wg, bg, cheb_k))
    z, r = z_r[..., :H], z_r[..., H:]
    cand = jnp.concatenate([x, z * state], axis=-1)
    hc = jnp.tanh(_agcn_ref(cand, A, wu, bu, cheb_k))
    return r * state + (1.0 - r) * hc


def _encoder_ref(x, init_states, A, layer_params, cheb_k, H):
    current = x
    output_hidden = []
    for i, (wg, bg, wu, bu) in enumerate(layer_params):
        state = init_states[i]
        inner = []
        for t in range(x.shape[1]):
            state = _cell_ref(current[:, t], state, A, wg, bg, wu, bu, cheb_k, H)
            inner.append(state)
        output_hidden.append(state)
        current = jnp.stack(inner, axis=1)
    return current, output_hidden


def _xavier_normal(key, shape):
    fan_in, fan_out = shape
    std = (2.0 / (fan_in + fan_out)) ** 0.5
    return std * jax.random.normal(key, shape, dtype=jnp.float32)


if __name__ == "__main__":
    # AGCRNN_Encoder(node_num=16, dim_in=4, dim_out=32, cheb_k=3, num_layers=2)
    B, T, N, DIN, H, CHEB_K, LAYERS = 2, 8, 16, 4, 32, 3, 2

    key = jax.random.PRNGKey(0)
    kx, ka, kst, kw = jax.random.split(key, 4)

    x = jax.random.normal(kx, (B, T, N, DIN), dtype=jnp.float32)
    # single 2-D row-normalized adaptive support
    support = jax.nn.softmax(
        jax.random.normal(ka, (N, N), dtype=jnp.float32), axis=-1)

    # per-layer init states (module's init_hidden gives zeros; use random to
    # exercise the state path harder)
    st_keys = jax.random.split(kst, LAYERS)
    init_states = [0.1 * jax.random.normal(st_keys[i], (B, N, H), jnp.float32)
                   for i in range(LAYERS)]

    # per-layer parameters (layer 0: dim_in=DIN, layers >0: dim_in=H)
    layer_params = []
    w_keys = jax.random.split(kw, 2 * LAYERS)
    for i in range(LAYERS):
        din_i = DIN if i == 0 else H
        kc = CHEB_K * (din_i + H)
        wg = _xavier_normal(w_keys[2 * i], (kc, 2 * H))
        bg = jnp.zeros((2 * H,), dtype=jnp.float32)
        wu = _xavier_normal(w_keys[2 * i + 1], (kc, H))
        bu = jnp.zeros((H,), dtype=jnp.float32)
        layer_params.append((wg, bg, wu, bu))

    out_seq, out_hidden = agcrnn_encoder_forward(
        x, init_states, support, layer_params, CHEB_K)
    out_seq = jax.block_until_ready(out_seq)
    out_hidden = [jax.block_until_ready(h) for h in out_hidden]

    ref_seq, ref_hidden = _encoder_ref(
        x, init_states, support, layer_params, CHEB_K, H)

    assert out_seq.shape == (B, T, N, H)
    assert jnp.allclose(out_seq, ref_seq, atol=1e-4, rtol=1e-4), \
        "sequence output mismatch vs reference"
    for i in range(LAYERS):
        assert out_hidden[i].shape == (B, N, H)
        assert jnp.allclose(out_hidden[i], ref_hidden[i], atol=1e-4, rtol=1e-4), \
            f"hidden state mismatch at layer {i}"

    print("KERNEL_OK")
</pallas_src>

<mosaic_0001>
module attributes {stable_mosaic.version = 11 : i64} {
  func.func @_encoder_kernel(%arg0: i32, %arg1: memref<1x8x16x32xf32, #tpu.memory_space<vmem>>, %arg2: memref<1x2x16x32xf32, #tpu.memory_space<vmem>>, %arg3: memref<16x16xf32, #tpu.memory_space<vmem>>, %arg4: memref<2x96x96xf32, #tpu.memory_space<vmem>>, %arg5: memref<2x96x64xf32, #tpu.memory_space<vmem>>, %arg6: memref<2x96x32xf32, #tpu.memory_space<vmem>>, %arg7: memref<2x1x96xf32, #tpu.memory_space<vmem>>, %arg8: memref<1x8x16x32xf32, #tpu.memory_space<vmem>>, %arg9: memref<1x2x16x32xf32, #tpu.memory_space<vmem>>, %arg10: memref<2x8x16x32xf32, #tpu.memory_space<vmem>>) attributes {dimension_semantics = [#tpu.dimension_semantics<parallel>], iteration_bounds = array<i64: 2>, scalar_prefetch = 0 : i64, scratch_operands = 1 : i64, tpu.core_type = #tpu.core_type<tc>, window_params = [{transform_indices = @transform_0, window_bounds = array<i64: 1, 8, 16, 32>}, {transform_indices = @transform_1, window_bounds = array<i64: 1, 2, 16, 32>}, {pipeline_mode = #tpu.pipeline_mode<synchronous>, transform_indices = @transform_2, window_bounds = array<i64: 16, 16>}, {pipeline_mode = #tpu.pipeline_mode<synchronous>, transform_indices = @transform_3, window_bounds = array<i64: 2, 96, 96>}, {pipeline_mode = #tpu.pipeline_mode<synchronous>, transform_indices = @transform_4, window_bounds = array<i64: 2, 96, 64>}, {pipeline_mode = #tpu.pipeline_mode<synchronous>, transform_indices = @transform_5, window_bounds = array<i64: 2, 96, 32>}, {pipeline_mode = #tpu.pipeline_mode<synchronous>, transform_indices = @transform_6, window_bounds = array<i64: 2, 1, 96>}, {transform_indices = @transform_7, window_bounds = array<i64: 1, 8, 16, 32>}, {transform_indices = @transform_8, window_bounds = array<i64: 1, 2, 16, 32>}]} {
    %c0 = arith.constant 0 : index
    %c0_0 = arith.constant 0 : index
    %0 = vector.load %arg3[%c0, %c0_0] : memref<16x16xf32, #tpu.memory_space<vmem>>, vector<16x16xf32>
    %c0_1 = arith.constant 0 : index
    %c0_2 = arith.constant 0 : index
    %c0_3 = arith.constant 0 : index
    %1 = vector.load %arg4[%c0_1, %c0_2, %c0_3] : memref<2x96x96xf32, #tpu.memory_space<vmem>>, vector<1x96x96xf32>
    %2 = vector.shape_cast %1 : vector<1x96x96xf32> to vector<96x96xf32>
    %c0_4 = arith.constant 0 : index
    %c0_5 = arith.constant 0 : index
    %c0_6 = arith.constant 0 : index
    %3 = vector.load %arg5[%c0_4, %c0_5, %c0_6] : memref<2x96x64xf32, #tpu.memory_space<vmem>>, vector<1x96x64xf32>
    %4 = vector.shape_cast %3 : vector<1x96x64xf32> to vector<96x64xf32>
    %c0_7 = arith.constant 0 : index
    %c0_8 = arith.constant 0 : index
    %c0_9 = arith.constant 0 : index
    %5 = vector.load %arg6[%c0_7, %c0_8, %c0_9] : memref<2x96x32xf32, #tpu.memory_space<vmem>>, vector<1x96x32xf32>
    %6 = vector.shape_cast %5 : vector<1x96x32xf32> to vector<96x32xf32>
    %c0_10 = arith.constant 0 : index
    %c0_11 = arith.constant 0 : index
    %c0_12 = arith.constant 0 : index
    %7 = vector.load %arg7[%c0_10, %c0_11, %c0_12] : memref<2x1x96xf32, #tpu.memory_space<vmem>>, vector<1x1x96xf32>
    %8 = vector.shape_cast %7 : vector<1x1x96xf32> to vector<1x96xf32>
    %c0_13 = arith.constant 0 : index
    %c0_14 = arith.constant 0 : index
    %c0_15 = arith.constant 0 : index
    %c0_16 = arith.constant 0 : index
    %9 = vector.load %arg2[%c0_13, %c0_14, %c0_15, %c0_16] : memref<1x2x16x32xf32, #tpu.memory_space<vmem>>, vector<1x1x16x32xf32>
    %10 = vector.shape_cast %9 : vector<1x1x16x32xf32> to vector<16x32xf32>
    %c0_17 = arith.constant 0 : index
    %c0_18 = arith.constant 0 : index
    %c0_19 = arith.constant 0 : index
    %c0_20 = arith.constant 0 : index
    %11 = vector.load %arg1[%c0_17, %c0_18, %c0_19, %c0_20] : memref<1x8x16x32xf32, #tpu.memory_space<vmem>>, vector<1x1x16x32xf32>
    %12 = vector.shape_cast %11 : vector<1x1x16x32xf32> to vector<16x32xf32>
    %cst = arith.constant dense<0.000000e+00> : vector<16x32xf32>
    %13 = tpu.matmul %0, %12, %cst {dimension_numbers = #tpu.dot_dimension_numbers<[1], [0], [0], [1], [0, 0, 1, 1], [], []>} : vector<16x16xf32>, vector<16x32xf32>, vector<16x32xf32> -> vector<16x32xf32>
    %cst_21 = arith.constant dense<0.000000e+00> : vector<16x32xf32>
    %14 = tpu.matmul %0, %13, %cst_21 {dimension_numbers = #tpu.dot_dimension_numbers<[1], [0], [0], [1], [0, 0, 1, 1], [], []>} : vector<16x16xf32>, vector<16x32xf32>, vector<16x32xf32> -> vector<16x32xf32>
    %cst_22 = arith.constant 2.000000e+00 : f32
    %15 = vector.broadcast %cst_22 : f32 to vector<16x32xf32>
    %16 = arith.mulf %15, %14 : vector<16x32xf32>
    %17 = arith.subf %16, %12 : vector<16x32xf32>
    %18 = tpu.concatenate %12, %13, %17 in 1 : vector<16x32xf32>, vector<16x32xf32>, vector<16x32xf32> -> vector<16x96xf32>
    %cst_23 = arith.constant dense<0.000000e+00> : vector<16x32xf32>
    %19 = tpu.matmul %0, %10, %cst_23 {dimension_numbers = #tpu.dot_dimension_numbers<[1], [0], [0], [1], [0, 0, 1, 1], [], []>} : vector<16x16xf32>, vector<16x32xf32>, vector<16x32xf32> -> vector<16x32xf32>
    %cst_24 = arith.constant dense<0.000000e+00> : vector<16x32xf32>
    %20 = tpu.matmul %0, %19, %cst_24 {dimension_numbers = #tpu.dot_dimension_numbers<[1], [0], [0], [1], [0, 0, 1, 1], [], []>} : vector<16x16xf32>, vector<16x32xf32>, vector<16x32xf32> -> vector<16x32xf32>
    %cst_25 = arith.constant 2.000000e+00 : f32
    %21 = vector.broadcast %cst_25 : f32 to vector<16x32xf32>
    %22 = arith.mulf %21, %20 : vector<16x32xf32>
    %23 = arith.subf %22, %10 : vector<16x32xf32>
    %24 = tpu.concatenate %10, %19, %23 in 1 : vector<16x32xf32>, vector<16x32xf32>, vector<16x32xf32> -> vector<16x96xf32>
    %cst_26 = arith.constant dense<0.000000e+00> : vector<16x96xf32>
    %25 = tpu.matmul %18, %2, %cst_26 {dimension_numbers = #tpu.dot_dimension_numbers<[1], [0], [0], [1], [0, 0, 1, 1], [], []>} : vector<16x96xf32>, vector<96x96xf32>, vector<16x96xf32> -> vector<16x96xf32>
    %26 = vector.broadcast %8 : vector<1x96xf32> to vector<16x96xf32>
    %27 = arith.addf %25, %26 : vector<16x96xf32>
    %cst_27 = arith.constant dense<0.000000e+00> : vector<16x64xf32>
    %28 = tpu.matmul %24, %4, %cst_27 {dimension_numbers = #tpu.dot_dimension_numbers<[1], [0], [0], [1], [0, 0, 1, 1], [], []>} : vector<16x96xf32>, vector<96x64xf32>, vector<16x64xf32> -> vector<16x64xf32>
    %29 = vector.extract_strided_slice %27 {offsets = [0, 0], sizes = [16, 32], strides = [1, 1]} : vector<16x96xf32> to vector<16x32xf32>
    %30 = vector.extract_strided_slice %28 {offsets = [0, 0], sizes = [16, 32], strides = [1, 1]} : vector<16x64xf32> to vector<16x32xf32>
    %31 = arith.addf %29, %30 : vector<16x32xf32>
    %32 = arith.negf %31 : vector<16x32xf32>
    %33 = math.exp %32 : vector<16x32xf32>
    %cst_28 = arith.constant 1.000000e+00 : f32
    %34 = vector.broadcast %cst_28 : f32 to vector<16x32xf32>
    %35 = arith.addf %34, %33 : vector<16x32xf32>
    %36 = arith.divf %34, %35 : vector<16x32xf32>
    %37 = vector.extract_strided_slice %27 {offsets = [0, 32], sizes = [16, 32], strides = [1, 1]} : vector<16x96xf32> to vector<16x32xf32>
    %38 = vector.extract_strided_slice %28 {offsets = [0, 32], sizes = [16, 32], strides = [1, 1]} : vector<16x64xf32> to vector<16x32xf32>
    %39 = arith.addf %37, %38 : vector<16x32xf32>
    %40 = arith.negf %39 : vector<16x32xf32>
    %41 = math.exp %40 : vector<16x32xf32>
    %cst_29 = arith.constant 1.000000e+00 : f32
    %42 = vector.broadcast %cst_29 : f32 to vector<16x32xf32>
    %43 = arith.addf %42, %41 : vector<16x32xf32>
    %44 = arith.divf %42, %43 : vector<16x32xf32>
    %45 = arith.mulf %36, %10 : vector<16x32xf32>
    %cst_30 = arith.constant dense<0.000000e+00> : vector<16x32xf32>
    %46 = tpu.matmul %0, %45, %cst_30 {dimension_numbers = #tpu.dot_dimension_numbers<[1], [0], [0], [1], [0, 0, 1, 1], [], []>} : vector<16x16xf32>, vector<16x32xf32>, vector<16x32xf32> -> vector<16x32xf32>
    %cst_31 = arith.constant dense<0.000000e+00> : vector<16x32xf32>
    %47 = tpu.matmul %0, %46, %cst_31 {dimension_numbers = #tpu.dot_dimension_numbers<[1], [0], [0], [1], [0, 0, 1, 1], [], []>} : vector<16x16xf32>, vector<16x32xf32>, vector<16x32xf32> -> vector<16x32xf32>
    %cst_32 = arith.constant 2.000000e+00 : f32
    %48 = vector.broadcast %cst_32 : f32 to vector<16x32xf32>
    %49 = arith.mulf %48, %47 : vector<16x32xf32>
    %50 = arith.subf %49, %45 : vector<16x32xf32>
    %51 = tpu.concatenate %45, %46, %50 in 1 : vector<16x32xf32>, vector<16x32xf32>, vector<16x32xf32> -> vector<16x96xf32>
    %52 = vector.extract_strided_slice %27 {offsets = [0, 64], sizes = [16, 32], strides = [1, 1]} : vector<16x96xf32> to vector<16x32xf32>
    %cst_33 = arith.constant dense<0.000000e+00> : vector<16x32xf32>
    %53 = tpu.matmul %51, %6, %cst_33 {dimension_numbers = #tpu.dot_dimension_numbers<[1], [0], [0], [1], [0, 0, 1, 1], [], []>} : vector<16x96xf32>, vector<96x32xf32>, vector<16x32xf32> -> vector<16x32xf32>
    %54 = arith.addf %52, %53 : vector<16x32xf32>
    %55 = math.tanh %54 : vector<16x32xf32>
    %56 = arith.mulf %44, %10 : vector<16x32xf32>
    %cst_34 = arith.constant 1.000000e+00 : f32
    %57 = vector.broadcast %cst_34 : f32 to vector<16x32xf32>
    %58 = arith.subf %57, %44 : vector<16x32xf32>
    %59 = arith.mulf %58, %55 : vector<16x32xf32>
    %60 = arith.addf %56, %59 : vector<16x32xf32>
    %c0_35 = arith.constant 0 : index
    %c0_36 = arith.constant 0 : index
    %c0_37 = arith.constant 0 : index
    %c0_38 = arith.constant 0 : index
    %61 = vector.load %arg10[%c0_35, %c0_36, %c0_37, %c0_38] : memref<2x8x16x32xf32, #tpu.memory_space<vmem>>, vector<1x1x16x32xf32>
    %62 = vector.shape_cast %61 : vector<1x1x16x32xf32> to vector<16x32xf32>
    %63 = vector.shape_cast %60 : vector<16x32xf32> to vector<1x1x16x32xf32>
    tpu.vector_store %arg10[%c0_35, %c0_36, %c0_37, %c0_38], %63 {strides = array<i32>} : memref<2x8x16x32xf32, #tpu.memory_space<vmem>>, vector<1x1x16x32xf32>,
    %c0_39 = arith.constant 0 : index
    %c1 = arith.constant 1 : index
    %c0_40 = arith.constant 0 : index
    %c0_41 = arith.constant 0 : index
    %64 = vector.load %arg1[%c0_39, %c1, %c0_40, %c0_41] : memref<1x8x16x32xf32, #tpu.memory_space<vmem>>, vector<1x1x16x32xf32>
    %65 = vector.shape_cast %64 : vector<1x1x16x32xf32> to vector<16x32xf32>
    %cst_42 = arith.constant dense<0.000000e+00> : vector<16x32xf32>
    %66 = tpu.matmul %0, %65, %cst_42 {dimension_numbers = #tpu.dot_dimension_numbers<[1], [0], [0], [1], [0, 0, 1, 1], [], []>} : vector<16x16xf32>, vector<16x32xf32>, vector<16x32xf32> -> vector<16x32xf32>
    %cst_43 = arith.constant dense<0.000000e+00> : vector<16x32xf32>
    %67 = tpu.matmul %0, %66, %cst_43 {dimension_numbers = #tpu.dot_dimension_numbers<[1], [0], [0], [1], [0, 0, 1, 1], [], []>} : vector<16x16xf32>, vector<16x32xf32>, vector<16x32xf32> -> vector<16x32xf32>
    %cst_44 = arith.constant 2.000000e+00 : f32
    %68 = vector.broadcast %cst_44 : f32 to vector<16x32xf32>
    %69 = arith.mulf %68, %67 : vector<16x32xf32>
    %70 = arith.subf %69, %65 : vector<16x32xf32>
    %71 = tpu.concatenate %65, %66, %70 in 1 : vector<16x32xf32>, vector<16x32xf32>, vector<16x32xf32> -> vector<16x96xf32>
    %cst_45 = arith.constant dense<0.000000e+00> : vector<16x32xf32>
    %72 = tpu.matmul %0, %60, %cst_45 {dimension_numbers = #tpu.dot_dimension_numbers<[1], [0], [0], [1], [0, 0, 1, 1], [], []>} : vector<16x16xf32>, vector<16x32xf32>, vector<16x32xf32> -> vector<16x32xf32>
    %cst_46 = arith.constant dense<0.000000e+00> : vector<16x32xf32>
    %73 = tpu.matmul %0, %72, %cst_46 {dimension_numbers = #tpu.dot_dimension_numbers<[1], [0], [0], [1], [0, 0, 1, 1], [], []>} : vector<16x16xf32>, vector<16x32xf32>, vector<16x32xf32> -> vector<16x32xf32>
    %cst_47 = arith.constant 2.000000e+00 : f32
    %74 = vector.broadcast %cst_47 : f32 to vector<16x32xf32>
    %75 = arith.mulf %74, %73 : vector<16x32xf32>
    %76 = arith.subf %75, %60 : vector<16x32xf32>
    %77 = tpu.concatenate %60, %72, %76 in 1 : vector<16x32xf32>, vector<16x32xf32>, vector<16x32xf32> -> vector<16x96xf32>
    %cst_48 = arith.constant dense<0.000000e+00> : vector<16x96xf32>
    %78 = tpu.matmul %71, %2, %cst_48 {dimension_numbers = #tpu.dot_dimension_numbers<[1], [0], [0], [1], [0, 0, 1, 1], [], []>} : vector<16x96xf32>, vector<96x96xf32>, vector<16x96xf32> -> vector<16x96xf32>
    %79 = vector.broadcast %8 : vector<1x96xf32> to vector<16x96xf32>
    %80 = arith.addf %78, %79 : vector<16x96xf32>
    %cst_49 = arith.constant dense<0.000000e+00> : vector<16x64xf32>
    %81 = tpu.matmul %77, %4, %cst_49 {dimension_numbers = #tpu.dot_dimension_numbers<[1], [0], [0], [1], [0, 0, 1, 1], [], []>} : vector<16x96xf32>, vector<96x64xf32>, vector<16x64xf32> -> vector<16x64xf32>
    %82 = vector.extract_strided_slice %80 {offsets = [0, 0], sizes = [16, 32], strides = [1, 1]} : vector<16x96xf32> to vector<16x32xf32>
    %83 = vector.extract_strided_slice %81 {offsets = [0, 0], sizes = [16, 32], strides = [1, 1]} : vector<16x64xf32> to vector<16x32xf32>
    %84 = arith.addf %82, %83 : vector<16x32xf32>
    %85 = arith.negf %84 : vector<16x32xf32>
    %86 = math.exp %85 : vector<16x32xf32>
    %cst_50 = arith.constant 1.000000e+00 : f32
    %87 = vector.broadcast %cst_50 : f32 to vector<16x32xf32>
    %88 = arith.addf %87, %86 : vector<16x32xf32>
    %89 = arith.divf %87, %88 : vector<16x32xf32>
    %90 = vector.extract_strided_slice %80 {offsets = [0, 32], sizes = [16, 32], strides = [1, 1]} : vector<16x96xf32> to vector<16x32xf32>
    %91 = vector.extract_strided_slice %81 {offsets = [0, 32], sizes = [16, 32], strides = [1, 1]} : vector<16x64xf32> to vector<16x32xf32>
    %92 = arith.addf %90, %91 : vector<16x32xf32>
    %93 = arith.negf %92 : vector<16x32xf32>
    %94 = math.exp %93 : vector<16x32xf32>
    %cst_51 = arith.constant 1.000000e+00 : f32
    %95 = vector.broadcast %cst_51 : f32 to vector<16x32xf32>
    %96 = arith.addf %95, %94 : vector<16x32xf32>
    %97 = arith.divf %95, %96 : vector<16x32xf32>
    %98 = arith.mulf %89, %60 : vector<16x32xf32>
    %cst_52 = arith.constant dense<0.000000e+00> : vector<16x32xf32>
    %99 = tpu.matmul %0, %98, %cst_52 {dimension_numbers = #tpu.dot_dimension_numbers<[1], [0], [0], [1], [0, 0, 1, 1], [], []>} : vector<16x16xf32>, vector<16x32xf32>, vector<16x32xf32> -> vector<16x32xf32>
    %cst_53 = arith.constant dense<0.000000e+00> : vector<16x32xf32>
    %100 = tpu.matmul %0, %99, %cst_53 {dimension_numbers = #tpu.dot_dimension_numbers<[1], [0], [0], [1], [0, 0, 1, 1], [], []>} : vector<16x16xf32>, vector<16x32xf32>, vector<16x32xf32> -> vector<16x32xf32>
    %cst_54 = arith.constant 2.000000e+00 : f32
    %101 = vector.broadcast %cst_54 : f32 to vector<16x32xf32>
    %102 = arith.mulf %101, %100 : vector<16x32xf32>
    %103 = arith.subf %102, %98 : vector<16x32xf32>
    %104 = tpu.concatenate %98, %99, %103 in 1 : vector<16x32xf32>, vector<16x32xf32>, vector<16x32xf32> -> vector<16x96xf32>
    %105 = vector.extract_strided_slice %80 {offsets = [0, 64], sizes = [16, 32], strides = [1, 1]} : vector<16x96xf32> to vector<16x32xf32>
    %cst_55 = arith.constant dense<0.000000e+00> : vector<16x32xf32>
    %106 = tpu.matmul %104, %6, %cst_55 {dimension_numbers = #tpu.dot_dimension_numbers<[1], [0], [0], [1], [0, 0, 1, 1], [], []>} : vector<16x96xf32>, vector<96x32xf32>, vector<16x32xf32> -> vector<16x32xf32>
    %107 = arith.addf %105, %106 : vector<16x32xf32>
    %108 = math.tanh %107 : vector<16x32xf32>
    %109 = arith.mulf %97, %60 : vector<16x32xf32>
    %cst_56 = arith.constant 1.000000e+00 : f32
    %110 = vector.broadcast %cst_56 : f32 to vector<16x32xf32>
    %111 = arith.subf %110, %97 : vector<16x32xf32>
    %112 = arith.mulf %111, %108 : vector<16x32xf32>
    %113 = arith.addf %109, %112 : vector<16x32xf32>
    %c0_57 = arith.constant 0 : index
    %c1_58 = arith.constant 1 : index
    %c0_59 = arith.constant 0 : index
    %c0_60 = arith.constant 0 : index
    %114 = vector.load %arg10[%c0_57, %c1_58, %c0_59, %c0_60] : memref<2x8x16x32xf32, #tpu.memory_space<vmem>>, vector<1x1x16x32xf32>
    %115 = vector.shape_cast %114 : vector<1x1x16x32xf32> to vector<16x32xf32>
    %116 = vector.shape_cast %113 : vector<16x32xf32> to vector<1x1x16x32xf32>
    tpu.vector_store %arg10[%c0_57, %c1_58, %c0_59, %c0_60], %116 {strides = array<i32>} : memref<2x8x16x32xf32, #tpu.memory_space<vmem>>, vector<1x1x16x32xf32>,
    %c0_61 = arith.constant 0 : index
    %c2 = arith.constant 2 : index
    %c0_62 = arith.constant 0 : index
    %c0_63 = arith.constant 0 : index
    %117 = vector.load %arg1[%c0_61, %c2, %c0_62, %c0_63] : memref<1x8x16x32xf32, #tpu.memory_space<vmem>>, vector<1x1x16x32xf32>
    %118 = vector.shape_cast %117 : vector<1x1x16x32xf32> to vector<16x32xf32>
    %cst_64 = arith.constant dense<0.000000e+00> : vector<16x32xf32>
    %119 = tpu.matmul %0, %118, %cst_64 {dimension_numbers = #tpu.dot_dimension_numbers<[1], [0], [0], [1], [0, 0, 1, 1], [], []>} : vector<16x16xf32>, vector<16x32xf32>, vector<16x32xf32> -> vector<16x32xf32>
    %cst_65 = arith.constant dense<0.000000e+00> : vector<16x32xf32>
    %120 = tpu.matmul %0, %119, %cst_65 {dimension_numbers = #tpu.dot_dimension_numbers<[1], [0], [0], [1], [0, 0, 1, 1], [], []>} : vector<16x16xf32>, vector<16x32xf32>, vector<16x32xf32> -> vector<16x32xf32>
    %cst_66 = arith.constant 2.000000e+00 : f32
    %121 = vector.broadcast %cst_66 : f32 to vector<16x32xf32>
    %122 = arith.mulf %121, %120 : vector<16x32xf32>
    %123 = arith.subf %122, %118 : vector<16x32xf32>
    %124 = tpu.concatenate %118, %119, %123 in 1 : vector<16x32xf32>, vector<16x32xf32>, vector<16x32xf32> -> vector<16x96xf32>
    %cst_67 = arith.constant dense<0.000000e+00> : vector<16x32xf32>
    %125 = tpu.matmul %0, %113, %cst_67 {dimension_numbers = #tpu.dot_dimension_numbers<[1], [0], [0], [1], [0, 0, 1, 1], [], []>} : vector<16x16xf32>, vector<16x32xf32>, vector<16x32xf32> -> vector<16x32xf32>
    %cst_68 = arith.constant dense<0.000000e+00> : vector<16x32xf32>
    %126 = tpu.matmul %0, %125, %cst_68 {dimension_numbers = #tpu.dot_dimension_numbers<[1], [0], [0], [1], [0, 0, 1, 1], [], []>} : vector<16x16xf32>, vector<16x32xf32>, vector<16x32xf32> -> vector<16x32xf32>
    %cst_69 = arith.constant 2.000000e+00 : f32
    %127 = vector.broadcast %cst_69 : f32 to vector<16x32xf32>
    %128 = arith.mulf %127, %126 : vector<16x32xf32>
    %129 = arith.subf %128, %113 : vector<16x32xf32>
    %130 = tpu.concatenate %113, %125, %129 in 1 : vector<16x32xf32>, vector<16x32xf32>, vector<16x32xf32> -> vector<16x96xf32>
    %cst_70 = arith.constant dense<0.000000e+00> : vector<16x96xf32>
    %131 = tpu.matmul %124, %2, %cst_70 {dimension_numbers = #tpu.dot_dimension_numbers<[1], [0], [0], [1], [0, 0, 1, 1], [], []>} : vector<16x96xf32>, vector<96x96xf32>, vector<16x96xf32> -> vector<16x96xf32>
    %132 = vector.broadcast %8 : vector<1x96xf32> to vector<16x96xf32>
    %133 = arith.addf %131, %132 : vector<16x96xf32>
    %cst_71 = arith.constant dense<0.000000e+00> : vector<16x64xf32>
    %134 = tpu.matmul %130, %4, %cst_71 {dimension_numbers = #tpu.dot_dimension_numbers<[1], [0], [0], [1], [0, 0, 1, 1], [], []>} : vector<16x96xf32>, vector<96x64xf32>, vector<16x64xf32> -> vector<16x64xf32>
    %135 = vector.extract_strided_slice %133 {offsets = [0, 0], sizes = [16, 32], strides = [1, 1]} : vector<16x96xf32> to vector<16x32xf32>
    %136 = vector.extract_strided_slice %134 {offsets = [0, 0], sizes = [16, 32], strides = [1, 1]} : vector<16x64xf32> to vector<16x32xf32>
    %137 = arith.addf %135, %136 : vector<16x32xf32>
    %138 = arith.negf %137 : vector<16x32xf32>
    %139 = math.exp %138 : vector<16x32xf32>
    %cst_72 = arith.constant 1.000000e+00 : f32
    %140 = vector.broadcast %cst_72 : f32 to vector<16x32xf32>
    %141 = arith.addf %140, %139 : vector<16x32xf32>
    %142 = arith.divf %140, %141 : vector<16x32xf32>
    %143 = vector.extract_strided_slice %133 {offsets = [0, 32], sizes = [16, 32], strides = [1, 1]} : vector<16x96xf32> to vector<16x32xf32>
    %144 = vector.extract_strided_slice %134 {offsets = [0, 32], sizes = [16, 32], strides = [1, 1]} : vector<16x64xf32> to vector<16x32xf32>
    %145 = arith.addf %143, %144 : vector<16x32xf32>
    %146 = arith.negf %145 : vector<16x32xf32>
    %147 = math.exp %146 : vector<16x32xf32>
    %cst_73 = arith.constant 1.000000e+00 : f32
    %148 = vector.broadcast %cst_73 : f32 to vector<16x32xf32>
    %149 = arith.addf %148, %147 : vector<16x32xf32>
    %150 = arith.divf %148, %149 : vector<16x32xf32>
    %151 = arith.mulf %142, %113 : vector<16x32xf32>
    %cst_74 = arith.constant dense<0.000000e+00> : vector<16x32xf32>
    %152 = tpu.matmul %0, %151, %cst_74 {dimension_numbers = #tpu.dot_dimension_numbers<[1], [0], [0], [1], [0, 0, 1, 1], [], []>} : vector<16x16xf32>, vector<16x32xf32>, vector<16x32xf32> -> vector<16x32xf32>
    %cst_75 = arith.constant dense<0.000000e+00> : vector<16x32xf32>
    %153 = tpu.matmul %0, %152, %cst_75 {dimension_numbers = #tpu.dot_dimension_numbers<[1], [0], [0], [1], [0, 0, 1, 1], [], []>} : vector<16x16xf32>, vector<16x32xf32>, vector<16x32xf32> -> vector<16x32xf32>
    %cst_76 = arith.constant 2.000000e+00 : f32
    %154 = vector.broadcast %cst_76 : f32 to vector<16x32xf32>
    %155 = arith.mulf %154, %153 : vector<16x32xf32>
    %156 = arith.subf %155, %151 : vector<16x32xf32>
    %157 = tpu.concatenate %151, %152, %156 in 1 : vector<16x32xf32>, vector<16x32xf32>, vector<16x32xf32> -> vector<16x96xf32>
    %158 = vector.extract_strided_slice %133 {offsets = [0, 64], sizes = [16, 32], strides = [1, 1]} : vector<16x96xf32> to vector<16x32xf32>
    %cst_77 = arith.constant dense<0.000000e+00> : vector<16x32xf32>
    %159 = tpu.matmul %157, %6, %cst_77 {dimension_numbers = #tpu.dot_dimension_numbers<[1], [0], [0], [1], [0, 0, 1, 1], [], []>} : vector<16x96xf32>, vector<96x32xf32>, vector<16x32xf32> -> vector<16x32xf32>
    %160 = arith.addf %158, %159 : vector<16x32xf32>
    %161 = math.tanh %160 : vector<16x32xf32>
    %162 = arith.mulf %150, %113 : vector<16x32xf32>
    %cst_78 = arith.constant 1.000000e+00 : f32
    %163 = vector.broadcast %cst_78 : f32 to vector<16x32xf32>
    %164 = arith.subf %163, %150 : vector<16x32xf32>
    %165 = arith.mulf %164, %161 : vector<16x32xf32>
    %166 = arith.addf %162, %165 : vector<16x32xf32>
    %c0_79 = arith.constant 0 : index
    %c2_80 = arith.constant 2 : index
    %c0_81 = arith.constant 0 : index
    %c0_82 = arith.constant 0 : index
    %167 = vector.load %arg10[%c0_79, %c2_80, %c0_81, %c0_82] : memref<2x8x16x32xf32, #tpu.memory_space<vmem>>, vector<1x1x16x32xf32>
    %168 = vector.shape_cast %167 : vector<1x1x16x32xf32> to vector<16x32xf32>
    %169 = vector.shape_cast %166 : vector<16x32xf32> to vector<1x1x16x32xf32>
    tpu.vector_store %arg10[%c0_79, %c2_80, %c0_81, %c0_82], %169 {strides = array<i32>} : memref<2x8x16x32xf32, #tpu.memory_space<vmem>>, vector<1x1x16x32xf32>,
    %c0_83 = arith.constant 0 : index
    %c3 = arith.constant 3 : index
    %c0_84 = arith.constant 0 : index
    %c0_85 = arith.constant 0 : index
    %170 = vector.load %arg1[%c0_83, %c3, %c0_84, %c0_85] : memref<1x8x16x32xf32, #tpu.memory_space<vmem>>, vector<1x1x16x32xf32>
    %171 = vector.shape_cast %170 : vector<1x1x16x32xf32> to vector<16x32xf32>
    %cst_86 = arith.constant dense<0.000000e+00> : vector<16x32xf32>
    %172 = tpu.matmul %0, %171, %cst_86 {dimension_numbers = #tpu.dot_dimension_numbers<[1], [0], [0], [1], [0, 0, 1, 1], [], []>} : vector<16x16xf32>, vector<16x32xf32>, vector<16x32xf32> -> vector<16x32xf32>
    %cst_87 = arith.constant dense<0.000000e+00> : vector<16x32xf32>
    %173 = tpu.matmul %0, %172, %cst_87 {dimension_numbers = #tpu.dot_dimension_numbers<[1], [0], [0], [1], [0, 0, 1, 1], [], []>} : vector<16x16xf32>, vector<16x32xf32>, vector<16x32xf32> -> vector<16x32xf32>
    %cst_88 = arith.constant 2.000000e+00 : f32
    %174 = vector.broadcast %cst_88 : f32 to vector<16x32xf32>
    %175 = arith.mulf %174, %173 : vector<16x32xf32>
    %176 = arith.subf %175, %171 : vector<16x32xf32>
    %177 = tpu.concatenate %171, %172, %176 in 1 : vector<16x32xf32>, vector<16x32xf32>, vector<16x32xf32> -> vector<16x96xf32>
    %cst_89 = arith.constant dense<0.000000e+00> : vector<16x32xf32>
    %178 = tpu.matmul %0, %166, %cst_89 {dimension_numbers = #tpu.dot_dimension_numbers<[1], [0], [0], [1], [0, 0, 1, 1], [], []>} : vector<16x16xf32>, vector<16x32xf32>, vector<16x32xf32> -> vector<16x32xf32>
    %cst_90 = arith.constant dense<0.000000e+00> : vector<16x32xf32>
    %179 = tpu.matmul %0, %178, %cst_90 {dimension_numbers = #tpu.dot_dimension_numbers<[1], [0], [0], [1], [0, 0, 1, 1], [], []>} : vector<16x16xf32>, vector<16x32xf32>, vector<16x32xf32> -> vector<16x32xf32>
    %cst_91 = arith.constant 2.000000e+00 : f32
    %180 = vector.broadcast %cst_91 : f32 to vector<16x32xf32>
    %181 = arith.mulf %180, %179 : vector<16x32xf32>
    %182 = arith.subf %181, %166 : vector<16x32xf32>
    %183 = tpu.concatenate %166, %178, %182 in 1 : vector<16x32xf32>, vector<16x32xf32>, vector<16x32xf32> -> vector<16x96xf32>
    %cst_92 = arith.constant dense<0.000000e+00> : vector<16x96xf32>
    %184 = tpu.matmul %177, %2, %cst_92 {dimension_numbers = #tpu.dot_dimension_numbers<[1], [0], [0], [1], [0, 0, 1, 1], [], []>} : vector<16x96xf32>, vector<96x96xf32>, vector<16x96xf32> -> vector<16x96xf32>
    %185 = vector.broadcast %8 : vector<1x96xf32> to vector<16x96xf32>
    %186 = arith.addf %184, %185 : vector<16x96xf32>
    %cst_93 = arith.constant dense<0.000000e+00> : vector<16x64xf32>
    %187 = tpu.matmul %183, %4, %cst_93 {dimension_numbers = #tpu.dot_dimension_numbers<[1], [0], [0], [1], [0, 0, 1, 1], [], []>} : vector<16x96xf32>, vector<96x64xf32>, vector<16x64xf32> -> vector<16x64xf32>
    %188 = vector.extract_strided_slice %186 {offsets = [0, 0], sizes = [16, 32], strides = [1, 1]} : vector<16x96xf32> to vector<16x32xf32>
    %189 = vector.extract_strided_slice %187 {offsets = [0, 0], sizes = [16, 32], strides = [1, 1]} : vector<16x64xf32> to vector<16x32xf32>
    %190 = arith.addf %188, %189 : vector<16x32xf32>
    %191 = arith.negf %190 : vector<16x32xf32>
    %192 = math.exp %191 : vector<16x32xf32>
    %cst_94 = arith.constant 1.000000e+00 : f32
    %193 = vector.broadcast %cst_94 : f32 to vector<16x32xf32>
    %194 = arith.addf %193, %192 : vector<16x32xf32>
    %195 = arith.divf %193, %194 : vector<16x32xf32>
    %196 = vector.extract_strided_slice %186 {offsets = [0, 32], sizes = [16, 32], strides = [1, 1]} : vector<16x96xf32> to vector<16x32xf32>
    %197 = vector.extract_strided_slice %187 {offsets = [0, 32], sizes = [16, 32], strides = [1, 1]} : vector<16x64xf32> to vector<16x32xf32>
    %198 = arith.addf %196, %197 : vector<16x32xf32>
    %199 = arith.negf %198 : vector<16x32xf32>
    %200 = math.exp %199 : vector<16x32xf32>
    %cst_95 = arith.constant 1.000000e+00 : f32
    %201 = vector.broadcast %cst_95 : f32 to vector<16x32xf32>
    %202 = arith.addf %201, %200 : vector<16x32xf32>
    %203 = arith.divf %201, %202 : vector<16x32xf32>
    %204 = arith.mulf %195, %166 : vector<16x32xf32>
    %cst_96 = arith.constant dense<0.000000e+00> : vector<16x32xf32>
    %205 = tpu.matmul %0, %204, %cst_96 {dimension_numbers = #tpu.dot_dimension_numbers<[1], [0], [0], [1], [0, 0, 1, 1], [], []>} : vector<16x16xf32>, vector<16x32xf32>, vector<16x32xf32> -> vector<16x32xf32>
    %cst_97 = arith.constant dense<0.000000e+00> : vector<16x32xf32>
    %206 = tpu.matmul %0, %205, %cst_97 {dimension_numbers = #tpu.dot_dimension_numbers<[1], [0], [0], [1], [0, 0, 1, 1], [], []>} : vector<16x16xf32>, vector<16x32xf32>, vector<16x32xf32> -> vector<16x32xf32>
    %cst_98 = arith.constant 2.000000e+00 : f32
    %207 = vector.broadcast %cst_98 : f32 to vector<16x32xf32>
    %208 = arith.mulf %207, %206 : vector<16x32xf32>
    %209 = arith.subf %208, %204 : vector<16x32xf32>
    %210 = tpu.concatenate %204, %205, %209 in 1 : vector<16x32xf32>, vector<16x32xf32>, vector<16x32xf32> -> vector<16x96xf32>
    %211 = vector.extract_strided_slice %186 {offsets = [0, 64], sizes = [16, 32], strides = [1, 1]} : vector<16x96xf32> to vector<16x32xf32>
    %cst_99 = arith.constant dense<0.000000e+00> : vector<16x32xf32>
    %212 = tpu.matmul %210, %6, %cst_99 {dimension_numbers = #tpu.dot_dimension_numbers<[1], [0], [0], [1], [0, 0, 1, 1], [], []>} : vector<16x96xf32>, vector<96x32xf32>, vector<16x32xf32> -> vector<16x32xf32>
    %213 = arith.addf %211, %212 : vector<16x32xf32>
    %214 = math.tanh %213 : vector<16x32xf32>
    %215 = arith.mulf %203, %166 : vector<16x32xf32>
    %cst_100 = arith.constant 1.000000e+00 : f32
    %216 = vector.broadcast %cst_100 : f32 to vector<16x32xf32>
    %217 = arith.subf %216, %203 : vector<16x32xf32>
    %218 = arith.mulf %217, %214 : vector<16x32xf32>
    %219 = arith.addf %215, %218 : vector<16x32xf32>
    %c0_101 = arith.constant 0 : index
    %c3_102 = arith.constant 3 : index
    %c0_103 = arith.constant 0 : index
    %c0_104 = arith.constant 0 : index
    %220 = vector.load %arg10[%c0_101, %c3_102, %c0_103, %c0_104] : memref<2x8x16x32xf32, #tpu.memory_space<vmem>>, vector<1x1x16x32xf32>
    %221 = vector.shape_cast %220 : vector<1x1x16x32xf32> to vector<16x32xf32>
    %222 = vector.shape_cast %219 : vector<16x32xf32> to vector<1x1x16x32xf32>
    tpu.vector_store %arg10[%c0_101, %c3_102, %c0_103, %c0_104], %222 {strides = array<i32>} : memref<2x8x16x32xf32, #tpu.memory_space<vmem>>, vector<1x1x16x32xf32>,
    %c0_105 = arith.constant 0 : index
    %c4 = arith.constant 4 : index
    %c0_106 = arith.constant 0 : index
    %c0_107 = arith.constant 0 : index
    %223 = vector.load %arg1[%c0_105, %c4, %c0_106, %c0_107] : memref<1x8x16x32xf32, #tpu.memory_space<vmem>>, vector<1x1x16x32xf32>
    %224 = vector.shape_cast %223 : vector<1x1x16x32xf32> to vector<16x32xf32>
    %cst_108 = arith.constant dense<0.000000e+00> : vector<16x32xf32>
    %225 = tpu.matmul %0, %224, %cst_108 {dimension_numbers = #tpu.dot_dimension_numbers<[1], [0], [0], [1], [0, 0, 1, 1], [], []>} : vector<16x16xf32>, vector<16x32xf32>, vector<16x32xf32> -> vector<16x32xf32>
    %cst_109 = arith.constant dense<0.000000e+00> : vector<16x32xf32>
    %226 = tpu.matmul %0, %225, %cst_109 {dimension_numbers = #tpu.dot_dimension_numbers<[1], [0], [0], [1], [0, 0, 1, 1], [], []>} : vector<16x16xf32>, vector<16x32xf32>, vector<16x32xf32> -> vector<16x32xf32>
    %cst_110 = arith.constant 2.000000e+00 : f32
    %227 = vector.broadcast %cst_110 : f32 to vector<16x32xf32>
    %228 = arith.mulf %227, %226 : vector<16x32xf32>
    %229 = arith.subf %228, %224 : vector<16x32xf32>
    %230 = tpu.concatenate %224, %225, %229 in 1 : vector<16x32xf32>, vector<16x32xf32>, vector<16x32xf32> -> vector<16x96xf32>
    %cst_111 = arith.constant dense<0.000000e+00> : vector<16x32xf32>
    %231 = tpu.matmul %0, %219, %cst_111 {dimension_numbers = #tpu.dot_dimension_numbers<[1], [0], [0], [1], [0, 0, 1, 1], [], []>} : vector<16x16xf32>, vector<16x32xf32>, vector<16x32xf32> -> vector<16x32xf32>
    %cst_112 = arith.constant dense<0.000000e+00> : vector<16x32xf32>
    %232 = tpu.matmul %0, %231, %cst_112 {dimension_numbers = #tpu.dot_dimension_numbers<[1], [0], [0], [1], [0, 0, 1, 1], [], []>} : vector<16x16xf32>, vector<16x32xf32>, vector<16x32xf32> -> vector<16x32xf32>
    %cst_113 = arith.constant 2.000000e+00 : f32
    %233 = vector.broadcast %cst_113 : f32 to vector<16x32xf32>
    %234 = arith.mulf %233, %232 : vector<16x32xf32>
    %235 = arith.subf %234, %219 : vector<16x32xf32>
    %236 = tpu.concatenate %219, %231, %235 in 1 : vector<16x32xf32>, vector<16x32xf32>, vector<16x32xf32> -> vector<16x96xf32>
    %cst_114 = arith.constant dense<0.000000e+00> : vector<16x96xf32>
    %237 = tpu.matmul %230, %2, %cst_114 {dimension_numbers = #tpu.dot_dimension_numbers<[1], [0], [0], [1], [0, 0, 1, 1], [], []>} : vector<16x96xf32>, vector<96x96xf32>, vector<16x96xf32> -> vector<16x96xf32>
    %238 = vector.broadcast %8 : vector<1x96xf32> to vector<16x96xf32>
    %239 = arith.addf %237, %238 : vector<16x96xf32>
    %cst_115 = arith.constant dense<0.000000e+00> : vector<16x64xf32>
    %240 = tpu.matmul %236, %4, %cst_115 {dimension_numbers = #tpu.dot_dimension_numbers<[1], [0], [0], [1], [0, 0, 1, 1], [], []>} : vector<16x96xf32>, vector<96x64xf32>, vector<16x64xf32> -> vector<16x64xf32>
    %241 = vector.extract_strided_slice %239 {offsets = [0, 0], sizes = [16, 32], strides = [1, 1]} : vector<16x96xf32> to vector<16x32xf32>
    %242 = vector.extract_strided_slice %240 {offsets = [0, 0], sizes = [16, 32], strides = [1, 1]} : vector<16x64xf32> to vector<16x32xf32>
    %243 = arith.addf %241, %242 : vector<16x32xf32>
    %244 = arith.negf %243 : vector<16x32xf32>
    %245 = math.exp %244 : vector<16x32xf32>
    %cst_116 = arith.constant 1.000000e+00 : f32
    %246 = vector.broadcast %cst_116 : f32 to vector<16x32xf32>
    %247 = arith.addf %246, %245 : vector<16x32xf32>
    %248 = arith.divf %246, %247 : vector<16x32xf32>
    %249 = vector.extract_strided_slice %239 {offsets = [0, 32], sizes = [16, 32], strides = [1, 1]} : vector<16x96xf32> to vector<16x32xf32>
    %250 = vector.extract_strided_slice %240 {offsets = [0, 32], sizes = [16, 32], strides = [1, 1]} : vector<16x64xf32> to vector<16x32xf32>
    %251 = arith.addf %249, %250 : vector<16x32xf32>
    %252 = arith.negf %251 : vector<16x32xf32>
    %253 = math.exp %252 : vector<16x32xf32>
    %cst_117 = arith.constant 1.000000e+00 : f32
    %254 = vector.broadcast %cst_117 : f32 to vector<16x32xf32>
    %255 = arith.addf %254, %253 : vector<16x32xf32>
    %256 = arith.divf %254, %255 : vector<16x32xf32>
    %257 = arith.mulf %248, %219 : vector<16x32xf32>
    %cst_118 = arith.constant dense<0.000000e+00> : vector<16x32xf32>
    %258 = tpu.matmul %0, %257, %cst_118 {dimension_numbers = #tpu.dot_dimension_numbers<[1], [0], [0], [1], [0, 0, 1, 1], [], []>} : vector<16x16xf32>, vector<16x32xf32>, vector<16x32xf32> -> vector<16x32xf32>
    %cst_119 = arith.constant dense<0.000000e+00> : vector<16x32xf32>
    %259 = tpu.matmul %0, %258, %cst_119 {dimension_numbers = #tpu.dot_dimension_numbers<[1], [0], [0], [1], [0, 0, 1, 1], [], []>} : vector<16x16xf32>, vector<16x32xf32>, vector<16x32xf32> -> vector<16x32xf32>
    %cst_120 = arith.constant 2.000000e+00 : f32
    %260 = vector.broadcast %cst_120 : f32 to vector<16x32xf32>
    %261 = arith.mulf %260, %259 : vector<16x32xf32>
    %262 = arith.subf %261, %257 : vector<16x32xf32>
    %263 = tpu.concatenate %257, %258, %262 in 1 : vector<16x32xf32>, vector<16x32xf32>, vector<16x32xf32> -> vector<16x96xf32>
    %264 = vector.extract_strided_slice %239 {offsets = [0, 64], sizes = [16, 32], strides = [1, 1]} : vector<16x96xf32> to vector<16x32xf32>
    %cst_121 = arith.constant dense<0.000000e+00> : vector<16x32xf32>
    %265 = tpu.matmul %263, %6, %cst_121 {dimension_numbers = #tpu.dot_dimension_numbers<[1], [0], [0], [1], [0, 0, 1, 1], [], []>} : vector<16x96xf32>, vector<96x32xf32>, vector<16x32xf32> -> vector<16x32xf32>
    %266 = arith.addf %264, %265 : vector<16x32xf32>
    %267 = math.tanh %266 : vector<16x32xf32>
    %268 = arith.mulf %256, %219 : vector<16x32xf32>
    %cst_122 = arith.constant 1.000000e+00 : f32
    %269 = vector.broadcast %cst_122 : f32 to vector<16x32xf32>
    %270 = arith.subf %269, %256 : vector<16x32xf32>
    %271 = arith.mulf %270, %267 : vector<16x32xf32>
    %272 = arith.addf %268, %271 : vector<16x32xf32>
    %c0_123 = arith.constant 0 : index
    %c4_124 = arith.constant 4 : index
    %c0_125 = arith.constant 0 : index
    %c0_126 = arith.constant 0 : index
    %273 = vector.load %arg10[%c0_123, %c4_124, %c0_125, %c0_126] : memref<2x8x16x32xf32, #tpu.memory_space<vmem>>, vector<1x1x16x32xf32>
    %274 = vector.shape_cast %273 : vector<1x1x16x32xf32> to vector<16x32xf32>
    %275 = vector.shape_cast %272 : vector<16x32xf32> to vector<1x1x16x32xf32>
    tpu.vector_store %arg10[%c0_123, %c4_124, %c0_125, %c0_126], %275 {strides = array<i32>} : memref<2x8x16x32xf32, #tpu.memory_space<vmem>>, vector<1x1x16x32xf32>,
    %c0_127 = arith.constant 0 : index
    %c5 = arith.constant 5 : index
    %c0_128 = arith.constant 0 : index
    %c0_129 = arith.constant 0 : index
    %276 = vector.load %arg1[%c0_127, %c5, %c0_128, %c0_129] : memref<1x8x16x32xf32, #tpu.memory_space<vmem>>, vector<1x1x16x32xf32>
    %277 = vector.shape_cast %276 : vector<1x1x16x32xf32> to vector<16x32xf32>
    %cst_130 = arith.constant dense<0.000000e+00> : vector<16x32xf32>
    %278 = tpu.matmul %0, %277, %cst_130 {dimension_numbers = #tpu.dot_dimension_numbers<[1], [0], [0], [1], [0, 0, 1, 1], [], []>} : vector<16x16xf32>, vector<16x32xf32>, vector<16x32xf32> -> vector<16x32xf32>
    %cst_131 = arith.constant dense<0.000000e+00> : vector<16x32xf32>
    %279 = tpu.matmul %0, %278, %cst_131 {dimension_numbers = #tpu.dot_dimension_numbers<[1], [0], [0], [1], [0, 0, 1, 1], [], []>} : vector<16x16xf32>, vector<16x32xf32>, vector<16x32xf32> -> vector<16x32xf32>
    %cst_132 = arith.constant 2.000000e+00 : f32
    %280 = vector.broadcast %cst_132 : f32 to vector<16x32xf32>
    %281 = arith.mulf %280, %279 : vector<16x32xf32>
    %282 = arith.subf %281, %277 : vector<16x32xf32>
    %283 = tpu.concatenate %277, %278, %282 in 1 : vector<16x32xf32>, vector<16x32xf32>, vector<16x32xf32> -> vector<16x96xf32>
    %cst_133 = arith.constant dense<0.000000e+00> : vector<16x32xf32>
    %284 = tpu.matmul %0, %272, %cst_133 {dimension_numbers = #tpu.dot_dimension_numbers<[1], [0], [0], [1], [0, 0, 1, 1], [], []>} : vector<16x16xf32>, vector<16x32xf32>, vector<16x32xf32> -> vector<16x32xf32>
    %cst_134 = arith.constant dense<0.000000e+00> : vector<16x32xf32>
    %285 = tpu.matmul %0, %284, %cst_134 {dimension_numbers = #tpu.dot_dimension_numbers<[1], [0], [0], [1], [0, 0, 1, 1], [], []>} : vector<16x16xf32>, vector<16x32xf32>, vector<16x32xf32> -> vector<16x32xf32>
    %cst_135 = arith.constant 2.000000e+00 : f32
    %286 = vector.broadcast %cst_135 : f32 to vector<16x32xf32>
    %287 = arith.mulf %286, %285 : vector<16x32xf32>
    %288 = arith.subf %287, %272 : vector<16x32xf32>
    %289 = tpu.concatenate %272, %284, %288 in 1 : vector<16x32xf32>, vector<16x32xf32>, vector<16x32xf32> -> vector<16x96xf32>
    %cst_136 = arith.constant dense<0.000000e+00> : vector<16x96xf32>
    %290 = tpu.matmul %283, %2, %cst_136 {dimension_numbers = #tpu.dot_dimension_numbers<[1], [0], [0], [1], [0, 0, 1, 1], [], []>} : vector<16x96xf32>, vector<96x96xf32>, vector<16x96xf32> -> vector<16x96xf32>
    %291 = vector.broadcast %8 : vector<1x96xf32> to vector<16x96xf32>
    %292 = arith.addf %290, %291 : vector<16x96xf32>
    %cst_137 = arith.constant dense<0.000000e+00> : vector<16x64xf32>
    %293 = tpu.matmul %289, %4, %cst_137 {dimension_numbers = #tpu.dot_dimension_numbers<[1], [0], [0], [1], [0, 0, 1, 1], [], []>} : vector<16x96xf32>, vector<96x64xf32>, vector<16x64xf32> -> vector<16x64xf32>
    %294 = vector.extract_strided_slice %292 {offsets = [0, 0], sizes = [16, 32], strides = [1, 1]} : vector<16x96xf32> to vector<16x32xf32>
    %295 = vector.extract_strided_slice %293 {offsets = [0, 0], sizes = [16, 32], strides = [1, 1]} : vector<16x64xf32> to vector<16x32xf32>
    %296 = arith.addf %294, %295 : vector<16x32xf32>
    %297 = arith.negf %296 : vector<16x32xf32>
    %298 = math.exp %297 : vector<16x32xf32>
    %cst_138 = arith.constant 1.000000e+00 : f32
    %299 = vector.broadcast %cst_138 : f32 to vector<16x32xf32>
    %300 = arith.addf %299, %298 : vector<16x32xf32>
    %301 = arith.divf %299, %300 : vector<16x32xf32>
    %302 = vector.extract_strided_slice %292 {offsets = [0, 32], sizes = [16, 32], strides = [1, 1]} : vector<16x96xf32> to vector<16x32xf32>
    %303 = vector.extract_strided_slice %293 {offsets = [0, 32], sizes = [16, 32], strides = [1, 1]} : vector<16x64xf32> to vector<16x32xf32>
    %304 = arith.addf %302, %303 : vector<16x32xf32>
    %305 = arith.negf %304 : vector<16x32xf32>
    %306 = math.exp %305 : vector<16x32xf32>
    %cst_139 = arith.constant 1.000000e+00 : f32
    %307 = vector.broadcast %cst_139 : f32 to vector<16x32xf32>
    %308 = arith.addf %307, %306 : vector<16x32xf32>
    %309 = arith.divf %307, %308 : vector<16x32xf32>
    %310 = arith.mulf %301, %272 : vector<16x32xf32>
    %cst_140 = arith.constant dense<0.000000e+00> : vector<16x32xf32>
    %311 = tpu.matmul %0, %310, %cst_140 {dimension_numbers = #tpu.dot_dimension_numbers<[1], [0], [0], [1], [0, 0, 1, 1], [], []>} : vector<16x16xf32>, vector<16x32xf32>, vector<16x32xf32> -> vector<16x32xf32>
    %cst_141 = arith.constant dense<0.000000e+00> : vector<16x32xf32>
    %312 = tpu.matmul %0, %311, %cst_141 {dimension_numbers = #tpu.dot_dimension_numbers<[1], [0], [0], [1], [0, 0, 1, 1], [], []>} : vector<16x16xf32>, vector<16x32xf32>, vector<16x32xf32> -> vector<16x32xf32>
    %cst_142 = arith.constant 2.000000e+00 : f32
    %313 = vector.broadcast %cst_142 : f32 to vector<16x32xf32>
    %314 = arith.mulf %313, %312 : vector<16x32xf32>
    %315 = arith.subf %314, %310 : vector<16x32xf32>
    %316 = tpu.concatenate %310, %311, %315 in 1 : vector<16x32xf32>, vector<16x32xf32>, vector<16x32xf32> -> vector<16x96xf32>
    %317 = vector.extract_strided_slice %292 {offsets = [0, 64], sizes = [16, 32], strides = [1, 1]} : vector<16x96xf32> to vector<16x32xf32>
    %cst_143 = arith.constant dense<0.000000e+00> : vector<16x32xf32>
    %318 = tpu.matmul %316, %6, %cst_143 {dimension_numbers = #tpu.dot_dimension_numbers<[1], [0], [0], [1], [0, 0, 1, 1], [], []>} : vector<16x96xf32>, vector<96x32xf32>, vector<16x32xf32> -> vector<16x32xf32>
    %319 = arith.addf %317, %318 : vector<16x32xf32>
    %320 = math.tanh %319 : vector<16x32xf32>
    %321 = arith.mulf %309, %272 : vector<16x32xf32>
    %cst_144 = arith.constant 1.000000e+00 : f32
    %322 = vector.broadcast %cst_144 : f32 to vector<16x32xf32>
    %323 = arith.subf %322, %309 : vector<16x32xf32>
    %324 = arith.mulf %323, %320 : vector<16x32xf32>
    %325 = arith.addf %321, %324 : vector<16x32xf32>
    %c0_145 = arith.constant 0 : index
    %c5_146 = arith.constant 5 : index
    %c0_147 = arith.constant 0 : index
    %c0_148 = arith.constant 0 : index
    %326 = vector.load %arg10[%c0_145, %c5_146, %c0_147, %c0_148] : memref<2x8x16x32xf32, #tpu.memory_space<vmem>>, vector<1x1x16x32xf32>
    %327 = vector.shape_cast %326 : vector<1x1x16x32xf32> to vector<16x32xf32>
    %328 = vector.shape_cast %325 : vector<16x32xf32> to vector<1x1x16x32xf32>
    tpu.vector_store %arg10[%c0_145, %c5_146, %c0_147, %c0_148], %328 {strides = array<i32>} : memref<2x8x16x32xf32, #tpu.memory_space<vmem>>, vector<1x1x16x32xf32>,
    %c0_149 = arith.constant 0 : index
    %c6 = arith.constant 6 : index
    %c0_150 = arith.constant 0 : index
    %c0_151 = arith.constant 0 : index
    %329 = vector.load %arg1[%c0_149, %c6, %c0_150, %c0_151] : memref<1x8x16x32xf32, #tpu.memory_space<vmem>>, vector<1x1x16x32xf32>
    %330 = vector.shape_cast %329 : vector<1x1x16x32xf32> to vector<16x32xf32>
    %cst_152 = arith.constant dense<0.000000e+00> : vector<16x32xf32>
    %331 = tpu.matmul %0, %330, %cst_152 {dimension_numbers = #tpu.dot_dimension_numbers<[1], [0], [0], [1], [0, 0, 1, 1], [], []>} : vector<16x16xf32>, vector<16x32xf32>, vector<16x32xf32> -> vector<16x32xf32>
    %cst_153 = arith.constant dense<0.000000e+00> : vector<16x32xf32>
    %332 = tpu.matmul %0, %331, %cst_153 {dimension_numbers = #tpu.dot_dimension_numbers<[1], [0], [0], [1], [0, 0, 1, 1], [], []>} : vector<16x16xf32>, vector<16x32xf32>, vector<16x32xf32> -> vector<16x32xf32>
    %cst_154 = arith.constant 2.000000e+00 : f32
    %333 = vector.broadcast %cst_154 : f32 to vector<16x32xf32>
    %334 = arith.mulf %333, %332 : vector<16x32xf32>
    %335 = arith.subf %334, %330 : vector<16x32xf32>
    %336 = tpu.concatenate %330, %331, %335 in 1 : vector<16x32xf32>, vector<16x32xf32>, vector<16x32xf32> -> vector<16x96xf32>
    %cst_155 = arith.constant dense<0.000000e+00> : vector<16x32xf32>
    %337 = tpu.matmul %0, %325, %cst_155 {dimension_numbers = #tpu.dot_dimension_numbers<[1], [0], [0], [1], [0, 0, 1, 1], [], []>} : vector<16x16xf32>, vector<16x32xf32>, vector<16x32xf32> -> vector<16x32xf32>
    %cst_156 = arith.constant dense<0.000000e+00> : vector<16x32xf32>
    %338 = tpu.matmul %0, %337, %cst_156 {dimension_numbers = #tpu.dot_dimension_numbers<[1], [0], [0], [1], [0, 0, 1, 1], [], []>} : vector<16x16xf32>, vector<16x32xf32>, vector<16x32xf32> -> vector<16x32xf32>
    %cst_157 = arith.constant 2.000000e+00 : f32
    %339 = vector.broadcast %cst_157 : f32 to vector<16x32xf32>
    %340 = arith.mulf %339, %338 : vector<16x32xf32>
    %341 = arith.subf %340, %325 : vector<16x32xf32>
    %342 = tpu.concatenate %325, %337, %341 in 1 : vector<16x32xf32>, vector<16x32xf32>, vector<16x32xf32> -> vector<16x96xf32>
    %cst_158 = arith.constant dense<0.000000e+00> : vector<16x96xf32>
    %343 = tpu.matmul %336, %2, %cst_158 {dimension_numbers = #tpu.dot_dimension_numbers<[1], [0], [0], [1], [0, 0, 1, 1], [], []>} : vector<16x96xf32>, vector<96x96xf32>, vector<16x96xf32> -> vector<16x96xf32>
    %344 = vector.broadcast %8 : vector<1x96xf32> to vector<16x96xf32>
    %345 = arith.addf %343, %344 : vector<16x96xf32>
    %cst_159 = arith.constant dense<0.000000e+00> : vector<16x64xf32>
    %346 = tpu.matmul %342, %4, %cst_159 {dimension_numbers = #tpu.dot_dimension_numbers<[1], [0], [0], [1], [0, 0, 1, 1], [], []>} : vector<16x96xf32>, vector<96x64xf32>, vector<16x64xf32> -> vector<16x64xf32>
    %347 = vector.extract_strided_slice %345 {offsets = [0, 0], sizes = [16, 32], strides = [1, 1]} : vector<16x96xf32> to vector<16x32xf32>
    %348 = vector.extract_strided_slice %346 {offsets = [0, 0], sizes = [16, 32], strides = [1, 1]} : vector<16x64xf32> to vector<16x32xf32>
    %349 = arith.addf %347, %348 : vector<16x32xf32>
    %350 = arith.negf %349 : vector<16x32xf32>
    %351 = math.exp %350 : vector<16x32xf32>
    %cst_160 = arith.constant 1.000000e+00 : f32
    %352 = vector.broadcast %cst_160 : f32 to vector<16x32xf32>
    %353 = arith.addf %352, %351 : vector<16x32xf32>
    %354 = arith.divf %352, %353 : vector<16x32xf32>
    %355 = vector.extract_strided_slice %345 {offsets = [0, 32], sizes = [16, 32], strides = [1, 1]} : vector<16x96xf32> to vector<16x32xf32>
    %356 = vector.extract_strided_slice %346 {offsets = [0, 32], sizes = [16, 32], strides = [1, 1]} : vector<16x64xf32> to vector<16x32xf32>
    %357 = arith.addf %355, %356 : vector<16x32xf32>
    %358 = arith.negf %357 : vector<16x32xf32>
    %359 = math.exp %358 : vector<16x32xf32>
    %cst_161 = arith.constant 1.000000e+00 : f32
    %360 = vector.broadcast %cst_161 : f32 to vector<16x32xf32>
    %361 = arith.addf %360, %359 : vector<16x32xf32>
    %362 = arith.divf %360, %361 : vector<16x32xf32>
    %363 = arith.mulf %354, %325 : vector<16x32xf32>
    %cst_162 = arith.constant dense<0.000000e+00> : vector<16x32xf32>
    %364 = tpu.matmul %0, %363, %cst_162 {dimension_numbers = #tpu.dot_dimension_numbers<[1], [0], [0], [1], [0, 0, 1, 1], [], []>} : vector<16x16xf32>, vector<16x32xf32>, vector<16x32xf32> -> vector<16x32xf32>
    %cst_163 = arith.constant dense<0.000000e+00> : vector<16x32xf32>
    %365 = tpu.matmul %0, %364, %cst_163 {dimension_numbers = #tpu.dot_dimension_numbers<[1], [0], [0], [1], [0, 0, 1, 1], [], []>} : vector<16x16xf32>, vector<16x32xf32>, vector<16x32xf32> -> vector<16x32xf32>
    %cst_164 = arith.constant 2.000000e+00 : f32
    %366 = vector.broadcast %cst_164 : f32 to vector<16x32xf32>
    %367 = arith.mulf %366, %365 : vector<16x32xf32>
    %368 = arith.subf %367, %363 : vector<16x32xf32>
    %369 = tpu.concatenate %363, %364, %368 in 1 : vector<16x32xf32>, vector<16x32xf32>, vector<16x32xf32> -> vector<16x96xf32>
    %370 = vector.extract_strided_slice %345 {offsets = [0, 64], sizes = [16, 32], strides = [1, 1]} : vector<16x96xf32> to vector<16x32xf32>
    %cst_165 = arith.constant dense<0.000000e+00> : vector<16x32xf32>
    %371 = tpu.matmul %369, %6, %cst_165 {dimension_numbers = #tpu.dot_dimension_numbers<[1], [0], [0], [1], [0, 0, 1, 1], [], []>} : vector<16x96xf32>, vector<96x32xf32>, vector<16x32xf32> -> vector<16x32xf32>
    %372 = arith.addf %370, %371 : vector<16x32xf32>
    %373 = math.tanh %372 : vector<16x32xf32>
    %374 = arith.mulf %362, %325 : vector<16x32xf32>
    %cst_166 = arith.constant 1.000000e+00 : f32
    %375 = vector.broadcast %cst_166 : f32 to vector<16x32xf32>
    %376 = arith.subf %375, %362 : vector<16x32xf32>
    %377 = arith.mulf %376, %373 : vector<16x32xf32>
    %378 = arith.addf %374, %377 : vector<16x32xf32>
    %c0_167 = arith.constant 0 : index
    %c6_168 = arith.constant 6 : index
    %c0_169 = arith.constant 0 : index
    %c0_170 = arith.constant 0 : index
    %379 = vector.load %arg10[%c0_167, %c6_168, %c0_169, %c0_170] : memref<2x8x16x32xf32, #tpu.memory_space<vmem>>, vector<1x1x16x32xf32>
    %380 = vector.shape_cast %379 : vector<1x1x16x32xf32> to vector<16x32xf32>
    %381 = vector.shape_cast %378 : vector<16x32xf32> to vector<1x1x16x32xf32>
    tpu.vector_store %arg10[%c0_167, %c6_168, %c0_169, %c0_170], %381 {strides = array<i32>} : memref<2x8x16x32xf32, #tpu.memory_space<vmem>>, vector<1x1x16x32xf32>,
    %c0_171 = arith.constant 0 : index
    %c7 = arith.constant 7 : index
    %c0_172 = arith.constant 0 : index
    %c0_173 = arith.constant 0 : index
    %382 = vector.load %arg1[%c0_171, %c7, %c0_172, %c0_173] : memref<1x8x16x32xf32, #tpu.memory_space<vmem>>, vector<1x1x16x32xf32>
    %383 = vector.shape_cast %382 : vector<1x1x16x32xf32> to vector<16x32xf32>
    %cst_174 = arith.constant dense<0.000000e+00> : vector<16x32xf32>
    %384 = tpu.matmul %0, %383, %cst_174 {dimension_numbers = #tpu.dot_dimension_numbers<[1], [0], [0], [1], [0, 0, 1, 1], [], []>} : vector<16x16xf32>, vector<16x32xf32>, vector<16x32xf32> -> vector<16x32xf32>
    %cst_175 = arith.constant dense<0.000000e+00> : vector<16x32xf32>
    %385 = tpu.matmul %0, %384, %cst_175 {dimension_numbers = #tpu.dot_dimension_numbers<[1], [0], [0], [1], [0, 0, 1, 1], [], []>} : vector<16x16xf32>, vector<16x32xf32>, vector<16x32xf32> -> vector<16x32xf32>
    %cst_176 = arith.constant 2.000000e+00 : f32
    %386 = vector.broadcast %cst_176 : f32 to vector<16x32xf32>
    %387 = arith.mulf %386, %385 : vector<16x32xf32>
    %388 = arith.subf %387, %383 : vector<16x32xf32>
    %389 = tpu.concatenate %383, %384, %388 in 1 : vector<16x32xf32>, vector<16x32xf32>, vector<16x32xf32> -> vector<16x96xf32>
    %cst_177 = arith.constant dense<0.000000e+00> : vector<16x32xf32>
    %390 = tpu.matmul %0, %378, %cst_177 {dimension_numbers = #tpu.dot_dimension_numbers<[1], [0], [0], [1], [0, 0, 1, 1], [], []>} : vector<16x16xf32>, vector<16x32xf32>, vector<16x32xf32> -> vector<16x32xf32>
    %cst_178 = arith.constant dense<0.000000e+00> : vector<16x32xf32>
    %391 = tpu.matmul %0, %390, %cst_178 {dimension_numbers = #tpu.dot_dimension_numbers<[1], [0], [0], [1], [0, 0, 1, 1], [], []>} : vector<16x16xf32>, vector<16x32xf32>, vector<16x32xf32> -> vector<16x32xf32>
    %cst_179 = arith.constant 2.000000e+00 : f32
    %392 = vector.broadcast %cst_179 : f32 to vector<16x32xf32>
    %393 = arith.mulf %392, %391 : vector<16x32xf32>
    %394 = arith.subf %393, %378 : vector<16x32xf32>
    %395 = tpu.concatenate %378, %390, %394 in 1 : vector<16x32xf32>, vector<16x32xf32>, vector<16x32xf32> -> vector<16x96xf32>
    %cst_180 = arith.constant dense<0.000000e+00> : vector<16x96xf32>
    %396 = tpu.matmul %389, %2, %cst_180 {dimension_numbers = #tpu.dot_dimension_numbers<[1], [0], [0], [1], [0, 0, 1, 1], [], []>} : vector<16x96xf32>, vector<96x96xf32>, vector<16x96xf32> -> vector<16x96xf32>
    %397 = vector.broadcast %8 : vector<1x96xf32> to vector<16x96xf32>
    %398 = arith.addf %396, %397 : vector<16x96xf32>
    %cst_181 = arith.constant dense<0.000000e+00> : vector<16x64xf32>
    %399 = tpu.matmul %395, %4, %cst_181 {dimension_numbers = #tpu.dot_dimension_numbers<[1], [0], [0], [1], [0, 0, 1, 1], [], []>} : vector<16x96xf32>, vector<96x64xf32>, vector<16x64xf32> -> vector<16x64xf32>
    %400 = vector.extract_strided_slice %398 {offsets = [0, 0], sizes = [16, 32], strides = [1, 1]} : vector<16x96xf32> to vector<16x32xf32>
    %401 = vector.extract_strided_slice %399 {offsets = [0, 0], sizes = [16, 32], strides = [1, 1]} : vector<16x64xf32> to vector<16x32xf32>
    %402 = arith.addf %400, %401 : vector<16x32xf32>
    %403 = arith.negf %402 : vector<16x32xf32>
    %404 = math.exp %403 : vector<16x32xf32>
    %cst_182 = arith.constant 1.000000e+00 : f32
    %405 = vector.broadcast %cst_182 : f32 to vector<16x32xf32>
    %406 = arith.addf %405, %404 : vector<16x32xf32>
    %407 = arith.divf %405, %406 : vector<16x32xf32>
    %408 = vector.extract_strided_slice %398 {offsets = [0, 32], sizes = [16, 32], strides = [1, 1]} : vector<16x96xf32> to vector<16x32xf32>
    %409 = vector.extract_strided_slice %399 {offsets = [0, 32], sizes = [16, 32], strides = [1, 1]} : vector<16x64xf32> to vector<16x32xf32>
    %410 = arith.addf %408, %409 : vector<16x32xf32>
    %411 = arith.negf %410 : vector<16x32xf32>
    %412 = math.exp %411 : vector<16x32xf32>
    %cst_183 = arith.constant 1.000000e+00 : f32
    %413 = vector.broadcast %cst_183 : f32 to vector<16x32xf32>
    %414 = arith.addf %413, %412 : vector<16x32xf32>
    %415 = arith.divf %413, %414 : vector<16x32xf32>
    %416 = arith.mulf %407, %378 : vector<16x32xf32>
    %cst_184 = arith.constant dense<0.000000e+00> : vector<16x32xf32>
    %417 = tpu.matmul %0, %416, %cst_184 {dimension_numbers = #tpu.dot_dimension_numbers<[1], [0], [0], [1], [0, 0, 1, 1], [], []>} : vector<16x16xf32>, vector<16x32xf32>, vector<16x32xf32> -> vector<16x32xf32>
    %cst_185 = arith.constant dense<0.000000e+00> : vector<16x32xf32>
    %418 = tpu.matmul %0, %417, %cst_185 {dimension_numbers = #tpu.dot_dimension_numbers<[1], [0], [0], [1], [0, 0, 1, 1], [], []>} : vector<16x16xf32>, vector<16x32xf32>, vector<16x32xf32> -> vector<16x32xf32>
    %cst_186 = arith.constant 2.000000e+00 : f32
    %419 = vector.broadcast %cst_186 : f32 to vector<16x32xf32>
    %420 = arith.mulf %419, %418 : vector<16x32xf32>
    %421 = arith.subf %420, %416 : vector<16x32xf32>
    %422 = tpu.concatenate %416, %417, %421 in 1 : vector<16x32xf32>, vector<16x32xf32>, vector<16x32xf32> -> vector<16x96xf32>
    %423 = vector.extract_strided_slice %398 {offsets = [0, 64], sizes = [16, 32], strides = [1, 1]} : vector<16x96xf32> to vector<16x32xf32>
    %cst_187 = arith.constant dense<0.000000e+00> : vector<16x32xf32>
    %424 = tpu.matmul %422, %6, %cst_187 {dimension_numbers = #tpu.dot_dimension_numbers<[1], [0], [0], [1], [0, 0, 1, 1], [], []>} : vector<16x96xf32>, vector<96x32xf32>, vector<16x32xf32> -> vector<16x32xf32>
    %425 = arith.addf %423, %424 : vector<16x32xf32>
    %426 = math.tanh %425 : vector<16x32xf32>
    %427 = arith.mulf %415, %378 : vector<16x32xf32>
    %cst_188 = arith.constant 1.000000e+00 : f32
    %428 = vector.broadcast %cst_188 : f32 to vector<16x32xf32>
    %429 = arith.subf %428, %415 : vector<16x32xf32>
    %430 = arith.mulf %429, %426 : vector<16x32xf32>
    %431 = arith.addf %427, %430 : vector<16x32xf32>
    %c0_189 = arith.constant 0 : index
    %c7_190 = arith.constant 7 : index
    %c0_191 = arith.constant 0 : index
    %c0_192 = arith.constant 0 : index
    %432 = vector.load %arg10[%c0_189, %c7_190, %c0_191, %c0_192] : memref<2x8x16x32xf32, #tpu.memory_space<vmem>>, vector<1x1x16x32xf32>
    %433 = vector.shape_cast %432 : vector<1x1x16x32xf32> to vector<16x32xf32>
    %434 = vector.shape_cast %431 : vector<16x32xf32> to vector<1x1x16x32xf32>
    tpu.vector_store %arg10[%c0_189, %c7_190, %c0_191, %c0_192], %434 {strides = array<i32>} : memref<2x8x16x32xf32, #tpu.memory_space<vmem>>, vector<1x1x16x32xf32>,
    %c0_193 = arith.constant 0 : index
    %c0_194 = arith.constant 0 : index
    %c0_195 = arith.constant 0 : index
    %c0_196 = arith.constant 0 : index
    %435 = vector.load %arg9[%c0_193, %c0_194, %c0_195, %c0_196] : memref<1x2x16x32xf32, #tpu.memory_space<vmem>>, vector<1x1x16x32xf32>
    %436 = vector.shape_cast %435 : vector<1x1x16x32xf32> to vector<16x32xf32>
    %437 = vector.shape_cast %431 : vector<16x32xf32> to vector<1x1x16x32xf32>
    tpu.vector_store %arg9[%c0_193, %c0_194, %c0_195, %c0_196], %437 {strides = array<i32>} : memref<1x2x16x32xf32, #tpu.memory_space<vmem>>, vector<1x1x16x32xf32>,
    %c1_197 = arith.constant 1 : index
    %c0_198 = arith.constant 0 : index
    %c0_199 = arith.constant 0 : index
    %438 = vector.load %arg4[%c1_197, %c0_198, %c0_199] : memref<2x96x96xf32, #tpu.memory_space<vmem>>, vector<1x96x96xf32>
    %439 = vector.shape_cast %438 : vector<1x96x96xf32> to vector<96x96xf32>
    %c1_200 = arith.constant 1 : index
    %c0_201 = arith.constant 0 : index
    %c0_202 = arith.constant 0 : index
    %440 = vector.load %arg5[%c1_200, %c0_201, %c0_202] : memref<2x96x64xf32, #tpu.memory_space<vmem>>, vector<1x96x64xf32>
    %441 = vector.shape_cast %440 : vector<1x96x64xf32> to vector<96x64xf32>
    %c1_203 = arith.constant 1 : index
    %c0_204 = arith.constant 0 : index
    %c0_205 = arith.constant 0 : index
    %442 = vector.load %arg6[%c1_203, %c0_204, %c0_205] : memref<2x96x32xf32, #tpu.memory_space<vmem>>, vector<1x96x32xf32>
    %443 = vector.shape_cast %442 : vector<1x96x32xf32> to vector<96x32xf32>
    %c1_206 = arith.constant 1 : index
    %c0_207 = arith.constant 0 : index
    %c0_208 = arith.constant 0 : index
    %444 = vector.load %arg7[%c1_206, %c0_207, %c0_208] : memref<2x1x96xf32, #tpu.memory_space<vmem>>, vector<1x1x96xf32>
    %445 = vector.shape_cast %444 : vector<1x1x96xf32> to vector<1x96xf32>
    %c0_209 = arith.constant 0 : index
    %c1_210 = arith.constant 1 : index
    %c0_211 = arith.constant 0 : index
    %c0_212 = arith.constant 0 : index
    %446 = vector.load %arg2[%c0_209, %c1_210, %c0_211, %c0_212] : memref<1x2x16x32xf32, #tpu.memory_space<vmem>>, vector<1x1x16x32xf32>
    %447 = vector.shape_cast %446 : vector<1x1x16x32xf32> to vector<16x32xf32>
    %c0_213 = arith.constant 0 : index
    %c0_214 = arith.constant 0 : index
    %c0_215 = arith.constant 0 : index
    %c0_216 = arith.constant 0 : index
    %448 = vector.load %arg10[%c0_213, %c0_214, %c0_215, %c0_216] : memref<2x8x16x32xf32, #tpu.memory_space<vmem>>, vector<1x1x16x32xf32>
    %449 = vector.shape_cast %448 : vector<1x1x16x32xf32> to vector<16x32xf32>
    %cst_217 = arith.constant dense<0.000000e+00> : vector<16x32xf32>
    %450 = tpu.matmul %0, %449, %cst_217 {dimension_numbers = #tpu.dot_dimension_numbers<[1], [0], [0], [1], [0, 0, 1, 1], [], []>} : vector<16x16xf32>, vector<16x32xf32>, vector<16x32xf32> -> vector<16x32xf32>
    %cst_218 = arith.constant dense<0.000000e+00> : vector<16x32xf32>
    %451 = tpu.matmul %0, %450, %cst_218 {dimension_numbers = #tpu.dot_dimension_numbers<[1], [0], [0], [1], [0, 0, 1, 1], [], []>} : vector<16x16xf32>, vector<16x32xf32>, vector<16x32xf32> -> vector<16x32xf32>
    %cst_219 = arith.constant 2.000000e+00 : f32
    %452 = vector.broadcast %cst_219 : f32 to vector<16x32xf32>
    %453 = arith.mulf %452, %451 : vector<16x32xf32>
    %454 = arith.subf %453, %449 : vector<16x32xf32>
    %455 = tpu.concatenate %449, %450, %454 in 1 : vector<16x32xf32>, vector<16x32xf32>, vector<16x32xf32> -> vector<16x96xf32>
    %cst_220 = arith.constant dense<0.000000e+00> : vector<16x32xf32>
    %456 = tpu.matmul %0, %447, %cst_220 {dimension_numbers = #tpu.dot_dimension_numbers<[1], [0], [0], [1], [0, 0, 1, 1], [], []>} : vector<16x16xf32>, vector<16x32xf32>, vector<16x32xf32> -> vector<16x32xf32>
    %cst_221 = arith.constant dense<0.000000e+00> : vector<16x32xf32>
    %457 = tpu.matmul %0, %456, %cst_221 {dimension_numbers = #tpu.dot_dimension_numbers<[1], [0], [0], [1], [0, 0, 1, 1], [], []>} : vector<16x16xf32>, vector<16x32xf32>, vector<16x32xf32> -> vector<16x32xf32>
    %cst_222 = arith.constant 2.000000e+00 : f32
    %458 = vector.broadcast %cst_222 : f32 to vector<16x32xf32>
    %459 = arith.mulf %458, %457 : vector<16x32xf32>
    %460 = arith.subf %459, %447 : vector<16x32xf32>
    %461 = tpu.concatenate %447, %456, %460 in 1 : vector<16x32xf32>, vector<16x32xf32>, vector<16x32xf32> -> vector<16x96xf32>
    %cst_223 = arith.constant dense<0.000000e+00> : vector<16x96xf32>
    %462 = tpu.matmul %455, %439, %cst_223 {dimension_numbers = #tpu.dot_dimension_numbers<[1], [0], [0], [1], [0, 0, 1, 1], [], []>} : vector<16x96xf32>, vector<96x96xf32>, vector<16x96xf32> -> vector<16x96xf32>
    %463 = vector.broadcast %445 : vector<1x96xf32> to vector<16x96xf32>
    %464 = arith.addf %462, %463 : vector<16x96xf32>
    %cst_224 = arith.constant dense<0.000000e+00> : vector<16x64xf32>
    %465 = tpu.matmul %461, %441, %cst_224 {dimension_numbers = #tpu.dot_dimension_numbers<[1], [0], [0], [1], [0, 0, 1, 1], [], []>} : vector<16x96xf32>, vector<96x64xf32>, vector<16x64xf32> -> vector<16x64xf32>
    %466 = vector.extract_strided_slice %464 {offsets = [0, 0], sizes = [16, 32], strides = [1, 1]} : vector<16x96xf32> to vector<16x32xf32>
    %467 = vector.extract_strided_slice %465 {offsets = [0, 0], sizes = [16, 32], strides = [1, 1]} : vector<16x64xf32> to vector<16x32xf32>
    %468 = arith.addf %466, %467 : vector<16x32xf32>
    %469 = arith.negf %468 : vector<16x32xf32>
    %470 = math.exp %469 : vector<16x32xf32>
    %cst_225 = arith.constant 1.000000e+00 : f32
    %471 = vector.broadcast %cst_225 : f32 to vector<16x32xf32>
    %472 = arith.addf %471, %470 : vector<16x32xf32>
    %473 = arith.divf %471, %472 : vector<16x32xf32>
    %474 = vector.extract_strided_slice %464 {offsets = [0, 32], sizes = [16, 32], strides = [1, 1]} : vector<16x96xf32> to vector<16x32xf32>
    %475 = vector.extract_strided_slice %465 {offsets = [0, 32], sizes = [16, 32], strides = [1, 1]} : vector<16x64xf32> to vector<16x32xf32>
    %476 = arith.addf %474, %475 : vector<16x32xf32>
    %477 = arith.negf %476 : vector<16x32xf32>
    %478 = math.exp %477 : vector<16x32xf32>
    %cst_226 = arith.constant 1.000000e+00 : f32
    %479 = vector.broadcast %cst_226 : f32 to vector<16x32xf32>
    %480 = arith.addf %479, %478 : vector<16x32xf32>
    %481 = arith.divf %479, %480 : vector<16x32xf32>
    %482 = arith.mulf %473, %447 : vector<16x32xf32>
    %cst_227 = arith.constant dense<0.000000e+00> : vector<16x32xf32>
    %483 = tpu.matmul %0, %482, %cst_227 {dimension_numbers = #tpu.dot_dimension_numbers<[1], [0], [0], [1], [0, 0, 1, 1], [], []>} : vector<16x16xf32>, vector<16x32xf32>, vector<16x32xf32> -> vector<16x32xf32>
    %cst_228 = arith.constant dense<0.000000e+00> : vector<16x32xf32>
    %484 = tpu.matmul %0, %483, %cst_228 {dimension_numbers = #tpu.dot_dimension_numbers<[1], [0], [0], [1], [0, 0, 1, 1], [], []>} : vector<16x16xf32>, vector<16x32xf32>, vector<16x32xf32> -> vector<16x32xf32>
    %cst_229 = arith.constant 2.000000e+00 : f32
    %485 = vector.broadcast %cst_229 : f32 to vector<16x32xf32>
    %486 = arith.mulf %485, %484 : vector<16x32xf32>
    %487 = arith.subf %486, %482 : vector<16x32xf32>
    %488 = tpu.concatenate %482, %483, %487 in 1 : vector<16x32xf32>, vector<16x32xf32>, vector<16x32xf32> -> vector<16x96xf32>
    %489 = vector.extract_strided_slice %464 {offsets = [0, 64], sizes = [16, 32], strides = [1, 1]} : vector<16x96xf32> to vector<16x32xf32>
    %cst_230 = arith.constant dense<0.000000e+00> : vector<16x32xf32>
    %490 = tpu.matmul %488, %443, %cst_230 {dimension_numbers = #tpu.dot_dimension_numbers<[1], [0], [0], [1], [0, 0, 1, 1], [], []>} : vector<16x96xf32>, vector<96x32xf32>, vector<16x32xf32> -> vector<16x32xf32>
    %491 = arith.addf %489, %490 : vector<16x32xf32>
    %492 = math.tanh %491 : vector<16x32xf32>
    %493 = arith.mulf %481, %447 : vector<16x32xf32>
    %cst_231 = arith.constant 1.000000e+00 : f32
    %494 = vector.broadcast %cst_231 : f32 to vector<16x32xf32>
    %495 = arith.subf %494, %481 : vector<16x32xf32>
    %496 = arith.mulf %495, %492 : vector<16x32xf32>
    %497 = arith.addf %493, %496 : vector<16x32xf32>
    %c0_232 = arith.constant 0 : index
    %c0_233 = arith.constant 0 : index
    %c0_234 = arith.constant 0 : index
    %c0_235 = arith.constant 0 : index
    %498 = vector.load %arg8[%c0_232, %c0_233, %c0_234, %c0_235] : memref<1x8x16x32xf32, #tpu.memory_space<vmem>>, vector<1x1x16x32xf32>
    %499 = vector.shape_cast %498 : vector<1x1x16x32xf32> to vector<16x32xf32>
    %500 = vector.shape_cast %497 : vector<16x32xf32> to vector<1x1x16x32xf32>
    tpu.vector_store %arg8[%c0_232, %c0_233, %c0_234, %c0_235], %500 {strides = array<i32>} : memref<1x8x16x32xf32, #tpu.memory_space<vmem>>, vector<1x1x16x32xf32>,
    %c0_236 = arith.constant 0 : index
    %c1_237 = arith.constant 1 : index
    %c0_238 = arith.constant 0 : index
    %c0_239 = arith.constant 0 : index
    %501 = vector.load %arg10[%c0_236, %c1_237, %c0_238, %c0_239] : memref<2x8x16x32xf32, #tpu.memory_space<vmem>>, vector<1x1x16x32xf32>
    %502 = vector.shape_cast %501 : vector<1x1x16x32xf32> to vector<16x32xf32>
    %cst_240 = arith.constant dense<0.000000e+00> : vector<16x32xf32>
    %503 = tpu.matmul %0, %502, %cst_240 {dimension_numbers = #tpu.dot_dimension_numbers<[1], [0], [0], [1], [0, 0, 1, 1], [], []>} : vector<16x16xf32>, vector<16x32xf32>, vector<16x32xf32> -> vector<16x32xf32>
    %cst_241 = arith.constant dense<0.000000e+00> : vector<16x32xf32>
    %504 = tpu.matmul %0, %503, %cst_241 {dimension_numbers = #tpu.dot_dimension_numbers<[1], [0], [0], [1], [0, 0, 1, 1], [], []>} : vector<16x16xf32>, vector<16x32xf32>, vector<16x32xf32> -> vector<16x32xf32>
    %cst_242 = arith.constant 2.000000e+00 : f32
    %505 = vector.broadcast %cst_242 : f32 to vector<16x32xf32>
    %506 = arith.mulf %505, %504 : vector<16x32xf32>
    %507 = arith.subf %506, %502 : vector<16x32xf32>
    %508 = tpu.concatenate %502, %503, %507 in 1 : vector<16x32xf32>, vector<16x32xf32>, vector<16x32xf32> -> vector<16x96xf32>
    %cst_243 = arith.constant dense<0.000000e+00> : vector<16x32xf32>
    %509 = tpu.matmul %0, %497, %cst_243 {dimension_numbers = #tpu.dot_dimension_numbers<[1], [0], [0], [1], [0, 0, 1, 1], [], []>} : vector<16x16xf32>, vector<16x32xf32>, vector<16x32xf32> -> vector<16x32xf32>
    %cst_244 = arith.constant dense<0.000000e+00> : vector<16x32xf32>
    %510 = tpu.matmul %0, %509, %cst_244 {dimension_numbers = #tpu.dot_dimension_numbers<[1], [0], [0], [1], [0, 0, 1, 1], [], []>} : vector<16x16xf32>, vector<16x32xf32>, vector<16x32xf32> -> vector<16x32xf32>
    %cst_245 = arith.constant 2.000000e+00 : f32
    %511 = vector.broadcast %cst_245 : f32 to vector<16x32xf32>
    %512 = arith.mulf %511, %510 : vector<16x32xf32>
    %513 = arith.subf %512, %497 : vector<16x32xf32>
    %514 = tpu.concatenate %497, %509, %513 in 1 : vector<16x32xf32>, vector<16x32xf32>, vector<16x32xf32> -> vector<16x96xf32>
    %cst_246 = arith.constant dense<0.000000e+00> : vector<16x96xf32>
    %515 = tpu.matmul %508, %439, %cst_246 {dimension_numbers = #tpu.dot_dimension_numbers<[1], [0], [0], [1], [0, 0, 1, 1], [], []>} : vector<16x96xf32>, vector<96x96xf32>, vector<16x96xf32> -> vector<16x96xf32>
    %516 = vector.broadcast %445 : vector<1x96xf32> to vector<16x96xf32>
    %517 = arith.addf %515, %516 : vector<16x96xf32>
    %cst_247 = arith.constant dense<0.000000e+00> : vector<16x64xf32>
    %518 = tpu.matmul %514, %441, %cst_247 {dimension_numbers = #tpu.dot_dimension_numbers<[1], [0], [0], [1], [0, 0, 1, 1], [], []>} : vector<16x96xf32>, vector<96x64xf32>, vector<16x64xf32> -> vector<16x64xf32>
    %519 = vector.extract_strided_slice %517 {offsets = [0, 0], sizes = [16, 32], strides = [1, 1]} : vector<16x96xf32> to vector<16x32xf32>
    %520 = vector.extract_strided_slice %518 {offsets = [0, 0], sizes = [16, 32], strides = [1, 1]} : vector<16x64xf32> to vector<16x32xf32>
    %521 = arith.addf %519, %520 : vector<16x32xf32>
    %522 = arith.negf %521 : vector<16x32xf32>
    %523 = math.exp %522 : vector<16x32xf32>
    %cst_248 = arith.constant 1.000000e+00 : f32
    %524 = vector.broadcast %cst_248 : f32 to vector<16x32xf32>
    %525 = arith.addf %524, %523 : vector<16x32xf32>
    %526 = arith.divf %524, %525 : vector<16x32xf32>
    %527 = vector.extract_strided_slice %517 {offsets = [0, 32], sizes = [16, 32], strides = [1, 1]} : vector<16x96xf32> to vector<16x32xf32>
    %528 = vector.extract_strided_slice %518 {offsets = [0, 32], sizes = [16, 32], strides = [1, 1]} : vector<16x64xf32> to vector<16x32xf32>
    %529 = arith.addf %527, %528 : vector<16x32xf32>
    %530 = arith.negf %529 : vector<16x32xf32>
    %531 = math.exp %530 : vector<16x32xf32>
    %cst_249 = arith.constant 1.000000e+00 : f32
    %532 = vector.broadcast %cst_249 : f32 to vector<16x32xf32>
    %533 = arith.addf %532, %531 : vector<16x32xf32>
    %534 = arith.divf %532, %533 : vector<16x32xf32>
    %535 = arith.mulf %526, %497 : vector<16x32xf32>
    %cst_250 = arith.constant dense<0.000000e+00> : vector<16x32xf32>
    %536 = tpu.matmul %0, %535, %cst_250 {dimension_numbers = #tpu.dot_dimension_numbers<[1], [0], [0], [1], [0, 0, 1, 1], [], []>} : vector<16x16xf32>, vector<16x32xf32>, vector<16x32xf32> -> vector<16x32xf32>
    %cst_251 = arith.constant dense<0.000000e+00> : vector<16x32xf32>
    %537 = tpu.matmul %0, %536, %cst_251 {dimension_numbers = #tpu.dot_dimension_numbers<[1], [0], [0], [1], [0, 0, 1, 1], [], []>} : vector<16x16xf32>, vector<16x32xf32>, vector<16x32xf32> -> vector<16x32xf32>
    %cst_252 = arith.constant 2.000000e+00 : f32
    %538 = vector.broadcast %cst_252 : f32 to vector<16x32xf32>
    %539 = arith.mulf %538, %537 : vector<16x32xf32>
    %540 = arith.subf %539, %535 : vector<16x32xf32>
    %541 = tpu.concatenate %535, %536, %540 in 1 : vector<16x32xf32>, vector<16x32xf32>, vector<16x32xf32> -> vector<16x96xf32>
    %542 = vector.extract_strided_slice %517 {offsets = [0, 64], sizes = [16, 32], strides = [1, 1]} : vector<16x96xf32> to vector<16x32xf32>
    %cst_253 = arith.constant dense<0.000000e+00> : vector<16x32xf32>
    %543 = tpu.matmul %541, %443, %cst_253 {dimension_numbers = #tpu.dot_dimension_numbers<[1], [0], [0], [1], [0, 0, 1, 1], [], []>} : vector<16x96xf32>, vector<96x32xf32>, vector<16x32xf32> -> vector<16x32xf32>
    %544 = arith.addf %542, %543 : vector<16x32xf32>
    %545 = math.tanh %544 : vector<16x32xf32>
    %546 = arith.mulf %534, %497 : vector<16x32xf32>
    %cst_254 = arith.constant 1.000000e+00 : f32
    %547 = vector.broadcast %cst_254 : f32 to vector<16x32xf32>
    %548 = arith.subf %547, %534 : vector<16x32xf32>
    %549 = arith.mulf %548, %545 : vector<16x32xf32>
    %550 = arith.addf %546, %549 : vector<16x32xf32>
    %c0_255 = arith.constant 0 : index
    %c1_256 = arith.constant 1 : index
    %c0_257 = arith.constant 0 : index
    %c0_258 = arith.constant 0 : index
    %551 = vector.load %arg8[%c0_255, %c1_256, %c0_257, %c0_258] : memref<1x8x16x32xf32, #tpu.memory_space<vmem>>, vector<1x1x16x32xf32>
    %552 = vector.shape_cast %551 : vector<1x1x16x32xf32> to vector<16x32xf32>
    %553 = vector.shape_cast %550 : vector<16x32xf32> to vector<1x1x16x32xf32>
    tpu.vector_store %arg8[%c0_255, %c1_256, %c0_257, %c0_258], %553 {strides = array<i32>} : memref<1x8x16x32xf32, #tpu.memory_space<vmem>>, vector<1x1x16x32xf32>,
    %c0_259 = arith.constant 0 : index
    %c2_260 = arith.constant 2 : index
    %c0_261 = arith.constant 0 : index
    %c0_262 = arith.constant 0 : index
    %554 = vector.load %arg10[%c0_259, %c2_260, %c0_261, %c0_262] : memref<2x8x16x32xf32, #tpu.memory_space<vmem>>, vector<1x1x16x32xf32>
    %555 = vector.shape_cast %554 : vector<1x1x16x32xf32> to vector<16x32xf32>
    %cst_263 = arith.constant dense<0.000000e+00> : vector<16x32xf32>
    %556 = tpu.matmul %0, %555, %cst_263 {dimension_numbers = #tpu.dot_dimension_numbers<[1], [0], [0], [1], [0, 0, 1, 1], [], []>} : vector<16x16xf32>, vector<16x32xf32>, vector<16x32xf32> -> vector<16x32xf32>
    %cst_264 = arith.constant dense<0.000000e+00> : vector<16x32xf32>
    %557 = tpu.matmul %0, %556, %cst_264 {dimension_numbers = #tpu.dot_dimension_numbers<[1], [0], [0], [1], [0, 0, 1, 1], [], []>} : vector<16x16xf32>, vector<16x32xf32>, vector<16x32xf32> -> vector<16x32xf32>
    %cst_265 = arith.constant 2.000000e+00 : f32
    %558 = vector.broadcast %cst_265 : f32 to vector<16x32xf32>
    %559 = arith.mulf %558, %557 : vector<16x32xf32>
    %560 = arith.subf %559, %555 : vector<16x32xf32>
    %561 = tpu.concatenate %555, %556, %560 in 1 : vector<16x32xf32>, vector<16x32xf32>, vector<16x32xf32> -> vector<16x96xf32>
    %cst_266 = arith.constant dense<0.000000e+00> : vector<16x32xf32>
    %562 = tpu.matmul %0, %550, %cst_266 {dimension_numbers = #tpu.dot_dimension_numbers<[1], [0], [0], [1], [0, 0, 1, 1], [], []>} : vector<16x16xf32>, vector<16x32xf32>, vector<16x32xf32> -> vector<16x32xf32>
    %cst_267 = arith.constant dense<0.000000e+00> : vector<16x32xf32>
    %563 = tpu.matmul %0, %562, %cst_267 {dimension_numbers = #tpu.dot_dimension_numbers<[1], [0], [0], [1], [0, 0, 1, 1], [], []>} : vector<16x16xf32>, vector<16x32xf32>, vector<16x32xf32> -> vector<16x32xf32>
    %cst_268 = arith.constant 2.000000e+00 : f32
    %564 = vector.broadcast %cst_268 : f32 to vector<16x32xf32>
    %565 = arith.mulf %564, %563 : vector<16x32xf32>
    %566 = arith.subf %565, %550 : vector<16x32xf32>
    %567 = tpu.concatenate %550, %562, %566 in 1 : vector<16x32xf32>, vector<16x32xf32>, vector<16x32xf32> -> vector<16x96xf32>
    %cst_269 = arith.constant dense<0.000000e+00> : vector<16x96xf32>
    %568 = tpu.matmul %561, %439, %cst_269 {dimension_numbers = #tpu.dot_dimension_numbers<[1], [0], [0], [1], [0, 0, 1, 1], [], []>} : vector<16x96xf32>, vector<96x96xf32>, vector<16x96xf32> -> vector<16x96xf32>
    %569 = vector.broadcast %445 : vector<1x96xf32> to vector<16x96xf32>
    %570 = arith.addf %568, %569 : vector<16x96xf32>
    %cst_270 = arith.constant dense<0.000000e+00> : vector<16x64xf32>
    %571 = tpu.matmul %567, %441, %cst_270 {dimension_numbers = #tpu.dot_dimension_numbers<[1], [0], [0], [1], [0, 0, 1, 1], [], []>} : vector<16x96xf32>, vector<96x64xf32>, vector<16x64xf32> -> vector<16x64xf32>
    %572 = vector.extract_strided_slice %570 {offsets = [0, 0], sizes = [16, 32], strides = [1, 1]} : vector<16x96xf32> to vector<16x32xf32>
    %573 = vector.extract_strided_slice %571 {offsets = [0, 0], sizes = [16, 32], strides = [1, 1]} : vector<16x64xf32> to vector<16x32xf32>
    %574 = arith.addf %572, %573 : vector<16x32xf32>
    %575 = arith.negf %574 : vector<16x32xf32>
    %576 = math.exp %575 : vector<16x32xf32>
    %cst_271 = arith.constant 1.000000e+00 : f32
    %577 = vector.broadcast %cst_271 : f32 to vector<16x32xf32>
    %578 = arith.addf %577, %576 : vector<16x32xf32>
    %579 = arith.divf %577, %578 : vector<16x32xf32>
    %580 = vector.extract_strided_slice %570 {offsets = [0, 32], sizes = [16, 32], strides = [1, 1]} : vector<16x96xf32> to vector<16x32xf32>
    %581 = vector.extract_strided_slice %571 {offsets = [0, 32], sizes = [16, 32], strides = [1, 1]} : vector<16x64xf32> to vector<16x32xf32>
    %582 = arith.addf %580, %581 : vector<16x32xf32>
    %583 = arith.negf %582 : vector<16x32xf32>
    %584 = math.exp %583 : vector<16x32xf32>
    %cst_272 = arith.constant 1.000000e+00 : f32
    %585 = vector.broadcast %cst_272 : f32 to vector<16x32xf32>
    %586 = arith.addf %585, %584 : vector<16x32xf32>
    %587 = arith.divf %585, %586 : vector<16x32xf32>
    %588 = arith.mulf %579, %550 : vector<16x32xf32>
    %cst_273 = arith.constant dense<0.000000e+00> : vector<16x32xf32>
    %589 = tpu.matmul %0, %588, %cst_273 {dimension_numbers = #tpu.dot_dimension_numbers<[1], [0], [0], [1], [0, 0, 1, 1], [], []>} : vector<16x16xf32>, vector<16x32xf32>, vector<16x32xf32> -> vector<16x32xf32>
    %cst_274 = arith.constant dense<0.000000e+00> : vector<16x32xf32>
    %590 = tpu.matmul %0, %589, %cst_274 {dimension_numbers = #tpu.dot_dimension_numbers<[1], [0], [0], [1], [0, 0, 1, 1], [], []>} : vector<16x16xf32>, vector<16x32xf32>, vector<16x32xf32> -> vector<16x32xf32>
    %cst_275 = arith.constant 2.000000e+00 : f32
    %591 = vector.broadcast %cst_275 : f32 to vector<16x32xf32>
    %592 = arith.mulf %591, %590 : vector<16x32xf32>
    %593 = arith.subf %592, %588 : vector<16x32xf32>
    %594 = tpu.concatenate %588, %589, %593 in 1 : vector<16x32xf32>, vector<16x32xf32>, vector<16x32xf32> -> vector<16x96xf32>
    %595 = vector.extract_strided_slice %570 {offsets = [0, 64], sizes = [16, 32], strides = [1, 1]} : vector<16x96xf32> to vector<16x32xf32>
    %cst_276 = arith.constant dense<0.000000e+00> : vector<16x32xf32>
    %596 = tpu.matmul %594, %443, %cst_276 {dimension_numbers = #tpu.dot_dimension_numbers<[1], [0], [0], [1], [0, 0, 1, 1], [], []>} : vector<16x96xf32>, vector<96x32xf32>, vector<16x32xf32> -> vector<16x32xf32>
    %597 = arith.addf %595, %596 : vector<16x32xf32>
    %598 = math.tanh %597 : vector<16x32xf32>
    %599 = arith.mulf %587, %550 : vector<16x32xf32>
    %cst_277 = arith.constant 1.000000e+00 : f32
    %600 = vector.broadcast %cst_277 : f32 to vector<16x32xf32>
    %601 = arith.subf %600, %587 : vector<16x32xf32>
    %602 = arith.mulf %601, %598 : vector<16x32xf32>
    %603 = arith.addf %599, %602 : vector<16x32xf32>
    %c0_278 = arith.constant 0 : index
    %c2_279 = arith.constant 2 : index
    %c0_280 = arith.constant 0 : index
    %c0_281 = arith.constant 0 : index
    %604 = vector.load %arg8[%c0_278, %c2_279, %c0_280, %c0_281] : memref<1x8x16x32xf32, #tpu.memory_space<vmem>>, vector<1x1x16x32xf32>
    %605 = vector.shape_cast %604 : vector<1x1x16x32xf32> to vector<16x32xf32>
    %606 = vector.shape_cast %603 : vector<16x32xf32> to vector<1x1x16x32xf32>
    tpu.vector_store %arg8[%c0_278, %c2_279, %c0_280, %c0_281], %606 {strides = array<i32>} : memref<1x8x16x32xf32, #tpu.memory_space<vmem>>, vector<1x1x16x32xf32>,
    %c0_282 = arith.constant 0 : index
    %c3_283 = arith.constant 3 : index
    %c0_284 = arith.constant 0 : index
    %c0_285 = arith.constant 0 : index
    %607 = vector.load %arg10[%c0_282, %c3_283, %c0_284, %c0_285] : memref<2x8x16x32xf32, #tpu.memory_space<vmem>>, vector<1x1x16x32xf32>
    %608 = vector.shape_cast %607 : vector<1x1x16x32xf32> to vector<16x32xf32>
    %cst_286 = arith.constant dense<0.000000e+00> : vector<16x32xf32>
    %609 = tpu.matmul %0, %608, %cst_286 {dimension_numbers = #tpu.dot_dimension_numbers<[1], [0], [0], [1], [0, 0, 1, 1], [], []>} : vector<16x16xf32>, vector<16x32xf32>, vector<16x32xf32> -> vector<16x32xf32>
    %cst_287 = arith.constant dense<0.000000e+00> : vector<16x32xf32>
    %610 = tpu.matmul %0, %609, %cst_287 {dimension_numbers = #tpu.dot_dimension_numbers<[1], [0], [0], [1], [0, 0, 1, 1], [], []>} : vector<16x16xf32>, vector<16x32xf32>, vector<16x32xf32> -> vector<16x32xf32>
    %cst_288 = arith.constant 2.000000e+00 : f32
    %611 = vector.broadcast %cst_288 : f32 to vector<16x32xf32>
    %612 = arith.mulf %611, %610 : vector<16x32xf32>
    %613 = arith.subf %612, %608 : vector<16x32xf32>
    %614 = tpu.concatenate %608, %609, %613 in 1 : vector<16x32xf32>, vector<16x32xf32>, vector<16x32xf32> -> vector<16x96xf32>
    %cst_289 = arith.constant dense<0.000000e+00> : vector<16x32xf32>
    %615 = tpu.matmul %0, %603, %cst_289 {dimension_numbers = #tpu.dot_dimension_numbers<[1], [0], [0], [1], [0, 0, 1, 1], [], []>} : vector<16x16xf32>, vector<16x32xf32>, vector<16x32xf32> -> vector<16x32xf32>
    %cst_290 = arith.constant dense<0.000000e+00> : vector<16x32xf32>
    %616 = tpu.matmul %0, %615, %cst_290 {dimension_numbers = #tpu.dot_dimension_numbers<[1], [0], [0], [1], [0, 0, 1, 1], [], []>} : vector<16x16xf32>, vector<16x32xf32>, vector<16x32xf32> -> vector<16x32xf32>
    %cst_291 = arith.constant 2.000000e+00 : f32
    %617 = vector.broadcast %cst_291 : f32 to vector<16x32xf32>
    %618 = arith.mulf %617, %616 : vector<16x32xf32>
    %619 = arith.subf %618, %603 : vector<16x32xf32>
    %620 = tpu.concatenate %603, %615, %619 in 1 : vector<16x32xf32>, vector<16x32xf32>, vector<16x32xf32> -> vector<16x96xf32>
    %cst_292 = arith.constant dense<0.000000e+00> : vector<16x96xf32>
    %621 = tpu.matmul %614, %439, %cst_292 {dimension_numbers = #tpu.dot_dimension_numbers<[1], [0], [0], [1], [0, 0, 1, 1], [], []>} : vector<16x96xf32>, vector<96x96xf32>, vector<16x96xf32> -> vector<16x96xf32>
    %622 = vector.broadcast %445 : vector<1x96xf32> to vector<16x96xf32>
    %623 = arith.addf %621, %622 : vector<16x96xf32>
    %cst_293 = arith.constant dense<0.000000e+00> : vector<16x64xf32>
    %624 = tpu.matmul %620, %441, %cst_293 {dimension_numbers = #tpu.dot_dimension_numbers<[1], [0], [0], [1], [0, 0, 1, 1], [], []>} : vector<16x96xf32>, vector<96x64xf32>, vector<16x64xf32> -> vector<16x64xf32>
    %625 = vector.extract_strided_slice %623 {offsets = [0, 0], sizes = [16, 32], strides = [1, 1]} : vector<16x96xf32> to vector<16x32xf32>
    %626 = vector.extract_strided_slice %624 {offsets = [0, 0], sizes = [16, 32], strides = [1, 1]} : vector<16x64xf32> to vector<16x32xf32>
    %627 = arith.addf %625, %626 : vector<16x32xf32>
    %628 = arith.negf %627 : vector<16x32xf32>
    %629 = math.exp %628 : vector<16x32xf32>
    %cst_294 = arith.constant 1.000000e+00 : f32
    %630 = vector.broadcast %cst_294 : f32 to vector<16x32xf32>
    %631 = arith.addf %630, %629 : vector<16x32xf32>
    %632 = arith.divf %630, %631 : vector<16x32xf32>
    %633 = vector.extract_strided_slice %623 {offsets = [0, 32], sizes = [16, 32], strides = [1, 1]} : vector<16x96xf32> to vector<16x32xf32>
    %634 = vector.extract_strided_slice %624 {offsets = [0, 32], sizes = [16, 32], strides = [1, 1]} : vector<16x64xf32> to vector<16x32xf32>
    %635 = arith.addf %633, %634 : vector<16x32xf32>
    %636 = arith.negf %635 : vector<16x32xf32>
    %637 = math.exp %636 : vector<16x32xf32>
    %cst_295 = arith.constant 1.000000e+00 : f32
    %638 = vector.broadcast %cst_295 : f32 to vector<16x32xf32>
    %639 = arith.addf %638, %637 : vector<16x32xf32>
    %640 = arith.divf %638, %639 : vector<16x32xf32>
    %641 = arith.mulf %632, %603 : vector<16x32xf32>
    %cst_296 = arith.constant dense<0.000000e+00> : vector<16x32xf32>
    %642 = tpu.matmul %0, %641, %cst_296 {dimension_numbers = #tpu.dot_dimension_numbers<[1], [0], [0], [1], [0, 0, 1, 1], [], []>} : vector<16x16xf32>, vector<16x32xf32>, vector<16x32xf32> -> vector<16x32xf32>
    %cst_297 = arith.constant dense<0.000000e+00> : vector<16x32xf32>
    %643 = tpu.matmul %0, %642, %cst_297 {dimension_numbers = #tpu.dot_dimension_numbers<[1], [0], [0], [1], [0, 0, 1, 1], [], []>} : vector<16x16xf32>, vector<16x32xf32>, vector<16x32xf32> -> vector<16x32xf32>
    %cst_298 = arith.constant 2.000000e+00 : f32
    %644 = vector.broadcast %cst_298 : f32 to vector<16x32xf32>
    %645 = arith.mulf %644, %643 : vector<16x32xf32>
    %646 = arith.subf %645, %641 : vector<16x32xf32>
    %647 = tpu.concatenate %641, %642, %646 in 1 : vector<16x32xf32>, vector<16x32xf32>, vector<16x32xf32> -> vector<16x96xf32>
    %648 = vector.extract_strided_slice %623 {offsets = [0, 64], sizes = [16, 32], strides = [1, 1]} : vector<16x96xf32> to vector<16x32xf32>
    %cst_299 = arith.constant dense<0.000000e+00> : vector<16x32xf32>
    %649 = tpu.matmul %647, %443, %cst_299 {dimension_numbers = #tpu.dot_dimension_numbers<[1], [0], [0], [1], [0, 0, 1, 1], [], []>} : vector<16x96xf32>, vector<96x32xf32>, vector<16x32xf32> -> vector<16x32xf32>
    %650 = arith.addf %648, %649 : vector<16x32xf32>
    %651 = math.tanh %650 : vector<16x32xf32>
    %652 = arith.mulf %640, %603 : vector<16x32xf32>
    %cst_300 = arith.constant 1.000000e+00 : f32
    %653 = vector.broadcast %cst_300 : f32 to vector<16x32xf32>
    %654 = arith.subf %653, %640 : vector<16x32xf32>
    %655 = arith.mulf %654, %651 : vector<16x32xf32>
    %656 = arith.addf %652, %655 : vector<16x32xf32>
    %c0_301 = arith.constant 0 : index
    %c3_302 = arith.constant 3 : index
    %c0_303 = arith.constant 0 : index
    %c0_304 = arith.constant 0 : index
    %657 = vector.load %arg8[%c0_301, %c3_302, %c0_303, %c0_304] : memref<1x8x16x32xf32, #tpu.memory_space<vmem>>, vector<1x1x16x32xf32>
    %658 = vector.shape_cast %657 : vector<1x1x16x32xf32> to vector<16x32xf32>
    %659 = vector.shape_cast %656 : vector<16x32xf32> to vector<1x1x16x32xf32>
    tpu.vector_store %arg8[%c0_301, %c3_302, %c0_303, %c0_304], %659 {strides = array<i32>} : memref<1x8x16x32xf32, #tpu.memory_space<vmem>>, vector<1x1x16x32xf32>,
    %c0_305 = arith.constant 0 : index
    %c4_306 = arith.constant 4 : index
    %c0_307 = arith.constant 0 : index
    %c0_308 = arith.constant 0 : index
    %660 = vector.load %arg10[%c0_305, %c4_306, %c0_307, %c0_308] : memref<2x8x16x32xf32, #tpu.memory_space<vmem>>, vector<1x1x16x32xf32>
    %661 = vector.shape_cast %660 : vector<1x1x16x32xf32> to vector<16x32xf32>
    %cst_309 = arith.constant dense<0.000000e+00> : vector<16x32xf32>
    %662 = tpu.matmul %0, %661, %cst_309 {dimension_numbers = #tpu.dot_dimension_numbers<[1], [0], [0], [1], [0, 0, 1, 1], [], []>} : vector<16x16xf32>, vector<16x32xf32>, vector<16x32xf32> -> vector<16x32xf32>
    %cst_310 = arith.constant dense<0.000000e+00> : vector<16x32xf32>
    %663 = tpu.matmul %0, %662, %cst_310 {dimension_numbers = #tpu.dot_dimension_numbers<[1], [0], [0], [1], [0, 0, 1, 1], [], []>} : vector<16x16xf32>, vector<16x32xf32>, vector<16x32xf32> -> vector<16x32xf32>
    %cst_311 = arith.constant 2.000000e+00 : f32
    %664 = vector.broadcast %cst_311 : f32 to vector<16x32xf32>
    %665 = arith.mulf %664, %663 : vector<16x32xf32>
    %666 = arith.subf %665, %661 : vector<16x32xf32>
    %667 = tpu.concatenate %661, %662, %666 in 1 : vector<16x32xf32>, vector<16x32xf32>, vector<16x32xf32> -> vector<16x96xf32>
    %cst_312 = arith.constant dense<0.000000e+00> : vector<16x32xf32>
    %668 = tpu.matmul %0, %656, %cst_312 {dimension_numbers = #tpu.dot_dimension_numbers<[1], [0], [0], [1], [0, 0, 1, 1], [], []>} : vector<16x16xf32>, vector<16x32xf32>, vector<16x32xf32> -> vector<16x32xf32>
    %cst_313 = arith.constant dense<0.000000e+00> : vector<16x32xf32>
    %669 = tpu.matmul %0, %668, %cst_313 {dimension_numbers = #tpu.dot_dimension_numbers<[1], [0], [0], [1], [0, 0, 1, 1], [], []>} : vector<16x16xf32>, vector<16x32xf32>, vector<16x32xf32> -> vector<16x32xf32>
    %cst_314 = arith.constant 2.000000e+00 : f32
    %670 = vector.broadcast %cst_314 : f32 to vector<16x32xf32>
    %671 = arith.mulf %670, %669 : vector<16x32xf32>
    %672 = arith.subf %671, %656 : vector<16x32xf32>
    %673 = tpu.concatenate %656, %668, %672 in 1 : vector<16x32xf32>, vector<16x32xf32>, vector<16x32xf32> -> vector<16x96xf32>
    %cst_315 = arith.constant dense<0.000000e+00> : vector<16x96xf32>
    %674 = tpu.matmul %667, %439, %cst_315 {dimension_numbers = #tpu.dot_dimension_numbers<[1], [0], [0], [1], [0, 0, 1, 1], [], []>} : vector<16x96xf32>, vector<96x96xf32>, vector<16x96xf32> -> vector<16x96xf32>
    %675 = vector.broadcast %445 : vector<1x96xf32> to vector<16x96xf32>
    %676 = arith.addf %674, %675 : vector<16x96xf32>
    %cst_316 = arith.constant dense<0.000000e+00> : vector<16x64xf32>
    %677 = tpu.matmul %673, %441, %cst_316 {dimension_numbers = #tpu.dot_dimension_numbers<[1], [0], [0], [1], [0, 0, 1, 1], [], []>} : vector<16x96xf32>, vector<96x64xf32>, vector<16x64xf32> -> vector<16x64xf32>
    %678 = vector.extract_strided_slice %676 {offsets = [0, 0], sizes = [16, 32], strides = [1, 1]} : vector<16x96xf32> to vector<16x32xf32>
    %679 = vector.extract_strided_slice %677 {offsets = [0, 0], sizes = [16, 32], strides = [1, 1]} : vector<16x64xf32> to vector<16x32xf32>
    %680 = arith.addf %678, %679 : vector<16x32xf32>
    %681 = arith.negf %680 : vector<16x32xf32>
    %682 = math.exp %681 : vector<16x32xf32>
    %cst_317 = arith.constant 1.000000e+00 : f32
    %683 = vector.broadcast %cst_317 : f32 to vector<16x32xf32>
    %684 = arith.addf %683, %682 : vector<16x32xf32>
    %685 = arith.divf %683, %684 : vector<16x32xf32>
    %686 = vector.extract_strided_slice %676 {offsets = [0, 32], sizes = [16, 32], strides = [1, 1]} : vector<16x96xf32> to vector<16x32xf32>
    %687 = vector.extract_strided_slice %677 {offsets = [0, 32], sizes = [16, 32], strides = [1, 1]} : vector<16x64xf32> to vector<16x32xf32>
    %688 = arith.addf %686, %687 : vector<16x32xf32>
    %689 = arith.negf %688 : vector<16x32xf32>
    %690 = math.exp %689 : vector<16x32xf32>
    %cst_318 = arith.constant 1.000000e+00 : f32
    %691 = vector.broadcast %cst_318 : f32 to vector<16x32xf32>
    %692 = arith.addf %691, %690 : vector<16x32xf32>
    %693 = arith.divf %691, %692 : vector<16x32xf32>
    %694 = arith.mulf %685, %656 : vector<16x32xf32>
    %cst_319 = arith.constant dense<0.000000e+00> : vector<16x32xf32>
    %695 = tpu.matmul %0, %694, %cst_319 {dimension_numbers = #tpu.dot_dimension_numbers<[1], [0], [0], [1], [0, 0, 1, 1], [], []>} : vector<16x16xf32>, vector<16x32xf32>, vector<16x32xf32> -> vector<16x32xf32>
    %cst_320 = arith.constant dense<0.000000e+00> : vector<16x32xf32>
    %696 = tpu.matmul %0, %695, %cst_320 {dimension_numbers = #tpu.dot_dimension_numbers<[1], [0], [0], [1], [0, 0, 1, 1], [], []>} : vector<16x16xf32>, vector<16x32xf32>, vector<16x32xf32> -> vector<16x32xf32>
    %cst_321 = arith.constant 2.000000e+00 : f32
    %697 = vector.broadcast %cst_321 : f32 to vector<16x32xf32>
    %698 = arith.mulf %697, %696 : vector<16x32xf32>
    %699 = arith.subf %698, %694 : vector<16x32xf32>
    %700 = tpu.concatenate %694, %695, %699 in 1 : vector<16x32xf32>, vector<16x32xf32>, vector<16x32xf32> -> vector<16x96xf32>
    %701 = vector.extract_strided_slice %676 {offsets = [0, 64], sizes = [16, 32], strides = [1, 1]} : vector<16x96xf32> to vector<16x32xf32>
    %cst_322 = arith.constant dense<0.000000e+00> : vector<16x32xf32>
    %702 = tpu.matmul %700, %443, %cst_322 {dimension_numbers = #tpu.dot_dimension_numbers<[1], [0], [0], [1], [0, 0, 1, 1], [], []>} : vector<16x96xf32>, vector<96x32xf32>, vector<16x32xf32> -> vector<16x32xf32>
    %703 = arith.addf %701, %702 : vector<16x32xf32>
    %704 = math.tanh %703 : vector<16x32xf32>
    %705 = arith.mulf %693, %656 : vector<16x32xf32>
    %cst_323 = arith.constant 1.000000e+00 : f32
    %706 = vector.broadcast %cst_323 : f32 to vector<16x32xf32>
    %707 = arith.subf %706, %693 : vector<16x32xf32>
    %708 = arith.mulf %707, %704 : vector<16x32xf32>
    %709 = arith.addf %705, %708 : vector<16x32xf32>
    %c0_324 = arith.constant 0 : index
    %c4_325 = arith.constant 4 : index
    %c0_326 = arith.constant 0 : index
    %c0_327 = arith.constant 0 : index
    %710 = vector.load %arg8[%c0_324, %c4_325, %c0_326, %c0_327] : memref<1x8x16x32xf32, #tpu.memory_space<vmem>>, vector<1x1x16x32xf32>
    %711 = vector.shape_cast %710 : vector<1x1x16x32xf32> to vector<16x32xf32>
    %712 = vector.shape_cast %709 : vector<16x32xf32> to vector<1x1x16x32xf32>
    tpu.vector_store %arg8[%c0_324, %c4_325, %c0_326, %c0_327], %712 {strides = array<i32>} : memref<1x8x16x32xf32, #tpu.memory_space<vmem>>, vector<1x1x16x32xf32>,
    %c0_328 = arith.constant 0 : index
    %c5_329 = arith.constant 5 : index
    %c0_330 = arith.constant 0 : index
    %c0_331 = arith.constant 0 : index
    %713 = vector.load %arg10[%c0_328, %c5_329, %c0_330, %c0_331] : memref<2x8x16x32xf32, #tpu.memory_space<vmem>>, vector<1x1x16x32xf32>
    %714 = vector.shape_cast %713 : vector<1x1x16x32xf32> to vector<16x32xf32>
    %cst_332 = arith.constant dense<0.000000e+00> : vector<16x32xf32>
    %715 = tpu.matmul %0, %714, %cst_332 {dimension_numbers = #tpu.dot_dimension_numbers<[1], [0], [0], [1], [0, 0, 1, 1], [], []>} : vector<16x16xf32>, vector<16x32xf32>, vector<16x32xf32> -> vector<16x32xf32>
    %cst_333 = arith.constant dense<0.000000e+00> : vector<16x32xf32>
    %716 = tpu.matmul %0, %715, %cst_333 {dimension_numbers = #tpu.dot_dimension_numbers<[1], [0], [0], [1], [0, 0, 1, 1], [], []>} : vector<16x16xf32>, vector<16x32xf32>, vector<16x32xf32> -> vector<16x32xf32>
    %cst_334 = arith.constant 2.000000e+00 : f32
    %717 = vector.broadcast %cst_334 : f32 to vector<16x32xf32>
    %718 = arith.mulf %717, %716 : vector<16x32xf32>
    %719 = arith.subf %718, %714 : vector<16x32xf32>
    %720 = tpu.concatenate %714, %715, %719 in 1 : vector<16x32xf32>, vector<16x32xf32>, vector<16x32xf32> -> vector<16x96xf32>
    %cst_335 = arith.constant dense<0.000000e+00> : vector<16x32xf32>
    %721 = tpu.matmul %0, %709, %cst_335 {dimension_numbers = #tpu.dot_dimension_numbers<[1], [0], [0], [1], [0, 0, 1, 1], [], []>} : vector<16x16xf32>, vector<16x32xf32>, vector<16x32xf32> -> vector<16x32xf32>
    %cst_336 = arith.constant dense<0.000000e+00> : vector<16x32xf32>
    %722 = tpu.matmul %0, %721, %cst_336 {dimension_numbers = #tpu.dot_dimension_numbers<[1], [0], [0], [1], [0, 0, 1, 1], [], []>} : vector<16x16xf32>, vector<16x32xf32>, vector<16x32xf32> -> vector<16x32xf32>
    %cst_337 = arith.constant 2.000000e+00 : f32
    %723 = vector.broadcast %cst_337 : f32 to vector<16x32xf32>
    %724 = arith.mulf %723, %722 : vector<16x32xf32>
    %725 = arith.subf %724, %709 : vector<16x32xf32>
    %726 = tpu.concatenate %709, %721, %725 in 1 : vector<16x32xf32>, vector<16x32xf32>, vector<16x32xf32> -> vector<16x96xf32>
    %cst_338 = arith.constant dense<0.000000e+00> : vector<16x96xf32>
    %727 = tpu.matmul %720, %439, %cst_338 {dimension_numbers = #tpu.dot_dimension_numbers<[1], [0], [0], [1], [0, 0, 1, 1], [], []>} : vector<16x96xf32>, vector<96x96xf32>, vector<16x96xf32> -> vector<16x96xf32>
    %728 = vector.broadcast %445 : vector<1x96xf32> to vector<16x96xf32>
    %729 = arith.addf %727, %728 : vector<16x96xf32>
    %cst_339 = arith.constant dense<0.000000e+00> : vector<16x64xf32>
    %730 = tpu.matmul %726, %441, %cst_339 {dimension_numbers = #tpu.dot_dimension_numbers<[1], [0], [0], [1], [0, 0, 1, 1], [], []>} : vector<16x96xf32>, vector<96x64xf32>, vector<16x64xf32> -> vector<16x64xf32>
    %731 = vector.extract_strided_slice %729 {offsets = [0, 0], sizes = [16, 32], strides = [1, 1]} : vector<16x96xf32> to vector<16x32xf32>
    %732 = vector.extract_strided_slice %730 {offsets = [0, 0], sizes = [16, 32], strides = [1, 1]} : vector<16x64xf32> to vector<16x32xf32>
    %733 = arith.addf %731, %732 : vector<16x32xf32>
    %734 = arith.negf %733 : vector<16x32xf32>
    %735 = math.exp %734 : vector<16x32xf32>
    %cst_340 = arith.constant 1.000000e+00 : f32
    %736 = vector.broadcast %cst_340 : f32 to vector<16x32xf32>
    %737 = arith.addf %736, %735 : vector<16x32xf32>
    %738 = arith.divf %736, %737 : vector<16x32xf32>
    %739 = vector.extract_strided_slice %729 {offsets = [0, 32], sizes = [16, 32], strides = [1, 1]} : vector<16x96xf32> to vector<16x32xf32>
    %740 = vector.extract_strided_slice %730 {offsets = [0, 32], sizes = [16, 32], strides = [1, 1]} : vector<16x64xf32> to vector<16x32xf32>
    %741 = arith.addf %739, %740 : vector<16x32xf32>
    %742 = arith.negf %741 : vector<16x32xf32>
    %743 = math.exp %742 : vector<16x32xf32>
    %cst_341 = arith.constant 1.000000e+00 : f32
    %744 = vector.broadcast %cst_341 : f32 to vector<16x32xf32>
    %745 = arith.addf %744, %743 : vector<16x32xf32>
    %746 = arith.divf %744, %745 : vector<16x32xf32>
    %747 = arith.mulf %738, %709 : vector<16x32xf32>
    %cst_342 = arith.constant dense<0.000000e+00> : vector<16x32xf32>
    %748 = tpu.matmul %0, %747, %cst_342 {dimension_numbers = #tpu.dot_dimension_numbers<[1], [0], [0], [1], [0, 0, 1, 1], [], []>} : vector<16x16xf32>, vector<16x32xf32>, vector<16x32xf32> -> vector<16x32xf32>
    %cst_343 = arith.constant dense<0.000000e+00> : vector<16x32xf32>
    %749 = tpu.matmul %0, %748, %cst_343 {dimension_numbers = #tpu.dot_dimension_numbers<[1], [0], [0], [1], [0, 0, 1, 1], [], []>} : vector<16x16xf32>, vector<16x32xf32>, vector<16x32xf32> -> vector<16x32xf32>
    %cst_344 = arith.constant 2.000000e+00 : f32
    %750 = vector.broadcast %cst_344 : f32 to vector<16x32xf32>
    %751 = arith.mulf %750, %749 : vector<16x32xf32>
    %752 = arith.subf %751, %747 : vector<16x32xf32>
    %753 = tpu.concatenate %747, %748, %752 in 1 : vector<16x32xf32>, vector<16x32xf32>, vector<16x32xf32> -> vector<16x96xf32>
    %754 = vector.extract_strided_slice %729 {offsets = [0, 64], sizes = [16, 32], strides = [1, 1]} : vector<16x96xf32> to vector<16x32xf32>
    %cst_345 = arith.constant dense<0.000000e+00> : vector<16x32xf32>
    %755 = tpu.matmul %753, %443, %cst_345 {dimension_numbers = #tpu.dot_dimension_numbers<[1], [0], [0], [1], [0, 0, 1, 1], [], []>} : vector<16x96xf32>, vector<96x32xf32>, vector<16x32xf32> -> vector<16x32xf32>
    %756 = arith.addf %754, %755 : vector<16x32xf32>
    %757 = math.tanh %756 : vector<16x32xf32>
    %758 = arith.mulf %746, %709 : vector<16x32xf32>
    %cst_346 = arith.constant 1.000000e+00 : f32
    %759 = vector.broadcast %cst_346 : f32 to vector<16x32xf32>
    %760 = arith.subf %759, %746 : vector<16x32xf32>
    %761 = arith.mulf %760, %757 : vector<16x32xf32>
    %762 = arith.addf %758, %761 : vector<16x32xf32>
    %c0_347 = arith.constant 0 : index
    %c5_348 = arith.constant 5 : index
    %c0_349 = arith.constant 0 : index
    %c0_350 = arith.constant 0 : index
    %763 = vector.load %arg8[%c0_347, %c5_348, %c0_349, %c0_350] : memref<1x8x16x32xf32, #tpu.memory_space<vmem>>, vector<1x1x16x32xf32>
    %764 = vector.shape_cast %763 : vector<1x1x16x32xf32> to vector<16x32xf32>
    %765 = vector.shape_cast %762 : vector<16x32xf32> to vector<1x1x16x32xf32>
    tpu.vector_store %arg8[%c0_347, %c5_348, %c0_349, %c0_350], %765 {strides = array<i32>} : memref<1x8x16x32xf32, #tpu.memory_space<vmem>>, vector<1x1x16x32xf32>,
    %c0_351 = arith.constant 0 : index
    %c6_352 = arith.constant 6 : index
    %c0_353 = arith.constant 0 : index
    %c0_354 = arith.constant 0 : index
    %766 = vector.load %arg10[%c0_351, %c6_352, %c0_353, %c0_354] : memref<2x8x16x32xf32, #tpu.memory_space<vmem>>, vector<1x1x16x32xf32>
    %767 = vector.shape_cast %766 : vector<1x1x16x32xf32> to vector<16x32xf32>
    %cst_355 = arith.constant dense<0.000000e+00> : vector<16x32xf32>
    %768 = tpu.matmul %0, %767, %cst_355 {dimension_numbers = #tpu.dot_dimension_numbers<[1], [0], [0], [1], [0, 0, 1, 1], [], []>} : vector<16x16xf32>, vector<16x32xf32>, vector<16x32xf32> -> vector<16x32xf32>
    %cst_356 = arith.constant dense<0.000000e+00> : vector<16x32xf32>
    %769 = tpu.matmul %0, %768, %cst_356 {dimension_numbers = #tpu.dot_dimension_numbers<[1], [0], [0], [1], [0, 0, 1, 1], [], []>} : vector<16x16xf32>, vector<16x32xf32>, vector<16x32xf32> -> vector<16x32xf32>
    %cst_357 = arith.constant 2.000000e+00 : f32
    %770 = vector.broadcast %cst_357 : f32 to vector<16x32xf32>
    %771 = arith.mulf %770, %769 : vector<16x32xf32>
    %772 = arith.subf %771, %767 : vector<16x32xf32>
    %773 = tpu.concatenate %767, %768, %772 in 1 : vector<16x32xf32>, vector<16x32xf32>, vector<16x32xf32> -> vector<16x96xf32>
    %cst_358 = arith.constant dense<0.000000e+00> : vector<16x32xf32>
    %774 = tpu.matmul %0, %762, %cst_358 {dimension_numbers = #tpu.dot_dimension_numbers<[1], [0], [0], [1], [0, 0, 1, 1], [], []>} : vector<16x16xf32>, vector<16x32xf32>, vector<16x32xf32> -> vector<16x32xf32>
    %cst_359 = arith.constant dense<0.000000e+00> : vector<16x32xf32>
    %775 = tpu.matmul %0, %774, %cst_359 {dimension_numbers = #tpu.dot_dimension_numbers<[1], [0], [0], [1], [0, 0, 1, 1], [], []>} : vector<16x16xf32>, vector<16x32xf32>, vector<16x32xf32> -> vector<16x32xf32>
    %cst_360 = arith.constant 2.000000e+00 : f32
    %776 = vector.broadcast %cst_360 : f32 to vector<16x32xf32>
    %777 = arith.mulf %776, %775 : vector<16x32xf32>
    %778 = arith.subf %777, %762 : vector<16x32xf32>
    %779 = tpu.concatenate %762, %774, %778 in 1 : vector<16x32xf32>, vector<16x32xf32>, vector<16x32xf32> -> vector<16x96xf32>
    %cst_361 = arith.constant dense<0.000000e+00> : vector<16x96xf32>
    %780 = tpu.matmul %773, %439, %cst_361 {dimension_numbers = #tpu.dot_dimension_numbers<[1], [0], [0], [1], [0, 0, 1, 1], [], []>} : vector<16x96xf32>, vector<96x96xf32>, vector<16x96xf32> -> vector<16x96xf32>
    %781 = vector.broadcast %445 : vector<1x96xf32> to vector<16x96xf32>
    %782 = arith.addf %780, %781 : vector<16x96xf32>
    %cst_362 = arith.constant dense<0.000000e+00> : vector<16x64xf32>
    %783 = tpu.matmul %779, %441, %cst_362 {dimension_numbers = #tpu.dot_dimension_numbers<[1], [0], [0], [1], [0, 0, 1, 1], [], []>} : vector<16x96xf32>, vector<96x64xf32>, vector<16x64xf32> -> vector<16x64xf32>
    %784 = vector.extract_strided_slice %782 {offsets = [0, 0], sizes = [16, 32], strides = [1, 1]} : vector<16x96xf32> to vector<16x32xf32>
    %785 = vector.extract_strided_slice %783 {offsets = [0, 0], sizes = [16, 32], strides = [1, 1]} : vector<16x64xf32> to vector<16x32xf32>
    %786 = arith.addf %784, %785 : vector<16x32xf32>
    %787 = arith.negf %786 : vector<16x32xf32>
    %788 = math.exp %787 : vector<16x32xf32>
    %cst_363 = arith.constant 1.000000e+00 : f32
    %789 = vector.broadcast %cst_363 : f32 to vector<16x32xf32>
    %790 = arith.addf %789, %788 : vector<16x32xf32>
    %791 = arith.divf %789, %790 : vector<16x32xf32>
    %792 = vector.extract_strided_slice %782 {offsets = [0, 32], sizes = [16, 32], strides = [1, 1]} : vector<16x96xf32> to vector<16x32xf32>
    %793 = vector.extract_strided_slice %783 {offsets = [0, 32], sizes = [16, 32], strides = [1, 1]} : vector<16x64xf32> to vector<16x32xf32>
    %794 = arith.addf %792, %793 : vector<16x32xf32>
    %795 = arith.negf %794 : vector<16x32xf32>
    %796 = math.exp %795 : vector<16x32xf32>
    %cst_364 = arith.constant 1.000000e+00 : f32
    %797 = vector.broadcast %cst_364 : f32 to vector<16x32xf32>
    %798 = arith.addf %797, %796 : vector<16x32xf32>
    %799 = arith.divf %797, %798 : vector<16x32xf32>
    %800 = arith.mulf %791, %762 : vector<16x32xf32>
    %cst_365 = arith.constant dense<0.000000e+00> : vector<16x32xf32>
    %801 = tpu.matmul %0, %800, %cst_365 {dimension_numbers = #tpu.dot_dimension_numbers<[1], [0], [0], [1], [0, 0, 1, 1], [], []>} : vector<16x16xf32>, vector<16x32xf32>, vector<16x32xf32> -> vector<16x32xf32>
    %cst_366 = arith.constant dense<0.000000e+00> : vector<16x32xf32>
    %802 = tpu.matmul %0, %801, %cst_366 {dimension_numbers = #tpu.dot_dimension_numbers<[1], [0], [0], [1], [0, 0, 1, 1], [], []>} : vector<16x16xf32>, vector<16x32xf32>, vector<16x32xf32> -> vector<16x32xf32>
    %cst_367 = arith.constant 2.000000e+00 : f32
    %803 = vector.broadcast %cst_367 : f32 to vector<16x32xf32>
    %804 = arith.mulf %803, %802 : vector<16x32xf32>
    %805 = arith.subf %804, %800 : vector<16x32xf32>
    %806 = tpu.concatenate %800, %801, %805 in 1 : vector<16x32xf32>, vector<16x32xf32>, vector<16x32xf32> -> vector<16x96xf32>
    %807 = vector.extract_strided_slice %782 {offsets = [0, 64], sizes = [16, 32], strides = [1, 1]} : vector<16x96xf32> to vector<16x32xf32>
    %cst_368 = arith.constant dense<0.000000e+00> : vector<16x32xf32>
    %808 = tpu.matmul %806, %443, %cst_368 {dimension_numbers = #tpu.dot_dimension_numbers<[1], [0], [0], [1], [0, 0, 1, 1], [], []>} : vector<16x96xf32>, vector<96x32xf32>, vector<16x32xf32> -> vector<16x32xf32>
    %809 = arith.addf %807, %808 : vector<16x32xf32>
    %810 = math.tanh %809 : vector<16x32xf32>
    %811 = arith.mulf %799, %762 : vector<16x32xf32>
    %cst_369 = arith.constant 1.000000e+00 : f32
    %812 = vector.broadcast %cst_369 : f32 to vector<16x32xf32>
    %813 = arith.subf %812, %799 : vector<16x32xf32>
    %814 = arith.mulf %813, %810 : vector<16x32xf32>
    %815 = arith.addf %811, %814 : vector<16x32xf32>
    %c0_370 = arith.constant 0 : index
    %c6_371 = arith.constant 6 : index
    %c0_372 = arith.constant 0 : index
    %c0_373 = arith.constant 0 : index
    %816 = vector.load %arg8[%c0_370, %c6_371, %c0_372, %c0_373] : memref<1x8x16x32xf32, #tpu.memory_space<vmem>>, vector<1x1x16x32xf32>
    %817 = vector.shape_cast %816 : vector<1x1x16x32xf32> to vector<16x32xf32>
    %818 = vector.shape_cast %815 : vector<16x32xf32> to vector<1x1x16x32xf32>
    tpu.vector_store %arg8[%c0_370, %c6_371, %c0_372, %c0_373], %818 {strides = array<i32>} : memref<1x8x16x32xf32, #tpu.memory_space<vmem>>, vector<1x1x16x32xf32>,
    %c0_374 = arith.constant 0 : index
    %c7_375 = arith.constant 7 : index
    %c0_376 = arith.constant 0 : index
    %c0_377 = arith.constant 0 : index
    %819 = vector.load %arg10[%c0_374, %c7_375, %c0_376, %c0_377] : memref<2x8x16x32xf32, #tpu.memory_space<vmem>>, vector<1x1x16x32xf32>
    %820 = vector.shape_cast %819 : vector<1x1x16x32xf32> to vector<16x32xf32>
    %cst_378 = arith.constant dense<0.000000e+00> : vector<16x32xf32>
    %821 = tpu.matmul %0, %820, %cst_378 {dimension_numbers = #tpu.dot_dimension_numbers<[1], [0], [0], [1], [0, 0, 1, 1], [], []>} : vector<16x16xf32>, vector<16x32xf32>, vector<16x32xf32> -> vector<16x32xf32>
    %cst_379 = arith.constant dense<0.000000e+00> : vector<16x32xf32>
    %822 = tpu.matmul %0, %821, %cst_379 {dimension_numbers = #tpu.dot_dimension_numbers<[1], [0], [0], [1], [0, 0, 1, 1], [], []>} : vector<16x16xf32>, vector<16x32xf32>, vector<16x32xf32> -> vector<16x32xf32>
    %cst_380 = arith.constant 2.000000e+00 : f32
    %823 = vector.broadcast %cst_380 : f32 to vector<16x32xf32>
    %824 = arith.mulf %823, %822 : vector<16x32xf32>
    %825 = arith.subf %824, %820 : vector<16x32xf32>
    %826 = tpu.concatenate %820, %821, %825 in 1 : vector<16x32xf32>, vector<16x32xf32>, vector<16x32xf32> -> vector<16x96xf32>
    %cst_381 = arith.constant dense<0.000000e+00> : vector<16x32xf32>
    %827 = tpu.matmul %0, %815, %cst_381 {dimension_numbers = #tpu.dot_dimension_numbers<[1], [0], [0], [1], [0, 0, 1, 1], [], []>} : vector<16x16xf32>, vector<16x32xf32>, vector<16x32xf32> -> vector<16x32xf32>
    %cst_382 = arith.constant dense<0.000000e+00> : vector<16x32xf32>
    %828 = tpu.matmul %0, %827, %cst_382 {dimension_numbers = #tpu.dot_dimension_numbers<[1], [0], [0], [1], [0, 0, 1, 1], [], []>} : vector<16x16xf32>, vector<16x32xf32>, vector<16x32xf32> -> vector<16x32xf32>
    %cst_383 = arith.constant 2.000000e+00 : f32
    %829 = vector.broadcast %cst_383 : f32 to vector<16x32xf32>
    %830 = arith.mulf %829, %828 : vector<16x32xf32>
    %831 = arith.subf %830, %815 : vector<16x32xf32>
    %832 = tpu.concatenate %815, %827, %831 in 1 : vector<16x32xf32>, vector<16x32xf32>, vector<16x32xf32> -> vector<16x96xf32>
    %cst_384 = arith.constant dense<0.000000e+00> : vector<16x96xf32>
    %833 = tpu.matmul %826, %439, %cst_384 {dimension_numbers = #tpu.dot_dimension_numbers<[1], [0], [0], [1], [0, 0, 1, 1], [], []>} : vector<16x96xf32>, vector<96x96xf32>, vector<16x96xf32> -> vector<16x96xf32>
    %834 = vector.broadcast %445 : vector<1x96xf32> to vector<16x96xf32>
    %835 = arith.addf %833, %834 : vector<16x96xf32>
    %cst_385 = arith.constant dense<0.000000e+00> : vector<16x64xf32>
    %836 = tpu.matmul %832, %441, %cst_385 {dimension_numbers = #tpu.dot_dimension_numbers<[1], [0], [0], [1], [0, 0, 1, 1], [], []>} : vector<16x96xf32>, vector<96x64xf32>, vector<16x64xf32> -> vector<16x64xf32>
    %837 = vector.extract_strided_slice %835 {offsets = [0, 0], sizes = [16, 32], strides = [1, 1]} : vector<16x96xf32> to vector<16x32xf32>
    %838 = vector.extract_strided_slice %836 {offsets = [0, 0], sizes = [16, 32], strides = [1, 1]} : vector<16x64xf32> to vector<16x32xf32>
    %839 = arith.addf %837, %838 : vector<16x32xf32>
    %840 = arith.negf %839 : vector<16x32xf32>
    %841 = math.exp %840 : vector<16x32xf32>
    %cst_386 = arith.constant 1.000000e+00 : f32
    %842 = vector.broadcast %cst_386 : f32 to vector<16x32xf32>
    %843 = arith.addf %842, %841 : vector<16x32xf32>
    %844 = arith.divf %842, %843 : vector<16x32xf32>
    %845 = vector.extract_strided_slice %835 {offsets = [0, 32], sizes = [16, 32], strides = [1, 1]} : vector<16x96xf32> to vector<16x32xf32>
    %846 = vector.extract_strided_slice %836 {offsets = [0, 32], sizes = [16, 32], strides = [1, 1]} : vector<16x64xf32> to vector<16x32xf32>
    %847 = arith.addf %845, %846 : vector<16x32xf32>
    %848 = arith.negf %847 : vector<16x32xf32>
    %849 = math.exp %848 : vector<16x32xf32>
    %cst_387 = arith.constant 1.000000e+00 : f32
    %850 = vector.broadcast %cst_387 : f32 to vector<16x32xf32>
    %851 = arith.addf %850, %849 : vector<16x32xf32>
    %852 = arith.divf %850, %851 : vector<16x32xf32>
    %853 = arith.mulf %844, %815 : vector<16x32xf32>
    %cst_388 = arith.constant dense<0.000000e+00> : vector<16x32xf32>
    %854 = tpu.matmul %0, %853, %cst_388 {dimension_numbers = #tpu.dot_dimension_numbers<[1], [0], [0], [1], [0, 0, 1, 1], [], []>} : vector<16x16xf32>, vector<16x32xf32>, vector<16x32xf32> -> vector<16x32xf32>
    %cst_389 = arith.constant dense<0.000000e+00> : vector<16x32xf32>
    %855 = tpu.matmul %0, %854, %cst_389 {dimension_numbers = #tpu.dot_dimension_numbers<[1], [0], [0], [1], [0, 0, 1, 1], [], []>} : vector<16x16xf32>, vector<16x32xf32>, vector<16x32xf32> -> vector<16x32xf32>
    %cst_390 = arith.constant 2.000000e+00 : f32
    %856 = vector.broadcast %cst_390 : f32 to vector<16x32xf32>
    %857 = arith.mulf %856, %855 : vector<16x32xf32>
    %858 = arith.subf %857, %853 : vector<16x32xf32>
    %859 = tpu.concatenate %853, %854, %858 in 1 : vector<16x32xf32>, vector<16x32xf32>, vector<16x32xf32> -> vector<16x96xf32>
    %860 = vector.extract_strided_slice %835 {offsets = [0, 64], sizes = [16, 32], strides = [1, 1]} : vector<16x96xf32> to vector<16x32xf32>
    %cst_391 = arith.constant dense<0.000000e+00> : vector<16x32xf32>
    %861 = tpu.matmul %859, %443, %cst_391 {dimension_numbers = #tpu.dot_dimension_numbers<[1], [0], [0], [1], [0, 0, 1, 1], [], []>} : vector<16x96xf32>, vector<96x32xf32>, vector<16x32xf32> -> vector<16x32xf32>
    %862 = arith.addf %860, %861 : vector<16x32xf32>
    %863 = math.tanh %862 : vector<16x32xf32>
    %864 = arith.mulf %852, %815 : vector<16x32xf32>
    %cst_392 = arith.constant 1.000000e+00 : f32
    %865 = vector.broadcast %cst_392 : f32 to vector<16x32xf32>
    %866 = arith.subf %865, %852 : vector<16x32xf32>
    %867 = arith.mulf %866, %863 : vector<16x32xf32>
    %868 = arith.addf %864, %867 : vector<16x32xf32>
    %c0_393 = arith.constant 0 : index
    %c7_394 = arith.constant 7 : index
    %c0_395 = arith.constant 0 : index
    %c0_396 = arith.constant 0 : index
    %869 = vector.load %arg8[%c0_393, %c7_394, %c0_395, %c0_396] : memref<1x8x16x32xf32, #tpu.memory_space<vmem>>, vector<1x1x16x32xf32>
    %870 = vector.shape_cast %869 : vector<1x1x16x32xf32> to vector<16x32xf32>
    %871 = vector.shape_cast %868 : vector<16x32xf32> to vector<1x1x16x32xf32>
    tpu.vector_store %arg8[%c0_393, %c7_394, %c0_395, %c0_396], %871 {strides = array<i32>} : memref<1x8x16x32xf32, #tpu.memory_space<vmem>>, vector<1x1x16x32xf32>,
    %c0_397 = arith.constant 0 : index
    %c1_398 = arith.constant 1 : index
    %c0_399 = arith.constant 0 : index
    %c0_400 = arith.constant 0 : index
    %872 = vector.load %arg9[%c0_397, %c1_398, %c0_399, %c0_400] : memref<1x2x16x32xf32, #tpu.memory_space<vmem>>, vector<1x1x16x32xf32>
    %873 = vector.shape_cast %872 : vector<1x1x16x32xf32> to vector<16x32xf32>
    %874 = vector.shape_cast %868 : vector<16x32xf32> to vector<1x1x16x32xf32>
    tpu.vector_store %arg9[%c0_397, %c1_398, %c0_399, %c0_400], %874 {strides = array<i32>} : memref<1x2x16x32xf32, #tpu.memory_space<vmem>>, vector<1x1x16x32xf32>,
    return
  }
  func.func @transform_0(%arg0: i32) -> (i32, i32, i32, i32) {
    %c0_i32 = arith.constant 0 : i32
    %c0_i32_0 = arith.constant 0 : i32
    %c0_i32_1 = arith.constant 0 : i32
    %c0_i32_2 = arith.constant 0 : i32
    return %arg0, %c0_i32, %c0_i32_0, %c0_i32_1 : i32, i32, i32, i32
  }
  func.func @transform_1(%arg0: i32) -> (i32, i32, i32, i32) {
    %c0_i32 = arith.constant 0 : i32
    %c0_i32_0 = arith.constant 0 : i32
    %c0_i32_1 = arith.constant 0 : i32
    %c0_i32_2 = arith.constant 0 : i32
    return %arg0, %c0_i32, %c0_i32_0, %c0_i32_1 : i32, i32, i32, i32
  }
  func.func @transform_2(%arg0: i32) -> (i32, i32) {
    %c0_i32 = arith.constant 0 : i32
    %c0_i32_0 = arith.constant 0 : i32
    %c0_i32_1 = arith.constant 0 : i32
    return %c0_i32, %c0_i32_0 : i32, i32
  }
  func.func @transform_3(%arg0: i32) -> (i32, i32, i32) {
    %c0_i32 = arith.constant 0 : i32
    %c0_i32_0 = arith.constant 0 : i32
    %c0_i32_1 = arith.constant 0 : i32
    %c0_i32_2 = arith.constant 0 : i32
    return %c0_i32, %c0_i32_0, %c0_i32_1 : i32, i32, i32
  }
  func.func @transform_4(%arg0: i32) -> (i32, i32, i32) {
    %c0_i32 = arith.constant 0 : i32
    %c0_i32_0 = arith.constant 0 : i32
    %c0_i32_1 = arith.constant 0 : i32
    %c0_i32_2 = arith.constant 0 : i32
    return %c0_i32, %c0_i32_0, %c0_i32_1 : i32, i32, i32
  }
  func.func @transform_5(%arg0: i32) -> (i32, i32, i32) {
    %c0_i32 = arith.constant 0 : i32
    %c0_i32_0 = arith.constant 0 : i32
    %c0_i32_1 = arith.constant 0 : i32
    %c0_i32_2 = arith.constant 0 : i32
    return %c0_i32, %c0_i32_0, %c0_i32_1 : i32, i32, i32
  }
  func.func @transform_6(%arg0: i32) -> (i32, i32, i32) {
    %c0_i32 = arith.constant 0 : i32
    %c0_i32_0 = arith.constant 0 : i32
    %c0_i32_1 = arith.constant 0 : i32
    %c0_i32_2 = arith.constant 0 : i32
    return %c0_i32, %c0_i32_0, %c0_i32_1 : i32, i32, i32
  }
  func.func @transform_7(%arg0: i32) -> (i32, i32, i32, i32) {
    %c0_i32 = arith.constant 0 : i32
    %c0_i32_0 = arith.constant 0 : i32
    %c0_i32_1 = arith.constant 0 : i32
    %c0_i32_2 = arith.constant 0 : i32
    return %arg0, %c0_i32, %c0_i32_0, %c0_i32_1 : i32, i32, i32, i32
  }
  func.func @transform_8(%arg0: i32) -> (i32, i32, i32, i32) {
    %c0_i32 = arith.constant 0 : i32
    %c0_i32_0 = arith.constant 0 : i32
    %c0_i32_1 = arith.constant 0 : i32
    %c0_i32_2 = arith.constant 0 : i32
    return %arg0, %c0_i32, %c0_i32_0, %c0_i32_1 : i32, i32, i32, i32
  }
}

</mosaic_0001>

<bundles_post_ra>
// kernel: tpu_custom_call.1
= control target key start
LH: loop header
LB: loop body
LE: loop exit
PB: predicated region body
PF: predicated region fallthrough
CT: control target
= control target key end

     0   :  { %s22272_s0 = inlined_call_operand.vmem [shape: f32[2,8,16,32], index: 0, kind: input, shape index: {}]   ;;  %s22273_s1 = inlined_call_operand.vmem [shape: f32[2,2,16,32], index: 1, kind: input, shape index: {}]   ;;  %s22274_s2 = inlined_call_operand.hbm [shape: f32[16,16], index: 2, kind: input, shape index: {}]   ;;  %s22275_s3 = inlined_call_operand.vmem [shape: f32[2,96,96], index: 3, kind: input, shape index: {}]   ;;  %s22276_s4 = inlined_call_operand.vmem [shape: f32[2,96,64], index: 4, kind: input, shape index: {}]   ;;  %s22277_s5 = inlined_call_operand.vmem [shape: f32[2,96,32], index: 5, kind: input, shape index: {}]   ;;  %s22278_s6 = inlined_call_operand.vmem [shape: f32[2,1,96], index: 6, kind: input, shape index: {}]   ;;  %s22279_s7 = inlined_call_operand.hbm [shape: f32[2,8,16,32], index: 7, kind: output, shape index: {0}]   ;;  %s22280_s8 = inlined_call_operand.hbm [shape: f32[2,2,16,32], index: 8, kind: output, shape index: {1}]  }
   0x1   :  { %22287 = sst [smem:[#allocation16_spill]] %s22272_s0 }
   0x2   :  { %14 = vsyncpa [#allocation4], 0 }
   0x3   :  { %15 = vsyncpa [#allocation5], 0 }
   0x4   :  { %17 = vsyncpa [#allocation5 + $0x1], 0 }
   0x5   :  { %18 = vsyncpa [#allocation8], 0 }
   0x6   :  { %20 = vsyncpa [#allocation8 + $0x1], 0  ;;  %s17818_s27 = smov 0   ;;  %s17820_s28 = smov 0  }
   0x7   :  { %s17822_s29 = smov 0   ;;  %s17824_s30 = smov 0  }
   0x8 LB: > { %s17839_s9 = sadd.s32 4294967295, %s17761_s30   ;;  %s13788_s10 = sadd.s32 4294967294, %s17761_s30   ;;  %s17761_s30 = sphi %s17824_s30, %s22304_s30   ;;  %s17757_s29 = sphi %s17822_s29, %s22303_s29   ;;  %s17753_s28 = sphi %s17820_s28, %s22302_s28   ;;  %s17749_s27 = sphi %s17818_s27, %s22301_s27  }
   0x9   : > { %s17843_s11 = sadd.s32 1, %s17761_s30   ;;  %s190_s12 = sadd.s32 1, %s17757_s29 }
   0xa   : > { %s187_s13 = ssub.s32 %s17761_s30, %s17843_s11  ;;  %p200_p0 = scmp.ne.s32.totalorder %s17757_s29, %s17753_s28 }
   0xb   : > { %p188_p1 = scmp.eq.s32.totalorder %s187_s13, 0  ;;  %p201_p2 = scmp.eq.s32.totalorder %s17839_s9, 1 }
   0xc   : > { %p206_p3 = scmp.ne.s32.totalorder %s17753_s28, %s17749_s27  ;;  %p207_p4 = scmp.eq.s32.totalorder %s13788_s10, 1 }
   0xd   : > { %s17854_s14 = scalar_select %p188_p1, %s17757_s29, %s190_s12  }
   0xe   : > { %p17856_p5 = por %p201_p2, %p200_p0  ;;  %p17860_p6 = por %p207_p4, %p206_p3 }
   0xf   : > { %p13789_p7 = scmp.ge.s32.totalorder %s17761_s30, 1  ;;  %p240_p8 = scmp.lt.s32.totalorder %s17761_s30, 3 }
  0x10   : > { %s22289_s16 = scalar_select %p17860_p6, 1, 0 }
  0x11   : > { %p17246_p9 = scmp.eq.s32.totalorder %s17839_s9, 0  ;;  %p17867_p10 = pnand %p13789_p7, %p240_p8 }
  0x12   : > { %s17763_s18 = smov [#allocation3]  }
  0x13   : > { %s252_s19 = sshll.u32 %s17763_s18, 4  ;;  %p17235_p11 = pneg %p17867_p10  ;;  %s253_s19 = int_to_ptr.vmem [resolvable:$true] %s252_s19 }
  0x14   : > { %s17652_s20 = scalar_lea.vmem %s253_s19, 256  ;;  %p17660_p3 = scmp.lt.s32.totalorder %s253_s19, %s253_s19 }
  0x15   : > { %p17236_p12 = pnand %p17246_p9, %p17235_p11  ;;  %p17653_p0 = scmp.ne.s32.totalorder %s253_s19, %s17652_s20 }
  0x16   : > { %p17661_p4 = scmp.lt.s32.totalorder %s17652_s20, %s17652_s20 }
  0x17   : > { %p17643_p13 = pneg %p17236_p12 }
  0x18   : > { %p17662_p6 = por %p17661_p4, %p17660_p3 }
  0x19   : > { %p17655_p1 = pnand %p17653_p0, %p17643_p13 }
  0x1b   : > { %p17656_p2 = pneg %p17655_p1 }
  0x1d   : > { %p17663_p7 = pnand %p17662_p6, %p17656_p2 }
  0x1f   : > { %17666 = shalt.err (!%p17663_p7)
}
  0x20   : > { %s17764_s21 = smov 128   ;;  %s17765_s22 = smov 8  }
  0x21   : > { %17238 = dma.hbm_to_vmem [thread:$0]  (!%p17236_p12), %s22274_s2, 256, %s253_s19, [#allocation4], %s17764_s21, %s17764_s21, %s17765_s22  }
  0x22   : > { %296 = sbr.rel (%p17867_p10) target bundleno = 28756 (0x7054), region = 48 }
  0x27   : > { %17736 = dma.done.wait (%p17246_p9), [#allocation4], 256  }
  0x28   : > { %17738 = vsyncadd (%p17246_p9), [#allocation4], 4294967040  ;;  %p340_p8 = scmp.lt.s32.totalorder %s17839_s9, 1  ;;  %s22291_s0 = sld [smem:[#allocation16_spill]]  ;;  %vm393_vm0 = vcmask 130048   ;;  %v17897_v2 = vld [vmem:[#allocation3] sm:$0xff] }
  0x29   : > { %15263 = vmatprep.mubr.msk.f32.mxu1 %vm393_vm0, %v17897_v2  ;;  %v17903_v3 = vld [vmem:[#allocation3 + $0x8] sm:$0xff]  ;;  %s17766_s21 = smov 32   ;;  %v17939_v8 = vld [vmem:[%s22275_s3 + $0x58] sm:$0xff]  ;;  %v17944_v9 = vld [vmem:[%s22275_s3 + $0x50] sm:$0xff]  ;;  %vm570_vm1 = vcmask 261120   ;;  %vm573_vm2 = vcmask 523264  }
  0x2a   : > { %s341_s25 = scalar_select %p340_p8, %s17839_s9, 1  ;;  %15287 = vmatprep.subr.mxu0 %v17939_v8  ;;  %v17951_v10 = vld [vmem:[%s22275_s3 + $0x48] sm:$0xff]  ;;  %v17958_v11 = vld [vmem:[%s22275_s3 + $0x40] sm:$0xff]  ;;  %v17965_v12 = vld [vmem:[%s22275_s3 + $0x38] sm:$0xff]  ;;  %vm756_vm3 = vcmask 785408  }
  0x2b   : > { %15288 = vmatpush3.msra.mxu0 %v17939_v8  ;;  %v17972_v13 = vld [vmem:[%s22275_s3 + $0x30] sm:$0xff]  ;;  %v17979_v14 = vld [vmem:[%s22275_s3 + $0x28] sm:$0xff]  ;;  %v17988_v15 = vld [vmem:[%s22275_s3 + $0x20] sm:$0xff]  ;;  %s17768_s22 = smov 96   ;;  %s20446_s18 = sand.u32 1, %s17753_s28  }
  0x2c   : > { %s14199_s26 = sshll.u32 %s341_s25, 7  ;;  %s14200_s17 = sshll.u32 %s341_s25, 5  ;;  %15289 = vmatprep.subr.mxu0 %v17944_v9  ;;  %v17995_v16 = vld [vmem:[%s22275_s3 + $0x18] sm:$0xff]  ;;  %v18002_v17 = vld [vmem:[%s22275_s3 + $0x10] sm:$0xff]  ;;  %v18007_v18 = vld [vmem:[%s22275_s3 + $0x8] sm:$0xff] }
  0x2d   : > { %s17914_s20 = scalar_lea.vmem %s22273_s1, %s14200_s17  ;;  %15290 = vmatpush3.msra.mxu0 %v17944_v9  ;;  %v18015_v19 = vld [vmem:[%s22275_s3] sm:$0xff]  ;;  %v18031_v28 = vld [vmem:[%s22276_s4 + $0x58] sm:$0xff]  ;;  %v18036_v29 = vld [vmem:[%s22276_s4 + $0x50] sm:$0xff]  ;;  %s13794_s19 = sshll.u32 %s20446_s18, 7 }
  0x2e   : > { %s17889_s13 = scalar_lea.vmem %s22291_s0, %s14199_s26  ;;  %v17918_v6 = vld [vmem:[%s17914_s20 + $0x8] sm:$0xff]  ;;  %v17924_v7 = vld [vmem:[%s17914_s20] sm:$0xff]  ;;  %15291 = vmatprep.subr.mxu0 %v17951_v10  ;;  %s17767_s26 = smov 64   ;;  %v18057_v32 = vld [vmem:[%s22276_s4 + $0x38] sm:$0xff] }
  0x2f   : > { %v17892_v0 = vld [vmem:[%s17889_s13 + $0x8] sm:$0xff]  ;;  %v17895_v1 = vld [vmem:[%s17889_s13] sm:$0xff]  ;;  %15292 = vmatpush3.msra.mxu0 %v17951_v10  ;;  %v18064_v33 = vld [vmem:[%s22276_s4 + $0x30] sm:$0xff]  ;;  %s20452_s23 = scalar_lea.vmem [#allocation6], %s13794_s19  ;;  %s14202_s19 = sshll.u32 %s17839_s9, 9 }
  0x30   : > { %15259 = vmatprep.subr.mxu1 %v17892_v0  ;;  %15293 = vmatprep.subr.mxu0 %v17958_v11  ;;  %v18043_v30 = vld [vmem:[%s22276_s4 + $0x48] sm:$0xff]  ;;  %v18050_v31 = vld [vmem:[%s22276_s4 + $0x40] sm:$0xff]  ;;  %v18085_v36 = vld [vmem:[%s22276_s4 + $0x18] sm:$0xff]  ;;  %s13654_s17 = sshll.u32 %s20452_s23, 4  ;;  %s17769_s24 = smov [#allocation6]   ;;  %s22190_s17 = int_to_ptr.vmem [resolvable:$true] %s13654_s17 }
  0x31   : > { %15260 = vmatpush3.msra.mxu1 %v17892_v0  ;;  %15294 = vmatpush3.msra.mxu0 %v17958_v11  ;;  %v18071_v34 = vld [vmem:[%s22276_s4 + $0x28] sm:$0xff]  ;;  %v18078_v35 = vld [vmem:[%s22276_s4 + $0x20] sm:$0xff]  ;;  %v18092_v37 = vld [vmem:[%s22276_s4 + $0x10] sm:$0xff]  ;;  %s17671_s25 = sshll.u32 %s17769_s24, 4  ;;  %s17672_s25 = int_to_ptr.vmem [resolvable:$false] %s17671_s25 }
  0x32   : > { %15261 = vmatprep.subr.mxu1 %v17895_v1  ;;  %15295 = vmatprep.subr.mxu0 %v17965_v12  ;;  %v18109_v47 = vld [vmem:[%s22276_s4 + $0x8] sm:$0xff]  ;;  %v18116_v48 = vld [vmem:[%s22276_s4] sm:$0xff]  ;;  %s17673_s0 = scalar_lea.vmem %s17672_s25, 4096  ;;  %p17674_p11 = scmp.lt.s32.totalorder %s22190_s17, %s17672_s25 }
  0x33   : > { %15262 = vmatpush3.msra.mxu1 %v17895_v1  ;;  %15296 = vmatpush3.msra.mxu0 %v17965_v12  ;;  %v18137_v63 = vld [vmem:[%s22278_s6] ss:$0 sm:$0xff] }
  0x34   : > { %15264 = vmatmul.mubr.msk.f32.vlgmr.msra.gmra.mxu1 %vm393_vm0, %v17903_v3  ;;  %15297 = vmatprep.subr.mxu0 %v17972_v13 }
  0x35   : > { %15270 = vmatprep.mubr.msk.f32.mxu1 %vm393_vm0, %v17897_v2  ;;  %15298 = vmatpush3.msra.mxu0 %v17972_v13 }
  0x36   : > { %15299 = vmatprep.subr.mxu0 %v17979_v14 }
  0x37   : > { %15300 = vmatpush3.msra.mxu0 %v17979_v14 }
  0x38   : > { %15301 = vmatprep.subr.mxu0 %v17988_v15 }
  0x39   : > { %15302 = vmatpush3.msra.mxu0 %v17988_v15 }
  0x3a   : > { %15303 = vmatprep.subr.mxu0 %v17995_v16 }
  0x3b   : > { %15304 = vmatpush3.msra.mxu0 %v17995_v16 }
  0x3c   : > { %15305 = vmatprep.subr.mxu0 %v18002_v17 }
  0x3d   : > { %15306 = vmatpush3.msra.mxu0 %v18002_v17 }
  0x3e   : > { %15307 = vmatprep.subr.mxu0 %v18007_v18 }
  0x3f   : > { %15308 = vmatpush3.msra.mxu0 %v18007_v18 }
  0x40   : > { %15309 = vmatprep.subr.mxu0 %v18015_v19 }
  0x41   : > { %15310 = vmatpush3.msra.mxu0 %v18015_v19 }
  0xf4   : > { %v15265_v4 = vpop.f32.mrf.mxu1 }
  0xf5   : > { %558 = vrot.lane.b32.xlu0 %v15265_v4, %s17766_s21  ;;  %15266 = vmatprep.subr.mxu1 %v15265_v4 }
  0xf6   : > { %v466_v5 = vpop.f32.mrf.mxu1  ;;  %15267 = vmatpush3.msra.mxu1 %v15265_v4 }
  0xf7   : > { %15268 = vmatprep.subr.mxu1 %v466_v5 }
  0xf8   : > { %15269 = vmatpush3.msra.mxu1 %v466_v5 }
  0xf9   : > { %556 = vrot.lane.b32.xlu0 %v466_v5, %s17766_s21  ;;  %15271 = vmatmul.mubr.msk.f32.vlgmr.msra.gmra.mxu1 %vm393_vm0, %v17903_v3 }
  0xfa   : > { %15273 = vmatprep.subr.mxu1 %v17918_v6  ;;  %15277 = vmatprep.mubr.msk.f32.mxu1 %vm393_vm0, %v17897_v2 }
  0xfb   : > { %15274 = vmatpush3.msra.mxu1 %v17918_v6 }
  0xfc   : > { %15275 = vmatprep.subr.mxu1 %v17924_v7 }
  0xfd   : > { %15276 = vmatpush3.msra.mxu1 %v17924_v7 }
  0xfe   : > { %15278 = vmatmul.mubr.msk.f32.vlgmr.msra.gmra.mxu1 %vm393_vm0, %v17903_v3 }
  0xff   : > { %15284 = vmatprep.mubr.msk.f32.mxu1 %vm393_vm0, %v17897_v2 }
 0x167   : > { %v559_v38 = vpop.permute.xlu0 %558 }
 0x168   : > { %v572_v44 = vsel %vm570_vm1, %v17892_v0, %v559_v38 }
 0x16b   : > { %v557_v41 = vpop.permute.xlu0 %556 }
 0x16c   : > { %v571_v42 = vsel %vm570_vm1, %v17895_v1, %v557_v41 }
 0x1b9   : > { %v15272_v20 = vpop.f32.mrf.mxu1 }
 0x1ba   : > { %v551_v21 = vmul.f32 2.0, %v15272_v20 }
 0x1bb   : > { %v541_v22 = vpop.f32.mrf.mxu1 }
 0x1bc   : > { %v553_v23 = vsub.f32 %v551_v21, %v17892_v0  ;;  %v550_v25 = vmul.f32 2.0, %v541_v22 }
 0x1be   : > { %v15279_v24 = vpop.f32.mrf.mxu1  ;;  %566 = vrot.lane.b32.xlu1 %v553_v23, %s17767_s26  ;;  %v552_v27 = vsub.f32 %v550_v25, %v17895_v1 }
 0x1bf   : > { %15280 = vmatprep.subr.mxu1 %v15279_v24 }
 0x1c0   : > { %v642_v26 = vpop.f32.mrf.mxu1  ;;  %15281 = vmatpush3.msra.mxu1 %v15279_v24 }
 0x1c1   : > { %732 = vrot.lane.b32.xlu0 %v642_v26, %s17766_s21  ;;  %15282 = vmatprep.subr.mxu1 %v642_v26 }
 0x1c2   : > { %15283 = vmatpush3.msra.mxu1 %v642_v26  ;;  %734 = vrot.lane.b32.xlu1 %v15279_v24, %s17766_s21 }
 0x1c3   : > { %15285 = vmatmul.mubr.msk.f32.vlgmr.msra.gmra.mxu1 %vm393_vm0, %v17903_v3  ;;  %15314 = vmatprep.subr.mxu1 %v18031_v28 }
 0x1c4   : > { %15315 = vmatpush3.msra.mxu1 %v18031_v28 }
 0x1c5   : > { %15316 = vmatprep.subr.mxu1 %v18036_v29 }
 0x1c6   : > { %564 = vrot.lane.b32.xlu1 %v552_v27, %s17767_s26  ;;  %15317 = vmatpush3.msra.mxu1 %v18036_v29 }
 0x1c7   : > { %15318 = vmatprep.subr.mxu1 %v18043_v30 }
 0x1c8   : > { %15319 = vmatpush3.msra.mxu1 %v18043_v30 }
 0x1c9   : > { %15320 = vmatprep.subr.mxu1 %v18050_v31 }
 0x1ca   : > { %15321 = vmatpush3.msra.mxu1 %v18050_v31 }
 0x1cb   : > { %15322 = vmatprep.subr.mxu1 %v18057_v32 }
 0x1cc   : > { %15323 = vmatpush3.msra.mxu1 %v18057_v32 }
 0x1cd   : > { %15324 = vmatprep.subr.mxu1 %v18064_v33 }
 0x1ce   : > { %15325 = vmatpush3.msra.mxu1 %v18064_v33 }
 0x1cf   : > { %15326 = vmatprep.subr.mxu1 %v18071_v34 }
 0x1d0   : > { %15327 = vmatpush3.msra.mxu1 %v18071_v34 }
 0x1d1   : > { %15328 = vmatprep.subr.mxu1 %v18078_v35 }
 0x1d2   : > { %15329 = vmatpush3.msra.mxu1 %v18078_v35 }
 0x1d3   : > { %15330 = vmatprep.subr.mxu1 %v18085_v36 }
 0x1d4   : > { %15331 = vmatpush3.msra.mxu1 %v18085_v36 }
 0x1d5   : > { %15332 = vmatprep.subr.mxu1 %v18092_v37 }
 0x1d6   : > { %15333 = vmatpush3.msra.mxu1 %v18092_v37 }
 0x1d7   : > { %15334 = vmatprep.subr.mxu1 %v18109_v47 }
 0x1d8   : > { %15335 = vmatpush3.msra.mxu1 %v18109_v47 }
 0x1d9   : > { %15336 = vmatprep.subr.mxu1 %v18116_v48 }
 0x1da   : > { %15337 = vmatpush3.msra.mxu1 %v18116_v48 }
 0x230   : > { %v567_v39 = vpop.permute.xlu1 %566 }
 0x231   : > { %v575_v46 = vsel %vm573_vm2, %v572_v44, %v567_v39 }
 0x233   : > { %v733_v55 = vpop.permute.xlu0 %732 }
 0x234   : > { %v735_v40 = vpop.permute.xlu1 %734  ;;  %v746_v57 = vsel %vm570_vm1, %v17924_v7, %v733_v55  ;;  %v18230_v55 = vld [vmem:[%s22277_s5 + $0x18] sm:$0xff] }
 0x235   : > { %v747_v59 = vsel %vm570_vm1, %v17918_v6, %v735_v40 }
 0x238   : > { %v565_v43 = vpop.permute.xlu1 %564 }
 0x239   : > { %v574_v45 = vsel %vm573_vm2, %v571_v42, %v565_v43 }
 0x23a   : > { %15311 = vmatprep.mubr.msk.f32.mxu0 %vm756_vm3, %v574_v45  ;;  %v18176_v45 = vld [vmem:[%s22277_s5 + $0x58] sm:$0xff] }
 0x23b   : > { %15312 = vmatmul.mubr.msk.f32.vlgmr.msra.gmra.mxu0 %vm756_vm3, %v575_v46  ;;  %v18181_v46 = vld [vmem:[%s22277_s5 + $0x50] sm:$0xff]  ;;  %15355 = vmatprep.subr.mxu0 %v18176_v45 }
 0x23c   : > { %15356 = vmatpush3.msra.mxu0 %v18176_v45 }
 0x23d   : > { %15357 = vmatprep.subr.mxu0 %v18181_v46 }
 0x23e   : > { %15358 = vmatpush3.msra.mxu0 %v18181_v46 }
 0x283   : > { %v15286_v49 = vpop.f32.mrf.mxu1 }
 0x284   : > { %v727_v50 = vmul.f32 2.0, %v15286_v49  ;;  %v18188_v49 = vld [vmem:[%s22277_s5 + $0x48] sm:$0xff] }
 0x285   : > { %v717_v51 = vpop.f32.mrf.mxu1  ;;  %15359 = vmatprep.subr.mxu0 %v18188_v49 }
 0x286   : > { %v729_v52 = vsub.f32 %v727_v50, %v17918_v6  ;;  %v726_v53 = vmul.f32 2.0, %v717_v51  ;;  %v18195_v50 = vld [vmem:[%s22277_s5 + $0x40] sm:$0xff]  ;;  %15360 = vmatpush3.msra.mxu0 %v18188_v49  ;;  %v18202_v51 = vld [vmem:[%s22277_s5 + $0x38] sm:$0xff] }
 0x287   : > { %15361 = vmatprep.subr.mxu0 %v18195_v50 }
 0x288   : > { %v728_v54 = vsub.f32 %v726_v53, %v17924_v7  ;;  %742 = vrot.lane.b32.xlu1 %v729_v52, %s17767_s26  ;;  %15362 = vmatpush3.msra.mxu0 %v18195_v50  ;;  %v18209_v52 = vld [vmem:[%s22277_s5 + $0x30] sm:$0xff]  ;;  %v18216_v53 = vld [vmem:[%s22277_s5 + $0x28] sm:$0xff] }
 0x289   : > { %15363 = vmatprep.subr.mxu0 %v18202_v51 }
 0x28a   : > { %740 = vrot.lane.b32.xlu0 %v728_v54, %s17767_s26  ;;  %15364 = vmatpush3.msra.mxu0 %v18202_v51  ;;  %v18223_v54 = vld [vmem:[%s22277_s5 + $0x20] sm:$0xff] }
 0x28b   : > { %15365 = vmatprep.subr.mxu0 %v18209_v52 }
 0x28c   : > { %15366 = vmatpush3.msra.mxu0 %v18209_v52 }
 0x28d   : > { %15367 = vmatprep.subr.mxu0 %v18216_v53 }
 0x28e   : > { %15368 = vmatpush3.msra.mxu0 %v18216_v53 }
 0x28f   : > { %15369 = vmatprep.subr.mxu0 %v18223_v54 }
 0x290   : > { %15370 = vmatpush3.msra.mxu0 %v18223_v54 }
 0x291   : > { %15371 = vmatprep.subr.mxu0 %v18230_v55 }
 0x292   : > { %15372 = vmatpush3.msra.mxu0 %v18230_v55 }
 0x2fa   : > { %v743_v56 = vpop.permute.xlu1 %742 }
 0x2fb   : > { %v749_v61 = vsel %vm573_vm2, %v747_v59, %v743_v56  ;;  %v15313_v62 = vpop.f32.mrf.mxu0  ;;  %v18237_v56 = vld [vmem:[%s22277_s5 + $0x10] sm:$0xff]  ;;  %v18258_v59 = vld [vmem:[%s17889_s13 + $0x18] sm:$0xff] }
 0x2fc   : > { %v741_v58 = vpop.permute.xlu0 %740  ;;  %v18140_v1 = vadd.f32 %v15313_v62, %v18137_v63  ;;  %15373 = vmatprep.subr.mxu0 %v18237_v56 }
 0x2fd   : > { %v748_v60 = vsel %vm573_vm2, %v746_v57, %v741_v58  ;;  %v829_v0 = vpop.f32.mrf.mxu0  ;;  %15374 = vmatpush3.msra.mxu0 %v18237_v56  ;;  %v18246_v57 = vld [vmem:[%s22277_s5 + $0x8] sm:$0xff]  ;;  %v18253_v58 = vld [vmem:[%s22277_s5] sm:$0xff] }
 0x2fe   : > { %15338 = vmatprep.mubr.msk.f32.mxu1 %vm756_vm3, %v748_v60  ;;  %v18143_v5 = vadd.f32 %v18137_v63, %v829_v0  ;;  %15375 = vmatprep.subr.mxu0 %v18246_v57  ;;  %v18261_v60 = vld [vmem:[%s17889_s13 + $0x10] sm:$0xff] }
 0x2ff   : > { %15339 = vmatmul.mubr.msk.f32.vlgmr.msra.gmra.mxu1 %vm756_vm3, %v749_v61  ;;  %15376 = vmatpush3.msra.mxu0 %v18246_v57 }
 0x300   : > { %15345 = vmatprep.mubr.msk.f32.mxu1 %vm393_vm0, %v17897_v2  ;;  %15377 = vmatprep.subr.mxu0 %v18253_v58 }
 0x301   : > { %15378 = vmatpush3.msra.mxu0 %v18253_v58 }
 0x302   : > { %15437 = vmatprep.subr.mxu0 %v18031_v28 }
 0x3bf   : > { %v15340_v4 = vpop.f32.mrf.mxu1 }
 0x3c0   : > { %v920_v20 = vadd.f32 %v15340_v4, %v18140_v1 }
 0x3c1   : > { %v910_v21 = vpop.f32.mrf.mxu1 }
 0x3c2   : > { %v13814_v22 = vmul.f32 -1.442695, %v920_v20  ;;  %v919_v23 = vadd.f32 %v910_v21, %v18143_v5 }
 0x3c4   : > { %17289 = vpow2.f32 %v13814_v22  ;;  %v13813_v24 = vmul.f32 -1.442695, %v919_v23 }
 0x3c6   : > { %17291 = vpow2.f32 %v13813_v24 }
 0x3d1   : > { %v17290_v25 = vpop.eup %17289 }
 0x3d2   : > { %v928_v26 = vadd.f32 1.0, %v17290_v25 }
 0x3d3   : > { %v17292_v27 = vpop.eup %17291 }
 0x3d4   : > { %17293 = vrcp.f32 %v928_v26  ;;  %v927_v38 = vadd.f32 1.0, %v17292_v27 }
 0x3d6   : > { %17295 = vrcp.f32 %v927_v38 }
 0x3e1   : > { %v18147_v39 = vpop.eup %17293 }
 0x3e2   : > { %v18151_v40 = vmul.f32 %v18147_v39, %v17918_v6 }
 0x3e3   : > { %v18153_v41 = vpop.eup %17295 }
 0x3e4   : > { %15341 = vmatprep.subr.mxu1 %v18151_v40  ;;  %v18158_v42 = vmul.f32 %v18153_v41, %v17924_v7 }
 0x3e5   : > { %15342 = vmatpush3.msra.mxu1 %v18151_v40 }
 0x3e6   : > { %15343 = vmatprep.subr.mxu1 %v18158_v42 }
 0x3e7   : > { %15344 = vmatpush3.msra.mxu1 %v18158_v42 }
 0x3e8   : > { %15346 = vmatmul.mubr.msk.f32.vlgmr.msra.gmra.mxu1 %vm393_vm0, %v17903_v3 }
 0x3e9   : > { %15352 = vmatprep.mubr.msk.f32.mxu1 %vm393_vm0, %v17897_v2 }
 0x4a8   : > { %v15347_v43 = vpop.f32.mrf.mxu1 }
 0x4a9   : > { %1093 = vrot.lane.b32.xlu1 %v15347_v43, %s17766_s21  ;;  %15348 = vmatprep.subr.mxu1 %v15347_v43 }
 0x4aa   : > { %v1001_v44 = vpop.f32.mrf.mxu1  ;;  %15349 = vmatpush3.msra.mxu1 %v15347_v43 }
 0x4ab   : > { %1091 = vrot.lane.b32.xlu0 %v1001_v44, %s17766_s21  ;;  %15350 = vmatprep.subr.mxu1 %v1001_v44 }
 0x4ac   : > { %15351 = vmatpush3.msra.mxu1 %v1001_v44 }
 0x4ad   : > { %15353 = vmatmul.mubr.msk.f32.vlgmr.msra.gmra.mxu1 %vm393_vm0, %v17903_v3  ;;  %15382 = vmatprep.subr.mxu1 %v18258_v59 }
 0x4ae   : > { %15386 = vmatprep.mubr.msk.f32.mxu1 %vm393_vm0, %v17897_v2  ;;  %15383 = vmatpush3.msra.mxu1 %v18258_v59 }
 0x4af   : > { %15384 = vmatprep.subr.mxu1 %v18261_v60 }
 0x4b0   : > { %15385 = vmatpush3.msra.mxu1 %v18261_v60 }
 0x4b1   : > { %15387 = vmatmul.mubr.msk.f32.vlgmr.msra.gmra.mxu1 %vm393_vm0, %v17903_v3 }
 0x4b2   : > { %15393 = vmatprep.mubr.msk.f32.mxu1 %vm393_vm0, %v17897_v2 }
 0x51b   : > { %v1094_v22 = vpop.permute.xlu1 %1093 }
 0x51c   : > { %v1106_v27 = vsel %vm570_vm1, %v18151_v40, %v1094_v22 }
 0x51d   : > { %v1092_v23 = vpop.permute.xlu0 %1091 }
 0x51e   : > { %v1105_v25 = vsel %vm570_vm1, %v18158_v42, %v1092_v23  ;;  %v1213_v23 = vsub.f32 1.0, %v18147_v39 }
 0x56d   : > { %v15354_v61 = vpop.f32.mrf.mxu1 }
 0x56e   : > { %v1086_v62 = vmul.f32 2.0, %v15354_v61 }
 0x56f   : > { %v1076_v0 = vpop.f32.mrf.mxu1 }
 0x570   : > { %v1088_v4 = vsub.f32 %v1086_v62, %v18151_v40  ;;  %v1085_v20 = vmul.f32 2.0, %v1076_v0 }
 0x571   : > { %v15388_v44 = vpop.f32.mrf.mxu1 }
 0x572   : > { %v1087_v21 = vsub.f32 %v1085_v20, %v18158_v42  ;;  %1101 = vrot.lane.b32.xlu1 %v1088_v4, %s17767_s26  ;;  %15389 = vmatprep.subr.mxu1 %v15388_v44 }
 0x573   : > { %v1305_v61 = vpop.f32.mrf.mxu1  ;;  %15390 = vmatpush3.msra.mxu1 %v15388_v44 }
 0x574   : > { %1099 = vrot.lane.b32.xlu0 %v1087_v21, %s17767_s26  ;;  %15391 = vmatprep.subr.mxu1 %v1305_v61 }
 0x575   : > { %15392 = vmatpush3.msra.mxu1 %v1305_v61 }
 0x576   : > { %15394 = vmatmul.mubr.msk.f32.vlgmr.msra.gmra.mxu1 %vm393_vm0, %v17903_v3 }
 0x577   : > { %15400 = vmatprep.mubr.msk.f32.mxu1 %vm393_vm0, %v17897_v2 }
 0x5e4   : > { %v1102_v24 = vpop.permute.xlu1 %1101 }
 0x5e5   : > { %v1108_v43 = vsel %vm573_vm2, %v1106_v27, %v1102_v24 }
 0x5e6   : > { %v1100_v26 = vpop.permute.xlu0 %1099 }
 0x5e7   : > { %v1107_v38 = vsel %vm573_vm2, %v1105_v25, %v1100_v26 }
 0x5e8   : > { %15379 = vmatprep.mubr.msk.f32.mxu0 %vm756_vm3, %v1107_v38 }
 0x5e9   : > { %15380 = vmatmul.mubr.msk.f32.vlgmr.msra.gmra.mxu0 %vm756_vm3, %v1108_v43 }
 0x5ea   : > { %15438 = vmatpush3.msra.mxu0 %v18031_v28 }
 0x5eb   : > { %15439 = vmatprep.subr.mxu0 %v18036_v29 }
 0x5ec   : > { %15440 = vmatpush3.msra.mxu0 %v18036_v29 }
 0x5ed   : > { %15441 = vmatprep.subr.mxu0 %v18043_v30 }
 0x5ee   : > { %15442 = vmatpush3.msra.mxu0 %v18043_v30 }
 0x5ef   : > { %15443 = vmatprep.subr.mxu0 %v18050_v31 }
 0x5f0   : > { %15444 = vmatpush3.msra.mxu0 %v18050_v31 }
 0x5f1   : > { %15445 = vmatprep.subr.mxu0 %v18057_v32 }
 0x5f2   : > { %15446 = vmatpush3.msra.mxu0 %v18057_v32 }
 0x5f3   : > { %15447 = vmatprep.subr.mxu0 %v18064_v33 }
 0x5f4   : > { %15448 = vmatpush3.msra.mxu0 %v18064_v33 }
 0x5f5   : > { %15449 = vmatprep.subr.mxu0 %v18071_v34 }
 0x5f6   : > { %15450 = vmatpush3.msra.mxu0 %v18071_v34 }
 0x5f7   : > { %15451 = vmatprep.subr.mxu0 %v18078_v35 }
 0x5f8   : > { %15452 = vmatpush3.msra.mxu0 %v18078_v35 }
 0x5f9   : > { %15453 = vmatprep.subr.mxu0 %v18085_v36 }
 0x5fa   : > { %15454 = vmatpush3.msra.mxu0 %v18085_v36 }
 0x5fb   : > { %15455 = vmatprep.subr.mxu0 %v18092_v37 }
 0x5fc   : > { %15456 = vmatpush3.msra.mxu0 %v18092_v37 }
 0x5fd   : > { %15457 = vmatprep.subr.mxu0 %v18109_v47 }
 0x5fe   : > { %15458 = vmatpush3.msra.mxu0 %v18109_v47 }
 0x5ff   : > { %15459 = vmatprep.subr.mxu0 %v18116_v48 }
 0x600   : > { %15460 = vmatpush3.msra.mxu0 %v18116_v48 }
 0x601   : > { %15478 = vmatprep.subr.mxu0 %v18176_v45 }
 0x636   : > { %v15395_v22 = vpop.f32.mrf.mxu1 }
 0x638   : > { %v1380_v27 = vpop.f32.mrf.mxu1 }
 0x6a9   : > { %v15381_v40 = vpop.f32.mrf.mxu0 }
 0x6aa   : > { %1194 = vrot.lane.b32.xlu0 %v15381_v40, %s17767_s26 }
 0x6ab   : > { %v1181_v42 = vpop.f32.mrf.mxu0 }
 0x6ac   : > { %1192 = vrot.lane.b32.xlu1 %v1181_v42, %s17767_s26 }
 0x6ae   : > { %1206 = vrot.lane.b32.xlu0 %v17918_v6, %s17766_s21 }
 0x6b2   : > { %1204 = vrot.lane.b32.xlu0 %v17924_v7, %s17766_s21 }
 0x71c   : > { %v1195_v62 = vpop.permute.xlu0 %1194 }
 0x71d   : > { %v1199_v0 = vadd.f32 %v1195_v62, %v18140_v1  ;;  %v1389_v62 = vmul.f32 2.0, %v1380_v27 }
 0x71e   : > { %v1193_v4 = vpop.permute.xlu1 %1192 }
 0x71f   : > { %17297 = vtanh.f32 %v1199_v0  ;;  %v1198_v6 = vadd.f32 %v1193_v4, %v18143_v5  ;;  %v1212_v5 = vsub.f32 1.0, %v18153_v41  ;;  %v1391_v4 = vsub.f32 %v1389_v62, %v18261_v60 }
 0x720   : > { %v1207_v21 = vpop.permute.xlu0 %1206 }
 0x721   : > { %17299 = vtanh.f32 %v1198_v6  ;;  %v1211_v25 = vmul.f32 %v18147_v39, %v1207_v21  ;;  %v1390_v39 = vmul.f32 2.0, %v15395_v22 }
 0x723   : > { %v1392_v6 = vsub.f32 %v1390_v39, %v18258_v59 }
 0x724   : > { %v1205_v26 = vpop.permute.xlu0 %1204 }
 0x725   : > { %v1210_v40 = vmul.f32 %v18153_v41, %v1205_v26 }
 0x72c   : > { %v17298_v7 = vpop.eup %17297 }
 0x72d   : > { %1218 = vrot.lane.b32.xlu1 %v17298_v7, %s17768_s22 }
 0x72e   : > { %v17300_v20 = vpop.eup %17299 }
 0x731   : > { %1216 = vrot.lane.b32.xlu1 %v17300_v20, %s17768_s22 }
 0x79f   : > { %v1219_v24 = vpop.permute.xlu1 %1218 }
 0x7a0   : > { %v1223_v1 = vmul.f32 %v1219_v24, %v1213_v23 }
 0x7a2   : > { %v18324_v38 = vadd.f32 %v1223_v1, %v1211_v25 }
 0x7a3   : > { %v1217_v43 = vpop.permute.xlu1 %1216 }
 0x7a4   : > { %v1222_v42 = vmul.f32 %v1217_v43, %v1212_v5  ;;  %1230 = vrot.lane.b32.xlu0 %v18324_v38, %s17768_s22 }
 0x7a6   : > { %v18330_v0 = vadd.f32 %v1222_v42, %v1210_v40 }
 0x7a8   : > { %1228 = vrot.lane.b32.xlu1 %v18330_v0, %s17768_s22  ;;  %1395 = vrot.lane.b32.xlu0 %v1305_v61, %s17766_s21 }
 0x7ac   : > { %1397 = vrot.lane.b32.xlu1 %v15388_v44, %s17766_s21  ;;  %1403 = vrot.lane.b32.xlu0 %v1391_v4, %s17767_s26 }
 0x7b0   : > { %1405 = vrot.lane.b32.xlu1 %v1392_v6, %s17767_s26 }
 0x816   : > { %v18340_v41 = vpop.permute.xlu0 %1230 }
 0x817   : > { %1235 = vst.msk [vmem:[#allocation2 + $0x8] sm:$0xff] %vm570_vm1, %v18340_v41  ;;  %15396 = vmatprep.subr.mxu1 %v18340_v41 }
 0x818   : > { %15397 = vmatpush3.msra.mxu1 %v18340_v41 }
 0x81a   : > { %v18346_v7 = vpop.permute.xlu1 %1228  ;;  %v1396_v44 = vpop.permute.xlu0 %1395 }
 0x81b   : > { %1234 = vst.msk [vmem:[#allocation2] sm:$0xff] %vm570_vm1, %v18346_v7  ;;  %15398 = vmatprep.subr.mxu1 %v18346_v7  ;;  %v1409_v20 = vsel %vm570_vm1, %v18261_v60, %v1396_v44 }
 0x81c   : > { %15399 = vmatpush3.msra.mxu1 %v18346_v7 }
 0x81d   : > { %15401 = vmatmul.mubr.msk.f32.vlgmr.msra.gmra.mxu1 %vm393_vm0, %v17903_v3 }
 0x81e   : > { %15407 = vmatprep.mubr.msk.f32.mxu1 %vm393_vm0, %v17897_v2  ;;  %v1404_v21 = vpop.permute.xlu0 %1403 }
 0x81f   : > { %v1411_v23 = vsel %vm573_vm2, %v1409_v20, %v1404_v21 }
 0x8dd   : > { %v15402_v61 = vpop.f32.mrf.mxu1 }
 0x8de   : > { %1571 = vrot.lane.b32.xlu1 %v15402_v61, %s17766_s21  ;;  %15403 = vmatprep.subr.mxu1 %v15402_v61 }
 0x8df   : > { %v1479_v22 = vpop.f32.mrf.mxu1  ;;  %15404 = vmatpush3.msra.mxu1 %v15402_v61 }
 0x8e0   : > { %1569 = vrot.lane.b32.xlu0 %v1479_v22, %s17766_s21  ;;  %15405 = vmatprep.subr.mxu1 %v1479_v22 }
 0x8e1   : > { %15406 = vmatpush3.msra.mxu1 %v1479_v22 }
 0x8e2   : > { %15408 = vmatmul.mubr.msk.f32.vlgmr.msra.gmra.mxu1 %vm393_vm0, %v17903_v3  ;;  %15410 = vmatprep.subr.mxu1 %v17939_v8 }
 0x8e3   : > { %15411 = vmatpush3.msra.mxu1 %v17939_v8  ;;  %15434 = vmatprep.mubr.msk.f32.mxu1 %vm756_vm3, %v1411_v23  ;;  %v1398_v8 = vpop.permute.xlu1 %1397 }
 0x8e4   : > { %15412 = vmatprep.subr.mxu1 %v17944_v9 }
 0x8e5   : > { %15413 = vmatpush3.msra.mxu1 %v17944_v9  ;;  %v1410_v9 = vsel %vm570_vm1, %v18258_v59, %v1398_v8 }
 0x8e6   : > { %15414 = vmatprep.subr.mxu1 %v17951_v10 }
 0x8e7   : > { %15415 = vmatpush3.msra.mxu1 %v17951_v10  ;;  %v1406_v10 = vpop.permute.xlu1 %1405 }
 0x8e8   : > { %15416 = vmatprep.subr.mxu1 %v17958_v11 }
 0x8e9   : > { %15417 = vmatpush3.msra.mxu1 %v17958_v11  ;;  %v1412_v11 = vsel %vm573_vm2, %v1410_v9, %v1406_v10 }
 0x8ea   : > { %15418 = vmatprep.subr.mxu1 %v17965_v12 }
 0x8eb   : > { %15419 = vmatpush3.msra.mxu1 %v17965_v12 }
 0x8ec   : > { %15420 = vmatprep.subr.mxu1 %v17972_v13 }
 0x8ed   : > { %15421 = vmatpush3.msra.mxu1 %v17972_v13 }
 0x8ee   : > { %15422 = vmatprep.subr.mxu1 %v17979_v14 }
 0x8ef   : > { %15423 = vmatpush3.msra.mxu1 %v17979_v14 }
 0x8f0   : > { %15424 = vmatprep.subr.mxu1 %v17988_v15 }
 0x8f1   : > { %15425 = vmatpush3.msra.mxu1 %v17988_v15 }
 0x8f2   : > { %15426 = vmatprep.subr.mxu1 %v17995_v16 }
 0x8f3   : > { %15427 = vmatpush3.msra.mxu1 %v17995_v16 }
 0x8f4   : > { %15428 = vmatprep.subr.mxu1 %v18002_v17 }
 0x8f5   : > { %15429 = vmatpush3.msra.mxu1 %v18002_v17 }
 0x8f6   : > { %15430 = vmatprep.subr.mxu1 %v18007_v18 }
 0x8f7   : > { %15431 = vmatpush3.msra.mxu1 %v18007_v18 }
 0x8f8   : > { %15432 = vmatprep.subr.mxu1 %v18015_v19 }
 0x8f9   : > { %15433 = vmatpush3.msra.mxu1 %v18015_v19 }
 0x8fa   : > { %15435 = vmatmul.mubr.msk.f32.vlgmr.msra.gmra.mxu1 %vm756_vm3, %v1412_v11 }
 0x8fb   : > { %15468 = vmatprep.mubr.msk.f32.mxu1 %vm393_vm0, %v17897_v2 }
 0x950   : > { %v1572_v18 = vpop.permute.xlu1 %1571 }
 0x951   : > { %v1584_v25 = vsel %vm570_vm1, %v18340_v41, %v1572_v18 }
 0x952   : > { %v1570_v59 = vpop.permute.xlu0 %1569 }
 0x953   : > { %v1583_v60 = vsel %vm570_vm1, %v18346_v7, %v1570_v59 }
 0x9a2   : > { %v15409_v12 = vpop.f32.mrf.mxu1 }
 0x9a3   : > { %v1564_v13 = vmul.f32 2.0, %v15409_v12  ;;  %v18460_v12 = vld [vmem:[%s17889_s13 + $0x20] sm:$0xff] }
 0x9a4   : > { %v1554_v14 = vpop.f32.mrf.mxu1 }
 0x9a5   : > { %v1566_v15 = vsub.f32 %v1564_v13, %v18340_v41  ;;  %v1563_v16 = vmul.f32 2.0, %v1554_v14 }
 0x9a7   : > { %v1565_v17 = vsub.f32 %v1563_v16, %v18346_v7  ;;  %1579 = vrot.lane.b32.xlu1 %v1566_v15, %s17767_s26 }
 0x9a9   : > { %1577 = vrot.lane.b32.xlu0 %v1565_v17, %s17767_s26 }
 0x9ba   : > { %v15436_v27 = vpop.f32.mrf.mxu1 }
 0x9bb   : > { %v18431_v43 = vadd.f32 %v15436_v27, %v18137_v63 }
 0x9bc   : > { %v1659_v5 = vpop.f32.mrf.mxu1 }
 0x9bd   : > { %v18434_v42 = vadd.f32 %v18137_v63, %v1659_v5 }
 0xa19   : > { %v1580_v19 = vpop.permute.xlu1 %1579 }
 0xa1a   : > { %v1586_v26 = vsel %vm573_vm2, %v1584_v25, %v1580_v19 }
 0xa1b   : > { %v1578_v24 = vpop.permute.xlu0 %1577 }
 0xa1c   : > { %v1585_v1 = vsel %vm573_vm2, %v1583_v60, %v1578_v24 }
 0xa1d   : > { %15461 = vmatprep.mubr.msk.f32.mxu0 %vm756_vm3, %v1585_v1 }
 0xa1e   : > { %15462 = vmatmul.mubr.msk.f32.vlgmr.msra.gmra.mxu0 %vm756_vm3, %v1586_v26 }
 0xa1f   : > { %15479 = vmatpush3.msra.mxu0 %v18176_v45 }
 0xa20   : > { %15480 = vmatprep.subr.mxu0 %v18181_v46 }
 0xa21   : > { %15481 = vmatpush3.msra.mxu0 %v18181_v46 }
 0xa22   : > { %15482 = vmatprep.subr.mxu0 %v18188_v49 }
 0xa23   : > { %15483 = vmatpush3.msra.mxu0 %v18188_v49 }
 0xa24   : > { %15484 = vmatprep.subr.mxu0 %v18195_v50 }
 0xa25   : > { %15485 = vmatpush3.msra.mxu0 %v18195_v50 }
 0xa26   : > { %15486 = vmatprep.subr.mxu0 %v18202_v51 }
 0xa27   : > { %15487 = vmatpush3.msra.mxu0 %v18202_v51 }
 0xa28   : > { %15488 = vmatprep.subr.mxu0 %v18209_v52 }
 0xa29   : > { %15489 = vmatpush3.msra.mxu0 %v18209_v52 }
 0xa2a   : > { %15490 = vmatprep.subr.mxu0 %v18216_v53 }
 0xa2b   : > { %15491 = vmatpush3.msra.mxu0 %v18216_v53 }
 0xa2c   : > { %15492 = vmatprep.subr.mxu0 %v18223_v54 }
 0xa2d   : > { %15493 = vmatpush3.msra.mxu0 %v18223_v54 }
 0xa2e   : > { %15494 = vmatprep.subr.mxu0 %v18230_v55 }
 0xa2f   : > { %15495 = vmatpush3.msra.mxu0 %v18230_v55 }
 0xa30   : > { %15496 = vmatprep.subr.mxu0 %v18237_v56 }
 0xa31   : > { %15497 = vmatpush3.msra.mxu0 %v18237_v56 }
 0xa32   : > { %15498 = vmatprep.subr.mxu0 %v18246_v57 }
 0xa33   : > { %15499 = vmatpush3.msra.mxu0 %v18246_v57 }
 0xa34   : > { %15500 = vmatprep.subr.mxu0 %v18253_v58 }
 0xa35   : > { %15501 = vmatpush3.msra.mxu0 %v18253_v58 }
 0xa36   : > { %15560 = vmatprep.subr.mxu0 %v18031_v28 }
 0xade   : > { %v15463_v40 = vpop.f32.mrf.mxu0 }
 0xadf   : > { %v1750_v62 = vadd.f32 %v15463_v40, %v18431_v43 }
 0xae0   : > { %v1740_v39 = vpop.f32.mrf.mxu0 }
 0xae1   : > { %v13836_v4 = vmul.f32 -1.442695, %v1750_v62  ;;  %v1749_v6 = vadd.f32 %v1740_v39, %v18434_v42 }
 0xae3   : > { %17301 = vpow2.f32 %v13836_v4  ;;  %v13835_v44 = vmul.f32 -1.442695, %v1749_v6 }
 0xae5   : > { %17303 = vpow2.f32 %v13835_v44 }
 0xaf0   : > { %v17302_v61 = vpop.eup %17301 }
 0xaf1   : > { %v1758_v20 = vadd.f32 1.0, %v17302_v61 }
 0xaf2   : > { %v17304_v21 = vpop.eup %17303 }
 0xaf3   : > { %17305 = vrcp.f32 %v1758_v20  ;;  %v1757_v22 = vadd.f32 1.0, %v17304_v21 }
 0xaf5   : > { %17307 = vrcp.f32 %v1757_v22 }
 0xb00   : > { %v18438_v23 = vpop.eup %17305 }
 0xb01   : > { %v1764_v8 = vmul.f32 %v18438_v23, %v18340_v41  ;;  %v2035_v27 = vsub.f32 1.0, %v18438_v23  ;;  %v2033_v40 = vmul.f32 %v18438_v23, %v18324_v38 }
 0xb02   : > { %v18442_v9 = vpop.eup %17307 }
 0xb03   : > { %15464 = vmatprep.subr.mxu1 %v1764_v8  ;;  %v1763_v10 = vmul.f32 %v18442_v9, %v18346_v7  ;;  %v18457_v7 = vld [vmem:[%s17889_s13 + $0x28] sm:$0xff]  ;;  %v2032_v6 = vmul.f32 %v18442_v9, %v18330_v0 }
 0xb04   : > { %15465 = vmatpush3.msra.mxu1 %v1764_v8 }
 0xb05   : > { %15466 = vmatprep.subr.mxu1 %v1763_v10 }
 0xb06   : > { %15467 = vmatpush3.msra.mxu1 %v1763_v10 }
 0xb07   : > { %15469 = vmatmul.mubr.msk.f32.vlgmr.msra.gmra.mxu1 %vm393_vm0, %v17903_v3 }
 0xb08   : > { %15475 = vmatprep.mubr.msk.f32.mxu1 %vm393_vm0, %v17897_v2 }
 0xbc7   : > { %v15470_v11 = vpop.f32.mrf.mxu1 }
 0xbc8   : > { %1923 = vrot.lane.b32.xlu1 %v15470_v11, %s17766_s21  ;;  %15471 = vmatprep.subr.mxu1 %v15470_v11 }
 0xbc9   : > { %v1831_v41 = vpop.f32.mrf.mxu1  ;;  %15472 = vmatpush3.msra.mxu1 %v15470_v11 }
 0xbca   : > { %1921 = vrot.lane.b32.xlu0 %v1831_v41, %s17766_s21  ;;  %15473 = vmatprep.subr.mxu1 %v1831_v41 }
 0xbcb   : > { %15474 = vmatpush3.msra.mxu1 %v1831_v41 }
 0xbcc   : > { %15476 = vmatmul.mubr.msk.f32.vlgmr.msra.gmra.mxu1 %vm393_vm0, %v17903_v3  ;;  %15505 = vmatprep.subr.mxu1 %v18457_v7 }
 0xbcd   : > { %15509 = vmatprep.mubr.msk.f32.mxu1 %vm393_vm0, %v17897_v2  ;;  %15506 = vmatpush3.msra.mxu1 %v18457_v7 }
 0xbce   : > { %15507 = vmatprep.subr.mxu1 %v18460_v12 }
 0xbcf   : > { %15508 = vmatpush3.msra.mxu1 %v18460_v12 }
 0xbd0   : > { %15510 = vmatmul.mubr.msk.f32.vlgmr.msra.gmra.mxu1 %vm393_vm0, %v17903_v3 }
 0xbd1   : > { %15516 = vmatprep.mubr.msk.f32.mxu1 %vm393_vm0, %v17897_v2 }
 0xc3a   : > { %v1924_v59 = vpop.permute.xlu1 %1923 }
 0xc3b   : > { %v1936_v1 = vsel %vm570_vm1, %v1764_v8, %v1924_v59  ;;  %v18605_v59 = vld [vmem:[%s22275_s3 + $0x28] sm:$0xff] }
 0xc3c   : > { %v1922_v19 = vpop.permute.xlu0 %1921 }
 0xc3d   : > { %v1935_v24 = vsel %vm570_vm1, %v1763_v10, %v1922_v19 }
 0xc8c   : > { %v15477_v13 = vpop.f32.mrf.mxu1 }
 0xc8d   : > { %v1916_v14 = vmul.f32 2.0, %v15477_v13 }
 0xc8e   : > { %v1906_v15 = vpop.f32.mrf.mxu1 }
 0xc8f   : > { %v1918_v16 = vsub.f32 %v1916_v14, %v1764_v8  ;;  %v1915_v17 = vmul.f32 2.0, %v1906_v15  ;;  %v18562_v14 = vld [vmem:[%s22275_s3 + $0x58] sm:$0xff]  ;;  %v18577_v15 = vld [vmem:[%s22275_s3 + $0x48] sm:$0xff] }
 0xc91   : > { %v1917_v18 = vsub.f32 %v1915_v17, %v1763_v10  ;;  %1931 = vrot.lane.b32.xlu1 %v1918_v16, %s17767_s26  ;;  %v18584_v16 = vld [vmem:[%s22275_s3 + $0x40] sm:$0xff]  ;;  %v18591_v17 = vld [vmem:[%s22275_s3 + $0x38] sm:$0xff] }
 0xc93   : > { %1929 = vrot.lane.b32.xlu0 %v1917_v18, %s17767_s26  ;;  %v18598_v18 = vld [vmem:[%s22275_s3 + $0x30] sm:$0xff] }
 0xd03   : > { %v1932_v60 = vpop.permute.xlu1 %1931 }
 0xd04   : > { %v1938_v26 = vsel %vm573_vm2, %v1936_v1, %v1932_v60  ;;  %v18612_v60 = vld [vmem:[%s22275_s3 + $0x20] sm:$0xff] }
 0xd05   : > { %v1930_v25 = vpop.permute.xlu0 %1929 }
 0xd06   : > { %v1937_v3 = vsel %vm573_vm2, %v1935_v24, %v1930_v25  ;;  %v18619_v24 = vld [vmem:[%s22275_s3 + $0x18] sm:$0xff]  ;;  %v18626_v25 = vld [vmem:[%s22275_s3 + $0x10] sm:$0xff] }
 0xd07   : > { %15502 = vmatprep.mubr.msk.f32.mxu0 %vm756_vm3, %v1937_v3 }
 0xd08   : > { %15503 = vmatmul.mubr.msk.f32.vlgmr.msra.gmra.mxu0 %vm756_vm3, %v1938_v26  ;;  %v18635_v26 = vld [vmem:[%s22275_s3 + $0x8] sm:$0xff] }
 0xd09   : > { %15561 = vmatpush3.msra.mxu0 %v18031_v28 }
 0xd0a   : > { %15562 = vmatprep.subr.mxu0 %v18036_v29 }
 0xd0b   : > { %15563 = vmatpush3.msra.mxu0 %v18036_v29  ;;  %v15511_v29 = vpop.f32.mrf.mxu1 }
 0xd0c   : > { %15564 = vmatprep.subr.mxu0 %v18043_v30  ;;  %15512 = vmatprep.subr.mxu1 %v15511_v29 }
 0xd0d   : > { %15565 = vmatpush3.msra.mxu0 %v18043_v30  ;;  %v2128_v30 = vpop.f32.mrf.mxu1  ;;  %15513 = vmatpush3.msra.mxu1 %v15511_v29 }
 0xd0e   : > { %15566 = vmatprep.subr.mxu0 %v18050_v31  ;;  %15514 = vmatprep.subr.mxu1 %v2128_v30 }
 0xd0f   : > { %15567 = vmatpush3.msra.mxu0 %v18050_v31  ;;  %15515 = vmatpush3.msra.mxu1 %v2128_v30  ;;  %v18504_v31 = vld [vmem:[#allocation3 + $0x8] sm:$0xff] }
 0xd10   : > { %15568 = vmatprep.subr.mxu0 %v18057_v32  ;;  %15517 = vmatmul.mubr.msk.f32.vlgmr.msra.gmra.mxu1 %vm393_vm0, %v18504_v31 }
 0xd11   : > { %15569 = vmatpush3.msra.mxu0 %v18057_v32  ;;  %v18508_v32 = vld [vmem:[#allocation3] sm:$0xff] }
 0xd12   : > { %15570 = vmatprep.subr.mxu0 %v18064_v33  ;;  %15523 = vmatprep.mubr.msk.f32.mxu1 %vm393_vm0, %v18508_v32 }
 0xd13   : > { %15571 = vmatpush3.msra.mxu0 %v18064_v33 }
 0xd14   : > { %15572 = vmatprep.subr.mxu0 %v18071_v34 }
 0xd15   : > { %15573 = vmatpush3.msra.mxu0 %v18071_v34 }
 0xd16   : > { %15574 = vmatprep.subr.mxu0 %v18078_v35 }
 0xd17   : > { %15575 = vmatpush3.msra.mxu0 %v18078_v35 }
 0xd18   : > { %15576 = vmatprep.subr.mxu0 %v18085_v36 }
 0xd19   : > { %15577 = vmatpush3.msra.mxu0 %v18085_v36 }
 0xd1a   : > { %15578 = vmatprep.subr.mxu0 %v18092_v37 }
 0xd1b   : > { %15579 = vmatpush3.msra.mxu0 %v18092_v37 }
 0xd1c   : > { %15580 = vmatprep.subr.mxu0 %v18109_v47 }
 0xd1d   : > { %15581 = vmatpush3.msra.mxu0 %v18109_v47 }
 0xd1e   : > { %15582 = vmatprep.subr.mxu0 %v18116_v48 }
 0xd1f   : > { %15583 = vmatpush3.msra.mxu0 %v18116_v48 }
 0xd20   : > { %15601 = vmatprep.subr.mxu0 %v18176_v45 }
 0xdc8   : > { %v15504_v2 = vpop.f32.mrf.mxu0 }
 0xdc9   : > { %2024 = vrot.lane.b32.xlu0 %v15504_v2, %s17767_s26  ;;  %v18642_v2 = vld [vmem:[%s22275_s3] sm:$0xff] }
 0xdca   : > { %v2011_v28 = vpop.f32.mrf.mxu0 }
 0xdcb   : > { %2022 = vrot.lane.b32.xlu1 %v2011_v28, %s17767_s26 }
 0xdd0   : > { %v15518_v48 = vpop.f32.mrf.mxu1 }
 0xdd1   : > { %v2213_v38 = vmul.f32 2.0, %v15518_v48 }
 0xdd2   : > { %v2203_v4 = vpop.f32.mrf.mxu1 }
 0xdd3   : > { %v2212_v20 = vmul.f32 2.0, %v2203_v4  ;;  %v2215_v22 = vsub.f32 %v2213_v38, %v18457_v7 }
 0xdd5   : > { %v2214_v21 = vsub.f32 %v2212_v20, %v18460_v12 }
 0xe3b   : > { %v2025_v33 = vpop.permute.xlu0 %2024 }
 0xe3c   : > { %v2029_v34 = vadd.f32 %v2025_v33, %v18431_v43  ;;  %v2034_v43 = vsub.f32 1.0, %v18442_v9 }
 0xe3d   : > { %v2023_v35 = vpop.permute.xlu1 %2022 }
 0xe3e   : > { %17309 = vtanh.f32 %v2029_v34  ;;  %v2028_v36 = vadd.f32 %v2023_v35, %v18434_v42 }
 0xe40   : > { %17311 = vtanh.f32 %v2028_v36 }
 0xe4b   : > { %v17310_v37 = vpop.eup %17309 }
 0xe4c   : > { %2040 = vrot.lane.b32.xlu0 %v17310_v37, %s17768_s22 }
 0xe4d   : > { %v17312_v47 = vpop.eup %17311 }
 0xe4e   : > { %2038 = vrot.lane.b32.xlu1 %v17312_v47, %s17768_s22 }
 0xebe   : > { %v2041_v5 = vpop.permute.xlu0 %2040 }
 0xebf   : > { %v2045_v62 = vmul.f32 %v2041_v5, %v2035_v27 }
 0xec0   : > { %v2039_v39 = vpop.permute.xlu1 %2038 }
 0xec1   : > { %v18520_v42 = vadd.f32 %v2045_v62, %v2033_v40  ;;  %v2044_v44 = vmul.f32 %v2039_v39, %v2034_v43 }
 0xec3   : > { %v18524_v61 = vadd.f32 %v2044_v44, %v2032_v6  ;;  %2052 = vrot.lane.b32.xlu0 %v18520_v42, %s17768_s22 }
 0xec5   : > { %2050 = vrot.lane.b32.xlu1 %v18524_v61, %s17768_s22 }
 0xec7   : > { %2218 = vrot.lane.b32.xlu0 %v2128_v30, %s17766_s21 }
 0xec9   : > { %2220 = vrot.lane.b32.xlu1 %v15511_v29, %s17766_s21 }
 0xecb   : > { %2226 = vrot.lane.b32.xlu0 %v2214_v21, %s17767_s26 }
 0xecd   : > { %2228 = vrot.lane.b32.xlu1 %v2215_v22, %s17767_s26  ;;  %v18718_v22 = vld [vmem:[%s17889_s13 + $0x38] sm:$0xff] }
 0xf35   : > { %v18536_v0 = vpop.permute.xlu0 %2052 }
 0xf36   : > { %2058 = vst.msk [vmem:[#allocation2 + $0x18] sm:$0xff] %vm570_vm1, %v18536_v0  ;;  %15519 = vmatprep.subr.mxu1 %v18536_v0 }
 0xf37   : > { %15520 = vmatpush3.msra.mxu1 %v18536_v0  ;;  %v18542_v23 = vpop.permute.xlu1 %2050 }
 0xf38   : > { %2057 = vst.msk [vmem:[#allocation2 + $0x10] sm:$0xff] %vm570_vm1, %v18542_v23  ;;  %15521 = vmatprep.subr.mxu1 %v18542_v23 }
 0xf39   : > { %15522 = vmatpush3.msra.mxu1 %v18542_v23  ;;  %v2219_v8 = vpop.permute.xlu0 %2218 }
 0xf3a   : > { %15524 = vmatmul.mubr.msk.f32.vlgmr.msra.gmra.mxu1 %vm393_vm0, %v18504_v31  ;;  %v2232_v10 = vsel %vm570_vm1, %v18460_v12, %v2219_v8  ;;  %v18570_v12 = vld [vmem:[%s22275_s3 + $0x50] sm:$0xff] }
 0xf3b   : > { %15530 = vmatprep.mubr.msk.f32.mxu1 %vm393_vm0, %v18508_v32  ;;  %v2221_v19 = vpop.permute.xlu1 %2220 }
 0xf3c   : > { %v2233_v1 = vsel %vm570_vm1, %v18457_v7, %v2221_v19 }
 0xf3d   : > { %v2227_v11 = vpop.permute.xlu0 %2226 }
 0xf3e   : > { %v2234_v13 = vsel %vm573_vm2, %v2232_v10, %v2227_v11 }
 0xf3f   : > { %v2229_v3 = vpop.permute.xlu1 %2228 }
 0xf40   : > { %v2235_v28 = vsel %vm573_vm2, %v2233_v1, %v2229_v3 }
 0xffa   : > { %v15525_v9 = vpop.f32.mrf.mxu1 }
 0xffb   : > { %2394 = vrot.lane.b32.xlu1 %v15525_v9, %s17766_s21  ;;  %15526 = vmatprep.subr.mxu1 %v15525_v9 }
 0xffc   : > { %v2302_v41 = vpop.f32.mrf.mxu1  ;;  %15527 = vmatpush3.msra.mxu1 %v15525_v9 }
 0xffd   : > { %2392 = vrot.lane.b32.xlu0 %v2302_v41, %s17766_s21  ;;  %15528 = vmatprep.subr.mxu1 %v2302_v41 }
 0xffe   : > { %15529 = vmatpush3.msra.mxu1 %v2302_v41 }
 0xfff   : > { %15531 = vmatmul.mubr.msk.f32.vlgmr.msra.gmra.mxu1 %vm393_vm0, %v18504_v31  ;;  %15533 = vmatprep.subr.mxu1 %v18562_v14 }
0x1000   : > { %15534 = vmatpush3.msra.mxu1 %v18562_v14  ;;  %15557 = vmatprep.mubr.msk.f32.mxu1 %vm756_vm3, %v2234_v13 }
0x1001   : > { %15535 = vmatprep.subr.mxu1 %v18570_v12 }
0x1002   : > { %15536 = vmatpush3.msra.mxu1 %v18570_v12 }
0x1003   : > { %15537 = vmatprep.subr.mxu1 %v18577_v15 }
0x1004   : > { %15538 = vmatpush3.msra.mxu1 %v18577_v15 }
0x1005   : > { %15539 = vmatprep.subr.mxu1 %v18584_v16 }
0x1006   : > { %15540 = vmatpush3.msra.mxu1 %v18584_v16 }
0x1007   : > { %15541 = vmatprep.subr.mxu1 %v18591_v17 }
0x1008   : > { %15542 = vmatpush3.msra.mxu1 %v18591_v17 }
0x1009   : > { %15543 = vmatprep.subr.mxu1 %v18598_v18 }
0x100a   : > { %15544 = vmatpush3.msra.mxu1 %v18598_v18 }
0x100b   : > { %15545 = vmatprep.subr.mxu1 %v18605_v59 }
0x100c   : > { %15546 = vmatpush3.msra.mxu1 %v18605_v59 }
0x100d   : > { %15547 = vmatprep.subr.mxu1 %v18612_v60 }
0x100e   : > { %15548 = vmatpush3.msra.mxu1 %v18612_v60 }
0x100f   : > { %15549 = vmatprep.subr.mxu1 %v18619_v24 }
0x1010   : > { %15550 = vmatpush3.msra.mxu1 %v18619_v24 }
0x1011   : > { %15551 = vmatprep.subr.mxu1 %v18626_v25 }
0x1012   : > { %15552 = vmatpush3.msra.mxu1 %v18626_v25 }
0x1013   : > { %15553 = vmatprep.subr.mxu1 %v18635_v26 }
0x1014   : > { %15554 = vmatpush3.msra.mxu1 %v18635_v26 }
0x1015   : > { %15555 = vmatprep.subr.mxu1 %v18642_v2 }
0x1016   : > { %15556 = vmatpush3.msra.mxu1 %v18642_v2 }
0x1017   : > { %15558 = vmatmul.mubr.msk.f32.vlgmr.msra.gmra.mxu1 %vm756_vm3, %v2235_v28 }
0x1018   : > { %15591 = vmatprep.mubr.msk.f32.mxu1 %vm393_vm0, %v18508_v32 }
0x106d   : > { %v2395_v36 = vpop.permute.xlu1 %2394 }
0x106e   : > { %v2407_v5 = vsel %vm570_vm1, %v18536_v0, %v2395_v36  ;;  %v18764_v36 = vld [vmem:[%s22276_s4 + $0x38] sm:$0xff] }
0x106f   : > { %v2393_v37 = vpop.permute.xlu0 %2392 }
0x1070   : > { %v2406_v48 = vsel %vm570_vm1, %v18542_v23, %v2393_v37  ;;  %v18771_v37 = vld [vmem:[%s22276_s4 + $0x30] sm:$0xff] }
0x10bf   : > { %v15532_v7 = vpop.f32.mrf.mxu1 }
0x10c0   : > { %v2387_v29 = vmul.f32 2.0, %v15532_v7 }
0x10c1   : > { %v2377_v30 = vpop.f32.mrf.mxu1 }
0x10c2   : > { %v2389_v33 = vsub.f32 %v2387_v29, %v18536_v0  ;;  %v2386_v34 = vmul.f32 2.0, %v2377_v30 }
0x10c4   : > { %v2388_v35 = vsub.f32 %v2386_v34, %v18542_v23  ;;  %2402 = vrot.lane.b32.xlu1 %v2389_v33, %s17767_s26  ;;  %v18743_v33 = vld [vmem:[%s22276_s4 + $0x50] sm:$0xff]  ;;  %v18750_v34 = vld [vmem:[%s22276_s4 + $0x48] sm:$0xff] }
0x10c6   : > { %2400 = vrot.lane.b32.xlu0 %v2388_v35, %s17767_s26  ;;  %v18757_v35 = vld [vmem:[%s22276_s4 + $0x40] sm:$0xff] }
0x1136   : > { %v2403_v47 = vpop.permute.xlu1 %2402 }
0x1137   : > { %v2409_v62 = vsel %vm573_vm2, %v2407_v5, %v2403_v47  ;;  %v18778_v47 = vld [vmem:[%s22276_s4 + $0x28] sm:$0xff]  ;;  %v18799_v5 = vld [vmem:[%s22276_s4 + $0x10] sm:$0xff] }
0x1138   : > { %v2401_v27 = vpop.permute.xlu0 %2400 }
0x1139   : > { %v2408_v40 = vsel %vm573_vm2, %v2406_v48, %v2401_v27  ;;  %v18785_v48 = vld [vmem:[%s22276_s4 + $0x20] sm:$0xff]  ;;  %v18792_v27 = vld [vmem:[%s22276_s4 + $0x18] sm:$0xff] }
0x113a   : > { %15584 = vmatprep.mubr.msk.f32.mxu0 %vm756_vm3, %v2408_v40  ;;  %v18806_v40 = vld [vmem:[%s22276_s4 + $0x8] sm:$0xff] }
0x113b   : > { %15585 = vmatmul.mubr.msk.f32.vlgmr.msra.gmra.mxu0 %vm756_vm3, %v2409_v62  ;;  %v18813_v62 = vld [vmem:[%s22276_s4] sm:$0xff] }
0x113c   : > { %15602 = vmatpush3.msra.mxu0 %v18176_v45  ;;  %v18688_v45 = vld [vmem:[%s22276_s4 + $0x58] sm:$0xff] }
0x113d   : > { %15603 = vmatprep.subr.mxu0 %v18181_v46 }
0x113e   : > { %15604 = vmatpush3.msra.mxu0 %v18181_v46  ;;  %v15559_v46 = vpop.f32.mrf.mxu1 }
0x113f   : > { %15605 = vmatprep.subr.mxu0 %v18188_v49 }
0x1140   : > { %15606 = vmatpush3.msra.mxu0 %v18188_v49  ;;  %v2482_v49 = vpop.f32.mrf.mxu1 }
0x1141   : > { %15607 = vmatprep.subr.mxu0 %v18195_v50 }
0x1142   : > { %15608 = vmatpush3.msra.mxu0 %v18195_v50  ;;  %v18692_v50 = vadd.f32 %v15559_v46, %v18137_v63  ;;  %v18820_v46 = vld [vmem:[%s22277_s5 + $0x58] sm:$0xff] }
0x1143   : > { %15609 = vmatprep.subr.mxu0 %v18202_v51 }
0x1144   : > { %15610 = vmatpush3.msra.mxu0 %v18202_v51 }
0x1145   : > { %15611 = vmatprep.subr.mxu0 %v18209_v52 }
0x1146   : > { %15612 = vmatpush3.msra.mxu0 %v18209_v52  ;;  %v18695_v52 = vadd.f32 %v18137_v63, %v2482_v49 }
0x1147   : > { %15613 = vmatprep.subr.mxu0 %v18216_v53 }
0x1148   : > { %15614 = vmatpush3.msra.mxu0 %v18216_v53 }
0x1149   : > { %15615 = vmatprep.subr.mxu0 %v18223_v54 }
0x114a   : > { %15616 = vmatpush3.msra.mxu0 %v18223_v54 }
0x114b   : > { %15617 = vmatprep.subr.mxu0 %v18230_v55 }
0x114c   : > { %15618 = vmatpush3.msra.mxu0 %v18230_v55 }
0x114d   : > { %15619 = vmatprep.subr.mxu0 %v18237_v56 }
0x114e   : > { %15620 = vmatpush3.msra.mxu0 %v18237_v56 }
0x114f   : > { %15621 = vmatprep.subr.mxu0 %v18246_v57 }
0x1150   : > { %15622 = vmatpush3.msra.mxu0 %v18246_v57 }
0x1151   : > { %15623 = vmatprep.subr.mxu0 %v18253_v58 }
0x1152   : > { %15624 = vmatpush3.msra.mxu0 %v18253_v58 }
0x1153   : > { %15683 = vmatprep.subr.mxu0 %v18688_v45 }
0x11fb   : > { %v15586_v51 = vpop.f32.mrf.mxu0 }
0x11fc   : > { %v2573_v53 = vadd.f32 %v15586_v51, %v18692_v50 }
0x11fd   : > { %v2563_v54 = vpop.f32.mrf.mxu0 }
0x11fe   : > { %v13858_v55 = vmul.f32 -1.442695, %v2573_v53  ;;  %v2572_v56 = vadd.f32 %v2563_v54, %v18695_v52 }
0x1200   : > { %17313 = vpow2.f32 %v13858_v55  ;;  %v13857_v57 = vmul.f32 -1.442695, %v2572_v56 }
0x1202   : > { %17315 = vpow2.f32 %v13857_v57 }
0x120d   : > { %v17314_v58 = vpop.eup %17313 }
0x120e   : > { %v2581_v43 = vadd.f32 1.0, %v17314_v58 }
0x120f   : > { %v17316_v39 = vpop.eup %17315 }
0x1210   : > { %17317 = vrcp.f32 %v2581_v43  ;;  %v2580_v4 = vadd.f32 1.0, %v17316_v39 }
0x1212   : > { %17319 = vrcp.f32 %v2580_v4 }
0x121d   : > { %v18699_v6 = vpop.eup %17317 }
0x121e   : > { %v2587_v63 = vmul.f32 %v18699_v6, %v18536_v0  ;;  %v18721_v0 = vld [vmem:[%s17889_s13 + $0x30] sm:$0xff] }
0x121f   : > { %v18703_v44 = vpop.eup %17319 }
0x1220   : > { %15587 = vmatprep.subr.mxu1 %v2587_v63  ;;  %v2586_v20 = vmul.f32 %v18703_v44, %v18542_v23 }
0x1221   : > { %15588 = vmatpush3.msra.mxu1 %v2587_v63 }
0x1222   : > { %15589 = vmatprep.subr.mxu1 %v2586_v20 }
0x1223   : > { %15590 = vmatpush3.msra.mxu1 %v2586_v20 }
0x1224   : > { %15592 = vmatmul.mubr.msk.f32.vlgmr.msra.gmra.mxu1 %vm393_vm0, %v18504_v31 }
0x1225   : > { %15598 = vmatprep.mubr.msk.f32.mxu1 %vm393_vm0, %v18508_v32 }
0x12e4   : > { %v15593_v38 = vpop.f32.mrf.mxu1 }
0x12e5   : > { %2746 = vrot.lane.b32.xlu1 %v15593_v38, %s17766_s21  ;;  %15594 = vmatprep.subr.mxu1 %v15593_v38 }
0x12e6   : > { %v2654_v21 = vpop.f32.mrf.mxu1  ;;  %15595 = vmatpush3.msra.mxu1 %v15593_v38  ;;  %v2856_v38 = vmul.f32 %v18699_v6, %v18520_v42 }
0x12e7   : > { %2744 = vrot.lane.b32.xlu0 %v2654_v21, %s17766_s21  ;;  %15596 = vmatprep.subr.mxu1 %v2654_v21 }
0x12e8   : > { %15597 = vmatpush3.msra.mxu1 %v2654_v21 }
0x12e9   : > { %15599 = vmatmul.mubr.msk.f32.vlgmr.msra.gmra.mxu1 %vm393_vm0, %v18504_v31  ;;  %15628 = vmatprep.subr.mxu1 %v18718_v22 }
0x12ea   : > { %15632 = vmatprep.mubr.msk.f32.mxu1 %vm393_vm0, %v18508_v32  ;;  %15629 = vmatpush3.msra.mxu1 %v18718_v22 }
0x12eb   : > { %15630 = vmatprep.subr.mxu1 %v18721_v0 }
0x12ec   : > { %15631 = vmatpush3.msra.mxu1 %v18721_v0 }
0x12ed   : > { %15633 = vmatmul.mubr.msk.f32.vlgmr.msra.gmra.mxu1 %vm393_vm0, %v18504_v31 }
0x12ee   : > { %15639 = vmatprep.mubr.msk.f32.mxu1 %vm393_vm0, %v18508_v32 }
0x1357   : > { %v2747_v13 = vpop.permute.xlu1 %2746 }
0x1358   : > { %v2759_v7 = vsel %vm570_vm1, %v2587_v63, %v2747_v13 }
0x1359   : > { %v2745_v19 = vpop.permute.xlu0 %2744 }
0x135a   : > { %v2758_v3 = vsel %vm570_vm1, %v2586_v20, %v2745_v19 }
0x13a9   : > { %v15600_v23 = vpop.f32.mrf.mxu1 }
0x13aa   : > { %v2739_v8 = vmul.f32 2.0, %v15600_v23 }
0x13ab   : > { %v2729_v9 = vpop.f32.mrf.mxu1 }
0x13ac   : > { %v2741_v10 = vsub.f32 %v2739_v8, %v2587_v63  ;;  %v2738_v11 = vmul.f32 2.0, %v2729_v9  ;;  %v2858_v63 = vsub.f32 1.0, %v18699_v6  ;;  %v2855_v9 = vmul.f32 %v18703_v44, %v18524_v61 }
0x13ad   : > { %v15634_v53 = vpop.f32.mrf.mxu1 }
0x13ae   : > { %v2740_v41 = vsub.f32 %v2738_v11, %v2586_v20  ;;  %2754 = vrot.lane.b32.xlu1 %v2741_v10, %s17767_s26  ;;  %15635 = vmatprep.subr.mxu1 %v15634_v53 }
0x13af   : > { %v2951_v54 = vpop.f32.mrf.mxu1  ;;  %15636 = vmatpush3.msra.mxu1 %v15634_v53 }
0x13b0   : > { %2752 = vrot.lane.b32.xlu0 %v2740_v41, %s17767_s26  ;;  %15637 = vmatprep.subr.mxu1 %v2951_v54 }
0x13b1   : > { %15638 = vmatpush3.msra.mxu1 %v2951_v54 }
0x13b2   : > { %15640 = vmatmul.mubr.msk.f32.vlgmr.msra.gmra.mxu1 %vm393_vm0, %v18504_v31 }
0x13b3   : > { %15646 = vmatprep.mubr.msk.f32.mxu1 %vm393_vm0, %v18508_v32 }
0x1420   : > { %v2755_v1 = vpop.permute.xlu1 %2754 }
0x1421   : > { %v2761_v30 = vsel %vm573_vm2, %v2759_v7, %v2755_v1 }
0x1422   : > { %v2753_v28 = vpop.permute.xlu0 %2752 }
0x1423   : > { %v2760_v29 = vsel %vm573_vm2, %v2758_v3, %v2753_v28 }
0x1424   : > { %15625 = vmatprep.mubr.msk.f32.mxu0 %vm756_vm3, %v2760_v29 }
0x1425   : > { %15626 = vmatmul.mubr.msk.f32.vlgmr.msra.gmra.mxu0 %vm756_vm3, %v2761_v30 }
0x1426   : > { %15684 = vmatpush3.msra.mxu0 %v18688_v45 }
0x1427   : > { %15685 = vmatprep.subr.mxu0 %v18743_v33 }
0x1428   : > { %15686 = vmatpush3.msra.mxu0 %v18743_v33 }
0x1429   : > { %15687 = vmatprep.subr.mxu0 %v18750_v34 }
0x142a   : > { %15688 = vmatpush3.msra.mxu0 %v18750_v34 }
0x142b   : > { %15689 = vmatprep.subr.mxu0 %v18757_v35 }
0x142c   : > { %15690 = vmatpush3.msra.mxu0 %v18757_v35 }
0x142d   : > { %15691 = vmatprep.subr.mxu0 %v18764_v36 }
0x142e   : > { %15692 = vmatpush3.msra.mxu0 %v18764_v36 }
0x142f   : > { %15693 = vmatprep.subr.mxu0 %v18771_v37 }
0x1430   : > { %15694 = vmatpush3.msra.mxu0 %v18771_v37 }
0x1431   : > { %15695 = vmatprep.subr.mxu0 %v18778_v47 }
0x1432   : > { %15696 = vmatpush3.msra.mxu0 %v18778_v47 }
0x1433   : > { %15697 = vmatprep.subr.mxu0 %v18785_v48 }
0x1434   : > { %15698 = vmatpush3.msra.mxu0 %v18785_v48 }
0x1435   : > { %15699 = vmatprep.subr.mxu0 %v18792_v27 }
0x1436   : > { %15700 = vmatpush3.msra.mxu0 %v18792_v27 }
0x1437   : > { %15701 = vmatprep.subr.mxu0 %v18799_v5 }
0x1438   : > { %15702 = vmatpush3.msra.mxu0 %v18799_v5 }
0x1439   : > { %15703 = vmatprep.subr.mxu0 %v18806_v40 }
0x143a   : > { %15704 = vmatpush3.msra.mxu0 %v18806_v40 }
0x143b   : > { %15705 = vmatprep.subr.mxu0 %v18813_v62 }
0x143c   : > { %15706 = vmatpush3.msra.mxu0 %v18813_v62 }
0x143d   : > { %15724 = vmatprep.subr.mxu0 %v18820_v46 }
0x1472   : > { %v15641_v4 = vpop.f32.mrf.mxu1 }
0x1473   : > { %v3036_v42 = vmul.f32 2.0, %v15641_v4 }
0x1474   : > { %v3026_v8 = vpop.f32.mrf.mxu1 }
0x1475   : > { %v3035_v41 = vmul.f32 2.0, %v3026_v8  ;;  %v3038_v13 = vsub.f32 %v3036_v42, %v18718_v22  ;;  %v18937_v8 = vld [vmem:[%s22277_s5 + $0x40] sm:$0xff] }
0x1476   : > { %v18965_v42 = vld [vmem:[%s22277_s5 + $0x20] sm:$0xff] }
0x1477   : > { %v3037_v6 = vsub.f32 %v3035_v41, %v18721_v0  ;;  %v18958_v41 = vld [vmem:[%s22277_s5 + $0x28] sm:$0xff] }
0x14e5   : > { %v15627_v49 = vpop.f32.mrf.mxu0 }
0x14e6   : > { %2847 = vrot.lane.b32.xlu0 %v15627_v49, %s17767_s26 }
0x14e7   : > { %v2834_v51 = vpop.f32.mrf.mxu0 }
0x14e8   : > { %2845 = vrot.lane.b32.xlu1 %v2834_v51, %s17767_s26 }
0x1558   : > { %v2848_v55 = vpop.permute.xlu0 %2847 }
0x1559   : > { %v2852_v56 = vadd.f32 %v2848_v55, %v18692_v50  ;;  %v2857_v50 = vsub.f32 1.0, %v18703_v44 }
0x155a   : > { %v2846_v57 = vpop.permute.xlu1 %2845 }
0x155b   : > { %17321 = vtanh.f32 %v2852_v56  ;;  %v2851_v58 = vadd.f32 %v2846_v57, %v18695_v52 }
0x155d   : > { %17323 = vtanh.f32 %v2851_v58 }
0x1568   : > { %v17322_v43 = vpop.eup %17321 }
0x1569   : > { %2863 = vrot.lane.b32.xlu0 %v17322_v43, %s17768_s22 }
0x156a   : > { %v17324_v39 = vpop.eup %17323 }
0x156b   : > { %2861 = vrot.lane.b32.xlu1 %v17324_v39, %s17768_s22 }
0x15db   : > { %v2864_v20 = vpop.permute.xlu0 %2863 }
0x15dc   : > { %v2868_v21 = vmul.f32 %v2864_v20, %v2858_v63 }
0x15dd   : > { %v2862_v23 = vpop.permute.xlu1 %2861 }
0x15de   : > { %v18837_v52 = vadd.f32 %v2868_v21, %v2856_v38  ;;  %v2867_v10 = vmul.f32 %v2862_v23, %v2857_v50  ;;  %v18923_v50 = vld [vmem:[%s22277_s5 + $0x50] sm:$0xff]  ;;  %v18930_v23 = vld [vmem:[%s22277_s5 + $0x48] sm:$0xff] }
0x15e0   : > { %v18841_v11 = vadd.f32 %v2867_v10, %v2855_v9  ;;  %2875 = vrot.lane.b32.xlu0 %v18837_v52, %s17768_s22  ;;  %v18944_v9 = vld [vmem:[%s22277_s5 + $0x38] sm:$0xff]  ;;  %v18951_v10 = vld [vmem:[%s22277_s5 + $0x30] sm:$0xff] }
0x15e2   : > { %2873 = vrot.lane.b32.xlu1 %v18841_v11, %s17768_s22 }
0x15e4   : > { %3041 = vrot.lane.b32.xlu0 %v2951_v54, %s17766_s21 }
0x15e6   : > { %3043 = vrot.lane.b32.xlu1 %v15634_v53, %s17766_s21 }
0x15e8   : > { %3049 = vrot.lane.b32.xlu0 %v3037_v6, %s17767_s26  ;;  %v18972_v6 = vld [vmem:[%s22277_s5 + $0x18] sm:$0xff] }
0x15ea   : > { %3051 = vrot.lane.b32.xlu1 %v3038_v13, %s17767_s26  ;;  %v18979_v13 = vld [vmem:[%s22277_s5 + $0x10] sm:$0xff] }
0x1652   : > { %v18853_v61 = vpop.permute.xlu0 %2875 }
0x1653   : > { %2881 = vst.msk [vmem:[#allocation2 + $0x28] sm:$0xff] %vm570_vm1, %v18853_v61  ;;  %15642 = vmatprep.subr.mxu1 %v18853_v61 }
0x1654   : > { %15643 = vmatpush3.msra.mxu1 %v18853_v61  ;;  %v18859_v44 = vpop.permute.xlu1 %2873 }
0x1655   : > { %2880 = vst.msk [vmem:[#allocation2 + $0x20] sm:$0xff] %vm570_vm1, %v18859_v44  ;;  %15644 = vmatprep.subr.mxu1 %v18859_v44 }
0x1656   : > { %15645 = vmatpush3.msra.mxu1 %v18859_v44  ;;  %v3042_v19 = vpop.permute.xlu0 %3041 }
0x1657   : > { %15647 = vmatmul.mubr.msk.f32.vlgmr.msra.gmra.mxu1 %vm393_vm0, %v18504_v31  ;;  %v3055_v3 = vsel %vm570_vm1, %v18721_v0, %v3042_v19  ;;  %v18986_v19 = vld [vmem:[%s22277_s5 + $0x8] sm:$0xff] }
0x1658   : > { %15653 = vmatprep.mubr.msk.f32.mxu1 %vm393_vm0, %v18508_v32  ;;  %v3044_v0 = vpop.permute.xlu1 %3043 }
0x1659   : > { %v3056_v30 = vsel %vm570_vm1, %v18718_v22, %v3044_v0 }
0x165a   : > { %v3050_v28 = vpop.permute.xlu0 %3049 }
0x165b   : > { %v3057_v29 = vsel %vm573_vm2, %v3055_v3, %v3050_v28 }
0x165c   : > { %v3052_v49 = vpop.permute.xlu1 %3051 }
0x165d   : > { %v3058_v51 = vsel %vm573_vm2, %v3056_v30, %v3052_v49 }
0x1717   : > { %v15648_v1 = vpop.f32.mrf.mxu1 }
0x1718   : > { %3217 = vrot.lane.b32.xlu1 %v15648_v1, %s17766_s21  ;;  %15649 = vmatprep.subr.mxu1 %v15648_v1 }
0x1719   : > { %v3125_v7 = vpop.f32.mrf.mxu1  ;;  %15650 = vmatpush3.msra.mxu1 %v15648_v1  ;;  %v18993_v1 = vld [vmem:[%s22277_s5] sm:$0xff] }
0x171a   : > { %3215 = vrot.lane.b32.xlu0 %v3125_v7, %s17766_s21  ;;  %15651 = vmatprep.subr.mxu1 %v3125_v7 }
0x171b   : > { %15652 = vmatpush3.msra.mxu1 %v3125_v7  ;;  %v19001_v7 = vld [vmem:[%s22278_s6] ss:$0 sm:$0xff] }
0x171c   : > { %15654 = vmatmul.mubr.msk.f32.vlgmr.msra.gmra.mxu1 %vm393_vm0, %v18504_v31  ;;  %15656 = vmatprep.subr.mxu1 %v18562_v14 }
0x171d   : > { %15657 = vmatpush3.msra.mxu1 %v18562_v14  ;;  %15680 = vmatprep.mubr.msk.f32.mxu1 %vm756_vm3, %v3057_v29 }
0x171e   : > { %15658 = vmatprep.subr.mxu1 %v18570_v12 }
0x171f   : > { %15659 = vmatpush3.msra.mxu1 %v18570_v12 }
0x1720   : > { %15660 = vmatprep.subr.mxu1 %v18577_v15 }
0x1721   : > { %15661 = vmatpush3.msra.mxu1 %v18577_v15 }
0x1722   : > { %15662 = vmatprep.subr.mxu1 %v18584_v16 }
0x1723   : > { %15663 = vmatpush3.msra.mxu1 %v18584_v16 }
0x1724   : > { %15664 = vmatprep.subr.mxu1 %v18591_v17 }
0x1725   : > { %15665 = vmatpush3.msra.mxu1 %v18591_v17 }
0x1726   : > { %15666 = vmatprep.subr.mxu1 %v18598_v18 }
0x1727   : > { %15667 = vmatpush3.msra.mxu1 %v18598_v18 }
0x1728   : > { %15668 = vmatprep.subr.mxu1 %v18605_v59 }
0x1729   : > { %15669 = vmatpush3.msra.mxu1 %v18605_v59 }
0x172a   : > { %15670 = vmatprep.subr.mxu1 %v18612_v60 }
0x172b   : > { %15671 = vmatpush3.msra.mxu1 %v18612_v60 }
0x172c   : > { %15672 = vmatprep.subr.mxu1 %v18619_v24 }
0x172d   : > { %15673 = vmatpush3.msra.mxu1 %v18619_v24 }
0x172e   : > { %15674 = vmatprep.subr.mxu1 %v18626_v25 }
0x172f   : > { %15675 = vmatpush3.msra.mxu1 %v18626_v25 }
0x1730   : > { %15676 = vmatprep.subr.mxu1 %v18635_v26 }
0x1731   : > { %15677 = vmatpush3.msra.mxu1 %v18635_v26 }
0x1732   : > { %15678 = vmatprep.subr.mxu1 %v18642_v2 }
0x1733   : > { %15679 = vmatpush3.msra.mxu1 %v18642_v2 }
0x1734   : > { %15681 = vmatmul.mubr.msk.f32.vlgmr.msra.gmra.mxu1 %vm756_vm3, %v3058_v51 }
0x1735   : > { %15714 = vmatprep.mubr.msk.f32.mxu1 %vm393_vm0, %v18508_v32 }
0x178a   : > { %v3218_v58 = vpop.permute.xlu1 %3217 }
0x178b   : > { %v3230_v20 = vsel %vm570_vm1, %v18853_v61, %v3218_v58 }
0x178c   : > { %v3216_v43 = vpop.permute.xlu0 %3215 }
0x178d   : > { %v3229_v4 = vsel %vm570_vm1, %v18859_v44, %v3216_v43 }
0x17dc   : > { %v15655_v53 = vpop.f32.mrf.mxu1 }
0x17dd   : > { %v3210_v54 = vmul.f32 2.0, %v15655_v53 }
0x17de   : > { %v3200_v55 = vpop.f32.mrf.mxu1 }
0x17df   : > { %v3212_v22 = vsub.f32 %v3210_v54, %v18853_v61  ;;  %v3209_v56 = vmul.f32 2.0, %v3200_v55 }
0x17e1   : > { %v3211_v57 = vsub.f32 %v3209_v56, %v18859_v44  ;;  %3225 = vrot.lane.b32.xlu1 %v3212_v22, %s17767_s26 }
0x17e3   : > { %3223 = vrot.lane.b32.xlu0 %v3211_v57, %s17767_s26 }
0x17f4   : > { %v15682_v3 = vpop.f32.mrf.mxu1 }
0x17f5   : > { %v19004_v29 = vadd.f32 %v19001_v7, %v15682_v3 }
0x17f6   : > { %v3305_v28 = vpop.f32.mrf.mxu1 }
0x17f7   : > { %v19007_v30 = vadd.f32 %v19001_v7, %v3305_v28 }
0x1853   : > { %v3226_v39 = vpop.permute.xlu1 %3225 }
0x1854   : > { %v3232_v21 = vsel %vm573_vm2, %v3230_v20, %v3226_v39 }
0x1855   : > { %v3224_v63 = vpop.permute.xlu0 %3223 }
0x1856   : > { %v3231_v38 = vsel %vm573_vm2, %v3229_v4, %v3224_v63 }
0x1857   : > { %15707 = vmatprep.mubr.msk.f32.mxu0 %vm756_vm3, %v3231_v38  ;;  %v19033_v38 = vld [vmem:[%s17889_s13 + $0x40] sm:$0xff] }
0x1858   : > { %15708 = vmatmul.mubr.msk.f32.vlgmr.msra.gmra.mxu0 %vm756_vm3, %v3232_v21 }
0x1859   : > { %15725 = vmatpush3.msra.mxu0 %v18820_v46 }
0x185a   : > { %15726 = vmatprep.subr.mxu0 %v18923_v50 }
0x185b   : > { %15727 = vmatpush3.msra.mxu0 %v18923_v50 }
0x185c   : > { %15728 = vmatprep.subr.mxu0 %v18930_v23 }
0x185d   : > { %15729 = vmatpush3.msra.mxu0 %v18930_v23 }
0x185e   : > { %15730 = vmatprep.subr.mxu0 %v18937_v8 }
0x185f   : > { %15731 = vmatpush3.msra.mxu0 %v18937_v8 }
0x1860   : > { %15732 = vmatprep.subr.mxu0 %v18944_v9 }
0x1861   : > { %15733 = vmatpush3.msra.mxu0 %v18944_v9 }
0x1862   : > { %15734 = vmatprep.subr.mxu0 %v18951_v10 }
0x1863   : > { %15735 = vmatpush3.msra.mxu0 %v18951_v10 }
0x1864   : > { %15736 = vmatprep.subr.mxu0 %v18958_v41 }
0x1865   : > { %15737 = vmatpush3.msra.mxu0 %v18958_v41 }
0x1866   : > { %15738 = vmatprep.subr.mxu0 %v18965_v42 }
0x1867   : > { %15739 = vmatpush3.msra.mxu0 %v18965_v42 }
0x1868   : > { %15740 = vmatprep.subr.mxu0 %v18972_v6 }
0x1869   : > { %15741 = vmatpush3.msra.mxu0 %v18972_v6 }
0x186a   : > { %15742 = vmatprep.subr.mxu0 %v18979_v13 }
0x186b   : > { %15743 = vmatpush3.msra.mxu0 %v18979_v13 }
0x186c   : > { %15744 = vmatprep.subr.mxu0 %v18986_v19 }
0x186d   : > { %15745 = vmatpush3.msra.mxu0 %v18986_v19 }
0x186e   : > { %15746 = vmatprep.subr.mxu0 %v18993_v1 }
0x186f   : > { %15747 = vmatpush3.msra.mxu0 %v18993_v1 }
0x1870   : > { %15806 = vmatprep.subr.mxu0 %v18688_v45 }
0x1918   : > { %v15709_v0 = vpop.f32.mrf.mxu0 }
0x1919   : > { %v3396_v49 = vadd.f32 %v15709_v0, %v19004_v29 }
0x191a   : > { %v3386_v51 = vpop.f32.mrf.mxu0 }
0x191b   : > { %v13880_v53 = vmul.f32 -1.442695, %v3396_v49  ;;  %v3395_v54 = vadd.f32 %v3386_v51, %v19007_v30 }
0x191d   : > { %17325 = vpow2.f32 %v13880_v53  ;;  %v13879_v55 = vmul.f32 -1.442695, %v3395_v54 }
0x191f   : > { %17327 = vpow2.f32 %v13879_v55 }
0x192a   : > { %v17326_v22 = vpop.eup %17325 }
0x192b   : > { %v3404_v56 = vadd.f32 1.0, %v17326_v22 }
0x192c   : > { %v17328_v57 = vpop.eup %17327 }
0x192d   : > { %17329 = vrcp.f32 %v3404_v56  ;;  %v3403_v58 = vadd.f32 1.0, %v17328_v57 }
0x192f   : > { %17331 = vrcp.f32 %v3403_v58 }
0x193a   : > { %v19011_v43 = vpop.eup %17329 }
0x193b   : > { %v3410_v39 = vmul.f32 %v19011_v43, %v18853_v61 }
0x193c   : > { %v19015_v4 = vpop.eup %17331 }
0x193d   : > { %15710 = vmatprep.subr.mxu1 %v3410_v39  ;;  %v3409_v63 = vmul.f32 %v19015_v4, %v18859_v44  ;;  %v19030_v44 = vld [vmem:[%s17889_s13 + $0x48] sm:$0xff] }
0x193e   : > { %15711 = vmatpush3.msra.mxu1 %v3410_v39 }
0x193f   : > { %15712 = vmatprep.subr.mxu1 %v3409_v63 }
0x1940   : > { %15713 = vmatpush3.msra.mxu1 %v3409_v63 }
0x1941   : > { %15715 = vmatmul.mubr.msk.f32.vlgmr.msra.gmra.mxu1 %vm393_vm0, %v18504_v31 }
0x1942   : > { %15721 = vmatprep.mubr.msk.f32.mxu1 %vm393_vm0, %v18508_v32 }
0x1a01   : > { %v15716_v20 = vpop.f32.mrf.mxu1 }
0x1a02   : > { %3569 = vrot.lane.b32.xlu1 %v15716_v20, %s17766_s21  ;;  %15717 = vmatprep.subr.mxu1 %v15716_v20 }
0x1a03   : > { %v3477_v61 = vpop.f32.mrf.mxu1  ;;  %15718 = vmatpush3.msra.mxu1 %v15716_v20 }
0x1a04   : > { %3567 = vrot.lane.b32.xlu0 %v3477_v61, %s17766_s21  ;;  %15719 = vmatprep.subr.mxu1 %v3477_v61 }
0x1a05   : > { %15720 = vmatpush3.msra.mxu1 %v3477_v61 }
0x1a06   : > { %15722 = vmatmul.mubr.msk.f32.vlgmr.msra.gmra.mxu1 %vm393_vm0, %v18504_v31  ;;  %15751 = vmatprep.subr.mxu1 %v19030_v44 }
0x1a07   : > { %15755 = vmatprep.mubr.msk.f32.mxu1 %vm393_vm0, %v18508_v32  ;;  %15752 = vmatpush3.msra.mxu1 %v19030_v44 }
0x1a08   : > { %15753 = vmatprep.subr.mxu1 %v19033_v38 }
0x1a09   : > { %15754 = vmatpush3.msra.mxu1 %v19033_v38 }
0x1a0a   : > { %15756 = vmatmul.mubr.msk.f32.vlgmr.msra.gmra.mxu1 %vm393_vm0, %v18504_v31 }
0x1a0b   : > { %15762 = vmatprep.mubr.msk.f32.mxu1 %vm393_vm0, %v18508_v32 }
0x1a74   : > { %v3570_v53 = vpop.permute.xlu1 %3569 }
0x1a75   : > { %v3582_v57 = vsel %vm570_vm1, %v3410_v39, %v3570_v53 }
0x1a76   : > { %v3568_v54 = vpop.permute.xlu0 %3567 }
0x1a77   : > { %v3581_v22 = vsel %vm570_vm1, %v3409_v63, %v3568_v54 }
0x1ac6   : > { %v15723_v21 = vpop.f32.mrf.mxu1 }
0x1ac7   : > { %v3562_v3 = vmul.f32 2.0, %v15723_v21 }
0x1ac8   : > { %v3552_v28 = vpop.f32.mrf.mxu1 }
0x1ac9   : > { %v3564_v0 = vsub.f32 %v3562_v3, %v3410_v39  ;;  %v3561_v49 = vmul.f32 2.0, %v3552_v28 }
0x1aca   : > { %v15757_v61 = vpop.f32.mrf.mxu1 }
0x1acb   : > { %v3563_v51 = vsub.f32 %v3561_v49, %v3409_v63  ;;  %3577 = vrot.lane.b32.xlu1 %v3564_v0, %s17767_s26  ;;  %15758 = vmatprep.subr.mxu1 %v15757_v61 }
0x1acc   : > { %v3774_v21 = vpop.f32.mrf.mxu1  ;;  %15759 = vmatpush3.msra.mxu1 %v15757_v61 }
0x1acd   : > { %3575 = vrot.lane.b32.xlu0 %v3563_v51, %s17767_s26  ;;  %15760 = vmatprep.subr.mxu1 %v3774_v21 }
0x1ace   : > { %15761 = vmatpush3.msra.mxu1 %v3774_v21 }
0x1acf   : > { %15763 = vmatmul.mubr.msk.f32.vlgmr.msra.gmra.mxu1 %vm393_vm0, %v18504_v31 }
0x1ad0   : > { %15769 = vmatprep.mubr.msk.f32.mxu1 %vm393_vm0, %v18508_v32 }
0x1b3d   : > { %v3578_v55 = vpop.permute.xlu1 %3577 }
0x1b3e   : > { %v3584_v20 = vsel %vm573_vm2, %v3582_v57, %v3578_v55  ;;  %v3681_v55 = vsub.f32 1.0, %v19011_v43 }
0x1b3f   : > { %v3576_v56 = vpop.permute.xlu0 %3575 }
0x1b40   : > { %v3583_v58 = vsel %vm573_vm2, %v3581_v22, %v3576_v56  ;;  %v3679_v56 = vmul.f32 %v19011_v43, %v18837_v52 }
0x1b41   : > { %15748 = vmatprep.mubr.msk.f32.mxu0 %vm756_vm3, %v3583_v58 }
0x1b42   : > { %15749 = vmatmul.mubr.msk.f32.vlgmr.msra.gmra.mxu0 %vm756_vm3, %v3584_v20 }
0x1b43   : > { %15807 = vmatpush3.msra.mxu0 %v18688_v45 }
0x1b44   : > { %15808 = vmatprep.subr.mxu0 %v18743_v33 }
0x1b45   : > { %15809 = vmatpush3.msra.mxu0 %v18743_v33 }
0x1b46   : > { %15810 = vmatprep.subr.mxu0 %v18750_v34 }
0x1b47   : > { %15811 = vmatpush3.msra.mxu0 %v18750_v34 }
0x1b48   : > { %15812 = vmatprep.subr.mxu0 %v18757_v35 }
0x1b49   : > { %15813 = vmatpush3.msra.mxu0 %v18757_v35 }
0x1b4a   : > { %15814 = vmatprep.subr.mxu0 %v18764_v36 }
0x1b4b   : > { %15815 = vmatpush3.msra.mxu0 %v18764_v36 }
0x1b4c   : > { %15816 = vmatprep.subr.mxu0 %v18771_v37 }
0x1b4d   : > { %15817 = vmatpush3.msra.mxu0 %v18771_v37 }
0x1b4e   : > { %15818 = vmatprep.subr.mxu0 %v18778_v47 }
0x1b4f   : > { %15819 = vmatpush3.msra.mxu0 %v18778_v47 }
0x1b50   : > { %15820 = vmatprep.subr.mxu0 %v18785_v48 }
0x1b51   : > { %15821 = vmatpush3.msra.mxu0 %v18785_v48 }
0x1b52   : > { %15822 = vmatprep.subr.mxu0 %v18792_v27 }
0x1b53   : > { %15823 = vmatpush3.msra.mxu0 %v18792_v27 }
0x1b54   : > { %15824 = vmatprep.subr.mxu0 %v18799_v5 }
0x1b55   : > { %15825 = vmatpush3.msra.mxu0 %v18799_v5 }
0x1b56   : > { %15826 = vmatprep.subr.mxu0 %v18806_v40 }
0x1b57   : > { %15827 = vmatpush3.msra.mxu0 %v18806_v40 }
0x1b58   : > { %15828 = vmatprep.subr.mxu0 %v18813_v62 }
0x1b59   : > { %15829 = vmatpush3.msra.mxu0 %v18813_v62 }
0x1b5a   : > { %15847 = vmatprep.subr.mxu0 %v18820_v46 }
0x1b8f   : > { %v15764_v54 = vpop.f32.mrf.mxu1 }
0x1b90   : > { %v3859_v52 = vmul.f32 2.0, %v15764_v54  ;;  %v19126_v54 = vld [vmem:[#allocation3 + $0x8] sm:$0xff] }
0x1b91   : > { %v3849_v20 = vpop.f32.mrf.mxu1 }
0x1c02   : > { %v15750_v39 = vpop.f32.mrf.mxu0 }
0x1c03   : > { %3670 = vrot.lane.b32.xlu0 %v15750_v39, %s17767_s26  ;;  %v3678_v39 = vmul.f32 %v19015_v4, %v18841_v11 }
0x1c04   : > { %v3657_v63 = vpop.f32.mrf.mxu0 }
0x1c05   : > { %3668 = vrot.lane.b32.xlu1 %v3657_v63, %s17767_s26 }
0x1c75   : > { %v3671_v3 = vpop.permute.xlu0 %3670 }
0x1c76   : > { %v3675_v28 = vadd.f32 %v3671_v3, %v19004_v29  ;;  %v3680_v29 = vsub.f32 1.0, %v19015_v4 }
0x1c77   : > { %v3669_v0 = vpop.permute.xlu1 %3668 }
0x1c78   : > { %17333 = vtanh.f32 %v3675_v28  ;;  %v3674_v49 = vadd.f32 %v3669_v0, %v19007_v30  ;;  %v3858_v28 = vmul.f32 2.0, %v3849_v20  ;;  %v3861_v0 = vsub.f32 %v3859_v52, %v19030_v44 }
0x1c7a   : > { %17335 = vtanh.f32 %v3674_v49  ;;  %v3860_v43 = vsub.f32 %v3858_v28, %v19033_v38 }
0x1c85   : > { %v17334_v51 = vpop.eup %17333 }
0x1c86   : > { %3686 = vrot.lane.b32.xlu0 %v17334_v51, %s17768_s22 }
0x1c87   : > { %v17336_v53 = vpop.eup %17335 }
0x1c88   : > { %3684 = vrot.lane.b32.xlu1 %v17336_v53, %s17768_s22 }
0x1cf8   : > { %v3687_v22 = vpop.permute.xlu0 %3686 }
0x1cf9   : > { %v3691_v57 = vmul.f32 %v3687_v22, %v3681_v55 }
0x1cfa   : > { %v3685_v58 = vpop.permute.xlu1 %3684 }
0x1cfb   : > { %v19089_v30 = vadd.f32 %v3691_v57, %v3679_v56  ;;  %v3690_v63 = vmul.f32 %v3685_v58, %v3680_v29 }
0x1cfd   : > { %v19093_v3 = vadd.f32 %v3690_v63, %v3678_v39  ;;  %3698 = vrot.lane.b32.xlu0 %v19089_v30, %s17768_s22 }
0x1cff   : > { %3696 = vrot.lane.b32.xlu1 %v19093_v3, %s17768_s22 }
0x1d01   : > { %3864 = vrot.lane.b32.xlu0 %v3774_v21, %s17766_s21 }
0x1d03   : > { %3866 = vrot.lane.b32.xlu1 %v15757_v61, %s17766_s21 }
0x1d05   : > { %3872 = vrot.lane.b32.xlu0 %v3860_v43, %s17767_s26 }
0x1d07   : > { %3874 = vrot.lane.b32.xlu1 %v3861_v0, %s17767_s26 }
0x1d6f   : > { %v19105_v11 = vpop.permute.xlu0 %3698 }
0x1d70   : > { %3704 = vst.msk [vmem:[#allocation2 + $0x38] sm:$0xff] %vm570_vm1, %v19105_v11  ;;  %15765 = vmatprep.subr.mxu1 %v19105_v11 }
0x1d71   : > { %15766 = vmatpush3.msra.mxu1 %v19105_v11  ;;  %v19111_v4 = vpop.permute.xlu1 %3696 }
0x1d72   : > { %3703 = vst.msk [vmem:[#allocation2 + $0x30] sm:$0xff] %vm570_vm1, %v19111_v4  ;;  %15767 = vmatprep.subr.mxu1 %v19111_v4 }
0x1d73   : > { %15768 = vmatpush3.msra.mxu1 %v19111_v4  ;;  %v3865_v61 = vpop.permute.xlu0 %3864 }
0x1d74   : > { %15770 = vmatmul.mubr.msk.f32.vlgmr.msra.gmra.mxu1 %vm393_vm0, %v18504_v31  ;;  %v3878_v49 = vsel %vm570_vm1, %v19033_v38, %v3865_v61 }
0x1d75   : > { %15776 = vmatprep.mubr.msk.f32.mxu1 %vm393_vm0, %v18508_v32  ;;  %v3867_v32 = vpop.permute.xlu1 %3866 }
0x1d77   : > { %v3873_v51 = vpop.permute.xlu0 %3872 }
0x1d78   : > { %v3880_v31 = vsel %vm573_vm2, %v3878_v49, %v3873_v51 }
0x1e34   : > { %v15771_v21 = vpop.f32.mrf.mxu1 }
0x1e35   : > { %4040 = vrot.lane.b32.xlu1 %v15771_v21, %s17766_s21  ;;  %15772 = vmatprep.subr.mxu1 %v15771_v21 }
0x1e36   : > { %v3948_v53 = vpop.f32.mrf.mxu1  ;;  %15773 = vmatpush3.msra.mxu1 %v15771_v21 }
0x1e37   : > { %4038 = vrot.lane.b32.xlu0 %v3948_v53, %s17766_s21  ;;  %15774 = vmatprep.subr.mxu1 %v3948_v53 }
0x1e38   : > { %15775 = vmatpush3.msra.mxu1 %v3948_v53 }
0x1e39   : > { %15777 = vmatmul.mubr.msk.f32.vlgmr.msra.gmra.mxu1 %vm393_vm0, %v19126_v54  ;;  %15779 = vmatprep.subr.mxu1 %v18562_v14 }
0x1e3a   : > { %15780 = vmatpush3.msra.mxu1 %v18562_v14  ;;  %15803 = vmatprep.mubr.msk.f32.mxu1 %vm756_vm3, %v3880_v31  ;;  %v3879_v14 = vsel %vm570_vm1, %v19030_v44, %v3867_v32 }
0x1e3b   : > { %15781 = vmatprep.subr.mxu1 %v18570_v12 }
0x1e3c   : > { %15782 = vmatpush3.msra.mxu1 %v18570_v12  ;;  %v3875_v12 = vpop.permute.xlu1 %3874 }
0x1e3d   : > { %15783 = vmatprep.subr.mxu1 %v18577_v15 }
0x1e3e   : > { %15784 = vmatpush3.msra.mxu1 %v18577_v15  ;;  %v3881_v15 = vsel %vm573_vm2, %v3879_v14, %v3875_v12 }
0x1e3f   : > { %15785 = vmatprep.subr.mxu1 %v18584_v16 }
0x1e40   : > { %15786 = vmatpush3.msra.mxu1 %v18584_v16  ;;  %v19159_v16 = vld [vmem:[#allocation3] sm:$0xff] }
0x1e41   : > { %15787 = vmatprep.subr.mxu1 %v18591_v17 }
0x1e42   : > { %15788 = vmatpush3.msra.mxu1 %v18591_v17 }
0x1e43   : > { %15789 = vmatprep.subr.mxu1 %v18598_v18 }
0x1e44   : > { %15790 = vmatpush3.msra.mxu1 %v18598_v18 }
0x1e45   : > { %15791 = vmatprep.subr.mxu1 %v18605_v59 }
0x1e46   : > { %15792 = vmatpush3.msra.mxu1 %v18605_v59 }
0x1e47   : > { %15793 = vmatprep.subr.mxu1 %v18612_v60 }
0x1e48   : > { %15794 = vmatpush3.msra.mxu1 %v18612_v60 }
0x1e49   : > { %15795 = vmatprep.subr.mxu1 %v18619_v24 }
0x1e4a   : > { %15796 = vmatpush3.msra.mxu1 %v18619_v24 }
0x1e4b   : > { %15797 = vmatprep.subr.mxu1 %v18626_v25 }
0x1e4c   : > { %15798 = vmatpush3.msra.mxu1 %v18626_v25 }
0x1e4d   : > { %15799 = vmatprep.subr.mxu1 %v18635_v26 }
0x1e4e   : > { %15800 = vmatpush3.msra.mxu1 %v18635_v26 }
0x1e4f   : > { %15801 = vmatprep.subr.mxu1 %v18642_v2 }
0x1e50   : > { %15802 = vmatpush3.msra.mxu1 %v18642_v2 }
0x1e51   : > { %15804 = vmatmul.mubr.msk.f32.vlgmr.msra.gmra.mxu1 %vm756_vm3, %v3881_v15  ;;  %v19229_v15 = vld [vmem:[%s17889_s13 + $0x50] sm:$0xff] }
0x1e52   : > { %15837 = vmatprep.mubr.msk.f32.mxu1 %vm393_vm0, %v19159_v16 }
0x1ea7   : > { %v4041_v26 = vpop.permute.xlu1 %4040 }
0x1ea8   : > { %v4053_v22 = vsel %vm570_vm1, %v19105_v11, %v4041_v26 }
0x1ea9   : > { %v4039_v2 = vpop.permute.xlu0 %4038 }
0x1eaa   : > { %v4052_v38 = vsel %vm570_vm1, %v19111_v4, %v4039_v2 }
0x1ef9   : > { %v15778_v17 = vpop.f32.mrf.mxu1 }
0x1efa   : > { %v4033_v18 = vmul.f32 2.0, %v15778_v17 }
0x1efb   : > { %v4023_v59 = vpop.f32.mrf.mxu1 }
0x1efc   : > { %v4035_v60 = vsub.f32 %v4033_v18, %v19105_v11  ;;  %v4032_v24 = vmul.f32 2.0, %v4023_v59 }
0x1efe   : > { %v4034_v25 = vsub.f32 %v4032_v24, %v19111_v4  ;;  %4048 = vrot.lane.b32.xlu1 %v4035_v60, %s17767_s26 }
0x1f00   : > { %4046 = vrot.lane.b32.xlu0 %v4034_v25, %s17767_s26 }
0x1f11   : > { %v15805_v29 = vpop.f32.mrf.mxu1 }
0x1f12   : > { %v19200_v20 = vadd.f32 %v19001_v7, %v15805_v29  ;;  %v19250_v29 = vld [vmem:[%s22276_s4 + $0x58] sm:$0xff] }
0x1f13   : > { %v4128_v58 = vpop.f32.mrf.mxu1 }
0x1f14   : > { %v19203_v63 = vadd.f32 %v19001_v7, %v4128_v58 }
0x1f70   : > { %v4049_v44 = vpop.permute.xlu1 %4048 }
0x1f71   : > { %v4055_v57 = vsel %vm573_vm2, %v4053_v22, %v4049_v44 }
0x1f72   : > { %v4047_v55 = vpop.permute.xlu0 %4046 }
0x1f73   : > { %v4054_v56 = vsel %vm573_vm2, %v4052_v38, %v4047_v55 }
0x1f74   : > { %15830 = vmatprep.mubr.msk.f32.mxu0 %vm756_vm3, %v4054_v56 }
0x1f75   : > { %15831 = vmatmul.mubr.msk.f32.vlgmr.msra.gmra.mxu0 %vm756_vm3, %v4055_v57 }
0x1f76   : > { %15848 = vmatpush3.msra.mxu0 %v18820_v46 }
0x1f77   : > { %15849 = vmatprep.subr.mxu0 %v18923_v50 }
0x1f78   : > { %15850 = vmatpush3.msra.mxu0 %v18923_v50 }
0x1f79   : > { %15851 = vmatprep.subr.mxu0 %v18930_v23 }
0x1f7a   : > { %15852 = vmatpush3.msra.mxu0 %v18930_v23 }
0x1f7b   : > { %15853 = vmatprep.subr.mxu0 %v18937_v8 }
0x1f7c   : > { %15854 = vmatpush3.msra.mxu0 %v18937_v8 }
0x1f7d   : > { %15855 = vmatprep.subr.mxu0 %v18944_v9 }
0x1f7e   : > { %15856 = vmatpush3.msra.mxu0 %v18944_v9 }
0x1f7f   : > { %15857 = vmatprep.subr.mxu0 %v18951_v10 }
0x1f80   : > { %15858 = vmatpush3.msra.mxu0 %v18951_v10 }
0x1f81   : > { %15859 = vmatprep.subr.mxu0 %v18958_v41 }
0x1f82   : > { %15860 = vmatpush3.msra.mxu0 %v18958_v41 }
0x1f83   : > { %15861 = vmatprep.subr.mxu0 %v18965_v42 }
0x1f84   : > { %15862 = vmatpush3.msra.mxu0 %v18965_v42 }
0x1f85   : > { %15863 = vmatprep.subr.mxu0 %v18972_v6 }
0x1f86   : > { %15864 = vmatpush3.msra.mxu0 %v18972_v6 }
0x1f87   : > { %15865 = vmatprep.subr.mxu0 %v18979_v13 }
0x1f88   : > { %15866 = vmatpush3.msra.mxu0 %v18979_v13 }
0x1f89   : > { %15867 = vmatprep.subr.mxu0 %v18986_v19 }
0x1f8a   : > { %15868 = vmatpush3.msra.mxu0 %v18986_v19 }
0x1f8b   : > { %15869 = vmatprep.subr.mxu0 %v18993_v1 }
0x1f8c   : > { %15870 = vmatpush3.msra.mxu0 %v18993_v1 }
0x1f8d   : > { %15929 = vmatprep.subr.mxu0 %v18688_v45 }
0x2035   : > { %v15832_v39 = vpop.f32.mrf.mxu0 }
0x2036   : > { %v4219_v28 = vadd.f32 %v15832_v39, %v19200_v20 }
0x2037   : > { %v4209_v52 = vpop.f32.mrf.mxu0 }
0x2038   : > { %v13902_v43 = vmul.f32 -1.442695, %v4219_v28  ;;  %v4218_v0 = vadd.f32 %v4209_v52, %v19203_v63 }
0x203a   : > { %17337 = vpow2.f32 %v13902_v43  ;;  %v13901_v61 = vmul.f32 -1.442695, %v4218_v0 }
0x203c   : > { %17339 = vpow2.f32 %v13901_v61 }
0x2047   : > { %v17338_v21 = vpop.eup %17337 }
0x2048   : > { %v4227_v45 = vadd.f32 1.0, %v17338_v21 }
0x2049   : > { %v17340_v49 = vpop.eup %17339 }
0x204a   : > { %17341 = vrcp.f32 %v4227_v45  ;;  %v4226_v51 = vadd.f32 1.0, %v17340_v49 }
0x204c   : > { %17343 = vrcp.f32 %v4226_v51 }
0x2057   : > { %v19207_v53 = vpop.eup %17341 }
0x2058   : > { %v4233_v31 = vmul.f32 %v19207_v53, %v19105_v11  ;;  %v4502_v39 = vmul.f32 %v19207_v53, %v19089_v30 }
0x2059   : > { %v19211_v32 = vpop.eup %17343 }
0x205a   : > { %15833 = vmatprep.subr.mxu1 %v4233_v31  ;;  %v4232_v14 = vmul.f32 %v19211_v32, %v19111_v4  ;;  %v19226_v4 = vld [vmem:[%s17889_s13 + $0x58] sm:$0xff]  ;;  %v4501_v0 = vmul.f32 %v19211_v32, %v19093_v3 }
0x205b   : > { %15834 = vmatpush3.msra.mxu1 %v4233_v31 }
0x205c   : > { %15835 = vmatprep.subr.mxu1 %v4232_v14 }
0x205d   : > { %15836 = vmatpush3.msra.mxu1 %v4232_v14 }
0x205e   : > { %15838 = vmatmul.mubr.msk.f32.vlgmr.msra.gmra.mxu1 %vm393_vm0, %v19126_v54 }
0x205f   : > { %15844 = vmatprep.mubr.msk.f32.mxu1 %vm393_vm0, %v19159_v16 }
0x211e   : > { %v15839_v12 = vpop.f32.mrf.mxu1 }
0x211f   : > { %4392 = vrot.lane.b32.xlu1 %v15839_v12, %s17766_s21  ;;  %15840 = vmatprep.subr.mxu1 %v15839_v12 }
0x2120   : > { %v4300_v11 = vpop.f32.mrf.mxu1  ;;  %15841 = vmatpush3.msra.mxu1 %v15839_v12 }
0x2121   : > { %4390 = vrot.lane.b32.xlu0 %v4300_v11, %s17766_s21  ;;  %15842 = vmatprep.subr.mxu1 %v4300_v11 }
0x2122   : > { %15843 = vmatpush3.msra.mxu1 %v4300_v11 }
0x2123   : > { %15845 = vmatmul.mubr.msk.f32.vlgmr.msra.gmra.mxu1 %vm393_vm0, %v19126_v54  ;;  %15874 = vmatprep.subr.mxu1 %v19226_v4 }
0x2124   : > { %15878 = vmatprep.mubr.msk.f32.mxu1 %vm393_vm0, %v19159_v16  ;;  %15875 = vmatpush3.msra.mxu1 %v19226_v4 }
0x2125   : > { %15876 = vmatprep.subr.mxu1 %v19229_v15 }
0x2126   : > { %15877 = vmatpush3.msra.mxu1 %v19229_v15 }
0x2127   : > { %15879 = vmatmul.mubr.msk.f32.vlgmr.msra.gmra.mxu1 %vm393_vm0, %v19126_v54 }
0x2128   : > { %15885 = vmatprep.mubr.msk.f32.mxu1 %vm393_vm0, %v19159_v16 }
0x2191   : > { %v4393_v26 = vpop.permute.xlu1 %4392 }
0x2192   : > { %v4405_v22 = vsel %vm570_vm1, %v4233_v31, %v4393_v26  ;;  %v19375_v26 = vld [vmem:[%s22275_s3 + $0x28] sm:$0xff] }
0x2193   : > { %v4391_v2 = vpop.permute.xlu0 %4390 }
0x2194   : > { %v4404_v38 = vsel %vm570_vm1, %v4232_v14, %v4391_v2 }
0x21e3   : > { %v15846_v17 = vpop.f32.mrf.mxu1 }
0x21e4   : > { %v4385_v18 = vmul.f32 2.0, %v15846_v17 }
0x21e5   : > { %v4375_v59 = vpop.f32.mrf.mxu1 }
0x21e6   : > { %v4387_v60 = vsub.f32 %v4385_v18, %v4233_v31  ;;  %v4384_v24 = vmul.f32 2.0, %v4375_v59  ;;  %v19332_v18 = vld [vmem:[%s22275_s3 + $0x58] sm:$0xff]  ;;  %v19347_v59 = vld [vmem:[%s22275_s3 + $0x48] sm:$0xff] }
0x21e8   : > { %v4386_v25 = vsub.f32 %v4384_v24, %v4232_v14  ;;  %4400 = vrot.lane.b32.xlu1 %v4387_v60, %s17767_s26  ;;  %v19354_v60 = vld [vmem:[%s22275_s3 + $0x40] sm:$0xff]  ;;  %v19361_v24 = vld [vmem:[%s22275_s3 + $0x38] sm:$0xff] }
0x21ea   : > { %4398 = vrot.lane.b32.xlu0 %v4386_v25, %s17767_s26  ;;  %v19368_v25 = vld [vmem:[%s22275_s3 + $0x30] sm:$0xff] }
0x225a   : > { %v4401_v44 = vpop.permute.xlu1 %4400 }
0x225b   : > { %v4407_v57 = vsel %vm573_vm2, %v4405_v22, %v4401_v44  ;;  %v19382_v44 = vld [vmem:[%s22275_s3 + $0x20] sm:$0xff] }
0x225c   : > { %v4399_v55 = vpop.permute.xlu0 %4398 }
0x225d   : > { %v4406_v56 = vsel %vm573_vm2, %v4404_v38, %v4399_v55  ;;  %v19389_v38 = vld [vmem:[%s22275_s3 + $0x18] sm:$0xff]  ;;  %v19396_v55 = vld [vmem:[%s22275_s3 + $0x10] sm:$0xff] }
0x225e   : > { %15871 = vmatprep.mubr.msk.f32.mxu0 %vm756_vm3, %v4406_v56 }
0x225f   : > { %15872 = vmatmul.mubr.msk.f32.vlgmr.msra.gmra.mxu0 %vm756_vm3, %v4407_v57  ;;  %v19405_v57 = vld [vmem:[%s22275_s3 + $0x8] sm:$0xff] }
0x2260   : > { %15930 = vmatpush3.msra.mxu0 %v19250_v29 }
0x2261   : > { %15931 = vmatprep.subr.mxu0 %v18743_v33 }
0x2262   : > { %15932 = vmatpush3.msra.mxu0 %v18743_v33 }
0x2263   : > { %15933 = vmatprep.subr.mxu0 %v18750_v34 }
0x2264   : > { %15934 = vmatpush3.msra.mxu0 %v18750_v34 }
0x2265   : > { %15935 = vmatprep.subr.mxu0 %v18757_v35 }
0x2266   : > { %15936 = vmatpush3.msra.mxu0 %v18757_v35  ;;  %v15880_v35 = vpop.f32.mrf.mxu1 }
0x2267   : > { %15937 = vmatprep.subr.mxu0 %v18764_v36  ;;  %15881 = vmatprep.subr.mxu1 %v15880_v35 }
0x2268   : > { %15938 = vmatpush3.msra.mxu0 %v18764_v36  ;;  %v4597_v36 = vpop.f32.mrf.mxu1  ;;  %15882 = vmatpush3.msra.mxu1 %v15880_v35 }
0x2269   : > { %15939 = vmatprep.subr.mxu0 %v18771_v37  ;;  %15883 = vmatprep.subr.mxu1 %v4597_v36 }
0x226a   : > { %15940 = vmatpush3.msra.mxu0 %v18771_v37  ;;  %15884 = vmatpush3.msra.mxu1 %v4597_v36 }
0x226b   : > { %15941 = vmatprep.subr.mxu0 %v18778_v47  ;;  %15886 = vmatmul.mubr.msk.f32.vlgmr.msra.gmra.mxu1 %vm393_vm0, %v19126_v54 }
0x226c   : > { %15942 = vmatpush3.msra.mxu0 %v18778_v47  ;;  %15892 = vmatprep.mubr.msk.f32.mxu1 %vm393_vm0, %v19159_v16 }
0x226d   : > { %15943 = vmatprep.subr.mxu0 %v18785_v48 }
0x226e   : > { %15944 = vmatpush3.msra.mxu0 %v18785_v48 }
0x226f   : > { %15945 = vmatprep.subr.mxu0 %v18792_v27 }
0x2270   : > { %15946 = vmatpush3.msra.mxu0 %v18792_v27 }
0x2271   : > { %15947 = vmatprep.subr.mxu0 %v18799_v5 }
0x2272   : > { %15948 = vmatpush3.msra.mxu0 %v18799_v5 }
0x2273   : > { %15949 = vmatprep.subr.mxu0 %v18806_v40 }
0x2274   : > { %15950 = vmatpush3.msra.mxu0 %v18806_v40 }
0x2275   : > { %15951 = vmatprep.subr.mxu0 %v18813_v62 }
0x2276   : > { %15952 = vmatpush3.msra.mxu0 %v18813_v62 }
0x2277   : > { %15970 = vmatprep.subr.mxu0 %v18820_v46  ;;  %v4504_v46 = vsub.f32 1.0, %v19207_v53 }
0x231f   : > { %v15873_v33 = vpop.f32.mrf.mxu0 }
0x2320   : > { %4493 = vrot.lane.b32.xlu0 %v15873_v33, %s17767_s26  ;;  %v19412_v33 = vld [vmem:[%s22275_s3] sm:$0xff] }
0x2321   : > { %v4480_v34 = vpop.f32.mrf.mxu0 }
0x2322   : > { %4491 = vrot.lane.b32.xlu1 %v4480_v34, %s17767_s26 }
0x232b   : > { %v15887_v62 = vpop.f32.mrf.mxu1 }
0x232c   : > { %v4682_v30 = vmul.f32 2.0, %v15887_v62 }
0x232d   : > { %v4672_v43 = vpop.f32.mrf.mxu1 }
0x232e   : > { %v4681_v45 = vmul.f32 2.0, %v4672_v43  ;;  %v4684_v51 = vsub.f32 %v4682_v30, %v19226_v4 }
0x2330   : > { %v4683_v49 = vsub.f32 %v4681_v45, %v19229_v15 }
0x2392   : > { %v4494_v37 = vpop.permute.xlu0 %4493 }
0x2393   : > { %v4498_v47 = vadd.f32 %v4494_v37, %v19200_v20  ;;  %v4503_v20 = vsub.f32 1.0, %v19211_v32 }
0x2394   : > { %v4492_v48 = vpop.permute.xlu1 %4491 }
0x2395   : > { %17345 = vtanh.f32 %v4498_v47  ;;  %v4497_v27 = vadd.f32 %v4492_v48, %v19203_v63 }
0x2397   : > { %17347 = vtanh.f32 %v4497_v27 }
0x23a2   : > { %v17346_v5 = vpop.eup %17345 }
0x23a3   : > { %4509 = vrot.lane.b32.xlu0 %v17346_v5, %s17768_s22 }
0x23a4   : > { %v17348_v40 = vpop.eup %17347 }
0x23a5   : > { %4507 = vrot.lane.b32.xlu1 %v17348_v40, %s17768_s22 }
0x2415   : > { %v4510_v58 = vpop.permute.xlu0 %4509 }
0x2416   : > { %v4514_v28 = vmul.f32 %v4510_v58, %v4504_v46 }
0x2417   : > { %v4508_v52 = vpop.permute.xlu1 %4507 }
0x2418   : > { %v19290_v63 = vadd.f32 %v4514_v28, %v4502_v39  ;;  %v4513_v61 = vmul.f32 %v4508_v52, %v4503_v20  ;;  %v19435_v20 = vld [vmem:[%s22277_s5 + $0x58] sm:$0xff] }
0x241a   : > { %v19294_v21 = vadd.f32 %v4513_v61, %v4501_v0  ;;  %4521 = vrot.lane.b32.xlu0 %v19290_v63, %s17768_s22 }
0x241c   : > { %4519 = vrot.lane.b32.xlu1 %v19294_v21, %s17768_s22 }
0x241e   : > { %4687 = vrot.lane.b32.xlu0 %v4597_v36, %s17766_s21 }
0x2420   : > { %4689 = vrot.lane.b32.xlu1 %v15880_v35, %s17766_s21 }
0x2422   : > { %4695 = vrot.lane.b32.xlu0 %v4683_v49, %s17767_s26 }
0x2424   : > { %4697 = vrot.lane.b32.xlu1 %v4684_v51, %s17767_s26 }
0x248c   : > { %v19306_v3 = vpop.permute.xlu0 %4521 }
0x248d   : > { %4527 = vst.msk [vmem:[#allocation2 + $0x48] sm:$0xff] %vm570_vm1, %v19306_v3  ;;  %15888 = vmatprep.subr.mxu1 %v19306_v3 }
0x248e   : > { %15889 = vmatpush3.msra.mxu1 %v19306_v3  ;;  %v19312_v53 = vpop.permute.xlu1 %4519 }
0x248f   : > { %4526 = vst.msk [vmem:[#allocation2 + $0x40] sm:$0xff] %vm570_vm1, %v19312_v53  ;;  %15890 = vmatprep.subr.mxu1 %v19312_v53 }
0x2490   : > { %15891 = vmatpush3.msra.mxu1 %v19312_v53  ;;  %v4688_v31 = vpop.permute.xlu0 %4687 }
0x2491   : > { %15893 = vmatmul.mubr.msk.f32.vlgmr.msra.gmra.mxu1 %vm393_vm0, %v19126_v54  ;;  %v4701_v14 = vsel %vm570_vm1, %v19229_v15, %v4688_v31  ;;  %v19340_v15 = vld [vmem:[%s22275_s3 + $0x50] sm:$0xff] }
0x2492   : > { %15899 = vmatprep.mubr.msk.f32.mxu1 %vm393_vm0, %v19159_v16  ;;  %v4690_v2 = vpop.permute.xlu1 %4689 }
0x2493   : > { %v4702_v22 = vsel %vm570_vm1, %v19226_v4, %v4690_v2 }
0x2494   : > { %v4696_v12 = vpop.permute.xlu0 %4695 }
0x2495   : > { %v4703_v17 = vsel %vm573_vm2, %v4701_v14, %v4696_v12 }
0x2496   : > { %v4698_v56 = vpop.permute.xlu1 %4697 }
0x2497   : > { %v4704_v34 = vsel %vm573_vm2, %v4702_v22, %v4698_v56 }
0x2551   : > { %v15894_v32 = vpop.f32.mrf.mxu1 }
0x2552   : > { %4863 = vrot.lane.b32.xlu1 %v15894_v32, %s17766_s21  ;;  %15895 = vmatprep.subr.mxu1 %v15894_v32 }
0x2553   : > { %v4771_v11 = vpop.f32.mrf.mxu1  ;;  %15896 = vmatpush3.msra.mxu1 %v15894_v32 }
0x2554   : > { %4861 = vrot.lane.b32.xlu0 %v4771_v11, %s17766_s21  ;;  %15897 = vmatprep.subr.mxu1 %v4771_v11 }
0x2555   : > { %15898 = vmatpush3.msra.mxu1 %v4771_v11 }
0x2556   : > { %15900 = vmatmul.mubr.msk.f32.vlgmr.msra.gmra.mxu1 %vm393_vm0, %v19126_v54  ;;  %15902 = vmatprep.subr.mxu1 %v19332_v18 }
0x2557   : > { %15903 = vmatpush3.msra.mxu1 %v19332_v18  ;;  %15926 = vmatprep.mubr.msk.f32.mxu1 %vm756_vm3, %v4703_v17 }
0x2558   : > { %15904 = vmatprep.subr.mxu1 %v19340_v15 }
0x2559   : > { %15905 = vmatpush3.msra.mxu1 %v19340_v15 }
0x255a   : > { %15906 = vmatprep.subr.mxu1 %v19347_v59 }
0x255b   : > { %15907 = vmatpush3.msra.mxu1 %v19347_v59 }
0x255c   : > { %15908 = vmatprep.subr.mxu1 %v19354_v60 }
0x255d   : > { %15909 = vmatpush3.msra.mxu1 %v19354_v60 }
0x255e   : > { %15910 = vmatprep.subr.mxu1 %v19361_v24 }
0x255f   : > { %15911 = vmatpush3.msra.mxu1 %v19361_v24 }
0x2560   : > { %15912 = vmatprep.subr.mxu1 %v19368_v25 }
0x2561   : > { %15913 = vmatpush3.msra.mxu1 %v19368_v25 }
0x2562   : > { %15914 = vmatprep.subr.mxu1 %v19375_v26 }
0x2563   : > { %15915 = vmatpush3.msra.mxu1 %v19375_v26 }
0x2564   : > { %15916 = vmatprep.subr.mxu1 %v19382_v44 }
0x2565   : > { %15917 = vmatpush3.msra.mxu1 %v19382_v44 }
0x2566   : > { %15918 = vmatprep.subr.mxu1 %v19389_v38 }
0x2567   : > { %15919 = vmatpush3.msra.mxu1 %v19389_v38 }
0x2568   : > { %15920 = vmatprep.subr.mxu1 %v19396_v55 }
0x2569   : > { %15921 = vmatpush3.msra.mxu1 %v19396_v55 }
0x256a   : > { %15922 = vmatprep.subr.mxu1 %v19405_v57 }
0x256b   : > { %15923 = vmatpush3.msra.mxu1 %v19405_v57 }
0x256c   : > { %15924 = vmatprep.subr.mxu1 %v19412_v33 }
0x256d   : > { %15925 = vmatpush3.msra.mxu1 %v19412_v33 }
0x256e   : > { %15927 = vmatmul.mubr.msk.f32.vlgmr.msra.gmra.mxu1 %vm756_vm3, %v4704_v34 }
0x256f   : > { %15960 = vmatprep.mubr.msk.f32.mxu1 %vm393_vm0, %v19159_v16 }
0x25c4   : > { %v4864_v27 = vpop.permute.xlu1 %4863 }
0x25c5   : > { %v4876_v58 = vsel %vm570_vm1, %v19306_v3, %v4864_v27  ;;  %v19527_v27 = vld [vmem:[%s22276_s4 + $0x40] sm:$0xff] }
0x25c6   : > { %v4862_v5 = vpop.permute.xlu0 %4861 }
0x25c7   : > { %v4875_v62 = vsel %vm570_vm1, %v19312_v53, %v4862_v5  ;;  %v19534_v5 = vld [vmem:[%s22276_s4 + $0x38] sm:$0xff] }
0x2616   : > { %v15901_v4 = vpop.f32.mrf.mxu1 }
0x2617   : > { %v4856_v35 = vmul.f32 2.0, %v15901_v4 }
0x2618   : > { %v4846_v36 = vpop.f32.mrf.mxu1 }
0x2619   : > { %v4858_v37 = vsub.f32 %v4856_v35, %v19306_v3  ;;  %v4855_v47 = vmul.f32 2.0, %v4846_v36 }
0x261b   : > { %v4857_v48 = vsub.f32 %v4855_v47, %v19312_v53  ;;  %4871 = vrot.lane.b32.xlu1 %v4858_v37, %s17767_s26  ;;  %v19513_v47 = vld [vmem:[%s22276_s4 + $0x50] sm:$0xff] }
0x261d   : > { %4869 = vrot.lane.b32.xlu0 %v4857_v48, %s17767_s26  ;;  %v19520_v48 = vld [vmem:[%s22276_s4 + $0x48] sm:$0xff] }
0x268d   : > { %v4872_v40 = vpop.permute.xlu1 %4871 }
0x268e   : > { %v4878_v28 = vsel %vm573_vm2, %v4876_v58, %v4872_v40  ;;  %v19541_v40 = vld [vmem:[%s22276_s4 + $0x30] sm:$0xff]  ;;  %v19562_v58 = vld [vmem:[%s22276_s4 + $0x18] sm:$0xff] }
0x268f   : > { %v4870_v46 = vpop.permute.xlu0 %4869 }
0x2690   : > { %v4877_v39 = vsel %vm573_vm2, %v4875_v62, %v4870_v46  ;;  %v19548_v62 = vld [vmem:[%s22276_s4 + $0x28] sm:$0xff]  ;;  %v19555_v46 = vld [vmem:[%s22276_s4 + $0x20] sm:$0xff] }
0x2691   : > { %15953 = vmatprep.mubr.msk.f32.mxu0 %vm756_vm3, %v4877_v39  ;;  %v19569_v39 = vld [vmem:[%s22276_s4 + $0x10] sm:$0xff] }
0x2692   : > { %15954 = vmatmul.mubr.msk.f32.vlgmr.msra.gmra.mxu0 %vm756_vm3, %v4878_v28  ;;  %v19576_v28 = vld [vmem:[%s22276_s4 + $0x8] sm:$0xff] }
0x2693   : > { %15971 = vmatpush3.msra.mxu0 %v19435_v20 }
0x2694   : > { %15972 = vmatprep.subr.mxu0 %v18923_v50 }
0x2695   : > { %15973 = vmatpush3.msra.mxu0 %v18923_v50  ;;  %v15928_v50 = vpop.f32.mrf.mxu1 }
0x2696   : > { %15974 = vmatprep.subr.mxu0 %v18930_v23 }
0x2697   : > { %15975 = vmatpush3.msra.mxu0 %v18930_v23  ;;  %v4951_v23 = vpop.f32.mrf.mxu1 }
0x2698   : > { %15976 = vmatprep.subr.mxu0 %v18937_v8 }
0x2699   : > { %15977 = vmatpush3.msra.mxu0 %v18937_v8  ;;  %v19462_v8 = vadd.f32 %v19001_v7, %v15928_v50  ;;  %v19583_v50 = vld [vmem:[%s22276_s4] sm:$0xff] }
0x269a   : > { %15978 = vmatprep.subr.mxu0 %v18944_v9 }
0x269b   : > { %15979 = vmatpush3.msra.mxu0 %v18944_v9 }
0x269c   : > { %15980 = vmatprep.subr.mxu0 %v18951_v10 }
0x269d   : > { %15981 = vmatpush3.msra.mxu0 %v18951_v10  ;;  %v19465_v10 = vadd.f32 %v19001_v7, %v4951_v23 }
0x269e   : > { %15982 = vmatprep.subr.mxu0 %v18958_v41 }
0x269f   : > { %15983 = vmatpush3.msra.mxu0 %v18958_v41 }
0x26a0   : > { %15984 = vmatprep.subr.mxu0 %v18965_v42 }
0x26a1   : > { %15985 = vmatpush3.msra.mxu0 %v18965_v42 }
0x26a2   : > { %15986 = vmatprep.subr.mxu0 %v18972_v6 }
0x26a3   : > { %15987 = vmatpush3.msra.mxu0 %v18972_v6 }
0x26a4   : > { %15988 = vmatprep.subr.mxu0 %v18979_v13 }
0x26a5   : > { %15989 = vmatpush3.msra.mxu0 %v18979_v13 }
0x26a6   : > { %15990 = vmatprep.subr.mxu0 %v18986_v19 }
0x26a7   : > { %15991 = vmatpush3.msra.mxu0 %v18986_v19 }
0x26a8   : > { %15992 = vmatprep.subr.mxu0 %v18993_v1 }
0x26a9   : > { %15993 = vmatpush3.msra.mxu0 %v18993_v1 }
0x26aa   : > { %16052 = vmatprep.subr.mxu0 %v19250_v29 }
0x2752   : > { %v15955_v9 = vpop.f32.mrf.mxu0 }
0x2753   : > { %v5042_v41 = vadd.f32 %v15955_v9, %v19462_v8 }
0x2754   : > { %v5032_v42 = vpop.f32.mrf.mxu0 }
0x2755   : > { %v13924_v6 = vmul.f32 -1.442695, %v5042_v41  ;;  %v5041_v13 = vadd.f32 %v5032_v42, %v19465_v10 }
0x2757   : > { %17349 = vpow2.f32 %v13924_v6  ;;  %v13923_v19 = vmul.f32 -1.442695, %v5041_v13 }
0x2759   : > { %17351 = vpow2.f32 %v13923_v19 }
0x2764   : > { %v17350_v1 = vpop.eup %17349 }
0x2765   : > { %v5050_v52 = vadd.f32 1.0, %v17350_v1 }
0x2766   : > { %v17352_v43 = vpop.eup %17351 }
0x2767   : > { %17353 = vrcp.f32 %v5050_v52  ;;  %v5049_v0 = vadd.f32 1.0, %v17352_v43 }
0x2769   : > { %17355 = vrcp.f32 %v5049_v0 }
0x2774   : > { %v19469_v61 = vpop.eup %17353 }
0x2775   : > { %v5056_v7 = vmul.f32 %v19469_v61, %v19306_v3  ;;  %v19488_v3 = vld [vmem:[%s17889_s13 + $0x68] sm:$0xff] }
0x2776   : > { %v19473_v45 = vpop.eup %17355 }
0x2777   : > { %15956 = vmatprep.subr.mxu1 %v5056_v7  ;;  %v5055_v30 = vmul.f32 %v19473_v45, %v19312_v53  ;;  %v19491_v53 = vld [vmem:[%s17889_s13 + $0x60] sm:$0xff] }
0x2778   : > { %15957 = vmatpush3.msra.mxu1 %v5056_v7 }
0x2779   : > { %15958 = vmatprep.subr.mxu1 %v5055_v30 }
0x277a   : > { %15959 = vmatpush3.msra.mxu1 %v5055_v30 }
0x277b   : > { %15961 = vmatmul.mubr.msk.f32.vlgmr.msra.gmra.mxu1 %vm393_vm0, %v19126_v54 }
0x277c   : > { %15967 = vmatprep.mubr.msk.f32.mxu1 %vm393_vm0, %v19159_v16 }
0x283b   : > { %v15962_v49 = vpop.f32.mrf.mxu1 }
0x283c   : > { %5215 = vrot.lane.b32.xlu1 %v15962_v49, %s17766_s21  ;;  %15963 = vmatprep.subr.mxu1 %v15962_v49 }
0x283d   : > { %v5123_v51 = vpop.f32.mrf.mxu1  ;;  %15964 = vmatpush3.msra.mxu1 %v15962_v49  ;;  %v5325_v49 = vmul.f32 %v19469_v61, %v19290_v63 }
0x283e   : > { %5213 = vrot.lane.b32.xlu0 %v5123_v51, %s17766_s21  ;;  %15965 = vmatprep.subr.mxu1 %v5123_v51 }
0x283f   : > { %15966 = vmatpush3.msra.mxu1 %v5123_v51 }
0x2840   : > { %15968 = vmatmul.mubr.msk.f32.vlgmr.msra.gmra.mxu1 %vm393_vm0, %v19126_v54  ;;  %15997 = vmatprep.subr.mxu1 %v19488_v3 }
0x2841   : > { %16001 = vmatprep.mubr.msk.f32.mxu1 %vm393_vm0, %v19159_v16  ;;  %15998 = vmatpush3.msra.mxu1 %v19488_v3 }
0x2842   : > { %15999 = vmatprep.subr.mxu1 %v19491_v53 }
0x2843   : > { %16000 = vmatpush3.msra.mxu1 %v19491_v53 }
0x2844   : > { %16002 = vmatmul.mubr.msk.f32.vlgmr.msra.gmra.mxu1 %vm393_vm0, %v19126_v54 }
0x2845   : > { %16008 = vmatprep.mubr.msk.f32.mxu1 %vm393_vm0, %v19159_v16 }
0x28ae   : > { %v5216_v2 = vpop.permute.xlu1 %5215 }
0x28af   : > { %v5228_v35 = vsel %vm570_vm1, %v5056_v7, %v5216_v2 }
0x28b0   : > { %v5214_v22 = vpop.permute.xlu0 %5213 }
0x28b1   : > { %v5227_v34 = vsel %vm570_vm1, %v5055_v30, %v5214_v22 }
0x2900   : > { %v15969_v31 = vpop.f32.mrf.mxu1 }
0x2901   : > { %v5208_v32 = vmul.f32 2.0, %v15969_v31 }
0x2902   : > { %v5198_v14 = vpop.f32.mrf.mxu1 }
0x2903   : > { %v5210_v12 = vsub.f32 %v5208_v32, %v5056_v7  ;;  %v5207_v11 = vmul.f32 2.0, %v5198_v14  ;;  %v5327_v7 = vsub.f32 1.0, %v19469_v61  ;;  %v5324_v14 = vmul.f32 %v19473_v45, %v19294_v21 }
0x2904   : > { %v16003_v41 = vpop.f32.mrf.mxu1 }
0x2905   : > { %v5209_v17 = vsub.f32 %v5207_v11, %v5055_v30  ;;  %5223 = vrot.lane.b32.xlu1 %v5210_v12, %s17767_s26  ;;  %16004 = vmatprep.subr.mxu1 %v16003_v41 }
0x2906   : > { %v5420_v42 = vpop.f32.mrf.mxu1  ;;  %16005 = vmatpush3.msra.mxu1 %v16003_v41 }
0x2907   : > { %5221 = vrot.lane.b32.xlu0 %v5209_v17, %s17767_s26  ;;  %16006 = vmatprep.subr.mxu1 %v5420_v42 }
0x2908   : > { %16007 = vmatpush3.msra.mxu1 %v5420_v42 }
0x2909   : > { %16009 = vmatmul.mubr.msk.f32.vlgmr.msra.gmra.mxu1 %vm393_vm0, %v19126_v54 }
0x290a   : > { %16015 = vmatprep.mubr.msk.f32.mxu1 %vm393_vm0, %v19159_v16 }
0x2977   : > { %v5224_v56 = vpop.permute.xlu1 %5223 }
0x2978   : > { %v5230_v37 = vsel %vm573_vm2, %v5228_v35, %v5224_v56 }
0x2979   : > { %v5222_v4 = vpop.permute.xlu0 %5221 }
0x297a   : > { %v5229_v36 = vsel %vm573_vm2, %v5227_v34, %v5222_v4 }
0x297b   : > { %15994 = vmatprep.mubr.msk.f32.mxu0 %vm756_vm3, %v5229_v36 }
0x297c   : > { %15995 = vmatmul.mubr.msk.f32.vlgmr.msra.gmra.mxu0 %vm756_vm3, %v5230_v37 }
0x297d   : > { %16053 = vmatpush3.msra.mxu0 %v19250_v29 }
0x297e   : > { %16054 = vmatprep.subr.mxu0 %v19513_v47 }
0x297f   : > { %16055 = vmatpush3.msra.mxu0 %v19513_v47 }
0x2980   : > { %16056 = vmatprep.subr.mxu0 %v19520_v48 }
0x2981   : > { %16057 = vmatpush3.msra.mxu0 %v19520_v48 }
0x2982   : > { %16058 = vmatprep.subr.mxu0 %v19527_v27 }
0x2983   : > { %16059 = vmatpush3.msra.mxu0 %v19527_v27 }
0x2984   : > { %16060 = vmatprep.subr.mxu0 %v19534_v5 }
0x2985   : > { %16061 = vmatpush3.msra.mxu0 %v19534_v5 }
0x2986   : > { %16062 = vmatprep.subr.mxu0 %v19541_v40 }
0x2987   : > { %16063 = vmatpush3.msra.mxu0 %v19541_v40 }
0x2988   : > { %16064 = vmatprep.subr.mxu0 %v19548_v62 }
0x2989   : > { %16065 = vmatpush3.msra.mxu0 %v19548_v62 }
0x298a   : > { %16066 = vmatprep.subr.mxu0 %v19555_v46 }
0x298b   : > { %16067 = vmatpush3.msra.mxu0 %v19555_v46 }
0x298c   : > { %16068 = vmatprep.subr.mxu0 %v19562_v58 }
0x298d   : > { %16069 = vmatpush3.msra.mxu0 %v19562_v58 }
0x298e   : > { %16070 = vmatprep.subr.mxu0 %v19569_v39 }
0x298f   : > { %16071 = vmatpush3.msra.mxu0 %v19569_v39 }
0x2990   : > { %16072 = vmatprep.subr.mxu0 %v19576_v28 }
0x2991   : > { %16073 = vmatpush3.msra.mxu0 %v19576_v28 }
0x2992   : > { %16074 = vmatprep.subr.mxu0 %v19583_v50 }
0x2993   : > { %16075 = vmatpush3.msra.mxu0 %v19583_v50 }
0x2994   : > { %16093 = vmatprep.subr.mxu0 %v19435_v20 }
0x29c9   : > { %v16010_v0 = vpop.f32.mrf.mxu1 }
0x29ca   : > { %v5505_v63 = vmul.f32 2.0, %v16010_v0 }
0x29cb   : > { %v5495_v32 = vpop.f32.mrf.mxu1 }
0x29cc   : > { %v5504_v17 = vmul.f32 2.0, %v5495_v32  ;;  %v5507_v2 = vsub.f32 %v5505_v63, %v19488_v3  ;;  %v19716_v32 = vld [vmem:[%s22277_s5 + $0x30] sm:$0xff] }
0x29cd   : > { %v19744_v63 = vld [vmem:[%s22277_s5 + $0x10] sm:$0xff] }
0x29ce   : > { %v5506_v61 = vsub.f32 %v5504_v17, %v19491_v53  ;;  %v19737_v17 = vld [vmem:[%s22277_s5 + $0x18] sm:$0xff] }
0x2a3c   : > { %v15996_v23 = vpop.f32.mrf.mxu0 }
0x2a3d   : > { %5316 = vrot.lane.b32.xlu0 %v15996_v23, %s17767_s26 }
0x2a3e   : > { %v5303_v9 = vpop.f32.mrf.mxu0 }
0x2a3f   : > { %5314 = vrot.lane.b32.xlu1 %v5303_v9, %s17767_s26 }
0x2aaf   : > { %v5317_v6 = vpop.permute.xlu0 %5316 }
0x2ab0   : > { %v5321_v13 = vadd.f32 %v5317_v6, %v19462_v8  ;;  %v5326_v8 = vsub.f32 1.0, %v19473_v45 }
0x2ab1   : > { %v5315_v19 = vpop.permute.xlu1 %5314 }
0x2ab2   : > { %17357 = vtanh.f32 %v5321_v13  ;;  %v5320_v1 = vadd.f32 %v5315_v19, %v19465_v10 }
0x2ab4   : > { %17359 = vtanh.f32 %v5320_v1 }
0x2abf   : > { %v17358_v52 = vpop.eup %17357 }
0x2ac0   : > { %5332 = vrot.lane.b32.xlu0 %v17358_v52, %s17768_s22 }
0x2ac1   : > { %v17360_v43 = vpop.eup %17359 }
0x2ac2   : > { %5330 = vrot.lane.b32.xlu1 %v17360_v43, %s17768_s22 }
0x2b32   : > { %v5333_v30 = vpop.permute.xlu0 %5332 }
0x2b33   : > { %v5337_v51 = vmul.f32 %v5333_v30, %v5327_v7 }
0x2b34   : > { %v5331_v31 = vpop.permute.xlu1 %5330 }
0x2b35   : > { %v19602_v10 = vadd.f32 %v5337_v51, %v5325_v49  ;;  %v5336_v12 = vmul.f32 %v5331_v31, %v5326_v8  ;;  %v19688_v49 = vld [vmem:[%s22277_s5 + $0x50] sm:$0xff]  ;;  %v19695_v51 = vld [vmem:[%s22277_s5 + $0x48] sm:$0xff]  ;;  %v19702_v8 = vld [vmem:[%s22277_s5 + $0x40] sm:$0xff] }
0x2b36   : > { %v19709_v31 = vld [vmem:[%s22277_s5 + $0x38] sm:$0xff] }
0x2b37   : > { %v19606_v11 = vadd.f32 %v5336_v12, %v5324_v14  ;;  %5344 = vrot.lane.b32.xlu0 %v19602_v10, %s17768_s22  ;;  %v19723_v14 = vld [vmem:[%s22277_s5 + $0x28] sm:$0xff]  ;;  %v19730_v12 = vld [vmem:[%s22277_s5 + $0x20] sm:$0xff] }
0x2b39   : > { %5342 = vrot.lane.b32.xlu1 %v19606_v11, %s17768_s22 }
0x2b3b   : > { %5510 = vrot.lane.b32.xlu0 %v5420_v42, %s17766_s21 }
0x2b3d   : > { %5512 = vrot.lane.b32.xlu1 %v16003_v41, %s17766_s21 }
0x2b3f   : > { %5518 = vrot.lane.b32.xlu0 %v5506_v61, %s17767_s26  ;;  %v19751_v61 = vld [vmem:[%s22277_s5 + $0x8] sm:$0xff] }
0x2b41   : > { %5520 = vrot.lane.b32.xlu1 %v5507_v2, %s17767_s26  ;;  %v19758_v2 = vld [vmem:[%s22277_s5] sm:$0xff] }
0x2ba9   : > { %v19618_v21 = vpop.permute.xlu0 %5344 }
0x2baa   : > { %5350 = vst.msk [vmem:[#allocation2 + $0x58] sm:$0xff] %vm570_vm1, %v19618_v21  ;;  %16011 = vmatprep.subr.mxu1 %v19618_v21 }
0x2bab   : > { %16012 = vmatpush3.msra.mxu1 %v19618_v21  ;;  %v19624_v45 = vpop.permute.xlu1 %5342 }
0x2bac   : > { %5349 = vst.msk [vmem:[#allocation2 + $0x50] sm:$0xff] %vm570_vm1, %v19624_v45  ;;  %16013 = vmatprep.subr.mxu1 %v19624_v45 }
0x2bad   : > { %16014 = vmatpush3.msra.mxu1 %v19624_v45  ;;  %v5511_v22 = vpop.permute.xlu0 %5510 }
0x2bae   : > { %16016 = vmatmul.mubr.msk.f32.vlgmr.msra.gmra.mxu1 %vm393_vm0, %v19126_v54  ;;  %v5524_v34 = vsel %vm570_vm1, %v19491_v53, %v5511_v22 }
0x2baf   : > { %16022 = vmatprep.mubr.msk.f32.mxu1 %vm393_vm0, %v19159_v16 }
0x2bb1   : > { %v5519_v4 = vpop.permute.xlu0 %5518 }
0x2bb2   : > { %v5526_v36 = vsel %vm573_vm2, %v5524_v34, %v5519_v4  ;;  %v19766_v34 = vld [vmem:[%s22278_s6] ss:$0 sm:$0xff] }
0x2c6e   : > { %v16017_v56 = vpop.f32.mrf.mxu1 }
0x2c6f   : > { %5686 = vrot.lane.b32.xlu1 %v16017_v56, %s17766_s21  ;;  %16018 = vmatprep.subr.mxu1 %v16017_v56 }
0x2c70   : > { %v5594_v35 = vpop.f32.mrf.mxu1  ;;  %16019 = vmatpush3.msra.mxu1 %v16017_v56 }
0x2c71   : > { %5684 = vrot.lane.b32.xlu0 %v5594_v35, %s17766_s21  ;;  %16020 = vmatprep.subr.mxu1 %v5594_v35 }
0x2c72   : > { %16021 = vmatpush3.msra.mxu1 %v5594_v35 }
0x2c73   : > { %16023 = vmatmul.mubr.msk.f32.vlgmr.msra.gmra.mxu1 %vm393_vm0, %v19126_v54  ;;  %16025 = vmatprep.subr.mxu1 %v19332_v18  ;;  %v5513_v54 = vpop.permute.xlu1 %5512 }
0x2c74   : > { %16026 = vmatpush3.msra.mxu1 %v19332_v18  ;;  %16049 = vmatprep.mubr.msk.f32.mxu1 %vm756_vm3, %v5526_v36  ;;  %v5525_v53 = vsel %vm570_vm1, %v19488_v3, %v5513_v54 }
0x2c75   : > { %16027 = vmatprep.subr.mxu1 %v19340_v15 }
0x2c76   : > { %16028 = vmatpush3.msra.mxu1 %v19340_v15 }
0x2c77   : > { %16029 = vmatprep.subr.mxu1 %v19347_v59  ;;  %v5521_v37 = vpop.permute.xlu1 %5520 }
0x2c78   : > { %16030 = vmatpush3.msra.mxu1 %v19347_v59  ;;  %v5527_v23 = vsel %vm573_vm2, %v5525_v53, %v5521_v37 }
0x2c79   : > { %16031 = vmatprep.subr.mxu1 %v19354_v60 }
0x2c7a   : > { %16032 = vmatpush3.msra.mxu1 %v19354_v60 }
0x2c7b   : > { %16033 = vmatprep.subr.mxu1 %v19361_v24 }
0x2c7c   : > { %16034 = vmatpush3.msra.mxu1 %v19361_v24 }
0x2c7d   : > { %16035 = vmatprep.subr.mxu1 %v19368_v25 }
0x2c7e   : > { %16036 = vmatpush3.msra.mxu1 %v19368_v25 }
0x2c7f   : > { %16037 = vmatprep.subr.mxu1 %v19375_v26 }
0x2c80   : > { %16038 = vmatpush3.msra.mxu1 %v19375_v26 }
0x2c81   : > { %16039 = vmatprep.subr.mxu1 %v19382_v44 }
0x2c82   : > { %16040 = vmatpush3.msra.mxu1 %v19382_v44 }
0x2c83   : > { %16041 = vmatprep.subr.mxu1 %v19389_v38 }
0x2c84   : > { %16042 = vmatpush3.msra.mxu1 %v19389_v38 }
0x2c85   : > { %16043 = vmatprep.subr.mxu1 %v19396_v55 }
0x2c86   : > { %16044 = vmatpush3.msra.mxu1 %v19396_v55 }
0x2c87   : > { %16045 = vmatprep.subr.mxu1 %v19405_v57 }
0x2c88   : > { %16046 = vmatpush3.msra.mxu1 %v19405_v57 }
0x2c89   : > { %16047 = vmatprep.subr.mxu1 %v19412_v33 }
0x2c8a   : > { %16048 = vmatpush3.msra.mxu1 %v19412_v33 }
0x2c8b   : > { %16050 = vmatmul.mubr.msk.f32.vlgmr.msra.gmra.mxu1 %vm756_vm3, %v5527_v23 }
0x2c8c   : > { %16083 = vmatprep.mubr.msk.f32.mxu1 %vm393_vm0, %v19159_v16 }
0x2ce1   : > { %v5687_v19 = vpop.permute.xlu1 %5686 }
0x2ce2   : > { %v5699_v16 = vsel %vm570_vm1, %v19618_v21, %v5687_v19 }
0x2ce3   : > { %v5685_v1 = vpop.permute.xlu0 %5684 }
0x2ce4   : > { %v5698_v43 = vsel %vm570_vm1, %v19624_v45, %v5685_v1 }
0x2d33   : > { %v16024_v9 = vpop.f32.mrf.mxu1 }
0x2d34   : > { %v5679_v41 = vmul.f32 2.0, %v16024_v9 }
0x2d35   : > { %v5669_v42 = vpop.f32.mrf.mxu1 }
0x2d36   : > { %v5681_v3 = vsub.f32 %v5679_v41, %v19618_v21  ;;  %v5678_v6 = vmul.f32 2.0, %v5669_v42 }
0x2d38   : > { %v5680_v13 = vsub.f32 %v5678_v6, %v19624_v45  ;;  %5694 = vrot.lane.b32.xlu1 %v5681_v3, %s17767_s26 }
0x2d3a   : > { %5692 = vrot.lane.b32.xlu0 %v5680_v13, %s17767_s26 }
0x2d4b   : > { %v16051_v22 = vpop.f32.mrf.mxu1 }
0x2d4c   : > { %v19769_v4 = vadd.f32 %v19766_v34, %v16051_v22 }
0x2d4d   : > { %v5774_v56 = vpop.f32.mrf.mxu1 }
0x2d4e   : > { %v19772_v36 = vadd.f32 %v19766_v34, %v5774_v56 }
0x2daa   : > { %v5695_v52 = vpop.permute.xlu1 %5694 }
0x2dab   : > { %v5701_v30 = vsel %vm573_vm2, %v5699_v16, %v5695_v52  ;;  %v19799_v16 = vld [vmem:[%s17889_s13 + $0x78] sm:$0xff] }
0x2dac   : > { %v5693_v0 = vpop.permute.xlu0 %5692 }
0x2dad   : > { %v5700_v7 = vsel %vm573_vm2, %v5698_v43, %v5693_v0  ;;  %v19784_v43 = vld [vmem:[#allocation3 + $0x8] sm:$0xff]  ;;  %v19788_v0 = vld [vmem:[#allocation3] sm:$0xff] }
0x2dae   : > { %16076 = vmatprep.mubr.msk.f32.mxu0 %vm756_vm3, %v5700_v7  ;;  %v19802_v7 = vld [vmem:[%s17889_s13 + $0x70] sm:$0xff] }
0x2daf   : > { %16077 = vmatmul.mubr.msk.f32.vlgmr.msra.gmra.mxu0 %vm756_vm3, %v5701_v30 }
0x2db0   : > { %16094 = vmatpush3.msra.mxu0 %v19435_v20 }
0x2db1   : > { %16095 = vmatprep.subr.mxu0 %v19688_v49 }
0x2db2   : > { %16096 = vmatpush3.msra.mxu0 %v19688_v49 }
0x2db3   : > { %16097 = vmatprep.subr.mxu0 %v19695_v51 }
0x2db4   : > { %16098 = vmatpush3.msra.mxu0 %v19695_v51 }
0x2db5   : > { %16099 = vmatprep.subr.mxu0 %v19702_v8 }
0x2db6   : > { %16100 = vmatpush3.msra.mxu0 %v19702_v8 }
0x2db7   : > { %16101 = vmatprep.subr.mxu0 %v19709_v31 }
0x2db8   : > { %16102 = vmatpush3.msra.mxu0 %v19709_v31 }
0x2db9   : > { %16103 = vmatprep.subr.mxu0 %v19716_v32 }
0x2dba   : > { %16104 = vmatpush3.msra.mxu0 %v19716_v32 }
0x2dbb   : > { %16105 = vmatprep.subr.mxu0 %v19723_v14 }
0x2dbc   : > { %16106 = vmatpush3.msra.mxu0 %v19723_v14 }
0x2dbd   : > { %16107 = vmatprep.subr.mxu0 %v19730_v12 }
0x2dbe   : > { %16108 = vmatpush3.msra.mxu0 %v19730_v12 }
0x2dbf   : > { %16109 = vmatprep.subr.mxu0 %v19737_v17 }
0x2dc0   : > { %16110 = vmatpush3.msra.mxu0 %v19737_v17 }
0x2dc1   : > { %16111 = vmatprep.subr.mxu0 %v19744_v63 }
0x2dc2   : > { %16112 = vmatpush3.msra.mxu0 %v19744_v63 }
0x2dc3   : > { %16113 = vmatprep.subr.mxu0 %v19751_v61 }
0x2dc4   : > { %16114 = vmatpush3.msra.mxu0 %v19751_v61 }
0x2dc5   : > { %16115 = vmatprep.subr.mxu0 %v19758_v2 }
0x2dc6   : > { %16116 = vmatpush3.msra.mxu0 %v19758_v2 }
0x2dc7   : > { %16175 = vmatprep.subr.mxu0 %v19250_v29 }
0x2e6f   : > { %v16078_v35 = vpop.f32.mrf.mxu0 }
0x2e70   : > { %v5865_v54 = vadd.f32 %v16078_v35, %v19769_v4 }
0x2e71   : > { %v5855_v53 = vpop.f32.mrf.mxu0 }
0x2e72   : > { %v13946_v37 = vmul.f32 -1.442695, %v5865_v54  ;;  %v5864_v23 = vadd.f32 %v5855_v53, %v19772_v36 }
0x2e74   : > { %17361 = vpow2.f32 %v13946_v37  ;;  %v13945_v9 = vmul.f32 -1.442695, %v5864_v23 }
0x2e76   : > { %17363 = vpow2.f32 %v13945_v9 }
0x2e81   : > { %v17362_v41 = vpop.eup %17361 }
0x2e82   : > { %v5873_v42 = vadd.f32 1.0, %v17362_v41 }
0x2e83   : > { %v17364_v3 = vpop.eup %17363 }
0x2e84   : > { %17365 = vrcp.f32 %v5873_v42  ;;  %v5872_v6 = vadd.f32 1.0, %v17364_v3 }
0x2e86   : > { %17367 = vrcp.f32 %v5872_v6 }
0x2e91   : > { %v19776_v13 = vpop.eup %17365 }
0x2e92   : > { %v5879_v19 = vmul.f32 %v19776_v13, %v19618_v21 }
0x2e93   : > { %v19780_v1 = vpop.eup %17367 }
0x2e94   : > { %16079 = vmatprep.subr.mxu1 %v5879_v19  ;;  %v5878_v52 = vmul.f32 %v19780_v1, %v19624_v45 }
0x2e95   : > { %16080 = vmatpush3.msra.mxu1 %v5879_v19 }
0x2e96   : > { %16081 = vmatprep.subr.mxu1 %v5878_v52 }
0x2e97   : > { %16082 = vmatpush3.msra.mxu1 %v5878_v52 }
0x2e98   : > { %16084 = vmatmul.mubr.msk.f32.vlgmr.msra.gmra.mxu1 %vm393_vm0, %v19784_v43 }
0x2e99   : > { %16090 = vmatprep.mubr.msk.f32.mxu1 %vm393_vm0, %v19788_v0 }
0x2f58   : > { %v16085_v21 = vpop.f32.mrf.mxu1 }
0x2f59   : > { %6038 = vrot.lane.b32.xlu1 %v16085_v21, %s17766_s21  ;;  %16086 = vmatprep.subr.mxu1 %v16085_v21 }
0x2f5a   : > { %v5946_v45 = vpop.f32.mrf.mxu1  ;;  %16087 = vmatpush3.msra.mxu1 %v16085_v21 }
0x2f5b   : > { %6036 = vrot.lane.b32.xlu0 %v5946_v45, %s17766_s21  ;;  %16088 = vmatprep.subr.mxu1 %v5946_v45 }
0x2f5c   : > { %16089 = vmatpush3.msra.mxu1 %v5946_v45 }
0x2f5d   : > { %16091 = vmatmul.mubr.msk.f32.vlgmr.msra.gmra.mxu1 %vm393_vm0, %v19784_v43  ;;  %16120 = vmatprep.subr.mxu1 %v19799_v16 }
0x2f5e   : > { %16124 = vmatprep.mubr.msk.f32.mxu1 %vm393_vm0, %v19788_v0  ;;  %16121 = vmatpush3.msra.mxu1 %v19799_v16 }
0x2f5f   : > { %16122 = vmatprep.subr.mxu1 %v19802_v7 }
0x2f60   : > { %16123 = vmatpush3.msra.mxu1 %v19802_v7 }
0x2f61   : > { %16125 = vmatmul.mubr.msk.f32.vlgmr.msra.gmra.mxu1 %vm393_vm0, %v19784_v43 }
0x2f62   : > { %16131 = vmatprep.mubr.msk.f32.mxu1 %vm393_vm0, %v19788_v0 }
0x2fcb   : > { %v6039_v37 = vpop.permute.xlu1 %6038 }
0x2fcc   : > { %v6051_v3 = vsel %vm570_vm1, %v5879_v19, %v6039_v37 }
0x2fcd   : > { %v6037_v23 = vpop.permute.xlu0 %6036 }
0x2fce   : > { %v6050_v41 = vsel %vm570_vm1, %v5878_v52, %v6037_v23 }
0x301d   : > { %v16092_v30 = vpop.f32.mrf.mxu1 }
0x301e   : > { %v6031_v22 = vmul.f32 2.0, %v16092_v30 }
0x301f   : > { %v6021_v56 = vpop.f32.mrf.mxu1 }
0x3020   : > { %v6033_v35 = vsub.f32 %v6031_v22, %v5879_v19  ;;  %v6030_v54 = vmul.f32 2.0, %v6021_v56  ;;  %v6147_v56 = vmul.f32 %v19780_v1, %v19606_v11 }
0x3022   : > { %v6032_v53 = vsub.f32 %v6030_v54, %v5878_v52  ;;  %6046 = vrot.lane.b32.xlu1 %v6033_v35, %s17767_s26  ;;  %v6148_v52 = vmul.f32 %v19776_v13, %v19602_v10 }
0x3024   : > { %6044 = vrot.lane.b32.xlu0 %v6032_v53, %s17767_s26 }
0x3094   : > { %v6047_v9 = vpop.permute.xlu1 %6046 }
0x3095   : > { %v6053_v21 = vsel %vm573_vm2, %v6051_v3, %v6047_v9 }
0x3096   : > { %v6045_v42 = vpop.permute.xlu0 %6044 }
0x3097   : > { %v6052_v6 = vsel %vm573_vm2, %v6050_v41, %v6045_v42 }
0x3098   : > { %16117 = vmatprep.mubr.msk.f32.mxu0 %vm756_vm3, %v6052_v6 }
0x3099   : > { %16118 = vmatmul.mubr.msk.f32.vlgmr.msra.gmra.mxu0 %vm756_vm3, %v6053_v21 }
0x309a   : > { %16176 = vmatpush3.msra.mxu0 %v19250_v29 }
0x309b   : > { %16177 = vmatprep.subr.mxu0 %v19513_v47 }
0x309c   : > { %16178 = vmatpush3.msra.mxu0 %v19513_v47 }
0x309d   : > { %16179 = vmatprep.subr.mxu0 %v19520_v48 }
0x309e   : > { %16180 = vmatpush3.msra.mxu0 %v19520_v48  ;;  %v16126_v48 = vpop.f32.mrf.mxu1 }
0x309f   : > { %16181 = vmatprep.subr.mxu0 %v19527_v27  ;;  %16127 = vmatprep.subr.mxu1 %v16126_v48 }
0x30a0   : > { %16182 = vmatpush3.msra.mxu0 %v19527_v27  ;;  %v6243_v27 = vpop.f32.mrf.mxu1  ;;  %16128 = vmatpush3.msra.mxu1 %v16126_v48 }
0x30a1   : > { %16183 = vmatprep.subr.mxu0 %v19534_v5  ;;  %16129 = vmatprep.subr.mxu1 %v6243_v27 }
0x30a2   : > { %16184 = vmatpush3.msra.mxu0 %v19534_v5  ;;  %16130 = vmatpush3.msra.mxu1 %v6243_v27 }
0x30a3   : > { %16185 = vmatprep.subr.mxu0 %v19541_v40  ;;  %16132 = vmatmul.mubr.msk.f32.vlgmr.msra.gmra.mxu1 %vm393_vm0, %v19784_v43 }
0x30a4   : > { %16186 = vmatpush3.msra.mxu0 %v19541_v40  ;;  %16138 = vmatprep.mubr.msk.f32.mxu1 %vm393_vm0, %v19788_v0 }
0x30a5   : > { %16187 = vmatprep.subr.mxu0 %v19548_v62 }
0x30a6   : > { %16188 = vmatpush3.msra.mxu0 %v19548_v62 }
0x30a7   : > { %16189 = vmatprep.subr.mxu0 %v19555_v46 }
0x30a8   : > { %16190 = vmatpush3.msra.mxu0 %v19555_v46 }
0x30a9   : > { %16191 = vmatprep.subr.mxu0 %v19562_v58 }
0x30aa   : > { %16192 = vmatpush3.msra.mxu0 %v19562_v58 }
0x30ab   : > { %16193 = vmatprep.subr.mxu0 %v19569_v39 }
0x30ac   : > { %16194 = vmatpush3.msra.mxu0 %v19569_v39 }
0x30ad   : > { %16195 = vmatprep.subr.mxu0 %v19576_v28 }
0x30ae   : > { %16196 = vmatpush3.msra.mxu0 %v19576_v28 }
0x30af   : > { %16197 = vmatprep.subr.mxu0 %v19583_v50 }
0x30b0   : > { %16198 = vmatpush3.msra.mxu0 %v19583_v50  ;;  %v6150_v50 = vsub.f32 1.0, %v19776_v13 }
0x30b1   : > { %16216 = vmatprep.subr.mxu0 %v19435_v20 }
0x3159   : > { %v16119_v29 = vpop.f32.mrf.mxu0 }
0x315a   : > { %6139 = vrot.lane.b32.xlu0 %v16119_v29, %s17767_s26 }
0x315b   : > { %v6126_v47 = vpop.f32.mrf.mxu0 }
0x315c   : > { %6137 = vrot.lane.b32.xlu1 %v6126_v47, %s17767_s26 }
0x3163   : > { %v16133_v28 = vpop.f32.mrf.mxu1 }
0x3164   : > { %v6328_v10 = vmul.f32 2.0, %v16133_v28  ;;  %v19985_v28 = vld [vmem:[#allocation2 + $0x8] sm:$0xff] }
0x3165   : > { %v6318_v22 = vpop.f32.mrf.mxu1 }
0x3166   : > { %v6327_v53 = vmul.f32 2.0, %v6318_v22  ;;  %v6330_v37 = vsub.f32 %v6328_v10, %v19799_v16  ;;  %v20010_v10 = vld [vmem:[%s17914_s20 + $0x10] sm:$0xff] }
0x3168   : > { %v6329_v13 = vsub.f32 %v6327_v53, %v19802_v7  ;;  %v20004_v53 = vld [vmem:[%s17914_s20 + $0x18] sm:$0xff]  ;;  %s13795_s20 = sshll.u32 %s20446_s18, 5 }
0x3169   : > { %s22013_s12 = scalar_lea.vmem [#allocation7], %s13795_s20  ;;  %s13636_s20 = scalar_lea.sflag [#allocation5], %s20446_s18 }
0x31cc   : > { %v6140_v5 = vpop.permute.xlu0 %6139 }
0x31cd   : > { %v6144_v40 = vadd.f32 %v6140_v5, %v19769_v4  ;;  %v6149_v4 = vsub.f32 1.0, %v19780_v1 }
0x31ce   : > { %v6138_v62 = vpop.permute.xlu1 %6137 }
0x31cf   : > { %17369 = vtanh.f32 %v6144_v40  ;;  %v6143_v46 = vadd.f32 %v6138_v62, %v19772_v36 }
0x31d1   : > { %17371 = vtanh.f32 %v6143_v46 }
0x31dc   : > { %v17370_v58 = vpop.eup %17369 }
0x31dd   : > { %6155 = vrot.lane.b32.xlu0 %v17370_v58, %s17768_s22 }
0x31de   : > { %v17372_v39 = vpop.eup %17371 }
0x31df   : > { %6153 = vrot.lane.b32.xlu1 %v17372_v39, %s17768_s22 }
0x324f   : > { %v6156_v19 = vpop.permute.xlu0 %6155 }
0x3250   : > { %v6160_v45 = vmul.f32 %v6156_v19, %v6150_v50  ;;  %v19991_v50 = vld [vmem:[#allocation2] sm:$0xff] }
0x3251   : > { %v6154_v30 = vpop.permute.xlu1 %6153 }
0x3252   : > { %v19858_v36 = vadd.f32 %v6160_v45, %v6148_v52  ;;  %v6159_v35 = vmul.f32 %v6154_v30, %v6149_v4 }
0x3254   : > { %22292 = vst [vmem:[#allocation12_spill] sm:$0xff] %v19858_v36  ;;  %v19862_v54 = vadd.f32 %v6159_v35, %v6147_v56  ;;  %6167 = vrot.lane.b32.xlu0 %v19858_v36, %s17768_s22 }
0x3256   : > { %22293 = vst [vmem:[#allocation13_spill] sm:$0xff] %v19862_v54  ;;  %6165 = vrot.lane.b32.xlu1 %v19862_v54, %s17768_s22 }
0x3258   : > { %6333 = vrot.lane.b32.xlu0 %v6243_v27, %s17766_s21 }
0x325a   : > { %6335 = vrot.lane.b32.xlu1 %v16126_v48, %s17766_s21 }
0x325c   : > { %6341 = vrot.lane.b32.xlu0 %v6329_v13, %s17767_s26 }
0x325e   : > { %6343 = vrot.lane.b32.xlu1 %v6330_v37, %s17767_s26 }
0x32c6   : > { %v19874_v11 = vpop.permute.xlu0 %6167 }
0x32c7   : > { %6173 = vst.msk [vmem:[#allocation2 + $0x68] sm:$0xff] %vm570_vm1, %v19874_v11  ;;  %16134 = vmatprep.subr.mxu1 %v19874_v11 }
0x32c8   : > { %16135 = vmatpush3.msra.mxu1 %v19874_v11  ;;  %v19880_v1 = vpop.permute.xlu1 %6165 }
0x32c9   : > { %6172 = vst.msk [vmem:[#allocation2 + $0x60] sm:$0xff] %vm570_vm1, %v19880_v1  ;;  %16136 = vmatprep.subr.mxu1 %v19880_v1 }
0x32ca   : > { %16137 = vmatpush3.msra.mxu1 %v19880_v1  ;;  %v6334_v23 = vpop.permute.xlu0 %6333 }
0x32cb   : > { %16139 = vmatmul.mubr.msk.f32.vlgmr.msra.gmra.mxu1 %vm393_vm0, %v19784_v43  ;;  %v6347_v41 = vsel %vm570_vm1, %v19802_v7, %v6334_v23 }
0x32cc   : > { %16145 = vmatprep.mubr.msk.f32.mxu1 %vm393_vm0, %v19788_v0 }
0x32ce   : > { %v6342_v42 = vpop.permute.xlu0 %6341 }
0x32cf   : > { %v6349_v6 = vsel %vm573_vm2, %v6347_v41, %v6342_v42 }
0x338b   : > { %v16140_v9 = vpop.f32.mrf.mxu1 }
0x338c   : > { %6509 = vrot.lane.b32.xlu1 %v16140_v9, %s17766_s21  ;;  %16141 = vmatprep.subr.mxu1 %v16140_v9 }
0x338d   : > { %v6417_v3 = vpop.f32.mrf.mxu1  ;;  %16142 = vmatpush3.msra.mxu1 %v16140_v9 }
0x338e   : > { %6507 = vrot.lane.b32.xlu0 %v6417_v3, %s17766_s21  ;;  %16143 = vmatprep.subr.mxu1 %v6417_v3 }
0x338f   : > { %16144 = vmatpush3.msra.mxu1 %v6417_v3 }
0x3390   : > { %16146 = vmatmul.mubr.msk.f32.vlgmr.msra.gmra.mxu1 %vm393_vm0, %v19784_v43  ;;  %16148 = vmatprep.subr.mxu1 %v19332_v18 }
0x3391   : > { %16149 = vmatpush3.msra.mxu1 %v19332_v18  ;;  %16172 = vmatprep.mubr.msk.f32.mxu1 %vm756_vm3, %v6349_v6  ;;  %v6336_v18 = vpop.permute.xlu1 %6335 }
0x3392   : > { %16150 = vmatprep.subr.mxu1 %v19340_v15 }
0x3393   : > { %16151 = vmatpush3.msra.mxu1 %v19340_v15  ;;  %v6348_v15 = vsel %vm570_vm1, %v19799_v16, %v6336_v18 }
0x3394   : > { %16152 = vmatprep.subr.mxu1 %v19347_v59 }
0x3395   : > { %16153 = vmatpush3.msra.mxu1 %v19347_v59  ;;  %v6344_v59 = vpop.permute.xlu1 %6343 }
0x3396   : > { %16154 = vmatprep.subr.mxu1 %v19354_v60 }
0x3397   : > { %16155 = vmatpush3.msra.mxu1 %v19354_v60  ;;  %v6350_v60 = vsel %vm573_vm2, %v6348_v15, %v6344_v59 }
0x3398   : > { %16156 = vmatprep.subr.mxu1 %v19361_v24 }
0x3399   : > { %16157 = vmatpush3.msra.mxu1 %v19361_v24 }
0x339a   : > { %16158 = vmatprep.subr.mxu1 %v19368_v25 }
0x339b   : > { %16159 = vmatpush3.msra.mxu1 %v19368_v25 }
0x339c   : > { %16160 = vmatprep.subr.mxu1 %v19375_v26 }
0x339d   : > { %16161 = vmatpush3.msra.mxu1 %v19375_v26 }
0x339e   : > { %16162 = vmatprep.subr.mxu1 %v19382_v44 }
0x339f   : > { %16163 = vmatpush3.msra.mxu1 %v19382_v44 }
0x33a0   : > { %16164 = vmatprep.subr.mxu1 %v19389_v38 }
0x33a1   : > { %16165 = vmatpush3.msra.mxu1 %v19389_v38 }
0x33a2   : > { %16166 = vmatprep.subr.mxu1 %v19396_v55 }
0x33a3   : > { %16167 = vmatpush3.msra.mxu1 %v19396_v55 }
0x33a4   : > { %16168 = vmatprep.subr.mxu1 %v19405_v57 }
0x33a5   : > { %16169 = vmatpush3.msra.mxu1 %v19405_v57 }
0x33a6   : > { %16170 = vmatprep.subr.mxu1 %v19412_v33 }
0x33a7   : > { %16171 = vmatpush3.msra.mxu1 %v19412_v33 }
0x33a8   : > { %16173 = vmatmul.mubr.msk.f32.vlgmr.msra.gmra.mxu1 %vm756_vm3, %v6350_v60 }
0x33a9   : > { %16206 = vmatprep.mubr.msk.f32.mxu1 %vm393_vm0, %v19788_v0 }
0x33fe   : > { %v6510_v57 = vpop.permute.xlu1 %6509 }
0x33ff   : > { %v6522_v29 = vsel %vm570_vm1, %v19874_v11, %v6510_v57  ;;  %v20066_v57 = vld [vmem:[%s22275_s3 + $0x98] sm:$0xff] }
0x3400   : > { %v6508_v16 = vpop.permute.xlu0 %6507 }
0x3401   : > { %v6521_v7 = vsel %vm570_vm1, %v19880_v1, %v6508_v16  ;;  %v20073_v16 = vld [vmem:[%s22275_s3 + $0x90] sm:$0xff] }
0x3450   : > { %v16147_v24 = vpop.f32.mrf.mxu1 }
0x3451   : > { %v6502_v25 = vmul.f32 2.0, %v16147_v24 }
0x3452   : > { %v6492_v26 = vpop.f32.mrf.mxu1 }
0x3453   : > { %v6504_v44 = vsub.f32 %v6502_v25, %v19874_v11  ;;  %v6501_v38 = vmul.f32 2.0, %v6492_v26  ;;  %v20036_v26 = vld [vmem:[%s22275_s3 + $0xb8] sm:$0xff] }
0x3455   : > { %v6503_v55 = vsub.f32 %v6501_v38, %v19880_v1  ;;  %6517 = vrot.lane.b32.xlu1 %v6504_v44, %s17767_s26  ;;  %v20042_v44 = vld [vmem:[%s22275_s3 + $0xb0] sm:$0xff]  ;;  %v20052_v38 = vld [vmem:[%s22275_s3 + $0xa8] sm:$0xff] }
0x3457   : > { %6515 = vrot.lane.b32.xlu0 %v6503_v55, %s17767_s26  ;;  %v20059_v55 = vld [vmem:[%s22275_s3 + $0xa0] sm:$0xff] }
0x34c7   : > { %v6518_v33 = vpop.permute.xlu1 %6517 }
0x34c8   : > { %v6524_v48 = vsel %vm573_vm2, %v6522_v29, %v6518_v33  ;;  %v20080_v33 = vld [vmem:[%s22275_s3 + $0x88] sm:$0xff]  ;;  %v20101_v29 = vld [vmem:[%s22275_s3 + $0x70] sm:$0xff] }
0x34c9   : > { %v6516_v21 = vpop.permute.xlu0 %6515 }
0x34ca   : > { %v6523_v47 = vsel %vm573_vm2, %v6521_v7, %v6516_v21  ;;  %v20087_v7 = vld [vmem:[%s22275_s3 + $0x80] sm:$0xff]  ;;  %v20094_v21 = vld [vmem:[%s22275_s3 + $0x78] sm:$0xff] }
0x34cb   : > { %16199 = vmatprep.mubr.msk.f32.mxu0 %vm756_vm3, %v6523_v47  ;;  %v20108_v47 = vld [vmem:[%s22275_s3 + $0x68] sm:$0xff] }
0x34cc   : > { %16200 = vmatmul.mubr.msk.f32.vlgmr.msra.gmra.mxu0 %vm756_vm3, %v6524_v48  ;;  %v20115_v48 = vld [vmem:[%s22275_s3 + $0x60] sm:$0xff] }
0x34cd   : > { %16217 = vmatpush3.msra.mxu0 %v19435_v20  ;;  %v16174_v20 = vpop.f32.mrf.mxu1 }
0x34ce   : > { %16218 = vmatprep.subr.mxu0 %v19688_v49 }
0x34cf   : > { %16219 = vmatpush3.msra.mxu0 %v19688_v49  ;;  %v6597_v49 = vpop.f32.mrf.mxu1 }
0x34d0   : > { %16220 = vmatprep.subr.mxu0 %v19695_v51 }
0x34d1   : > { %16221 = vmatpush3.msra.mxu0 %v19695_v51  ;;  %v19964_v51 = vadd.f32 %v19766_v34, %v16174_v20  ;;  %v20124_v20 = vld [vmem:[%s22276_s4 + $0xb8] sm:$0xff] }
0x34d2   : > { %16222 = vmatprep.subr.mxu0 %v19702_v8 }
0x34d3   : > { %16223 = vmatpush3.msra.mxu0 %v19702_v8 }
0x34d4   : > { %16224 = vmatprep.subr.mxu0 %v19709_v31 }
0x34d5   : > { %16225 = vmatpush3.msra.mxu0 %v19709_v31  ;;  %v19967_v31 = vadd.f32 %v19766_v34, %v6597_v49  ;;  %v20129_v49 = vld [vmem:[%s22276_s4 + $0xb0] sm:$0xff] }
0x34d6   : > { %16226 = vmatprep.subr.mxu0 %v19716_v32 }
0x34d7   : > { %16227 = vmatpush3.msra.mxu0 %v19716_v32 }
0x34d8   : > { %16228 = vmatprep.subr.mxu0 %v19723_v14 }
0x34d9   : > { %16229 = vmatpush3.msra.mxu0 %v19723_v14 }
0x34da   : > { %16230 = vmatprep.subr.mxu0 %v19730_v12 }
0x34db   : > { %16231 = vmatpush3.msra.mxu0 %v19730_v12 }
0x34dc   : > { %16232 = vmatprep.subr.mxu0 %v19737_v17 }
0x34dd   : > { %16233 = vmatpush3.msra.mxu0 %v19737_v17 }
0x34de   : > { %16234 = vmatprep.subr.mxu0 %v19744_v63 }
0x34df   : > { %16235 = vmatpush3.msra.mxu0 %v19744_v63 }
0x34e0   : > { %16236 = vmatprep.subr.mxu0 %v19751_v61 }
0x34e1   : > { %16237 = vmatpush3.msra.mxu0 %v19751_v61 }
0x34e2   : > { %16238 = vmatprep.subr.mxu0 %v19758_v2 }
0x34e3   : > { %16239 = vmatpush3.msra.mxu0 %v19758_v2 }
0x34e4   : > { %16298 = vmatprep.subr.mxu0 %v20124_v20 }
0x358c   : > { %v16201_v8 = vpop.f32.mrf.mxu0 }
0x358d   : > { %v6688_v32 = vadd.f32 %v16201_v8, %v19964_v51  ;;  %v20136_v8 = vld [vmem:[%s22276_s4 + $0xa8] sm:$0xff] }
0x358e   : > { %v6678_v14 = vpop.f32.mrf.mxu0 }
0x358f   : > { %v13968_v12 = vmul.f32 -1.442695, %v6688_v32  ;;  %v6687_v17 = vadd.f32 %v6678_v14, %v19967_v31  ;;  %v20143_v32 = vld [vmem:[%s22276_s4 + $0xa0] sm:$0xff]  ;;  %v20150_v14 = vld [vmem:[%s22276_s4 + $0x98] sm:$0xff] }
0x3591   : > { %17373 = vpow2.f32 %v13968_v12  ;;  %v13967_v63 = vmul.f32 -1.442695, %v6687_v17  ;;  %v20157_v12 = vld [vmem:[%s22276_s4 + $0x90] sm:$0xff]  ;;  %v20164_v17 = vld [vmem:[%s22276_s4 + $0x88] sm:$0xff] }
0x3593   : > { %17375 = vpow2.f32 %v13967_v63  ;;  %v20171_v63 = vld [vmem:[%s22276_s4 + $0x80] sm:$0xff] }
0x359e   : > { %v17374_v61 = vpop.eup %17373 }
0x359f   : > { %v6696_v2 = vadd.f32 1.0, %v17374_v61 }
0x35a0   : > { %v17376_v27 = vpop.eup %17375 }
0x35a1   : > { %17377 = vrcp.f32 %v6696_v2  ;;  %v6695_v5 = vadd.f32 1.0, %v17376_v27 }
0x35a3   : > { %17379 = vrcp.f32 %v6695_v5 }
0x35ae   : > { %v19971_v40 = vpop.eup %17377 }
0x35af   : > { %22294 = vst [vmem:[#allocation14_spill] sm:$0xff] %v19971_v40  ;;  %v6702_v34 = vmul.f32 %v19971_v40, %v19874_v11 }
0x35b0   : > { %v19975_v62 = vpop.eup %17379 }
0x35b1   : > { %22295 = vst [vmem:[#allocation15_spill] sm:$0xff] %v19975_v62  ;;  %16202 = vmatprep.subr.mxu1 %v6702_v34  ;;  %v6701_v46 = vmul.f32 %v19975_v62, %v19880_v1 }
0x35b2   : > { %16203 = vmatpush3.msra.mxu1 %v6702_v34 }
0x35b3   : > { %16204 = vmatprep.subr.mxu1 %v6701_v46 }
0x35b4   : > { %16205 = vmatpush3.msra.mxu1 %v6701_v46 }
0x35b5   : > { %16207 = vmatmul.mubr.msk.f32.vlgmr.msra.gmra.mxu1 %vm393_vm0, %v19784_v43 }
0x35b6   : > { %16213 = vmatprep.mubr.msk.f32.mxu1 %vm393_vm0, %v19788_v0 }
0x3675   : > { %v16208_v58 = vpop.f32.mrf.mxu1 }
0x3676   : > { %6861 = vrot.lane.b32.xlu1 %v16208_v58, %s17766_s21  ;;  %16209 = vmatprep.subr.mxu1 %v16208_v58 }
0x3677   : > { %v6769_v39 = vpop.f32.mrf.mxu1  ;;  %16210 = vmatpush3.msra.mxu1 %v16208_v58 }
0x3678   : > { %6859 = vrot.lane.b32.xlu0 %v6769_v39, %s17766_s21  ;;  %16211 = vmatprep.subr.mxu1 %v6769_v39 }
0x3679   : > { %16212 = vmatpush3.msra.mxu1 %v6769_v39 }
0x367a   : > { %16214 = vmatmul.mubr.msk.f32.vlgmr.msra.gmra.mxu1 %vm393_vm0, %v19784_v43  ;;  %16243 = vmatprep.subr.mxu1 %v19985_v28 }
0x367b   : > { %16244 = vmatpush3.msra.mxu1 %v19985_v28  ;;  %16247 = vmatprep.mubr.msk.f32.mxu1 %vm393_vm0, %v19788_v0 }
0x367c   : > { %16245 = vmatprep.subr.mxu1 %v19991_v50 }
0x367d   : > { %16246 = vmatpush3.msra.mxu1 %v19991_v50 }
0x367e   : > { %16248 = vmatmul.mubr.msk.f32.vlgmr.msra.gmra.mxu1 %vm393_vm0, %v19784_v43 }
0x367f   : > { %16254 = vmatprep.mubr.msk.f32.mxu1 %vm393_vm0, %v19788_v0 }
0x36e8   : > { %v6862_v13 = vpop.permute.xlu1 %6861 }
0x36e9   : > { %v6874_v9 = vsel %vm570_vm1, %v6702_v34, %v6862_v13 }
0x36ea   : > { %v6860_v37 = vpop.permute.xlu0 %6859 }
0x36eb   : > { %v6873_v1 = vsel %vm570_vm1, %v6701_v46, %v6860_v37 }
0x373a   : > { %v16215_v19 = vpop.f32.mrf.mxu1 }
0x373b   : > { %v6854_v52 = vmul.f32 2.0, %v16215_v19  ;;  %v20190_v19 = vld [vmem:[%s22276_s4 + $0x78] sm:$0xff] }
0x373c   : > { %v6844_v45 = vpop.f32.mrf.mxu1 }
0x373d   : > { %v6856_v4 = vsub.f32 %v6854_v52, %v6702_v34  ;;  %v6853_v30 = vmul.f32 2.0, %v6844_v45  ;;  %v20211_v52 = vld [vmem:[%s22276_s4 + $0x60] sm:$0xff] }
0x373e   : > { %v16249_v22 = vpop.f32.mrf.mxu1 }
0x373f   : > { %v6855_v56 = vsub.f32 %v6853_v30, %v6701_v46  ;;  %6869 = vrot.lane.b32.xlu1 %v6856_v4, %s17767_s26  ;;  %16250 = vmatprep.subr.mxu1 %v16249_v22 }
0x3740   : > { %v7111_v35 = vpop.f32.mrf.mxu1  ;;  %16251 = vmatpush3.msra.mxu1 %v16249_v22 }
0x3741   : > { %16252 = vmatprep.subr.mxu1 %v7111_v35  ;;  %6867 = vrot.lane.b32.xlu0 %v6855_v56, %s17767_s26 }
0x3742   : > { %16253 = vmatpush3.msra.mxu1 %v7111_v35 }
0x3743   : > { %7203 = vrot.lane.b32.xlu1 %v16249_v22, %s17766_s21  ;;  %16255 = vmatmul.mubr.msk.f32.vlgmr.msra.gmra.mxu1 %vm393_vm0, %v19784_v43 }
0x3744   : > { %16257 = vmatprep.subr.mxu1 %v20004_v53  ;;  %16261 = vmatprep.mubr.msk.f32.mxu1 %vm393_vm0, %v19788_v0 }
0x3745   : > { %16258 = vmatpush3.msra.mxu1 %v20004_v53  ;;  %7201 = vrot.lane.b32.xlu0 %v7111_v35, %s17766_s21 }
0x3746   : > { %16259 = vmatprep.subr.mxu1 %v20010_v10 }
0x3747   : > { %16260 = vmatpush3.msra.mxu1 %v20010_v10 }
0x3748   : > { %16262 = vmatmul.mubr.msk.f32.vlgmr.msra.gmra.mxu1 %vm393_vm0, %v19784_v43 }
0x3749   : > { %16268 = vmatprep.mubr.msk.f32.mxu1 %vm393_vm0, %v19788_v0 }
0x37b1   : > { %v6870_v11 = vpop.permute.xlu1 %6869 }
0x37b2   : > { %v6876_v42 = vsel %vm573_vm2, %v6874_v9, %v6870_v11 }
0x37b3   : > { %v6868_v23 = vpop.permute.xlu0 %6867 }
0x37b4   : > { %v6875_v41 = vsel %vm573_vm2, %v6873_v1, %v6868_v23 }
0x37b5   : > { %16240 = vmatprep.mubr.msk.f32.mxu0 %vm756_vm3, %v6875_v41  ;;  %v7204_v61 = vpop.permute.xlu1 %7203 }
0x37b6   : > { %16241 = vmatmul.mubr.msk.f32.vlgmr.msra.gmra.mxu0 %vm756_vm3, %v6876_v42  ;;  %v7216_v46 = vsel %vm570_vm1, %v19985_v28, %v7204_v61 }
0x37b7   : > { %16299 = vmatpush3.msra.mxu0 %v20124_v20  ;;  %v7202_v2 = vpop.permute.xlu0 %7201 }
0x37b8   : > { %16300 = vmatprep.subr.mxu0 %v20129_v49  ;;  %v7215_v5 = vsel %vm570_vm1, %v19991_v50, %v7202_v2 }
0x37b9   : > { %16301 = vmatpush3.msra.mxu0 %v20129_v49 }
0x37ba   : > { %16302 = vmatprep.subr.mxu0 %v20136_v8 }
0x37bb   : > { %16303 = vmatpush3.msra.mxu0 %v20136_v8 }
0x37bc   : > { %16304 = vmatprep.subr.mxu0 %v20143_v32 }
0x37bd   : > { %16305 = vmatpush3.msra.mxu0 %v20143_v32 }
0x37be   : > { %16306 = vmatprep.subr.mxu0 %v20150_v14 }
0x37bf   : > { %16307 = vmatpush3.msra.mxu0 %v20150_v14 }
0x37c0   : > { %16308 = vmatprep.subr.mxu0 %v20157_v12 }
0x37c1   : > { %16309 = vmatpush3.msra.mxu0 %v20157_v12 }
0x37c2   : > { %16310 = vmatprep.subr.mxu0 %v20164_v17 }
0x37c3   : > { %16311 = vmatpush3.msra.mxu0 %v20164_v17 }
0x37c4   : > { %16312 = vmatprep.subr.mxu0 %v20171_v63 }
0x37c5   : > { %16313 = vmatpush3.msra.mxu0 %v20171_v63 }
0x37c6   : > { %16314 = vmatprep.subr.mxu0 %v20190_v19 }
0x37c7   : > { %16315 = vmatpush3.msra.mxu0 %v20190_v19 }
0x3803   : > { %v16256_v3 = vpop.f32.mrf.mxu1 }
0x3804   : > { %v7196_v6 = vmul.f32 2.0, %v16256_v3 }
0x3805   : > { %v7186_v18 = vpop.f32.mrf.mxu1 }
0x3806   : > { %v7198_v15 = vsub.f32 %v7196_v6, %v19985_v28  ;;  %v7195_v59 = vmul.f32 2.0, %v7186_v18  ;;  %v20197_v28 = vld [vmem:[%s22276_s4 + $0x70] sm:$0xff]  ;;  %v20232_v18 = vld [vmem:[%s22278_s6 + $0x1] ss:$0 sm:$0xff] }
0x3807   : > { %16316 = vmatprep.subr.mxu0 %v20197_v28 }
0x3808   : > { %v7197_v60 = vsub.f32 %v7195_v59, %v19991_v50  ;;  %v16263_v24 = vpop.f32.mrf.mxu1  ;;  %7211 = vrot.lane.b32.xlu1 %v7198_v15, %s17767_s26  ;;  %16317 = vmatpush3.msra.mxu0 %v20197_v28  ;;  %v20204_v50 = vld [vmem:[%s22276_s4 + $0x68] sm:$0xff] }
0x3809   : > { %16264 = vmatprep.subr.mxu1 %v16263_v24  ;;  %16318 = vmatprep.subr.mxu0 %v20204_v50 }
0x380a   : > { %v7285_v25 = vpop.f32.mrf.mxu1  ;;  %16265 = vmatpush3.msra.mxu1 %v16263_v24  ;;  %7209 = vrot.lane.b32.xlu0 %v7197_v60, %s17767_s26 }
0x380b   : > { %16266 = vmatprep.subr.mxu1 %v7285_v25  ;;  %16319 = vmatpush3.msra.mxu0 %v20204_v50 }
0x380c   : > { %16267 = vmatpush3.msra.mxu1 %v7285_v25  ;;  %7377 = vrot.lane.b32.xlu1 %v16263_v24, %s17766_s21 }
0x380d   : > { %16269 = vmatmul.mubr.msk.f32.vlgmr.msra.gmra.mxu1 %vm393_vm0, %v19784_v43  ;;  %16271 = vmatprep.subr.mxu1 %v20036_v26 }
0x380e   : > { %7375 = vrot.lane.b32.xlu0 %v7285_v25, %s17766_s21  ;;  %16272 = vmatpush3.msra.mxu1 %v20036_v26 }
0x380f   : > { %16273 = vmatprep.subr.mxu1 %v20042_v44  ;;  %16320 = vmatprep.subr.mxu0 %v20211_v52 }
0x3810   : > { %16274 = vmatpush3.msra.mxu1 %v20042_v44  ;;  %16321 = vmatpush3.msra.mxu0 %v20211_v52 }
0x3811   : > { %16275 = vmatprep.subr.mxu1 %v20052_v38 }
0x3812   : > { %16276 = vmatpush3.msra.mxu1 %v20052_v38 }
0x3813   : > { %16277 = vmatprep.subr.mxu1 %v20059_v55 }
0x3814   : > { %16278 = vmatpush3.msra.mxu1 %v20059_v55 }
0x3815   : > { %16279 = vmatprep.subr.mxu1 %v20066_v57 }
0x3816   : > { %16280 = vmatpush3.msra.mxu1 %v20066_v57 }
0x3817   : > { %16281 = vmatprep.subr.mxu1 %v20073_v16 }
0x3818   : > { %16282 = vmatpush3.msra.mxu1 %v20073_v16 }
0x3819   : > { %16283 = vmatprep.subr.mxu1 %v20080_v33 }
0x381a   : > { %16284 = vmatpush3.msra.mxu1 %v20080_v33 }
0x381b   : > { %16285 = vmatprep.subr.mxu1 %v20087_v7 }
0x381c   : > { %16286 = vmatpush3.msra.mxu1 %v20087_v7 }
0x381d   : > { %16287 = vmatprep.subr.mxu1 %v20094_v21 }
0x381e   : > { %16288 = vmatpush3.msra.mxu1 %v20094_v21 }
0x381f   : > { %16289 = vmatprep.subr.mxu1 %v20101_v29 }
0x3820   : > { %16290 = vmatpush3.msra.mxu1 %v20101_v29 }
0x3821   : > { %16291 = vmatprep.subr.mxu1 %v20108_v47 }
0x3822   : > { %16292 = vmatpush3.msra.mxu1 %v20108_v47 }
0x3823   : > { %16293 = vmatprep.subr.mxu1 %v20115_v48 }
0x3824   : > { %16294 = vmatpush3.msra.mxu1 %v20115_v48 }
0x3876   : > { %v20227_v3 = vpop.f32.mrf.mxu0 }
0x3878   : > { %v20234_v15 = vpop.f32.mrf.mxu0 }
0x387a   : > { %v7212_v27 = vpop.permute.xlu1 %7211 }
0x387b   : > { %v7218_v39 = vsel %vm573_vm2, %v7216_v46, %v7212_v27 }
0x387c   : > { %v7210_v34 = vpop.permute.xlu0 %7209 }
0x387d   : > { %v7217_v58 = vsel %vm573_vm2, %v7215_v5, %v7210_v34 }
0x387e   : > { %16295 = vmatprep.mubr.msk.f32.mxu1 %vm756_vm3, %v7217_v58  ;;  %v7378_v13 = vpop.permute.xlu1 %7377 }
0x387f   : > { %16296 = vmatmul.mubr.msk.f32.vlgmr.msra.gmra.mxu1 %vm756_vm3, %v7218_v39  ;;  %v7390_v9 = vsel %vm570_vm1, %v20004_v53, %v7378_v13 }
0x3880   : > { %16329 = vmatprep.mubr.msk.f32.mxu1 %vm393_vm0, %v19788_v0  ;;  %v7376_v37 = vpop.permute.xlu0 %7375 }
0x3881   : > { %v7389_v1 = vsel %vm570_vm1, %v20010_v10, %v7376_v37  ;;  %v20266_v37 = vld [vmem:[#allocation2 + $0x18] sm:$0xff] }
0x38cd   : > { %v16270_v45 = vpop.f32.mrf.mxu1 }
0x38ce   : > { %v7370_v4 = vmul.f32 2.0, %v16270_v45 }
0x38cf   : > { %v7360_v30 = vpop.f32.mrf.mxu1 }
0x38d0   : > { %v7372_v22 = vsub.f32 %v7370_v4, %v20004_v53  ;;  %v7369_v56 = vmul.f32 2.0, %v7360_v30 }
0x38d2   : > { %v7371_v35 = vsub.f32 %v7369_v56, %v20010_v10  ;;  %7385 = vrot.lane.b32.xlu1 %v7372_v22, %s17767_s26 }
0x38d4   : > { %7383 = vrot.lane.b32.xlu0 %v7371_v35, %s17767_s26 }
0x393f   : > { %v16297_v6 = vpop.f32.mrf.mxu1 }
0x3940   : > { %v20237_v60 = vadd.f32 %v16297_v6, %v20232_v18  ;;  %v20318_v6 = vld [vmem:[%s22277_s5 + $0x90] sm:$0xff] }
0x3941   : > { %v7471_v59 = vpop.f32.mrf.mxu1 }
0x3942   : > { %v20240_v25 = vadd.f32 %v20232_v18, %v7471_v59  ;;  %v20325_v59 = vld [vmem:[%s22277_s5 + $0x88] sm:$0xff] }
0x3944   : > { %v7386_v11 = vpop.permute.xlu1 %7385 }
0x3945   : > { %v7392_v42 = vsel %vm573_vm2, %v7390_v9, %v7386_v11  ;;  %v20272_v11 = vld [vmem:[#allocation2 + $0x10] sm:$0xff]  ;;  %v20297_v9 = vld [vmem:[%s22277_s5 + $0xa8] sm:$0xff] }
0x3946   : > { %v7384_v23 = vpop.permute.xlu0 %7383 }
0x3947   : > { %v7391_v41 = vsel %vm573_vm2, %v7389_v1, %v7384_v23  ;;  %v20285_v1 = vld [vmem:[%s22277_s5 + $0xb8] sm:$0xff]  ;;  %v20290_v23 = vld [vmem:[%s22277_s5 + $0xb0] sm:$0xff] }
0x3948   : > { %16322 = vmatprep.mubr.msk.f32.mxu0 %vm756_vm3, %v7391_v41  ;;  %16339 = vmatprep.subr.mxu0 %v20285_v1  ;;  %v20304_v41 = vld [vmem:[%s22277_s5 + $0xa0] sm:$0xff] }
0x3949   : > { %16323 = vmatmul.mubr.msk.f32.vlgmr.msra.gmra.mxu0 %vm756_vm3, %v7392_v42  ;;  %v20311_v42 = vld [vmem:[%s22277_s5 + $0x98] sm:$0xff] }
0x394a   : > { %16340 = vmatpush3.msra.mxu0 %v20285_v1 }
0x394b   : > { %16341 = vmatprep.subr.mxu0 %v20290_v23 }
0x394c   : > { %16342 = vmatpush3.msra.mxu0 %v20290_v23 }
0x394d   : > { %16343 = vmatprep.subr.mxu0 %v20297_v9 }
0x394e   : > { %16344 = vmatpush3.msra.mxu0 %v20297_v9 }
0x394f   : > { %16345 = vmatprep.subr.mxu0 %v20304_v41 }
0x3950   : > { %16346 = vmatpush3.msra.mxu0 %v20304_v41 }
0x3951   : > { %16347 = vmatprep.subr.mxu0 %v20311_v42 }
0x3952   : > { %16348 = vmatpush3.msra.mxu0 %v20311_v42 }
0x3953   : > { %16349 = vmatprep.subr.mxu0 %v20318_v6 }
0x3954   : > { %16350 = vmatpush3.msra.mxu0 %v20318_v6 }
0x3955   : > { %16351 = vmatprep.subr.mxu0 %v20325_v59 }
0x3956   : > { %16352 = vmatpush3.msra.mxu0 %v20325_v59 }
0x3a09   : > { %v16324_v24 = vpop.f32.mrf.mxu0 }
0x3a0a   : > { %v7562_v61 = vadd.f32 %v16324_v24, %v20237_v60  ;;  %v20332_v24 = vld [vmem:[%s22277_s5 + $0x80] sm:$0xff] }
0x3a0b   : > { %v7552_v2 = vpop.f32.mrf.mxu0  ;;  %16353 = vmatprep.subr.mxu0 %v20332_v24 }
0x3a0c   : > { %v14028_v27 = vmul.f32 -1.442695, %v7562_v61  ;;  %v7561_v5 = vadd.f32 %v7552_v2, %v20240_v25  ;;  %v20339_v61 = vld [vmem:[%s22277_s5 + $0x78] sm:$0xff]  ;;  %16354 = vmatpush3.msra.mxu0 %v20332_v24  ;;  %v20346_v2 = vld [vmem:[%s22277_s5 + $0x70] sm:$0xff] }
0x3a0d   : > { %16355 = vmatprep.subr.mxu0 %v20339_v61 }
0x3a0e   : > { %17381 = vpow2.f32 %v14028_v27  ;;  %v14027_v34 = vmul.f32 -1.442695, %v7561_v5  ;;  %16356 = vmatpush3.msra.mxu0 %v20339_v61  ;;  %v20355_v27 = vld [vmem:[%s22277_s5 + $0x68] sm:$0xff]  ;;  %v20362_v5 = vld [vmem:[%s22277_s5 + $0x60] sm:$0xff] }
0x3a0f   : > { %16357 = vmatprep.subr.mxu0 %v20346_v2 }
0x3a10   : > { %17383 = vpow2.f32 %v14027_v34  ;;  %16358 = vmatpush3.msra.mxu0 %v20346_v2 }
0x3a11   : > { %16359 = vmatprep.subr.mxu0 %v20355_v27 }
0x3a12   : > { %16360 = vmatpush3.msra.mxu0 %v20355_v27 }
0x3a13   : > { %16361 = vmatprep.subr.mxu0 %v20362_v5 }
0x3a14   : > { %16362 = vmatpush3.msra.mxu0 %v20362_v5 }
0x3a15   : > { %16421 = vmatprep.subr.mxu0 %v20124_v20 }
0x3a1b   : > { %v17382_v46 = vpop.eup %17381 }
0x3a1c   : > { %v7570_v58 = vadd.f32 1.0, %v17382_v46 }
0x3a1d   : > { %v17384_v39 = vpop.eup %17383 }
0x3a1e   : > { %17385 = vrcp.f32 %v7570_v58  ;;  %v7569_v45 = vadd.f32 1.0, %v17384_v39 }
0x3a20   : > { %17387 = vrcp.f32 %v7569_v45 }
0x3a2b   : > { %v20244_v4 = vpop.eup %17385 }
0x3a2c   : > { %v20248_v30 = vmul.f32 %v20244_v4, %v20004_v53 }
0x3a2d   : > { %v20250_v22 = vpop.eup %17387 }
0x3a2e   : > { %16325 = vmatprep.subr.mxu1 %v20248_v30  ;;  %v20255_v56 = vmul.f32 %v20250_v22, %v20010_v10 }
0x3a2f   : > { %16326 = vmatpush3.msra.mxu1 %v20248_v30 }
0x3a30   : > { %16327 = vmatprep.subr.mxu1 %v20255_v56 }
0x3a31   : > { %16328 = vmatpush3.msra.mxu1 %v20255_v56 }
0x3a32   : > { %16330 = vmatmul.mubr.msk.f32.vlgmr.msra.gmra.mxu1 %vm393_vm0, %v19784_v43 }
0x3a33   : > { %16336 = vmatprep.mubr.msk.f32.mxu1 %vm393_vm0, %v19788_v0 }
0x3af2   : > { %v16331_v35 = vpop.f32.mrf.mxu1 }
0x3af3   : > { %7735 = vrot.lane.b32.xlu1 %v16331_v35, %s17766_s21  ;;  %16332 = vmatprep.subr.mxu1 %v16331_v35 }
0x3af4   : > { %v7643_v13 = vpop.f32.mrf.mxu1  ;;  %16333 = vmatpush3.msra.mxu1 %v16331_v35 }
0x3af5   : > { %7733 = vrot.lane.b32.xlu0 %v7643_v13, %s17766_s21  ;;  %16334 = vmatprep.subr.mxu1 %v7643_v13 }
0x3af6   : > { %16335 = vmatpush3.msra.mxu1 %v7643_v13 }
0x3af7   : > { %16337 = vmatmul.mubr.msk.f32.vlgmr.msra.gmra.mxu1 %vm393_vm0, %v19784_v43  ;;  %16366 = vmatprep.subr.mxu1 %v20266_v37 }
0x3af8   : > { %16367 = vmatpush3.msra.mxu1 %v20266_v37  ;;  %16370 = vmatprep.mubr.msk.f32.mxu1 %vm393_vm0, %v19788_v0 }
0x3af9   : > { %16368 = vmatprep.subr.mxu1 %v20272_v11 }
0x3afa   : > { %16369 = vmatpush3.msra.mxu1 %v20272_v11 }
0x3afb   : > { %16371 = vmatmul.mubr.msk.f32.vlgmr.msra.gmra.mxu1 %vm393_vm0, %v19784_v43 }
0x3afc   : > { %16377 = vmatprep.mubr.msk.f32.mxu1 %vm393_vm0, %v19788_v0 }
0x3bb7   : > { %v16338_v34 = vpop.f32.mrf.mxu1 }
0x3bb8   : > { %v7728_v46 = vmul.f32 2.0, %v16338_v34  ;;  %v7736_v34 = vpop.permute.xlu1 %7735 }
0x3bb9   : > { %v7718_v58 = vpop.f32.mrf.mxu1  ;;  %v7748_v40 = vsel %vm570_vm1, %v20248_v30, %v7736_v34 }
0x3bba   : > { %v7730_v39 = vsub.f32 %v7728_v46, %v20248_v30  ;;  %v7727_v45 = vmul.f32 2.0, %v7718_v58  ;;  %v7734_v46 = vpop.permute.xlu0 %7733 }
0x3bbb   : > { %v20368_v35 = vpop.f32.mrf.mxu1 }
0x3bbc   : > { %v7729_v13 = vsub.f32 %v7727_v45, %v20255_v56  ;;  %7743 = vrot.lane.b32.xlu1 %v7730_v39, %s17767_s26  ;;  %16373 = vmatprep.subr.mxu1 %v20368_v35  ;;  %v7747_v39 = vsel %vm570_vm1, %v20255_v56, %v7734_v46 }
0x3bbd   : > { %v20373_v36 = vpop.f32.mrf.mxu1  ;;  %16374 = vmatpush3.msra.mxu1 %v20368_v35 }
0x3bbe   : > { %16375 = vmatprep.subr.mxu1 %v20373_v36  ;;  %7741 = vrot.lane.b32.xlu0 %v7729_v13, %s17767_s26 }
0x3bbf   : > { %16376 = vmatpush3.msra.mxu1 %v20373_v36 }
0x3bc0   : > { %16378 = vmatmul.mubr.msk.f32.vlgmr.msra.gmra.mxu1 %vm393_vm0, %v19784_v43 }
0x3bc1   : > { %16384 = vmatprep.mubr.msk.f32.mxu1 %vm393_vm0, %v19788_v0 }
0x3c2e   : > { %v7744_v58 = vpop.permute.xlu1 %7743 }
0x3c2f   : > { %v7750_v54 = vsel %vm573_vm2, %v7748_v40, %v7744_v58 }
0x3c30   : > { %v7742_v45 = vpop.permute.xlu0 %7741 }
0x3c31   : > { %v7749_v13 = vsel %vm573_vm2, %v7747_v39, %v7742_v45 }
0x3c32   : > { %16363 = vmatprep.mubr.msk.f32.mxu0 %vm756_vm3, %v7749_v13 }
0x3c33   : > { %16364 = vmatmul.mubr.msk.f32.vlgmr.msra.gmra.mxu0 %vm756_vm3, %v7750_v54 }
0x3c34   : > { %16422 = vmatpush3.msra.mxu0 %v20124_v20 }
0x3c35   : > { %16423 = vmatprep.subr.mxu0 %v20129_v49 }
0x3c36   : > { %16424 = vmatpush3.msra.mxu0 %v20129_v49 }
0x3c37   : > { %16425 = vmatprep.subr.mxu0 %v20136_v8 }
0x3c38   : > { %16426 = vmatpush3.msra.mxu0 %v20136_v8 }
0x3c39   : > { %16427 = vmatprep.subr.mxu0 %v20143_v32 }
0x3c3a   : > { %16428 = vmatpush3.msra.mxu0 %v20143_v32 }
0x3c3b   : > { %16429 = vmatprep.subr.mxu0 %v20150_v14 }
0x3c3c   : > { %16430 = vmatpush3.msra.mxu0 %v20150_v14 }
0x3c3d   : > { %16431 = vmatprep.subr.mxu0 %v20157_v12 }
0x3c3e   : > { %16432 = vmatpush3.msra.mxu0 %v20157_v12 }
0x3c3f   : > { %16433 = vmatprep.subr.mxu0 %v20164_v17 }
0x3c40   : > { %16434 = vmatpush3.msra.mxu0 %v20164_v17 }
0x3c41   : > { %16435 = vmatprep.subr.mxu0 %v20171_v63 }
0x3c42   : > { %16436 = vmatpush3.msra.mxu0 %v20171_v63 }
0x3c43   : > { %16437 = vmatprep.subr.mxu0 %v20190_v19 }
0x3c44   : > { %16438 = vmatpush3.msra.mxu0 %v20190_v19 }
0x3c45   : > { %16439 = vmatprep.subr.mxu0 %v20197_v28 }
0x3c46   : > { %16440 = vmatpush3.msra.mxu0 %v20197_v28 }
0x3c47   : > { %16441 = vmatprep.subr.mxu0 %v20204_v50 }
0x3c48   : > { %16442 = vmatpush3.msra.mxu0 %v20204_v50 }
0x3c49   : > { %16443 = vmatprep.subr.mxu0 %v20211_v52 }
0x3c4a   : > { %16444 = vmatpush3.msra.mxu0 %v20211_v52 }
0x3c4b   : > { %16462 = vmatprep.subr.mxu0 %v20285_v1 }
0x3c80   : > { %v16379_v39 = vpop.f32.mrf.mxu1 }
0x3cf3   : > { %v16365_v43 = vpop.f32.mrf.mxu0 }
0x3cf4   : > { %7836 = vrot.lane.b32.xlu0 %v16365_v43, %s17767_s26 }
0x3cf5   : > { %v7823_v0 = vpop.f32.mrf.mxu0 }
0x3cf6   : > { %7834 = vrot.lane.b32.xlu1 %v7823_v0, %s17767_s26  ;;  %v8021_v0 = vpop.f32.mrf.mxu1 }
0x3cf8   : > { %7848 = vrot.lane.b32.xlu0 %v20004_v53, %s17766_s21  ;;  %v7855_v53 = vsub.f32 1.0, %v20244_v4 }
0x3cfc   : > { %7846 = vrot.lane.b32.xlu0 %v20010_v10, %s17766_s21 }
0x3d66   : > { %v7837_v54 = vpop.permute.xlu0 %7836 }
0x3d67   : > { %v7841_v40 = vadd.f32 %v7837_v54, %v20237_v60 }
0x3d68   : > { %v7835_v30 = vpop.permute.xlu1 %7834 }
0x3d69   : > { %17389 = vtanh.f32 %v7841_v40  ;;  %v7840_v56 = vadd.f32 %v7835_v30, %v20240_v25  ;;  %v7854_v25 = vsub.f32 1.0, %v20250_v22 }
0x3d6a   : > { %v7849_v58 = vpop.permute.xlu0 %7848 }
0x3d6b   : > { %17391 = vtanh.f32 %v7840_v56  ;;  %v7853_v10 = vmul.f32 %v20244_v4, %v7849_v58  ;;  %v8030_v56 = vmul.f32 2.0, %v8021_v0  ;;  %v8031_v4 = vmul.f32 2.0, %v16379_v39  ;;  %v20465_v58 = vld [vmem:[#allocation3 + $0x8] sm:$0xff] }
0x3d6e   : > { %v7847_v60 = vpop.permute.xlu0 %7846 }
0x3d6f   : > { %v7852_v40 = vmul.f32 %v20250_v22, %v7847_v60  ;;  %v8033_v22 = vsub.f32 %v8031_v4, %v20266_v37 }
0x3d76   : > { %v17390_v34 = vpop.eup %17389 }
0x3d77   : > { %7860 = vrot.lane.b32.xlu1 %v17390_v34, %s17768_s22 }
0x3d78   : > { %v17392_v46 = vpop.eup %17391 }
0x3d7b   : > { %7858 = vrot.lane.b32.xlu1 %v17392_v46, %s17768_s22  ;;  %v8032_v46 = vsub.f32 %v8030_v56, %v20272_v11 }
0x3de9   : > { %v7861_v45 = vpop.permute.xlu1 %7860 }
0x3dea   : > { %v7865_v13 = vmul.f32 %v7861_v45, %v7855_v53  ;;  %v20469_v53 = vld [vmem:[#allocation3] sm:$0xff] }
0x3dec   : > { %v20427_v43 = vadd.f32 %v7865_v13, %v7853_v10 }
0x3ded   : > { %v7859_v54 = vpop.permute.xlu1 %7858 }
0x3dee   : > { %v7864_v30 = vmul.f32 %v7859_v54, %v7854_v25  ;;  %7872 = vrot.lane.b32.xlu0 %v20427_v43, %s17768_s22 }
0x3df0   : > { %v20433_v34 = vadd.f32 %v7864_v30, %v7852_v40 }
0x3df2   : > { %8036 = vrot.lane.b32.xlu0 %v20373_v36, %s17766_s21  ;;  %7870 = vrot.lane.b32.xlu1 %v20433_v34, %s17768_s22 }
0x3df6   : > { %8044 = vrot.lane.b32.xlu0 %v8032_v46, %s17767_s26  ;;  %8038 = vrot.lane.b32.xlu1 %v20368_v35, %s17766_s21 }
0x3dfa   : > { %8046 = vrot.lane.b32.xlu1 %v8033_v22, %s17767_s26 }
0x3e60   : > { %v20449_v36 = vpop.permute.xlu0 %7872 }
0x3e61   : > { %16380 = vmatprep.subr.mxu1 %v20449_v36  ;;  %7877 = vst.msk [vmem:[%s20452_s23 + $0x8] sm:$0xff] %vm570_vm1, %v20449_v36 }
0x3e62   : > { %16381 = vmatpush3.msra.mxu1 %v20449_v36 }
0x3e64   : > { %v20458_v35 = vpop.permute.xlu1 %7870  ;;  %v8037_v39 = vpop.permute.xlu0 %8036 }
0x3e65   : > { %16382 = vmatprep.subr.mxu1 %v20458_v35  ;;  %7876 = vst.msk [vmem:[%s20452_s23] sm:$0xff] %vm570_vm1, %v20458_v35  ;;  %v8050_v60 = vsel %vm570_vm1, %v20272_v11, %v8037_v39 }
0x3e66   : > { %16383 = vmatpush3.msra.mxu1 %v20458_v35 }
0x3e67   : > { %16385 = vmatmul.mubr.msk.f32.vlgmr.msra.gmra.mxu1 %vm393_vm0, %v20465_v58 }
0x3e68   : > { %16391 = vmatprep.mubr.msk.f32.mxu1 %vm393_vm0, %v20469_v53  ;;  %v8045_v10 = vpop.permute.xlu0 %8044 }
0x3e69   : > { %v8052_v25 = vsel %vm573_vm2, %v8050_v60, %v8045_v10 }
0x3f27   : > { %v16386_v45 = vpop.f32.mrf.mxu1 }
0x3f28   : > { %8212 = vrot.lane.b32.xlu1 %v16386_v45, %s17766_s21  ;;  %16387 = vmatprep.subr.mxu1 %v16386_v45 }
0x3f29   : > { %v8120_v13 = vpop.f32.mrf.mxu1  ;;  %16388 = vmatpush3.msra.mxu1 %v16386_v45 }
0x3f2a   : > { %8210 = vrot.lane.b32.xlu0 %v8120_v13, %s17766_s21  ;;  %16389 = vmatprep.subr.mxu1 %v8120_v13 }
0x3f2b   : > { %16390 = vmatpush3.msra.mxu1 %v8120_v13 }
0x3f2c   : > { %16392 = vmatmul.mubr.msk.f32.vlgmr.msra.gmra.mxu1 %vm393_vm0, %v20465_v58  ;;  %16394 = vmatprep.subr.mxu1 %v20036_v26 }
0x3f2d   : > { %16395 = vmatpush3.msra.mxu1 %v20036_v26  ;;  %16418 = vmatprep.mubr.msk.f32.mxu1 %vm756_vm3, %v8052_v25  ;;  %v8039_v26 = vpop.permute.xlu1 %8038 }
0x3f2e   : > { %16396 = vmatprep.subr.mxu1 %v20042_v44 }
0x3f2f   : > { %16397 = vmatpush3.msra.mxu1 %v20042_v44 }
0x3f30   : > { %16398 = vmatprep.subr.mxu1 %v20052_v38 }
0x3f31   : > { %16399 = vmatpush3.msra.mxu1 %v20052_v38  ;;  %v8047_v44 = vpop.permute.xlu1 %8046  ;;  %v8051_v38 = vsel %vm570_vm1, %v20266_v37, %v8039_v26 }
0x3f32   : > { %16400 = vmatprep.subr.mxu1 %v20059_v55 }
0x3f33   : > { %16401 = vmatpush3.msra.mxu1 %v20059_v55  ;;  %v8053_v55 = vsel %vm573_vm2, %v8051_v38, %v8047_v44 }
0x3f34   : > { %16402 = vmatprep.subr.mxu1 %v20066_v57 }
0x3f35   : > { %16403 = vmatpush3.msra.mxu1 %v20066_v57 }
0x3f36   : > { %16404 = vmatprep.subr.mxu1 %v20073_v16 }
0x3f37   : > { %16405 = vmatpush3.msra.mxu1 %v20073_v16 }
0x3f38   : > { %16406 = vmatprep.subr.mxu1 %v20080_v33 }
0x3f39   : > { %16407 = vmatpush3.msra.mxu1 %v20080_v33 }
0x3f3a   : > { %16408 = vmatprep.subr.mxu1 %v20087_v7 }
0x3f3b   : > { %16409 = vmatpush3.msra.mxu1 %v20087_v7 }
0x3f3c   : > { %16410 = vmatprep.subr.mxu1 %v20094_v21 }
0x3f3d   : > { %16411 = vmatpush3.msra.mxu1 %v20094_v21 }
0x3f3e   : > { %16412 = vmatprep.subr.mxu1 %v20101_v29 }
0x3f3f   : > { %16413 = vmatpush3.msra.mxu1 %v20101_v29 }
0x3f40   : > { %16414 = vmatprep.subr.mxu1 %v20108_v47 }
0x3f41   : > { %16415 = vmatpush3.msra.mxu1 %v20108_v47 }
0x3f42   : > { %16416 = vmatprep.subr.mxu1 %v20115_v48 }
0x3f43   : > { %16417 = vmatpush3.msra.mxu1 %v20115_v48 }
0x3f44   : > { %16419 = vmatmul.mubr.msk.f32.vlgmr.msra.gmra.mxu1 %vm756_vm3, %v8053_v55 }
0x3f45   : > { %16452 = vmatprep.mubr.msk.f32.mxu1 %vm393_vm0, %v20469_v53 }
0x3f9a   : > { %v8213_v47 = vpop.permute.xlu1 %8212 }
0x3f9b   : > { %v8225_v54 = vsel %vm570_vm1, %v20449_v36, %v8213_v47 }
0x3f9c   : > { %v8211_v37 = vpop.permute.xlu0 %8210 }
0x3f9d   : > { %v8224_v11 = vsel %vm570_vm1, %v20458_v35, %v8211_v37 }
0x3fec   : > { %v16393_v57 = vpop.f32.mrf.mxu1 }
0x3fed   : > { %v8205_v16 = vmul.f32 2.0, %v16393_v57 }
0x3fee   : > { %v8195_v33 = vpop.f32.mrf.mxu1 }
0x3fef   : > { %v8207_v7 = vsub.f32 %v8205_v16, %v20449_v36  ;;  %v8204_v21 = vmul.f32 2.0, %v8195_v33 }
0x3ff1   : > { %v8206_v29 = vsub.f32 %v8204_v21, %v20458_v35  ;;  %8220 = vrot.lane.b32.xlu1 %v8207_v7, %s17767_s26 }
0x3ff3   : > { %8218 = vrot.lane.b32.xlu0 %v8206_v29, %s17767_s26  ;;  %v20575_v29 = vld [vmem:[#allocation2 + $0x20] sm:$0xff] }
0x4004   : > { %v16420_v56 = vpop.f32.mrf.mxu1 }
0x4005   : > { %v20548_v46 = vadd.f32 %v16420_v56, %v20232_v18 }
0x4006   : > { %v8300_v4 = vpop.f32.mrf.mxu1 }
0x4007   : > { %v20551_v39 = vadd.f32 %v20232_v18, %v8300_v4 }
0x4063   : > { %v8221_v48 = vpop.permute.xlu1 %8220 }
0x4064   : > { %v8227_v30 = vsel %vm573_vm2, %v8225_v54, %v8221_v48 }
0x4065   : > { %v8219_v0 = vpop.permute.xlu0 %8218 }
0x4066   : > { %v8226_v40 = vsel %vm573_vm2, %v8224_v11, %v8219_v0 }
0x4067   : > { %16445 = vmatprep.mubr.msk.f32.mxu0 %vm756_vm3, %v8226_v40 }
0x4068   : > { %16446 = vmatmul.mubr.msk.f32.vlgmr.msra.gmra.mxu0 %vm756_vm3, %v8227_v30 }
0x4069   : > { %16463 = vmatpush3.msra.mxu0 %v20285_v1 }
0x406a   : > { %16464 = vmatprep.subr.mxu0 %v20290_v23 }
0x406b   : > { %16465 = vmatpush3.msra.mxu0 %v20290_v23 }
0x406c   : > { %16466 = vmatprep.subr.mxu0 %v20297_v9 }
0x406d   : > { %16467 = vmatpush3.msra.mxu0 %v20297_v9 }
0x406e   : > { %16468 = vmatprep.subr.mxu0 %v20304_v41 }
0x406f   : > { %16469 = vmatpush3.msra.mxu0 %v20304_v41 }
0x4070   : > { %16470 = vmatprep.subr.mxu0 %v20311_v42 }
0x4071   : > { %16471 = vmatpush3.msra.mxu0 %v20311_v42 }
0x4072   : > { %16472 = vmatprep.subr.mxu0 %v20318_v6 }
0x4073   : > { %16473 = vmatpush3.msra.mxu0 %v20318_v6 }
0x4074   : > { %16474 = vmatprep.subr.mxu0 %v20325_v59 }
0x4075   : > { %16475 = vmatpush3.msra.mxu0 %v20325_v59 }
0x4076   : > { %16476 = vmatprep.subr.mxu0 %v20332_v24 }
0x4077   : > { %16477 = vmatpush3.msra.mxu0 %v20332_v24 }
0x4078   : > { %16478 = vmatprep.subr.mxu0 %v20339_v61 }
0x4079   : > { %16479 = vmatpush3.msra.mxu0 %v20339_v61 }
0x407a   : > { %16480 = vmatprep.subr.mxu0 %v20346_v2 }
0x407b   : > { %16481 = vmatpush3.msra.mxu0 %v20346_v2 }
0x407c   : > { %16482 = vmatprep.subr.mxu0 %v20355_v27 }
0x407d   : > { %16483 = vmatpush3.msra.mxu0 %v20355_v27 }
0x407e   : > { %16484 = vmatprep.subr.mxu0 %v20362_v5 }
0x407f   : > { %16485 = vmatpush3.msra.mxu0 %v20362_v5 }
0x4080   : > { %16544 = vmatprep.subr.mxu0 %v20124_v20 }
0x4128   : > { %v16447_v22 = vpop.f32.mrf.mxu0 }
0x4129   : > { %v8391_v45 = vadd.f32 %v16447_v22, %v20548_v46 }
0x412a   : > { %v8381_v10 = vpop.f32.mrf.mxu0 }
0x412b   : > { %v14048_v13 = vmul.f32 -1.442695, %v8391_v45  ;;  %v8390_v60 = vadd.f32 %v8381_v10, %v20551_v39 }
0x412d   : > { %17393 = vpow2.f32 %v14048_v13  ;;  %v14047_v25 = vmul.f32 -1.442695, %v8390_v60 }
0x412f   : > { %17395 = vpow2.f32 %v14047_v25 }
0x413a   : > { %v17394_v26 = vpop.eup %17393 }
0x413b   : > { %v8399_v44 = vadd.f32 1.0, %v17394_v26 }
0x413c   : > { %v17396_v38 = vpop.eup %17395 }
0x413d   : > { %17397 = vrcp.f32 %v8399_v44  ;;  %v8398_v55 = vadd.f32 1.0, %v17396_v38 }
0x413f   : > { %17399 = vrcp.f32 %v8398_v55 }
0x414a   : > { %v20555_v57 = vpop.eup %17397 }
0x414b   : > { %v8405_v16 = vmul.f32 %v20555_v57, %v20449_v36 }
0x414c   : > { %v20559_v33 = vpop.eup %17399 }
0x414d   : > { %16448 = vmatprep.subr.mxu1 %v8405_v16  ;;  %v8404_v7 = vmul.f32 %v20559_v33, %v20458_v35  ;;  %v20569_v35 = vld [vmem:[#allocation2 + $0x28] sm:$0xff] }
0x414e   : > { %16449 = vmatpush3.msra.mxu1 %v8405_v16 }
0x414f   : > { %16450 = vmatprep.subr.mxu1 %v8404_v7 }
0x4150   : > { %16451 = vmatpush3.msra.mxu1 %v8404_v7 }
0x4151   : > { %16453 = vmatmul.mubr.msk.f32.vlgmr.msra.gmra.mxu1 %vm393_vm0, %v20465_v58 }
0x4152   : > { %16459 = vmatprep.mubr.msk.f32.mxu1 %vm393_vm0, %v20469_v53 }
0x4211   : > { %v16454_v21 = vpop.f32.mrf.mxu1 }
0x4212   : > { %8564 = vrot.lane.b32.xlu1 %v16454_v21, %s17766_s21  ;;  %16455 = vmatprep.subr.mxu1 %v16454_v21 }
0x4213   : > { %v8472_v36 = vpop.f32.mrf.mxu1  ;;  %16456 = vmatpush3.msra.mxu1 %v16454_v21 }
0x4214   : > { %8562 = vrot.lane.b32.xlu0 %v8472_v36, %s17766_s21  ;;  %16457 = vmatprep.subr.mxu1 %v8472_v36 }
0x4215   : > { %16458 = vmatpush3.msra.mxu1 %v8472_v36 }
0x4216   : > { %16460 = vmatmul.mubr.msk.f32.vlgmr.msra.gmra.mxu1 %vm393_vm0, %v20465_v58  ;;  %16489 = vmatprep.subr.mxu1 %v20569_v35 }
0x4217   : > { %16490 = vmatpush3.msra.mxu1 %v20569_v35  ;;  %16493 = vmatprep.mubr.msk.f32.mxu1 %vm393_vm0, %v20469_v53 }
0x4218   : > { %16491 = vmatprep.subr.mxu1 %v20575_v29 }
0x4219   : > { %16492 = vmatpush3.msra.mxu1 %v20575_v29 }
0x421a   : > { %16494 = vmatmul.mubr.msk.f32.vlgmr.msra.gmra.mxu1 %vm393_vm0, %v20465_v58 }
0x421b   : > { %16500 = vmatprep.mubr.msk.f32.mxu1 %vm393_vm0, %v20469_v53 }
0x4284   : > { %v8565_v56 = vpop.permute.xlu1 %8564 }
0x4285   : > { %v8577_v13 = vsel %vm570_vm1, %v8405_v16, %v8565_v56  ;;  %v20707_v56 = vld [vmem:[%s22275_s3 + $0xa0] sm:$0xff] }
0x4286   : > { %v8563_v4 = vpop.permute.xlu0 %8562 }
0x4287   : > { %v8576_v45 = vsel %vm570_vm1, %v8404_v7, %v8563_v4  ;;  %v20714_v4 = vld [vmem:[%s22275_s3 + $0x98] sm:$0xff] }
0x42d6   : > { %v16461_v47 = vpop.f32.mrf.mxu1 }
0x42d7   : > { %v8557_v37 = vmul.f32 2.0, %v16461_v47 }
0x42d8   : > { %v8547_v48 = vpop.f32.mrf.mxu1 }
0x42d9   : > { %v8559_v11 = vsub.f32 %v8557_v37, %v8405_v16  ;;  %v8556_v0 = vmul.f32 2.0, %v8547_v48 }
0x42da   : > { %v20585_v54 = vpop.f32.mrf.mxu1 }
0x42db   : > { %v8558_v40 = vsub.f32 %v8556_v0, %v8404_v7  ;;  %8572 = vrot.lane.b32.xlu1 %v8559_v11, %s17767_s26  ;;  %16496 = vmatprep.subr.mxu1 %v20585_v54 }
0x42dc   : > { %v20589_v30 = vpop.f32.mrf.mxu1  ;;  %16497 = vmatpush3.msra.mxu1 %v20585_v54 }
0x42dd   : > { %16498 = vmatprep.subr.mxu1 %v20589_v30  ;;  %8570 = vrot.lane.b32.xlu0 %v8558_v40, %s17767_s26  ;;  %v20685_v40 = vld [vmem:[%s22275_s3 + $0xb8] sm:$0xff] }
0x42de   : > { %16499 = vmatpush3.msra.mxu1 %v20589_v30 }
0x42df   : > { %16501 = vmatmul.mubr.msk.f32.vlgmr.msra.gmra.mxu1 %vm393_vm0, %v20465_v58 }
0x42e0   : > { %16507 = vmatprep.mubr.msk.f32.mxu1 %vm393_vm0, %v20469_v53 }
0x434d   : > { %v8573_v22 = vpop.permute.xlu1 %8572 }
0x434e   : > { %v8579_v25 = vsel %vm573_vm2, %v8577_v13, %v8573_v22  ;;  %v20721_v22 = vld [vmem:[%s22275_s3 + $0x90] sm:$0xff]  ;;  %v20735_v13 = vld [vmem:[%s22275_s3 + $0x80] sm:$0xff] }
0x434f   : > { %v8571_v10 = vpop.permute.xlu0 %8570 }
0x4350   : > { %v8578_v60 = vsel %vm573_vm2, %v8576_v45, %v8571_v10  ;;  %v20728_v45 = vld [vmem:[%s22275_s3 + $0x88] sm:$0xff] }
0x4351   : > { %16486 = vmatprep.mubr.msk.f32.mxu0 %vm756_vm3, %v8578_v60  ;;  %v20742_v60 = vld [vmem:[%s22275_s3 + $0x78] sm:$0xff] }
0x4352   : > { %16487 = vmatmul.mubr.msk.f32.vlgmr.msra.gmra.mxu0 %vm756_vm3, %v8579_v25  ;;  %v20749_v25 = vld [vmem:[%s22275_s3 + $0x70] sm:$0xff] }
0x4353   : > { %16545 = vmatpush3.msra.mxu0 %v20124_v20 }
0x4354   : > { %16546 = vmatprep.subr.mxu0 %v20129_v49 }
0x4355   : > { %16547 = vmatpush3.msra.mxu0 %v20129_v49 }
0x4356   : > { %16548 = vmatprep.subr.mxu0 %v20136_v8 }
0x4357   : > { %16549 = vmatpush3.msra.mxu0 %v20136_v8 }
0x4358   : > { %16550 = vmatprep.subr.mxu0 %v20143_v32 }
0x4359   : > { %16551 = vmatpush3.msra.mxu0 %v20143_v32 }
0x435a   : > { %16552 = vmatprep.subr.mxu0 %v20150_v14 }
0x435b   : > { %16553 = vmatpush3.msra.mxu0 %v20150_v14 }
0x435c   : > { %16554 = vmatprep.subr.mxu0 %v20157_v12 }
0x435d   : > { %16555 = vmatpush3.msra.mxu0 %v20157_v12 }
0x435e   : > { %16556 = vmatprep.subr.mxu0 %v20164_v17 }
0x435f   : > { %16557 = vmatpush3.msra.mxu0 %v20164_v17 }
0x4360   : > { %16558 = vmatprep.subr.mxu0 %v20171_v63 }
0x4361   : > { %16559 = vmatpush3.msra.mxu0 %v20171_v63 }
0x4362   : > { %16560 = vmatprep.subr.mxu0 %v20190_v19 }
0x4363   : > { %16561 = vmatpush3.msra.mxu0 %v20190_v19  ;;  %v8676_v19 = vsub.f32 1.0, %v20555_v57 }
0x4364   : > { %16562 = vmatprep.subr.mxu0 %v20197_v28 }
0x4365   : > { %16563 = vmatpush3.msra.mxu0 %v20197_v28 }
0x4366   : > { %16564 = vmatprep.subr.mxu0 %v20204_v50 }
0x4367   : > { %16565 = vmatpush3.msra.mxu0 %v20204_v50 }
0x4368   : > { %16566 = vmatprep.subr.mxu0 %v20211_v52 }
0x4369   : > { %16567 = vmatpush3.msra.mxu0 %v20211_v52  ;;  %v8674_v52 = vmul.f32 %v20555_v57, %v20427_v43 }
0x436a   : > { %16585 = vmatprep.subr.mxu0 %v20285_v1 }
0x439f   : > { %v16502_v28 = vpop.f32.mrf.mxu1 }
0x43a0   : > { %v8853_v43 = vmul.f32 2.0, %v16502_v28 }
0x43a1   : > { %v8843_v16 = vpop.f32.mrf.mxu1 }
0x43a2   : > { %v8852_v21 = vmul.f32 2.0, %v8843_v16 }
0x43a4   : > { %v8854_v57 = vsub.f32 %v8852_v21, %v20575_v29 }
0x4412   : > { %v16488_v20 = vpop.f32.mrf.mxu0 }
0x4413   : > { %8665 = vrot.lane.b32.xlu0 %v16488_v20, %s17767_s26 }
0x4414   : > { %v8652_v49 = vpop.f32.mrf.mxu0 }
0x4415   : > { %8663 = vrot.lane.b32.xlu1 %v8652_v49, %s17767_s26  ;;  %v20756_v49 = vld [vmem:[%s22275_s3 + $0x68] sm:$0xff] }
0x4485   : > { %v8666_v8 = vpop.permute.xlu0 %8665 }
0x4486   : > { %v8670_v32 = vadd.f32 %v8666_v8, %v20548_v46  ;;  %v8675_v46 = vsub.f32 1.0, %v20559_v33 }
0x4487   : > { %v8664_v14 = vpop.permute.xlu1 %8663 }
0x4488   : > { %17401 = vtanh.f32 %v8670_v32  ;;  %v8669_v12 = vadd.f32 %v8664_v14, %v20551_v39  ;;  %v8673_v39 = vmul.f32 %v20559_v33, %v20433_v34  ;;  %v8855_v34 = vsub.f32 %v8853_v43, %v20569_v35  ;;  %v20765_v32 = vld [vmem:[%s22275_s3 + $0x60] sm:$0xff] }
0x448a   : > { %17403 = vtanh.f32 %v8669_v12 }
0x4495   : > { %v17402_v17 = vpop.eup %17401 }
0x4496   : > { %8681 = vrot.lane.b32.xlu0 %v17402_v17, %s17768_s22 }
0x4497   : > { %v17404_v63 = vpop.eup %17403 }
0x4498   : > { %8679 = vrot.lane.b32.xlu1 %v17404_v63, %s17768_s22 }
0x4508   : > { %v8682_v50 = vpop.permute.xlu0 %8681 }
0x4509   : > { %v8686_v26 = vmul.f32 %v8682_v50, %v8676_v19 }
0x450a   : > { %v8680_v44 = vpop.permute.xlu1 %8679 }
0x450b   : > { %v20639_v38 = vadd.f32 %v8686_v26, %v8674_v52  ;;  %v8685_v55 = vmul.f32 %v8680_v44, %v8675_v46 }
0x450d   : > { %v20643_v7 = vadd.f32 %v8685_v55, %v8673_v39  ;;  %8693 = vrot.lane.b32.xlu0 %v20639_v38, %s17768_s22 }
0x450f   : > { %8691 = vrot.lane.b32.xlu1 %v20643_v7, %s17768_s22 }
0x4511   : > { %8858 = vrot.lane.b32.xlu0 %v20589_v30, %s17766_s21  ;;  %v20700_v30 = vld [vmem:[%s22275_s3 + $0xa8] sm:$0xff] }
0x4513   : > { %8860 = vrot.lane.b32.xlu1 %v20585_v54, %s17766_s21 }
0x4515   : > { %8866 = vrot.lane.b32.xlu0 %v8854_v57, %s17767_s26 }
0x4517   : > { %8868 = vrot.lane.b32.xlu1 %v8855_v34, %s17767_s26 }
0x457f   : > { %v20657_v33 = vpop.permute.xlu0 %8693 }
0x4580   : > { %16503 = vmatprep.subr.mxu1 %v20657_v33  ;;  %14056 = vst.msk [vmem:[%s20452_s23 + $0x18] sm:$0xff] %vm570_vm1, %v20657_v33 }
0x4581   : > { %16504 = vmatpush3.msra.mxu1 %v20657_v33  ;;  %v20664_v36 = vpop.permute.xlu1 %8691 }
0x4582   : > { %16505 = vmatprep.subr.mxu1 %v20664_v36  ;;  %14055 = vst.msk [vmem:[%s20452_s23 + $0x10] sm:$0xff] %vm570_vm1, %v20664_v36 }
0x4583   : > { %16506 = vmatpush3.msra.mxu1 %v20664_v36  ;;  %v8859_v47 = vpop.permute.xlu0 %8858 }
0x4584   : > { %16508 = vmatmul.mubr.msk.f32.vlgmr.msra.gmra.mxu1 %vm393_vm0, %v20465_v58  ;;  %v8872_v0 = vsel %vm570_vm1, %v20575_v29, %v8859_v47  ;;  %v20693_v29 = vld [vmem:[%s22275_s3 + $0xb0] sm:$0xff] }
0x4585   : > { %16514 = vmatprep.mubr.msk.f32.mxu1 %vm393_vm0, %v20469_v53  ;;  %v8861_v10 = vpop.permute.xlu1 %8860 }
0x4586   : > { %v8873_v8 = vsel %vm570_vm1, %v20569_v35, %v8861_v10 }
0x4587   : > { %v8867_v48 = vpop.permute.xlu0 %8866 }
0x4588   : > { %v8874_v54 = vsel %vm573_vm2, %v8872_v0, %v8867_v48 }
0x4589   : > { %v8869_v20 = vpop.permute.xlu1 %8868 }
0x458a   : > { %v8875_v14 = vsel %vm573_vm2, %v8873_v8, %v8869_v20 }
0x4644   : > { %v16509_v37 = vpop.f32.mrf.mxu1 }
0x4645   : > { %9034 = vrot.lane.b32.xlu1 %v16509_v37, %s17766_s21  ;;  %16510 = vmatprep.subr.mxu1 %v16509_v37 }
0x4646   : > { %v8942_v11 = vpop.f32.mrf.mxu1  ;;  %16511 = vmatpush3.msra.mxu1 %v16509_v37 }
0x4647   : > { %9032 = vrot.lane.b32.xlu0 %v8942_v11, %s17766_s21  ;;  %16512 = vmatprep.subr.mxu1 %v8942_v11 }
0x4648   : > { %16513 = vmatpush3.msra.mxu1 %v8942_v11  ;;  %v20842_v11 = vld [vmem:[#allocation2 + $0x30] sm:$0xff] }
0x4649   : > { %16515 = vmatmul.mubr.msk.f32.vlgmr.msra.gmra.mxu1 %vm393_vm0, %v20465_v58  ;;  %16517 = vmatprep.subr.mxu1 %v20685_v40 }
0x464a   : > { %16518 = vmatpush3.msra.mxu1 %v20685_v40  ;;  %16541 = vmatprep.mubr.msk.f32.mxu1 %vm756_vm3, %v8874_v54 }
0x464b   : > { %16519 = vmatprep.subr.mxu1 %v20693_v29 }
0x464c   : > { %16520 = vmatpush3.msra.mxu1 %v20693_v29 }
0x464d   : > { %16521 = vmatprep.subr.mxu1 %v20700_v30 }
0x464e   : > { %16522 = vmatpush3.msra.mxu1 %v20700_v30 }
0x464f   : > { %16523 = vmatprep.subr.mxu1 %v20707_v56 }
0x4650   : > { %16524 = vmatpush3.msra.mxu1 %v20707_v56 }
0x4651   : > { %16525 = vmatprep.subr.mxu1 %v20714_v4 }
0x4652   : > { %16526 = vmatpush3.msra.mxu1 %v20714_v4 }
0x4653   : > { %16527 = vmatprep.subr.mxu1 %v20721_v22 }
0x4654   : > { %16528 = vmatpush3.msra.mxu1 %v20721_v22 }
0x4655   : > { %16529 = vmatprep.subr.mxu1 %v20728_v45 }
0x4656   : > { %16530 = vmatpush3.msra.mxu1 %v20728_v45 }
0x4657   : > { %16531 = vmatprep.subr.mxu1 %v20735_v13 }
0x4658   : > { %16532 = vmatpush3.msra.mxu1 %v20735_v13 }
0x4659   : > { %16533 = vmatprep.subr.mxu1 %v20742_v60 }
0x465a   : > { %16534 = vmatpush3.msra.mxu1 %v20742_v60 }
0x465b   : > { %16535 = vmatprep.subr.mxu1 %v20749_v25 }
0x465c   : > { %16536 = vmatpush3.msra.mxu1 %v20749_v25 }
0x465d   : > { %16537 = vmatprep.subr.mxu1 %v20756_v49 }
0x465e   : > { %16538 = vmatpush3.msra.mxu1 %v20756_v49 }
0x465f   : > { %16539 = vmatprep.subr.mxu1 %v20765_v32 }
0x4660   : > { %16540 = vmatpush3.msra.mxu1 %v20765_v32 }
0x4661   : > { %16542 = vmatmul.mubr.msk.f32.vlgmr.msra.gmra.mxu1 %vm756_vm3, %v8875_v14 }
0x4662   : > { %16575 = vmatprep.mubr.msk.f32.mxu1 %vm393_vm0, %v20469_v53 }
0x46b7   : > { %v9035_v50 = vpop.permute.xlu1 %9034 }
0x46b8   : > { %v9047_v39 = vsel %vm570_vm1, %v20657_v33, %v9035_v50 }
0x46b9   : > { %v9033_v52 = vpop.permute.xlu0 %9032 }
0x46ba   : > { %v9046_v46 = vsel %vm570_vm1, %v20664_v36, %v9033_v52 }
0x4709   : > { %v16516_v12 = vpop.f32.mrf.mxu1 }
0x470a   : > { %v9027_v17 = vmul.f32 2.0, %v16516_v12 }
0x470b   : > { %v9017_v63 = vpop.f32.mrf.mxu1 }
0x470c   : > { %v9029_v35 = vsub.f32 %v9027_v17, %v20657_v33  ;;  %v9026_v19 = vmul.f32 2.0, %v9017_v63 }
0x470e   : > { %v9028_v28 = vsub.f32 %v9026_v19, %v20664_v36  ;;  %9042 = vrot.lane.b32.xlu1 %v9029_v35, %s17767_s26 }
0x4710   : > { %9040 = vrot.lane.b32.xlu0 %v9028_v28, %s17767_s26 }
0x4780   : > { %v9043_v26 = vpop.permute.xlu1 %9042 }
0x4781   : > { %v9049_v16 = vsel %vm573_vm2, %v9047_v39, %v9043_v26  ;;  %v20883_v39 = vld [vmem:[%s22276_s4 + $0xa8] sm:$0xff] }
0x4782   : > { %v9041_v44 = vpop.permute.xlu0 %9040 }
0x4783   : > { %v9048_v55 = vsel %vm573_vm2, %v9046_v46, %v9041_v44  ;;  %v20876_v44 = vld [vmem:[%s22276_s4 + $0xb0] sm:$0xff] }
0x4784   : > { %16568 = vmatprep.mubr.msk.f32.mxu0 %vm756_vm3, %v9048_v55  ;;  %v20890_v55 = vld [vmem:[%s22276_s4 + $0xa0] sm:$0xff] }
0x4785   : > { %16569 = vmatmul.mubr.msk.f32.vlgmr.msra.gmra.mxu0 %vm756_vm3, %v9049_v16  ;;  %v20897_v16 = vld [vmem:[%s22276_s4 + $0x98] sm:$0xff] }
0x4786   : > { %16586 = vmatpush3.msra.mxu0 %v20285_v1  ;;  %v20811_v1 = vld [vmem:[%s22276_s4 + $0xb8] sm:$0xff] }
0x4787   : > { %16587 = vmatprep.subr.mxu0 %v20290_v23 }
0x4788   : > { %16588 = vmatpush3.msra.mxu0 %v20290_v23  ;;  %v16543_v23 = vpop.f32.mrf.mxu1 }
0x4789   : > { %16589 = vmatprep.subr.mxu0 %v20297_v9 }
0x478a   : > { %16590 = vmatpush3.msra.mxu0 %v20297_v9  ;;  %v9122_v9 = vpop.f32.mrf.mxu1 }
0x478b   : > { %16591 = vmatprep.subr.mxu0 %v20304_v41 }
0x478c   : > { %16592 = vmatpush3.msra.mxu0 %v20304_v41  ;;  %v20815_v41 = vadd.f32 %v16543_v23, %v20232_v18  ;;  %v20904_v23 = vld [vmem:[%s22276_s4 + $0x90] sm:$0xff] }
0x478d   : > { %16593 = vmatprep.subr.mxu0 %v20311_v42 }
0x478e   : > { %16594 = vmatpush3.msra.mxu0 %v20311_v42 }
0x478f   : > { %16595 = vmatprep.subr.mxu0 %v20318_v6 }
0x4790   : > { %16596 = vmatpush3.msra.mxu0 %v20318_v6  ;;  %v20818_v6 = vadd.f32 %v20232_v18, %v9122_v9  ;;  %v20911_v9 = vld [vmem:[%s22276_s4 + $0x88] sm:$0xff] }
0x4791   : > { %16597 = vmatprep.subr.mxu0 %v20325_v59 }
0x4792   : > { %16598 = vmatpush3.msra.mxu0 %v20325_v59 }
0x4793   : > { %16599 = vmatprep.subr.mxu0 %v20332_v24 }
0x4794   : > { %16600 = vmatpush3.msra.mxu0 %v20332_v24 }
0x4795   : > { %16601 = vmatprep.subr.mxu0 %v20339_v61 }
0x4796   : > { %16602 = vmatpush3.msra.mxu0 %v20339_v61 }
0x4797   : > { %16603 = vmatprep.subr.mxu0 %v20346_v2 }
0x4798   : > { %16604 = vmatpush3.msra.mxu0 %v20346_v2 }
0x4799   : > { %16605 = vmatprep.subr.mxu0 %v20355_v27 }
0x479a   : > { %16606 = vmatpush3.msra.mxu0 %v20355_v27 }
0x479b   : > { %16607 = vmatprep.subr.mxu0 %v20362_v5 }
0x479c   : > { %16608 = vmatpush3.msra.mxu0 %v20362_v5 }
0x479d   : > { %16667 = vmatprep.subr.mxu0 %v20811_v1 }
0x4845   : > { %v16570_v42 = vpop.f32.mrf.mxu0 }
0x4846   : > { %v9213_v59 = vadd.f32 %v16570_v42, %v20815_v41  ;;  %v20918_v42 = vld [vmem:[%s22276_s4 + $0x80] sm:$0xff] }
0x4847   : > { %v9203_v24 = vpop.f32.mrf.mxu0 }
0x4848   : > { %v14070_v61 = vmul.f32 -1.442695, %v9213_v59  ;;  %v9212_v2 = vadd.f32 %v9203_v24, %v20818_v6  ;;  %v20925_v59 = vld [vmem:[%s22276_s4 + $0x78] sm:$0xff]  ;;  %v20932_v24 = vld [vmem:[%s22276_s4 + $0x70] sm:$0xff] }
0x484a   : > { %17405 = vpow2.f32 %v14070_v61  ;;  %v14069_v27 = vmul.f32 -1.442695, %v9212_v2  ;;  %v20939_v61 = vld [vmem:[%s22276_s4 + $0x68] sm:$0xff]  ;;  %v20946_v2 = vld [vmem:[%s22276_s4 + $0x60] sm:$0xff] }
0x484c   : > { %17407 = vpow2.f32 %v14069_v27  ;;  %v20953_v27 = vld [vmem:[%s22277_s5 + $0xb8] sm:$0xff] }
0x4857   : > { %v17406_v5 = vpop.eup %17405 }
0x4858   : > { %v9221_v21 = vadd.f32 1.0, %v17406_v5 }
0x4859   : > { %v17408_v43 = vpop.eup %17407 }
0x485a   : > { %17409 = vrcp.f32 %v9221_v21  ;;  %v9220_v57 = vadd.f32 1.0, %v17408_v43 }
0x485c   : > { %17411 = vrcp.f32 %v9220_v57 }
0x4867   : > { %v20822_v34 = vpop.eup %17409 }
0x4868   : > { %v9227_v18 = vmul.f32 %v20822_v34, %v20657_v33 }
0x4869   : > { %v20826_v47 = vpop.eup %17411 }
0x486a   : > { %16571 = vmatprep.subr.mxu1 %v9227_v18  ;;  %v9226_v37 = vmul.f32 %v20826_v47, %v20664_v36  ;;  %v20836_v36 = vld [vmem:[#allocation2 + $0x38] sm:$0xff] }
0x486b   : > { %16572 = vmatpush3.msra.mxu1 %v9227_v18 }
0x486c   : > { %16573 = vmatprep.subr.mxu1 %v9226_v37 }
0x486d   : > { %16574 = vmatpush3.msra.mxu1 %v9226_v37 }
0x486e   : > { %16576 = vmatmul.mubr.msk.f32.vlgmr.msra.gmra.mxu1 %vm393_vm0, %v20465_v58 }
0x486f   : > { %16582 = vmatprep.mubr.msk.f32.mxu1 %vm393_vm0, %v20469_v53 }
0x492e   : > { %v16577_v48 = vpop.f32.mrf.mxu1 }
0x492f   : > { %9386 = vrot.lane.b32.xlu1 %v16577_v48, %s17766_s21  ;;  %16578 = vmatprep.subr.mxu1 %v16577_v48 }
0x4930   : > { %v9294_v33 = vpop.f32.mrf.mxu1  ;;  %16579 = vmatpush3.msra.mxu1 %v16577_v48 }
0x4931   : > { %9384 = vrot.lane.b32.xlu0 %v9294_v33, %s17766_s21  ;;  %16580 = vmatprep.subr.mxu1 %v9294_v33 }
0x4932   : > { %16581 = vmatpush3.msra.mxu1 %v9294_v33 }
0x4933   : > { %16583 = vmatmul.mubr.msk.f32.vlgmr.msra.gmra.mxu1 %vm393_vm0, %v20465_v58  ;;  %16612 = vmatprep.subr.mxu1 %v20836_v36 }
0x4934   : > { %16613 = vmatpush3.msra.mxu1 %v20836_v36  ;;  %16616 = vmatprep.mubr.msk.f32.mxu1 %vm393_vm0, %v20469_v53 }
0x4935   : > { %16614 = vmatprep.subr.mxu1 %v20842_v11 }
0x4936   : > { %16615 = vmatpush3.msra.mxu1 %v20842_v11 }
0x4937   : > { %16617 = vmatmul.mubr.msk.f32.vlgmr.msra.gmra.mxu1 %vm393_vm0, %v20465_v58 }
0x4938   : > { %16623 = vmatprep.mubr.msk.f32.mxu1 %vm393_vm0, %v20469_v53 }
0x49a1   : > { %v9387_v63 = vpop.permute.xlu1 %9386 }
0x49a2   : > { %v9399_v52 = vsel %vm570_vm1, %v9227_v18, %v9387_v63 }
0x49a3   : > { %v9385_v35 = vpop.permute.xlu0 %9384 }
0x49a4   : > { %v9398_v28 = vsel %vm570_vm1, %v9226_v37, %v9385_v35 }
0x49f3   : > { %v16584_v0 = vpop.f32.mrf.mxu1 }
0x49f4   : > { %v9379_v54 = vmul.f32 2.0, %v16584_v0  ;;  %v9498_v0 = vsub.f32 1.0, %v20822_v34 }
0x49f5   : > { %v9369_v10 = vpop.f32.mrf.mxu1 }
0x49f6   : > { %v9381_v20 = vsub.f32 %v9379_v54, %v9227_v18  ;;  %v9378_v8 = vmul.f32 2.0, %v9369_v10 }
0x49f7   : > { %v20852_v14 = vpop.f32.mrf.mxu1 }
0x49f8   : > { %v9380_v12 = vsub.f32 %v9378_v8, %v9226_v37  ;;  %9394 = vrot.lane.b32.xlu1 %v9381_v20, %s17767_s26  ;;  %16619 = vmatprep.subr.mxu1 %v20852_v14  ;;  %v9496_v20 = vmul.f32 %v20822_v34, %v20639_v38 }
0x49f9   : > { %v20856_v17 = vpop.f32.mrf.mxu1  ;;  %16620 = vmatpush3.msra.mxu1 %v20852_v14 }
0x49fa   : > { %16621 = vmatprep.subr.mxu1 %v20856_v17  ;;  %9392 = vrot.lane.b32.xlu0 %v9380_v12, %s17767_s26 }
0x49fb   : > { %16622 = vmatpush3.msra.mxu1 %v20856_v17 }
0x49fc   : > { %16624 = vmatmul.mubr.msk.f32.vlgmr.msra.gmra.mxu1 %vm393_vm0, %v20465_v58 }
0x49fd   : > { %16630 = vmatprep.mubr.msk.f32.mxu1 %vm393_vm0, %v20469_v53 }
0x4a6a   : > { %v9395_v19 = vpop.permute.xlu1 %9394 }
0x4a6b   : > { %v9401_v46 = vsel %vm573_vm2, %v9399_v52, %v9395_v19 }
0x4a6c   : > { %v9393_v50 = vpop.permute.xlu0 %9392 }
0x4a6d   : > { %v9400_v26 = vsel %vm573_vm2, %v9398_v28, %v9393_v50 }
0x4a6e   : > { %16609 = vmatprep.mubr.msk.f32.mxu0 %vm756_vm3, %v9400_v26 }
0x4a6f   : > { %16610 = vmatmul.mubr.msk.f32.vlgmr.msra.gmra.mxu0 %vm756_vm3, %v9401_v46 }
0x4a70   : > { %16668 = vmatpush3.msra.mxu0 %v20811_v1 }
0x4a71   : > { %16669 = vmatprep.subr.mxu0 %v20876_v44 }
0x4a72   : > { %16670 = vmatpush3.msra.mxu0 %v20876_v44 }
0x4a73   : > { %16671 = vmatprep.subr.mxu0 %v20883_v39 }
0x4a74   : > { %16672 = vmatpush3.msra.mxu0 %v20883_v39 }
0x4a75   : > { %16673 = vmatprep.subr.mxu0 %v20890_v55 }
0x4a76   : > { %16674 = vmatpush3.msra.mxu0 %v20890_v55 }
0x4a77   : > { %16675 = vmatprep.subr.mxu0 %v20897_v16 }
0x4a78   : > { %16676 = vmatpush3.msra.mxu0 %v20897_v16 }
0x4a79   : > { %16677 = vmatprep.subr.mxu0 %v20904_v23 }
0x4a7a   : > { %16678 = vmatpush3.msra.mxu0 %v20904_v23 }
0x4a7b   : > { %16679 = vmatprep.subr.mxu0 %v20911_v9 }
0x4a7c   : > { %16680 = vmatpush3.msra.mxu0 %v20911_v9 }
0x4a7d   : > { %16681 = vmatprep.subr.mxu0 %v20918_v42 }
0x4a7e   : > { %16682 = vmatpush3.msra.mxu0 %v20918_v42 }
0x4a7f   : > { %16683 = vmatprep.subr.mxu0 %v20925_v59 }
0x4a80   : > { %16684 = vmatpush3.msra.mxu0 %v20925_v59 }
0x4a81   : > { %16685 = vmatprep.subr.mxu0 %v20932_v24 }
0x4a82   : > { %16686 = vmatpush3.msra.mxu0 %v20932_v24 }
0x4a83   : > { %16687 = vmatprep.subr.mxu0 %v20939_v61 }
0x4a84   : > { %16688 = vmatpush3.msra.mxu0 %v20939_v61 }
0x4a85   : > { %16689 = vmatprep.subr.mxu0 %v20946_v2 }
0x4a86   : > { %16690 = vmatpush3.msra.mxu0 %v20946_v2 }
0x4a87   : > { %16708 = vmatprep.subr.mxu0 %v20953_v27 }
0x4abc   : > { %v16625_v54 = vpop.f32.mrf.mxu1 }
0x4abd   : > { %v9675_v38 = vmul.f32 2.0, %v16625_v54 }
0x4abe   : > { %v9665_v19 = vpop.f32.mrf.mxu1 }
0x4abf   : > { %v9674_v50 = vmul.f32 2.0, %v9665_v19  ;;  %v21063_v19 = vld [vmem:[%s22277_s5 + $0xa8] sm:$0xff] }
0x4ac1   : > { %v9676_v34 = vsub.f32 %v9674_v50, %v20842_v11  ;;  %v21070_v50 = vld [vmem:[%s22277_s5 + $0xa0] sm:$0xff] }
0x4b2f   : > { %v16611_v5 = vpop.f32.mrf.mxu0 }
0x4b30   : > { %9487 = vrot.lane.b32.xlu0 %v16611_v5, %s17767_s26 }
0x4b31   : > { %v9474_v21 = vpop.f32.mrf.mxu0 }
0x4b32   : > { %9485 = vrot.lane.b32.xlu1 %v9474_v21, %s17767_s26 }
0x4ba2   : > { %v9488_v43 = vpop.permute.xlu0 %9487 }
0x4ba3   : > { %v9492_v57 = vadd.f32 %v9488_v43, %v20815_v41  ;;  %v9497_v41 = vsub.f32 1.0, %v20826_v47 }
0x4ba4   : > { %v9486_v18 = vpop.permute.xlu1 %9485 }
0x4ba5   : > { %17413 = vtanh.f32 %v9492_v57  ;;  %v9491_v37 = vadd.f32 %v9486_v18, %v20818_v6  ;;  %v9495_v6 = vmul.f32 %v20826_v47, %v20643_v7  ;;  %v9677_v7 = vsub.f32 %v9675_v38, %v20836_v36  ;;  %v21077_v38 = vld [vmem:[%s22277_s5 + $0x98] sm:$0xff] }
0x4ba7   : > { %17415 = vtanh.f32 %v9491_v37 }
0x4bb2   : > { %v17414_v48 = vpop.eup %17413 }
0x4bb3   : > { %9503 = vrot.lane.b32.xlu0 %v17414_v48, %s17768_s22 }
0x4bb4   : > { %v17416_v33 = vpop.eup %17415 }
0x4bb5   : > { %9501 = vrot.lane.b32.xlu1 %v17416_v33, %s17768_s22 }
0x4c25   : > { %v9504_v10 = vpop.permute.xlu0 %9503 }
0x4c26   : > { %v9508_v8 = vmul.f32 %v9504_v10, %v9498_v0 }
0x4c27   : > { %v9502_v12 = vpop.permute.xlu1 %9501 }
0x4c28   : > { %v20966_v63 = vadd.f32 %v9508_v8, %v9496_v20  ;;  %v9507_v35 = vmul.f32 %v9502_v12, %v9497_v41 }
0x4c2a   : > { %v20970_v28 = vadd.f32 %v9507_v35, %v9495_v6  ;;  %9515 = vrot.lane.b32.xlu0 %v20966_v63, %s17768_s22  ;;  %v21056_v35 = vld [vmem:[%s22277_s5 + $0xb0] sm:$0xff] }
0x4c2c   : > { %9513 = vrot.lane.b32.xlu1 %v20970_v28, %s17768_s22 }
0x4c2e   : > { %9680 = vrot.lane.b32.xlu0 %v20856_v17, %s17766_s21 }
0x4c30   : > { %9682 = vrot.lane.b32.xlu1 %v20852_v14, %s17766_s21 }
0x4c32   : > { %9688 = vrot.lane.b32.xlu0 %v9676_v34, %s17767_s26  ;;  %v21084_v34 = vld [vmem:[%s22277_s5 + $0x90] sm:$0xff] }
0x4c34   : > { %9690 = vrot.lane.b32.xlu1 %v9677_v7, %s17767_s26  ;;  %v21091_v7 = vld [vmem:[%s22277_s5 + $0x88] sm:$0xff] }
0x4c9c   : > { %v20984_v47 = vpop.permute.xlu0 %9515 }
0x4c9d   : > { %14078 = vst.msk [vmem:[%s20452_s23 + $0x28] sm:$0xff] %vm570_vm1, %v20984_v47  ;;  %16626 = vmatprep.subr.mxu1 %v20984_v47 }
0x4c9e   : > { %16627 = vmatpush3.msra.mxu1 %v20984_v47  ;;  %v20991_v17 = vpop.permute.xlu1 %9513 }
0x4c9f   : > { %14077 = vst.msk [vmem:[%s20452_s23 + $0x20] sm:$0xff] %vm570_vm1, %v20991_v17  ;;  %16628 = vmatprep.subr.mxu1 %v20991_v17 }
0x4ca0   : > { %16629 = vmatpush3.msra.mxu1 %v20991_v17  ;;  %v9681_v14 = vpop.permute.xlu0 %9680 }
0x4ca1   : > { %16631 = vmatmul.mubr.msk.f32.vlgmr.msra.gmra.mxu1 %vm393_vm0, %v20465_v58  ;;  %v9694_v5 = vsel %vm570_vm1, %v20842_v11, %v9681_v14  ;;  %v21098_v14 = vld [vmem:[%s22277_s5 + $0x80] sm:$0xff] }
0x4ca2   : > { %16637 = vmatprep.mubr.msk.f32.mxu1 %vm393_vm0, %v20469_v53 }
0x4ca4   : > { %v9689_v26 = vpop.permute.xlu0 %9688 }
0x4ca5   : > { %v9696_v21 = vsel %vm573_vm2, %v9694_v5, %v9689_v26  ;;  %v21112_v26 = vld [vmem:[%s22277_s5 + $0x70] sm:$0xff]  ;;  %v21126_v5 = vld [vmem:[%s22277_s5 + $0x60] sm:$0xff] }
0x4d61   : > { %v16632_v52 = vpop.f32.mrf.mxu1 }
0x4d62   : > { %9856 = vrot.lane.b32.xlu1 %v16632_v52, %s17766_s21  ;;  %16633 = vmatprep.subr.mxu1 %v16632_v52 }
0x4d63   : > { %v9764_v46 = vpop.f32.mrf.mxu1  ;;  %16634 = vmatpush3.msra.mxu1 %v16632_v52  ;;  %v21105_v52 = vld [vmem:[%s22277_s5 + $0x78] sm:$0xff] }
0x4d64   : > { %9854 = vrot.lane.b32.xlu0 %v9764_v46, %s17766_s21  ;;  %16635 = vmatprep.subr.mxu1 %v9764_v46 }
0x4d65   : > { %16636 = vmatpush3.msra.mxu1 %v9764_v46  ;;  %v21119_v46 = vld [vmem:[%s22277_s5 + $0x68] sm:$0xff] }
0x4d66   : > { %16638 = vmatmul.mubr.msk.f32.vlgmr.msra.gmra.mxu1 %vm393_vm0, %v20465_v58  ;;  %16640 = vmatprep.subr.mxu1 %v20685_v40  ;;  %v9683_v58 = vpop.permute.xlu1 %9682 }
0x4d67   : > { %16641 = vmatpush3.msra.mxu1 %v20685_v40  ;;  %16664 = vmatprep.mubr.msk.f32.mxu1 %vm756_vm3, %v9696_v21  ;;  %v9695_v43 = vsel %vm570_vm1, %v20836_v36, %v9683_v58 }
0x4d68   : > { %16642 = vmatprep.subr.mxu1 %v20693_v29 }
0x4d69   : > { %16643 = vmatpush3.msra.mxu1 %v20693_v29 }
0x4d6a   : > { %16644 = vmatprep.subr.mxu1 %v20700_v30  ;;  %v9691_v11 = vpop.permute.xlu1 %9690 }
0x4d6b   : > { %16645 = vmatpush3.msra.mxu1 %v20700_v30  ;;  %v9697_v57 = vsel %vm573_vm2, %v9695_v43, %v9691_v11  ;;  %v21134_v11 = vld [vmem:[%s22278_s6 + $0x1] ss:$0 sm:$0xff] }
0x4d6c   : > { %16646 = vmatprep.subr.mxu1 %v20707_v56 }
0x4d6d   : > { %16647 = vmatpush3.msra.mxu1 %v20707_v56 }
0x4d6e   : > { %16648 = vmatprep.subr.mxu1 %v20714_v4 }
0x4d6f   : > { %16649 = vmatpush3.msra.mxu1 %v20714_v4 }
0x4d70   : > { %16650 = vmatprep.subr.mxu1 %v20721_v22 }
0x4d71   : > { %16651 = vmatpush3.msra.mxu1 %v20721_v22 }
0x4d72   : > { %16652 = vmatprep.subr.mxu1 %v20728_v45 }
0x4d73   : > { %16653 = vmatpush3.msra.mxu1 %v20728_v45 }
0x4d74   : > { %16654 = vmatprep.subr.mxu1 %v20735_v13 }
0x4d75   : > { %16655 = vmatpush3.msra.mxu1 %v20735_v13 }
0x4d76   : > { %16656 = vmatprep.subr.mxu1 %v20742_v60 }
0x4d77   : > { %16657 = vmatpush3.msra.mxu1 %v20742_v60 }
0x4d78   : > { %16658 = vmatprep.subr.mxu1 %v20749_v25 }
0x4d79   : > { %16659 = vmatpush3.msra.mxu1 %v20749_v25 }
0x4d7a   : > { %16660 = vmatprep.subr.mxu1 %v20756_v49 }
0x4d7b   : > { %16661 = vmatpush3.msra.mxu1 %v20756_v49 }
0x4d7c   : > { %16662 = vmatprep.subr.mxu1 %v20765_v32 }
0x4d7d   : > { %16663 = vmatpush3.msra.mxu1 %v20765_v32 }
0x4d7e   : > { %16665 = vmatmul.mubr.msk.f32.vlgmr.msra.gmra.mxu1 %vm756_vm3, %v9697_v57 }
0x4d7f   : > { %16698 = vmatprep.mubr.msk.f32.mxu1 %vm393_vm0, %v20469_v53 }
0x4dd4   : > { %v9857_v36 = vpop.permute.xlu1 %9856 }
0x4dd5   : > { %v9869_v53 = vsel %vm570_vm1, %v20984_v47, %v9857_v36 }
0x4dd6   : > { %v9855_v10 = vpop.permute.xlu0 %9854 }
0x4dd7   : > { %v9868_v8 = vsel %vm570_vm1, %v20991_v17, %v9855_v10 }
0x4e26   : > { %v16639_v18 = vpop.f32.mrf.mxu1 }
0x4e27   : > { %v9849_v37 = vmul.f32 2.0, %v16639_v18 }
0x4e28   : > { %v9839_v48 = vpop.f32.mrf.mxu1 }
0x4e29   : > { %v9851_v33 = vsub.f32 %v9849_v37, %v20984_v47  ;;  %v9848_v0 = vmul.f32 2.0, %v9839_v48 }
0x4e2b   : > { %v9850_v54 = vsub.f32 %v9848_v0, %v20991_v17  ;;  %9864 = vrot.lane.b32.xlu1 %v9851_v33, %s17767_s26 }
0x4e2d   : > { %9862 = vrot.lane.b32.xlu0 %v9850_v54, %s17767_s26 }
0x4e3e   : > { %v16666_v21 = vpop.f32.mrf.mxu1 }
0x4e3f   : > { %v21137_v43 = vadd.f32 %v21134_v11, %v16666_v21  ;;  %v21152_v21 = vld [vmem:[#allocation3 + $0x8] sm:$0xff] }
0x4e40   : > { %v9944_v58 = vpop.f32.mrf.mxu1 }
0x4e41   : > { %v21140_v18 = vadd.f32 %v21134_v11, %v9944_v58  ;;  %v21156_v58 = vld [vmem:[#allocation3] sm:$0xff] }
0x4e9d   : > { %v9865_v20 = vpop.permute.xlu1 %9864 }
0x4e9e   : > { %v9871_v6 = vsel %vm573_vm2, %v9869_v53, %v9865_v20 }
0x4e9f   : > { %v9863_v41 = vpop.permute.xlu0 %9862 }
0x4ea0   : > { %v9870_v12 = vsel %vm573_vm2, %v9868_v8, %v9863_v41 }
0x4ea1   : > { %16691 = vmatprep.mubr.msk.f32.mxu0 %vm756_vm3, %v9870_v12 }
0x4ea2   : > { %16692 = vmatmul.mubr.msk.f32.vlgmr.msra.gmra.mxu0 %vm756_vm3, %v9871_v6 }
0x4ea3   : > { %16709 = vmatpush3.msra.mxu0 %v20953_v27 }
0x4ea4   : > { %16710 = vmatprep.subr.mxu0 %v21056_v35 }
0x4ea5   : > { %16711 = vmatpush3.msra.mxu0 %v21056_v35 }
0x4ea6   : > { %16712 = vmatprep.subr.mxu0 %v21063_v19 }
0x4ea7   : > { %16713 = vmatpush3.msra.mxu0 %v21063_v19 }
0x4ea8   : > { %16714 = vmatprep.subr.mxu0 %v21070_v50 }
0x4ea9   : > { %16715 = vmatpush3.msra.mxu0 %v21070_v50 }
0x4eaa   : > { %16716 = vmatprep.subr.mxu0 %v21077_v38 }
0x4eab   : > { %16717 = vmatpush3.msra.mxu0 %v21077_v38 }
0x4eac   : > { %16718 = vmatprep.subr.mxu0 %v21084_v34 }
0x4ead   : > { %16719 = vmatpush3.msra.mxu0 %v21084_v34 }
0x4eae   : > { %16720 = vmatprep.subr.mxu0 %v21091_v7 }
0x4eaf   : > { %16721 = vmatpush3.msra.mxu0 %v21091_v7 }
0x4eb0   : > { %16722 = vmatprep.subr.mxu0 %v21098_v14 }
0x4eb1   : > { %16723 = vmatpush3.msra.mxu0 %v21098_v14 }
0x4eb2   : > { %16724 = vmatprep.subr.mxu0 %v21105_v52 }
0x4eb3   : > { %16725 = vmatpush3.msra.mxu0 %v21105_v52 }
0x4eb4   : > { %16726 = vmatprep.subr.mxu0 %v21112_v26 }
0x4eb5   : > { %16727 = vmatpush3.msra.mxu0 %v21112_v26 }
0x4eb6   : > { %16728 = vmatprep.subr.mxu0 %v21119_v46 }
0x4eb7   : > { %16729 = vmatpush3.msra.mxu0 %v21119_v46 }
0x4eb8   : > { %16730 = vmatprep.subr.mxu0 %v21126_v5 }
0x4eb9   : > { %16731 = vmatpush3.msra.mxu0 %v21126_v5 }
0x4eba   : > { %16790 = vmatprep.subr.mxu0 %v20811_v1 }
0x4f62   : > { %v16693_v57 = vpop.f32.mrf.mxu0 }
0x4f63   : > { %v10035_v37 = vadd.f32 %v16693_v57, %v21137_v43 }
0x4f64   : > { %v10025_v48 = vpop.f32.mrf.mxu0 }
0x4f65   : > { %v14092_v33 = vmul.f32 -1.442695, %v10035_v37  ;;  %v10034_v0 = vadd.f32 %v10025_v48, %v21140_v18  ;;  %v21168_v37 = vld [vmem:[#allocation2 + $0x40] sm:$0xff] }
0x4f67   : > { %17417 = vpow2.f32 %v14092_v33  ;;  %v14091_v54 = vmul.f32 -1.442695, %v10034_v0 }
0x4f69   : > { %17419 = vpow2.f32 %v14091_v54 }
0x4f74   : > { %v17418_v36 = vpop.eup %17417 }
0x4f75   : > { %v10043_v10 = vadd.f32 1.0, %v17418_v36 }
0x4f76   : > { %v17420_v20 = vpop.eup %17419 }
0x4f77   : > { %17421 = vrcp.f32 %v10043_v10  ;;  %v10042_v8 = vadd.f32 1.0, %v17420_v20 }
0x4f79   : > { %17423 = vrcp.f32 %v10042_v8 }
0x4f84   : > { %v21144_v41 = vpop.eup %17421 }
0x4f85   : > { %v10049_v53 = vmul.f32 %v21144_v41, %v20984_v47 }
0x4f86   : > { %v21148_v12 = vpop.eup %17423 }
0x4f87   : > { %16694 = vmatprep.subr.mxu1 %v10049_v53  ;;  %v10048_v6 = vmul.f32 %v21148_v12, %v20991_v17  ;;  %v21162_v17 = vld [vmem:[#allocation2 + $0x48] sm:$0xff] }
0x4f88   : > { %16695 = vmatpush3.msra.mxu1 %v10049_v53 }
0x4f89   : > { %16696 = vmatprep.subr.mxu1 %v10048_v6 }
0x4f8a   : > { %16697 = vmatpush3.msra.mxu1 %v10048_v6 }
0x4f8b   : > { %16699 = vmatmul.mubr.msk.f32.vlgmr.msra.gmra.mxu1 %vm393_vm0, %v21152_v21 }
0x4f8c   : > { %16705 = vmatprep.mubr.msk.f32.mxu1 %vm393_vm0, %v21156_v58 }
0x504b   : > { %v16700_v47 = vpop.f32.mrf.mxu1 }
0x504c   : > { %10208 = vrot.lane.b32.xlu1 %v16700_v47, %s17766_s21  ;;  %16701 = vmatprep.subr.mxu1 %v16700_v47 }
0x504d   : > { %v10116_v57 = vpop.f32.mrf.mxu1  ;;  %16702 = vmatpush3.msra.mxu1 %v16700_v47 }
0x504e   : > { %10206 = vrot.lane.b32.xlu0 %v10116_v57, %s17766_s21  ;;  %16703 = vmatprep.subr.mxu1 %v10116_v57 }
0x504f   : > { %16704 = vmatpush3.msra.mxu1 %v10116_v57 }
0x5050   : > { %16706 = vmatmul.mubr.msk.f32.vlgmr.msra.gmra.mxu1 %vm393_vm0, %v21152_v21  ;;  %16735 = vmatprep.subr.mxu1 %v21162_v17 }
0x5051   : > { %16736 = vmatpush3.msra.mxu1 %v21162_v17  ;;  %16739 = vmatprep.mubr.msk.f32.mxu1 %vm393_vm0, %v21156_v58 }
0x5052   : > { %16737 = vmatprep.subr.mxu1 %v21168_v37 }
0x5053   : > { %16738 = vmatpush3.msra.mxu1 %v21168_v37 }
0x5054   : > { %16740 = vmatmul.mubr.msk.f32.vlgmr.msra.gmra.mxu1 %vm393_vm0, %v21152_v21 }
0x5055   : > { %16746 = vmatprep.mubr.msk.f32.mxu1 %vm393_vm0, %v21156_v58 }
0x50be   : > { %v10209_v47 = vpop.permute.xlu1 %10208 }
0x50c0   : > { %v10207_v57 = vpop.permute.xlu0 %10206 }
0x5110   : > { %v16707_v48 = vpop.f32.mrf.mxu1 }
0x5111   : > { %v10201_v33 = vmul.f32 2.0, %v16707_v48 }
0x5112   : > { %v10191_v0 = vpop.f32.mrf.mxu1 }
0x5113   : > { %v10203_v54 = vsub.f32 %v10201_v33, %v10049_v53  ;;  %v10200_v36 = vmul.f32 2.0, %v10191_v0  ;;  %v10220_v33 = vsel %vm570_vm1, %v10048_v6, %v10207_v57 }
0x5114   : > { %v21178_v10 = vpop.f32.mrf.mxu1 }
0x5115   : > { %v10202_v20 = vsub.f32 %v10200_v36, %v10048_v6  ;;  %10216 = vrot.lane.b32.xlu1 %v10203_v54, %s17767_s26  ;;  %16742 = vmatprep.subr.mxu1 %v21178_v10  ;;  %v10221_v54 = vsel %vm570_vm1, %v10049_v53, %v10209_v47 }
0x5116   : > { %v21182_v8 = vpop.f32.mrf.mxu1  ;;  %16743 = vmatpush3.msra.mxu1 %v21178_v10 }
0x5117   : > { %16744 = vmatprep.subr.mxu1 %v21182_v8  ;;  %10214 = vrot.lane.b32.xlu0 %v10202_v20, %s17767_s26 }
0x5118   : > { %16745 = vmatpush3.msra.mxu1 %v21182_v8 }
0x5119   : > { %16747 = vmatmul.mubr.msk.f32.vlgmr.msra.gmra.mxu1 %vm393_vm0, %v21152_v21 }
0x511a   : > { %16753 = vmatprep.mubr.msk.f32.mxu1 %vm393_vm0, %v21156_v58 }
0x5187   : > { %v10217_v48 = vpop.permute.xlu1 %10216 }
0x5188   : > { %v10223_v20 = vsel %vm573_vm2, %v10221_v54, %v10217_v48 }
0x5189   : > { %v10215_v0 = vpop.permute.xlu0 %10214 }
0x518a   : > { %v10222_v36 = vsel %vm573_vm2, %v10220_v33, %v10215_v0 }
0x518b   : > { %16732 = vmatprep.mubr.msk.f32.mxu0 %vm756_vm3, %v10222_v36  ;;  %v10320_v36 = vsub.f32 1.0, %v21144_v41 }
0x518c   : > { %16733 = vmatmul.mubr.msk.f32.vlgmr.msra.gmra.mxu0 %vm756_vm3, %v10223_v20 }
0x518d   : > { %16791 = vmatpush3.msra.mxu0 %v20811_v1 }
0x518e   : > { %16792 = vmatprep.subr.mxu0 %v20876_v44 }
0x518f   : > { %16793 = vmatpush3.msra.mxu0 %v20876_v44 }
0x5190   : > { %16794 = vmatprep.subr.mxu0 %v20883_v39 }
0x5191   : > { %16795 = vmatpush3.msra.mxu0 %v20883_v39 }
0x5192   : > { %16796 = vmatprep.subr.mxu0 %v20890_v55 }
0x5193   : > { %16797 = vmatpush3.msra.mxu0 %v20890_v55 }
0x5194   : > { %16798 = vmatprep.subr.mxu0 %v20897_v16 }
0x5195   : > { %16799 = vmatpush3.msra.mxu0 %v20897_v16 }
0x5196   : > { %16800 = vmatprep.subr.mxu0 %v20904_v23 }
0x5197   : > { %16801 = vmatpush3.msra.mxu0 %v20904_v23 }
0x5198   : > { %16802 = vmatprep.subr.mxu0 %v20911_v9 }
0x5199   : > { %16803 = vmatpush3.msra.mxu0 %v20911_v9 }
0x519a   : > { %16804 = vmatprep.subr.mxu0 %v20918_v42 }
0x519b   : > { %16805 = vmatpush3.msra.mxu0 %v20918_v42 }
0x519c   : > { %16806 = vmatprep.subr.mxu0 %v20925_v59 }
0x519d   : > { %16807 = vmatpush3.msra.mxu0 %v20925_v59 }
0x519e   : > { %16808 = vmatprep.subr.mxu0 %v20932_v24 }
0x519f   : > { %16809 = vmatpush3.msra.mxu0 %v20932_v24 }
0x51a0   : > { %16810 = vmatprep.subr.mxu0 %v20939_v61 }
0x51a1   : > { %16811 = vmatpush3.msra.mxu0 %v20939_v61 }
0x51a2   : > { %16812 = vmatprep.subr.mxu0 %v20946_v2 }
0x51a3   : > { %16813 = vmatpush3.msra.mxu0 %v20946_v2 }
0x51a4   : > { %16831 = vmatprep.subr.mxu0 %v20953_v27 }
0x51d9   : > { %v16748_v20 = vpop.f32.mrf.mxu1 }
0x524c   : > { %v16734_v53 = vpop.f32.mrf.mxu0 }
0x524d   : > { %10309 = vrot.lane.b32.xlu0 %v16734_v53, %s17767_s26 }
0x524e   : > { %v10296_v6 = vpop.f32.mrf.mxu0 }
0x524f   : > { %10307 = vrot.lane.b32.xlu1 %v10296_v6, %s17767_s26  ;;  %v10318_v6 = vmul.f32 %v21144_v41, %v20966_v63  ;;  %v10497_v63 = vmul.f32 2.0, %v16748_v20 }
0x52bf   : > { %v10310_v47 = vpop.permute.xlu0 %10309 }
0x52c0   : > { %v10314_v57 = vadd.f32 %v10310_v47, %v21137_v43  ;;  %v10319_v43 = vsub.f32 1.0, %v21148_v12 }
0x52c1   : > { %v10308_v48 = vpop.permute.xlu1 %10307 }
0x52c2   : > { %17425 = vtanh.f32 %v10314_v57  ;;  %v10313_v33 = vadd.f32 %v10308_v48, %v21140_v18  ;;  %v10317_v18 = vmul.f32 %v21148_v12, %v20970_v28  ;;  %v10499_v28 = vsub.f32 %v10497_v63, %v21162_v17 }
0x52c4   : > { %17427 = vtanh.f32 %v10313_v33  ;;  %v10487_v33 = vpop.f32.mrf.mxu1 }
0x52cf   : > { %v17426_v0 = vpop.eup %17425 }
0x52d0   : > { %10325 = vrot.lane.b32.xlu0 %v17426_v0, %s17768_s22 }
0x52d1   : > { %v17428_v54 = vpop.eup %17427 }
0x52d2   : > { %10323 = vrot.lane.b32.xlu1 %v17428_v54, %s17768_s22  ;;  %v10496_v54 = vmul.f32 2.0, %v10487_v33 }
0x5342   : > { %v10326_v53 = vpop.permute.xlu0 %10325 }
0x5343   : > { %v10330_v62 = vmul.f32 %v10326_v53, %v10320_v36 }
0x5344   : > { %v10324_v47 = vpop.permute.xlu1 %10323 }
0x5345   : > { %v21232_v57 = vadd.f32 %v10330_v62, %v10318_v6  ;;  %v10329_v48 = vmul.f32 %v10324_v47, %v10319_v43  ;;  %v10498_v62 = vsub.f32 %v10496_v54, %v21168_v37 }
0x5347   : > { %v21236_v0 = vadd.f32 %v10329_v48, %v10317_v18  ;;  %10337 = vrot.lane.b32.xlu0 %v21232_v57, %s17768_s22 }
0x5349   : > { %10335 = vrot.lane.b32.xlu1 %v21236_v0, %s17768_s22 }
0x534b   : > { %10502 = vrot.lane.b32.xlu0 %v21182_v8, %s17766_s21 }
0x534d   : > { %10504 = vrot.lane.b32.xlu1 %v21178_v10, %s17766_s21 }
0x534f   : > { %10510 = vrot.lane.b32.xlu0 %v10498_v62, %s17767_s26 }
0x5351   : > { %10512 = vrot.lane.b32.xlu1 %v10499_v28, %s17767_s26 }
0x53b9   : > { %v21250_v41 = vpop.permute.xlu0 %10337 }
0x53ba   : > { %14100 = vst.msk [vmem:[%s20452_s23 + $0x38] sm:$0xff] %vm570_vm1, %v21250_v41  ;;  %16749 = vmatprep.subr.mxu1 %v21250_v41 }
0x53bb   : > { %16750 = vmatpush3.msra.mxu1 %v21250_v41  ;;  %v21257_v12 = vpop.permute.xlu1 %10335 }
0x53bc   : > { %14099 = vst.msk [vmem:[%s20452_s23 + $0x30] sm:$0xff] %vm570_vm1, %v21257_v12  ;;  %16751 = vmatprep.subr.mxu1 %v21257_v12 }
0x53bd   : > { %16752 = vmatpush3.msra.mxu1 %v21257_v12  ;;  %v10503_v10 = vpop.permute.xlu0 %10502 }
0x53be   : > { %16754 = vmatmul.mubr.msk.f32.vlgmr.msra.gmra.mxu1 %vm393_vm0, %v21152_v21  ;;  %v10516_v53 = vsel %vm570_vm1, %v21168_v37, %v10503_v10 }
0x53bf   : > { %16760 = vmatprep.mubr.msk.f32.mxu1 %vm393_vm0, %v21156_v58 }
0x53c1   : > { %v10511_v36 = vpop.permute.xlu0 %10510 }
0x53c2   : > { %v10518_v6 = vsel %vm573_vm2, %v10516_v53, %v10511_v36 }
0x547e   : > { %v16755_v8 = vpop.f32.mrf.mxu1 }
0x547f   : > { %10678 = vrot.lane.b32.xlu1 %v16755_v8, %s17766_s21  ;;  %16756 = vmatprep.subr.mxu1 %v16755_v8 }
0x5480   : > { %v10586_v20 = vpop.f32.mrf.mxu1  ;;  %16757 = vmatpush3.msra.mxu1 %v16755_v8 }
0x5481   : > { %10676 = vrot.lane.b32.xlu0 %v10586_v20, %s17766_s21  ;;  %16758 = vmatprep.subr.mxu1 %v10586_v20 }
0x5482   : > { %16759 = vmatpush3.msra.mxu1 %v10586_v20 }
0x5483   : > { %16761 = vmatmul.mubr.msk.f32.vlgmr.msra.gmra.mxu1 %vm393_vm0, %v21152_v21  ;;  %16763 = vmatprep.subr.mxu1 %v20685_v40 }
0x5484   : > { %16764 = vmatpush3.msra.mxu1 %v20685_v40  ;;  %16787 = vmatprep.mubr.msk.f32.mxu1 %vm756_vm3, %v10518_v6  ;;  %v10505_v40 = vpop.permute.xlu1 %10504 }
0x5485   : > { %16765 = vmatprep.subr.mxu1 %v20693_v29 }
0x5486   : > { %16766 = vmatpush3.msra.mxu1 %v20693_v29 }
0x5487   : > { %16767 = vmatprep.subr.mxu1 %v20700_v30 }
0x5488   : > { %16768 = vmatpush3.msra.mxu1 %v20700_v30  ;;  %v10513_v29 = vpop.permute.xlu1 %10512  ;;  %v10517_v30 = vsel %vm570_vm1, %v21162_v17, %v10505_v40 }
0x5489   : > { %16769 = vmatprep.subr.mxu1 %v20707_v56 }
0x548a   : > { %16770 = vmatpush3.msra.mxu1 %v20707_v56  ;;  %v10519_v56 = vsel %vm573_vm2, %v10517_v30, %v10513_v29 }
0x548b   : > { %16771 = vmatprep.subr.mxu1 %v20714_v4 }
0x548c   : > { %16772 = vmatpush3.msra.mxu1 %v20714_v4 }
0x548d   : > { %16773 = vmatprep.subr.mxu1 %v20721_v22 }
0x548e   : > { %16774 = vmatpush3.msra.mxu1 %v20721_v22 }
0x548f   : > { %16775 = vmatprep.subr.mxu1 %v20728_v45 }
0x5490   : > { %16776 = vmatpush3.msra.mxu1 %v20728_v45 }
0x5491   : > { %16777 = vmatprep.subr.mxu1 %v20735_v13 }
0x5492   : > { %16778 = vmatpush3.msra.mxu1 %v20735_v13 }
0x5493   : > { %16779 = vmatprep.subr.mxu1 %v20742_v60 }
0x5494   : > { %16780 = vmatpush3.msra.mxu1 %v20742_v60 }
0x5495   : > { %16781 = vmatprep.subr.mxu1 %v20749_v25 }
0x5496   : > { %16782 = vmatpush3.msra.mxu1 %v20749_v25 }
0x5497   : > { %16783 = vmatprep.subr.mxu1 %v20756_v49 }
0x5498   : > { %16784 = vmatpush3.msra.mxu1 %v20756_v49 }
0x5499   : > { %16785 = vmatprep.subr.mxu1 %v20765_v32 }
0x549a   : > { %16786 = vmatpush3.msra.mxu1 %v20765_v32 }
0x549b   : > { %16788 = vmatmul.mubr.msk.f32.vlgmr.msra.gmra.mxu1 %vm756_vm3, %v10519_v56 }
0x549c   : > { %16821 = vmatprep.mubr.msk.f32.mxu1 %vm393_vm0, %v21156_v58 }
0x54f1   : > { %v10679_v49 = vpop.permute.xlu1 %10678 }
0x54f2   : > { %v10691_v47 = vsel %vm570_vm1, %v21250_v41, %v10679_v49 }
0x54f3   : > { %v10677_v17 = vpop.permute.xlu0 %10676 }
0x54f4   : > { %v10690_v37 = vsel %vm570_vm1, %v21257_v12, %v10677_v17 }
0x5543   : > { %v16762_v4 = vpop.f32.mrf.mxu1 }
0x5544   : > { %v10671_v22 = vmul.f32 2.0, %v16762_v4 }
0x5545   : > { %v10661_v45 = vpop.f32.mrf.mxu1 }
0x5546   : > { %v10673_v13 = vsub.f32 %v10671_v22, %v21250_v41  ;;  %v10670_v60 = vmul.f32 2.0, %v10661_v45 }
0x5548   : > { %v10672_v25 = vsub.f32 %v10670_v60, %v21257_v12  ;;  %10686 = vrot.lane.b32.xlu1 %v10673_v13, %s17767_s26  ;;  %v21370_v13 = vld [vmem:[#allocation2 + $0x50] sm:$0xff] }
0x554a   : > { %10684 = vrot.lane.b32.xlu0 %v10672_v25, %s17767_s26 }
0x555b   : > { %v16789_v33 = vpop.f32.mrf.mxu1 }
0x555c   : > { %v21343_v63 = vadd.f32 %v21134_v11, %v16789_v33 }
0x555d   : > { %v10766_v54 = vpop.f32.mrf.mxu1 }
0x555e   : > { %v21346_v28 = vadd.f32 %v21134_v11, %v10766_v54 }
0x55ba   : > { %v10687_v32 = vpop.permute.xlu1 %10686 }
0x55bb   : > { %v10693_v48 = vsel %vm573_vm2, %v10691_v47, %v10687_v32 }
0x55bc   : > { %v10685_v43 = vpop.permute.xlu0 %10684 }
0x55bd   : > { %v10692_v18 = vsel %vm573_vm2, %v10690_v37, %v10685_v43 }
0x55be   : > { %16814 = vmatprep.mubr.msk.f32.mxu0 %vm756_vm3, %v10692_v18 }
0x55bf   : > { %16815 = vmatmul.mubr.msk.f32.vlgmr.msra.gmra.mxu0 %vm756_vm3, %v10693_v48 }
0x55c0   : > { %16832 = vmatpush3.msra.mxu0 %v20953_v27 }
0x55c1   : > { %16833 = vmatprep.subr.mxu0 %v21056_v35 }
0x55c2   : > { %16834 = vmatpush3.msra.mxu0 %v21056_v35 }
0x55c3   : > { %16835 = vmatprep.subr.mxu0 %v21063_v19 }
0x55c4   : > { %16836 = vmatpush3.msra.mxu0 %v21063_v19 }
0x55c5   : > { %16837 = vmatprep.subr.mxu0 %v21070_v50 }
0x55c6   : > { %16838 = vmatpush3.msra.mxu0 %v21070_v50 }
0x55c7   : > { %16839 = vmatprep.subr.mxu0 %v21077_v38 }
0x55c8   : > { %16840 = vmatpush3.msra.mxu0 %v21077_v38 }
0x55c9   : > { %16841 = vmatprep.subr.mxu0 %v21084_v34 }
0x55ca   : > { %16842 = vmatpush3.msra.mxu0 %v21084_v34 }
0x55cb   : > { %16843 = vmatprep.subr.mxu0 %v21091_v7 }
0x55cc   : > { %16844 = vmatpush3.msra.mxu0 %v21091_v7 }
0x55cd   : > { %16845 = vmatprep.subr.mxu0 %v21098_v14 }
0x55ce   : > { %16846 = vmatpush3.msra.mxu0 %v21098_v14 }
0x55cf   : > { %16847 = vmatprep.subr.mxu0 %v21105_v52 }
0x55d0   : > { %16848 = vmatpush3.msra.mxu0 %v21105_v52 }
0x55d1   : > { %16849 = vmatprep.subr.mxu0 %v21112_v26 }
0x55d2   : > { %16850 = vmatpush3.msra.mxu0 %v21112_v26 }
0x55d3   : > { %16851 = vmatprep.subr.mxu0 %v21119_v46 }
0x55d4   : > { %16852 = vmatpush3.msra.mxu0 %v21119_v46 }
0x55d5   : > { %16853 = vmatprep.subr.mxu0 %v21126_v5 }
0x55d6   : > { %16854 = vmatpush3.msra.mxu0 %v21126_v5 }
0x55d7   : > { %16913 = vmatprep.subr.mxu0 %v20811_v1 }
0x567f   : > { %v16816_v62 = vpop.f32.mrf.mxu0 }
0x5680   : > { %v10857_v10 = vadd.f32 %v16816_v62, %v21343_v63 }
0x5681   : > { %v10847_v8 = vpop.f32.mrf.mxu0 }
0x5682   : > { %v14114_v36 = vmul.f32 -1.442695, %v10857_v10  ;;  %v10856_v20 = vadd.f32 %v10847_v8, %v21346_v28 }
0x5684   : > { %17429 = vpow2.f32 %v14114_v36  ;;  %v14113_v53 = vmul.f32 -1.442695, %v10856_v20  ;;  %v21403_v20 = vld [vmem:[%s22276_s4 + $0xb8] sm:$0xff] }
0x5686   : > { %17431 = vpow2.f32 %v14113_v53 }
0x5691   : > { %v17430_v6 = vpop.eup %17429 }
0x5692   : > { %v10865_v1 = vadd.f32 1.0, %v17430_v6 }
0x5693   : > { %v17432_v40 = vpop.eup %17431 }
0x5694   : > { %17433 = vrcp.f32 %v10865_v1  ;;  %v10864_v29 = vadd.f32 1.0, %v17432_v40 }
0x5696   : > { %17435 = vrcp.f32 %v10864_v29 }
0x56a1   : > { %v21350_v30 = vpop.eup %17433 }
0x56a2   : > { %v10871_v56 = vmul.f32 %v21350_v30, %v21250_v41 }
0x56a3   : > { %v21354_v4 = vpop.eup %17435 }
0x56a4   : > { %16817 = vmatprep.subr.mxu1 %v10871_v56  ;;  %v10870_v22 = vmul.f32 %v21354_v4, %v21257_v12  ;;  %v21364_v12 = vld [vmem:[#allocation2 + $0x58] sm:$0xff] }
0x56a5   : > { %16818 = vmatpush3.msra.mxu1 %v10871_v56 }
0x56a6   : > { %16819 = vmatprep.subr.mxu1 %v10870_v22 }
0x56a7   : > { %16820 = vmatpush3.msra.mxu1 %v10870_v22 }
0x56a8   : > { %16822 = vmatmul.mubr.msk.f32.vlgmr.msra.gmra.mxu1 %vm393_vm0, %v21152_v21 }
0x56a9   : > { %16828 = vmatprep.mubr.msk.f32.mxu1 %vm393_vm0, %v21156_v58 }
0x5768   : > { %v16823_v45 = vpop.f32.mrf.mxu1 }
0x5769   : > { %11030 = vrot.lane.b32.xlu1 %v16823_v45, %s17766_s21  ;;  %16824 = vmatprep.subr.mxu1 %v16823_v45 }
0x576a   : > { %v10938_v41 = vpop.f32.mrf.mxu1  ;;  %16825 = vmatpush3.msra.mxu1 %v16823_v45 }
0x576b   : > { %11028 = vrot.lane.b32.xlu0 %v10938_v41, %s17766_s21  ;;  %16826 = vmatprep.subr.mxu1 %v10938_v41 }
0x576c   : > { %16827 = vmatpush3.msra.mxu1 %v10938_v41 }
0x576d   : > { %16829 = vmatmul.mubr.msk.f32.vlgmr.msra.gmra.mxu1 %vm393_vm0, %v21152_v21  ;;  %16858 = vmatprep.subr.mxu1 %v21364_v12 }
0x576e   : > { %16859 = vmatpush3.msra.mxu1 %v21364_v12  ;;  %16862 = vmatprep.mubr.msk.f32.mxu1 %vm393_vm0, %v21156_v58 }
0x576f   : > { %16860 = vmatprep.subr.mxu1 %v21370_v13 }
0x5770   : > { %16861 = vmatpush3.msra.mxu1 %v21370_v13 }
0x5771   : > { %16863 = vmatmul.mubr.msk.f32.vlgmr.msra.gmra.mxu1 %vm393_vm0, %v21152_v21 }
0x5772   : > { %16869 = vmatprep.mubr.msk.f32.mxu1 %vm393_vm0, %v21156_v58 }
0x57db   : > { %v11031_v18 = vpop.permute.xlu1 %11030 }
0x57dc   : > { %v11043_v10 = vsel %vm570_vm1, %v10871_v56, %v11031_v18  ;;  %v21514_v18 = vld [vmem:[%s22275_s3 + $0x98] sm:$0xff] }
0x57dd   : > { %v11029_v48 = vpop.permute.xlu0 %11028 }
0x57de   : > { %v11042_v54 = vsel %vm570_vm1, %v10870_v22, %v11029_v48  ;;  %v21521_v48 = vld [vmem:[%s22275_s3 + $0x90] sm:$0xff] }
0x582d   : > { %v16830_v60 = vpop.f32.mrf.mxu1 }
0x582e   : > { %v11023_v25 = vmul.f32 2.0, %v16830_v60 }
0x582f   : > { %v11013_v49 = vpop.f32.mrf.mxu1 }
0x5830   : > { %v11025_v17 = vsub.f32 %v11023_v25, %v10871_v56  ;;  %v11022_v32 = vmul.f32 2.0, %v11013_v49 }
0x5831   : > { %v21380_v37 = vpop.f32.mrf.mxu1 }
0x5832   : > { %v11024_v43 = vsub.f32 %v11022_v32, %v10870_v22  ;;  %11038 = vrot.lane.b32.xlu1 %v11025_v17, %s17767_s26  ;;  %16865 = vmatprep.subr.mxu1 %v21380_v37 }
0x5833   : > { %v21384_v47 = vpop.f32.mrf.mxu1  ;;  %16866 = vmatpush3.msra.mxu1 %v21380_v37 }
0x5834   : > { %16867 = vmatprep.subr.mxu1 %v21384_v47  ;;  %11036 = vrot.lane.b32.xlu0 %v11024_v43, %s17767_s26  ;;  %v21500_v43 = vld [vmem:[%s22275_s3 + $0xa8] sm:$0xff] }
0x5835   : > { %16868 = vmatpush3.msra.mxu1 %v21384_v47 }
0x5836   : > { %16870 = vmatmul.mubr.msk.f32.vlgmr.msra.gmra.mxu1 %vm393_vm0, %v21152_v21 }
0x5837   : > { %16876 = vmatprep.mubr.msk.f32.mxu1 %vm393_vm0, %v21156_v58 }
0x58a4   : > { %v11039_v33 = vpop.permute.xlu1 %11038 }
0x58a5   : > { %v11045_v36 = vsel %vm573_vm2, %v11043_v10, %v11039_v33  ;;  %v21528_v33 = vld [vmem:[%s22275_s3 + $0x88] sm:$0xff]  ;;  %v21542_v10 = vld [vmem:[%s22275_s3 + $0x78] sm:$0xff] }
0x58a6   : > { %v11037_v62 = vpop.permute.xlu0 %11036 }
0x58a7   : > { %v11044_v8 = vsel %vm573_vm2, %v11042_v54, %v11037_v62  ;;  %v21535_v62 = vld [vmem:[%s22275_s3 + $0x80] sm:$0xff] }
0x58a8   : > { %16855 = vmatprep.mubr.msk.f32.mxu0 %vm756_vm3, %v11044_v8  ;;  %v21549_v8 = vld [vmem:[%s22275_s3 + $0x70] sm:$0xff] }
0x58a9   : > { %16856 = vmatmul.mubr.msk.f32.vlgmr.msra.gmra.mxu0 %vm756_vm3, %v11045_v36 }
0x58aa   : > { %16914 = vmatpush3.msra.mxu0 %v21403_v20 }
0x58ab   : > { %16915 = vmatprep.subr.mxu0 %v20876_v44 }
0x58ac   : > { %16916 = vmatpush3.msra.mxu0 %v20876_v44 }
0x58ad   : > { %16917 = vmatprep.subr.mxu0 %v20883_v39 }
0x58ae   : > { %16918 = vmatpush3.msra.mxu0 %v20883_v39 }
0x58af   : > { %16919 = vmatprep.subr.mxu0 %v20890_v55 }
0x58b0   : > { %16920 = vmatpush3.msra.mxu0 %v20890_v55 }
0x58b1   : > { %16921 = vmatprep.subr.mxu0 %v20897_v16 }
0x58b2   : > { %16922 = vmatpush3.msra.mxu0 %v20897_v16 }
0x58b3   : > { %16923 = vmatprep.subr.mxu0 %v20904_v23 }
0x58b4   : > { %16924 = vmatpush3.msra.mxu0 %v20904_v23 }
0x58b5   : > { %16925 = vmatprep.subr.mxu0 %v20911_v9 }
0x58b6   : > { %16926 = vmatpush3.msra.mxu0 %v20911_v9 }
0x58b7   : > { %16927 = vmatprep.subr.mxu0 %v20918_v42 }
0x58b8   : > { %16928 = vmatpush3.msra.mxu0 %v20918_v42 }
0x58b9   : > { %16929 = vmatprep.subr.mxu0 %v20925_v59 }
0x58ba   : > { %16930 = vmatpush3.msra.mxu0 %v20925_v59 }
0x58bb   : > { %16931 = vmatprep.subr.mxu0 %v20932_v24 }
0x58bc   : > { %16932 = vmatpush3.msra.mxu0 %v20932_v24  ;;  %v11142_v24 = vsub.f32 1.0, %v21350_v30 }
0x58bd   : > { %16933 = vmatprep.subr.mxu0 %v20939_v61 }
0x58be   : > { %16934 = vmatpush3.msra.mxu0 %v20939_v61 }
0x58bf   : > { %16935 = vmatprep.subr.mxu0 %v20946_v2 }
0x58c0   : > { %16936 = vmatpush3.msra.mxu0 %v20946_v2 }
0x58c1   : > { %16954 = vmatprep.subr.mxu0 %v20953_v27  ;;  %v11140_v27 = vmul.f32 %v21350_v30, %v21232_v57 }
0x58f6   : > { %v16871_v61 = vpop.f32.mrf.mxu1 }
0x58f7   : > { %v11319_v57 = vmul.f32 2.0, %v16871_v61 }
0x58f8   : > { %v11309_v29 = vpop.f32.mrf.mxu1 }
0x58f9   : > { %v11318_v22 = vmul.f32 2.0, %v11309_v29  ;;  %v21588_v29 = vld [vmem:[%s22277_s5 + $0xb8] sm:$0xff] }
0x58fb   : > { %v11320_v30 = vsub.f32 %v11318_v22, %v21370_v13 }
0x5969   : > { %v16857_v44 = vpop.f32.mrf.mxu0 }
0x596a   : > { %11131 = vrot.lane.b32.xlu0 %v16857_v44, %s17767_s26  ;;  %v21556_v44 = vld [vmem:[%s22275_s3 + $0x68] sm:$0xff] }
0x596b   : > { %v11118_v39 = vpop.f32.mrf.mxu0 }
0x596c   : > { %11129 = vrot.lane.b32.xlu1 %v11118_v39, %s17767_s26 }
0x59dc   : > { %v11132_v55 = vpop.permute.xlu0 %11131 }
0x59dd   : > { %v11136_v16 = vadd.f32 %v11132_v55, %v21343_v63  ;;  %v11141_v63 = vsub.f32 1.0, %v21354_v4  ;;  %v21565_v55 = vld [vmem:[%s22275_s3 + $0x60] sm:$0xff] }
0x59de   : > { %v11130_v23 = vpop.permute.xlu1 %11129 }
0x59df   : > { %17437 = vtanh.f32 %v11136_v16  ;;  %v11135_v9 = vadd.f32 %v11130_v23, %v21346_v28  ;;  %v11139_v28 = vmul.f32 %v21354_v4, %v21236_v0  ;;  %v11321_v0 = vsub.f32 %v11319_v57, %v21364_v12 }
0x59e1   : > { %17439 = vtanh.f32 %v11135_v9 }
0x59ec   : > { %v17438_v42 = vpop.eup %17437 }
0x59ed   : > { %11147 = vrot.lane.b32.xlu0 %v17438_v42, %s17768_s22 }
0x59ee   : > { %v17440_v59 = vpop.eup %17439 }
0x59ef   : > { %11145 = vrot.lane.b32.xlu1 %v17440_v59, %s17768_s22 }
0x5a5f   : > { %v11148_v2 = vpop.permute.xlu0 %11147 }
0x5a60   : > { %v11152_v53 = vmul.f32 %v11148_v2, %v11142_v24 }
0x5a61   : > { %v11146_v6 = vpop.permute.xlu1 %11145 }
0x5a62   : > { %v21439_v1 = vadd.f32 %v11152_v53, %v11140_v27  ;;  %v11151_v40 = vmul.f32 %v11146_v6, %v11141_v63 }
0x5a64   : > { %v21443_v56 = vadd.f32 %v11151_v40, %v11139_v28  ;;  %11159 = vrot.lane.b32.xlu0 %v21439_v1, %s17768_s22 }
0x5a66   : > { %11157 = vrot.lane.b32.xlu1 %v21443_v56, %s17768_s22 }
0x5a68   : > { %11324 = vrot.lane.b32.xlu0 %v21384_v47, %s17766_s21  ;;  %v21507_v47 = vld [vmem:[%s22275_s3 + $0xa0] sm:$0xff] }
0x5a6a   : > { %11326 = vrot.lane.b32.xlu1 %v21380_v37, %s17766_s21  ;;  %v21485_v37 = vld [vmem:[%s22275_s3 + $0xb8] sm:$0xff] }
0x5a6c   : > { %11332 = vrot.lane.b32.xlu0 %v11320_v30, %s17767_s26 }
0x5a6e   : > { %11334 = vrot.lane.b32.xlu1 %v11321_v0, %s17767_s26 }
0x5ad6   : > { %v21457_v4 = vpop.permute.xlu0 %11159 }
0x5ad7   : > { %14122 = vst.msk [vmem:[%s20452_s23 + $0x48] sm:$0xff] %vm570_vm1, %v21457_v4  ;;  %16872 = vmatprep.subr.mxu1 %v21457_v4 }
0x5ad8   : > { %16873 = vmatpush3.msra.mxu1 %v21457_v4  ;;  %v21464_v45 = vpop.permute.xlu1 %11157 }
0x5ad9   : > { %14121 = vst.msk [vmem:[%s20452_s23 + $0x40] sm:$0xff] %vm570_vm1, %v21464_v45  ;;  %16874 = vmatprep.subr.mxu1 %v21464_v45 }
0x5ada   : > { %16875 = vmatpush3.msra.mxu1 %v21464_v45  ;;  %v11325_v41 = vpop.permute.xlu0 %11324 }
0x5adb   : > { %16877 = vmatmul.mubr.msk.f32.vlgmr.msra.gmra.mxu1 %vm393_vm0, %v21152_v21  ;;  %v11338_v17 = vsel %vm570_vm1, %v21370_v13, %v11325_v41  ;;  %v21493_v13 = vld [vmem:[%s22275_s3 + $0xb0] sm:$0xff] }
0x5adc   : > { %16883 = vmatprep.mubr.msk.f32.mxu1 %vm393_vm0, %v21156_v58  ;;  %v11327_v54 = vpop.permute.xlu1 %11326 }
0x5add   : > { %v11339_v39 = vsel %vm570_vm1, %v21364_v12, %v11327_v54 }
0x5ade   : > { %v11333_v25 = vpop.permute.xlu0 %11332 }
0x5adf   : > { %v11340_v32 = vsel %vm573_vm2, %v11338_v17, %v11333_v25 }
0x5ae0   : > { %v11335_v36 = vpop.permute.xlu1 %11334 }
0x5ae1   : > { %v11341_v16 = vsel %vm573_vm2, %v11339_v39, %v11335_v36 }
0x5b9b   : > { %v16878_v60 = vpop.f32.mrf.mxu1 }
0x5b9c   : > { %11500 = vrot.lane.b32.xlu1 %v16878_v60, %s17766_s21  ;;  %16879 = vmatprep.subr.mxu1 %v16878_v60 }
0x5b9d   : > { %v11408_v49 = vpop.f32.mrf.mxu1  ;;  %16880 = vmatpush3.msra.mxu1 %v16878_v60 }
0x5b9e   : > { %11498 = vrot.lane.b32.xlu0 %v11408_v49, %s17766_s21  ;;  %16881 = vmatprep.subr.mxu1 %v11408_v49 }
0x5b9f   : > { %16882 = vmatpush3.msra.mxu1 %v11408_v49  ;;  %v21642_v49 = vld [vmem:[#allocation2 + $0x60] sm:$0xff] }
0x5ba0   : > { %16884 = vmatmul.mubr.msk.f32.vlgmr.msra.gmra.mxu1 %vm393_vm0, %v21152_v21  ;;  %16886 = vmatprep.subr.mxu1 %v21485_v37 }
0x5ba1   : > { %16887 = vmatpush3.msra.mxu1 %v21485_v37  ;;  %16910 = vmatprep.mubr.msk.f32.mxu1 %vm756_vm3, %v11340_v32 }
0x5ba2   : > { %16888 = vmatprep.subr.mxu1 %v21493_v13 }
0x5ba3   : > { %16889 = vmatpush3.msra.mxu1 %v21493_v13 }
0x5ba4   : > { %16890 = vmatprep.subr.mxu1 %v21500_v43 }
0x5ba5   : > { %16891 = vmatpush3.msra.mxu1 %v21500_v43 }
0x5ba6   : > { %16892 = vmatprep.subr.mxu1 %v21507_v47 }
0x5ba7   : > { %16893 = vmatpush3.msra.mxu1 %v21507_v47 }
0x5ba8   : > { %16894 = vmatprep.subr.mxu1 %v21514_v18 }
0x5ba9   : > { %16895 = vmatpush3.msra.mxu1 %v21514_v18 }
0x5baa   : > { %16896 = vmatprep.subr.mxu1 %v21521_v48 }
0x5bab   : > { %16897 = vmatpush3.msra.mxu1 %v21521_v48 }
0x5bac   : > { %16898 = vmatprep.subr.mxu1 %v21528_v33 }
0x5bad   : > { %16899 = vmatpush3.msra.mxu1 %v21528_v33 }
0x5bae   : > { %16900 = vmatprep.subr.mxu1 %v21535_v62 }
0x5baf   : > { %16901 = vmatpush3.msra.mxu1 %v21535_v62 }
0x5bb0   : > { %16902 = vmatprep.subr.mxu1 %v21542_v10 }
0x5bb1   : > { %16903 = vmatpush3.msra.mxu1 %v21542_v10 }
0x5bb2   : > { %16904 = vmatprep.subr.mxu1 %v21549_v8 }
0x5bb3   : > { %16905 = vmatpush3.msra.mxu1 %v21549_v8 }
0x5bb4   : > { %16906 = vmatprep.subr.mxu1 %v21556_v44 }
0x5bb5   : > { %16907 = vmatpush3.msra.mxu1 %v21556_v44 }
0x5bb6   : > { %16908 = vmatprep.subr.mxu1 %v21565_v55 }
0x5bb7   : > { %16909 = vmatpush3.msra.mxu1 %v21565_v55 }
0x5bb8   : > { %16911 = vmatmul.mubr.msk.f32.vlgmr.msra.gmra.mxu1 %vm756_vm3, %v11341_v16 }
0x5bb9   : > { %16944 = vmatprep.mubr.msk.f32.mxu1 %vm393_vm0, %v21156_v58 }
0x5c0e   : > { %v11501_v61 = vpop.permute.xlu1 %11500 }
0x5c0f   : > { %v11513_v6 = vsel %vm570_vm1, %v21457_v4, %v11501_v61 }
0x5c10   : > { %v11499_v2 = vpop.permute.xlu0 %11498 }
0x5c11   : > { %v11512_v53 = vsel %vm570_vm1, %v21464_v45, %v11499_v2 }
0x5c60   : > { %v16885_v23 = vpop.f32.mrf.mxu1 }
0x5c61   : > { %v11493_v9 = vmul.f32 2.0, %v16885_v23 }
0x5c62   : > { %v11483_v42 = vpop.f32.mrf.mxu1 }
0x5c63   : > { %v11495_v12 = vsub.f32 %v11493_v9, %v21457_v4  ;;  %v11492_v59 = vmul.f32 2.0, %v11483_v42 }
0x5c65   : > { %v11494_v24 = vsub.f32 %v11492_v59, %v21464_v45  ;;  %11508 = vrot.lane.b32.xlu1 %v11495_v12, %s17767_s26 }
0x5c67   : > { %11506 = vrot.lane.b32.xlu0 %v11494_v24, %s17767_s26 }
0x5cd7   : > { %v11509_v27 = vpop.permute.xlu1 %11508 }
0x5cd8   : > { %v11515_v40 = vsel %vm573_vm2, %v11513_v6, %v11509_v27  ;;  %v21697_v6 = vld [vmem:[%s22276_s4 + $0x98] sm:$0xff] }
0x5cd9   : > { %v11507_v63 = vpop.permute.xlu0 %11506 }
0x5cda   : > { %v11514_v28 = vsel %vm573_vm2, %v11512_v53, %v11507_v63  ;;  %v21690_v63 = vld [vmem:[%s22276_s4 + $0xa0] sm:$0xff] }
0x5cdb   : > { %16937 = vmatprep.mubr.msk.f32.mxu0 %vm756_vm3, %v11514_v28  ;;  %v21704_v28 = vld [vmem:[%s22276_s4 + $0x90] sm:$0xff] }
0x5cdc   : > { %16938 = vmatmul.mubr.msk.f32.vlgmr.msra.gmra.mxu0 %vm756_vm3, %v11515_v40  ;;  %v21711_v40 = vld [vmem:[%s22276_s4 + $0x88] sm:$0xff] }
0x5cdd   : > { %16955 = vmatpush3.msra.mxu0 %v21588_v29 }
0x5cde   : > { %16956 = vmatprep.subr.mxu0 %v21056_v35 }
0x5cdf   : > { %16957 = vmatpush3.msra.mxu0 %v21056_v35  ;;  %v16912_v35 = vpop.f32.mrf.mxu1 }
0x5ce0   : > { %16958 = vmatprep.subr.mxu0 %v21063_v19 }
0x5ce1   : > { %16959 = vmatpush3.msra.mxu0 %v21063_v19  ;;  %v11588_v19 = vpop.f32.mrf.mxu1 }
0x5ce2   : > { %16960 = vmatprep.subr.mxu0 %v21070_v50 }
0x5ce3   : > { %16961 = vmatpush3.msra.mxu0 %v21070_v50  ;;  %v21615_v50 = vadd.f32 %v21134_v11, %v16912_v35  ;;  %v21718_v35 = vld [vmem:[%s22276_s4 + $0x80] sm:$0xff] }
0x5ce4   : > { %16962 = vmatprep.subr.mxu0 %v21077_v38 }
0x5ce5   : > { %16963 = vmatpush3.msra.mxu0 %v21077_v38 }
0x5ce6   : > { %16964 = vmatprep.subr.mxu0 %v21084_v34 }
0x5ce7   : > { %16965 = vmatpush3.msra.mxu0 %v21084_v34  ;;  %v21618_v34 = vadd.f32 %v21134_v11, %v11588_v19  ;;  %v21725_v19 = vld [vmem:[%s22276_s4 + $0x78] sm:$0xff] }
0x5ce8   : > { %16966 = vmatprep.subr.mxu0 %v21091_v7 }
0x5ce9   : > { %16967 = vmatpush3.msra.mxu0 %v21091_v7 }
0x5cea   : > { %16968 = vmatprep.subr.mxu0 %v21098_v14 }
0x5ceb   : > { %16969 = vmatpush3.msra.mxu0 %v21098_v14 }
0x5cec   : > { %16970 = vmatprep.subr.mxu0 %v21105_v52 }
0x5ced   : > { %16971 = vmatpush3.msra.mxu0 %v21105_v52 }
0x5cee   : > { %16972 = vmatprep.subr.mxu0 %v21112_v26 }
0x5cef   : > { %16973 = vmatpush3.msra.mxu0 %v21112_v26 }
0x5cf0   : > { %16974 = vmatprep.subr.mxu0 %v21119_v46 }
0x5cf1   : > { %16975 = vmatpush3.msra.mxu0 %v21119_v46 }
0x5cf2   : > { %16976 = vmatprep.subr.mxu0 %v21126_v5 }
0x5cf3   : > { %16977 = vmatpush3.msra.mxu0 %v21126_v5 }
0x5cf4   : > { %17036 = vmatprep.subr.mxu0 %v21403_v20 }
0x5d9c   : > { %v16939_v38 = vpop.f32.mrf.mxu0 }
0x5d9d   : > { %v11679_v7 = vadd.f32 %v16939_v38, %v21615_v50  ;;  %v21732_v38 = vld [vmem:[%s22276_s4 + $0x70] sm:$0xff] }
0x5d9e   : > { %v11669_v14 = vpop.f32.mrf.mxu0 }
0x5d9f   : > { %v14136_v52 = vmul.f32 -1.442695, %v11679_v7  ;;  %v11678_v26 = vadd.f32 %v11669_v14, %v21618_v34  ;;  %v21739_v7 = vld [vmem:[%s22276_s4 + $0x68] sm:$0xff]  ;;  %v21746_v14 = vld [vmem:[%s22276_s4 + $0x60] sm:$0xff] }
0x5da1   : > { %17441 = vpow2.f32 %v14136_v52  ;;  %v14135_v46 = vmul.f32 -1.442695, %v11678_v26 }
0x5da3   : > { %17443 = vpow2.f32 %v14135_v46 }
0x5dae   : > { %v17442_v5 = vpop.eup %17441 }
0x5daf   : > { %v11687_v22 = vadd.f32 1.0, %v17442_v5 }
0x5db0   : > { %v17444_v57 = vpop.eup %17443 }
0x5db1   : > { %17445 = vrcp.f32 %v11687_v22  ;;  %v11686_v30 = vadd.f32 1.0, %v17444_v57 }
0x5db3   : > { %17447 = vrcp.f32 %v11686_v30 }
0x5dbe   : > { %v21622_v0 = vpop.eup %17445 }
0x5dbf   : > { %v11693_v11 = vmul.f32 %v21622_v0, %v21457_v4 }
0x5dc0   : > { %v21626_v41 = vpop.eup %17447 }
0x5dc1   : > { %16940 = vmatprep.subr.mxu1 %v11693_v11  ;;  %v11692_v60 = vmul.f32 %v21626_v41, %v21464_v45  ;;  %v21636_v45 = vld [vmem:[#allocation2 + $0x68] sm:$0xff] }
0x5dc2   : > { %16941 = vmatpush3.msra.mxu1 %v11693_v11 }
0x5dc3   : > { %16942 = vmatprep.subr.mxu1 %v11692_v60 }
0x5dc4   : > { %16943 = vmatpush3.msra.mxu1 %v11692_v60 }
0x5dc5   : > { %16945 = vmatmul.mubr.msk.f32.vlgmr.msra.gmra.mxu1 %vm393_vm0, %v21152_v21 }
0x5dc6   : > { %16951 = vmatprep.mubr.msk.f32.mxu1 %vm393_vm0, %v21156_v58 }
0x5e85   : > { %v16946_v25 = vpop.f32.mrf.mxu1 }
0x5e86   : > { %11852 = vrot.lane.b32.xlu1 %v16946_v25, %s17766_s21  ;;  %16947 = vmatprep.subr.mxu1 %v16946_v25 }
0x5e87   : > { %v11760_v4 = vpop.f32.mrf.mxu1  ;;  %16948 = vmatpush3.msra.mxu1 %v16946_v25 }
0x5e88   : > { %11850 = vrot.lane.b32.xlu0 %v11760_v4, %s17766_s21  ;;  %16949 = vmatprep.subr.mxu1 %v11760_v4 }
0x5e89   : > { %16950 = vmatpush3.msra.mxu1 %v11760_v4 }
0x5e8a   : > { %16952 = vmatmul.mubr.msk.f32.vlgmr.msra.gmra.mxu1 %vm393_vm0, %v21152_v21  ;;  %16981 = vmatprep.subr.mxu1 %v21636_v45 }
0x5e8b   : > { %16982 = vmatpush3.msra.mxu1 %v21636_v45  ;;  %16985 = vmatprep.mubr.msk.f32.mxu1 %vm393_vm0, %v21156_v58 }
0x5e8c   : > { %16983 = vmatprep.subr.mxu1 %v21642_v49 }
0x5e8d   : > { %16984 = vmatpush3.msra.mxu1 %v21642_v49 }
0x5e8e   : > { %16986 = vmatmul.mubr.msk.f32.vlgmr.msra.gmra.mxu1 %vm393_vm0, %v21152_v21 }
0x5e8f   : > { %16992 = vmatprep.mubr.msk.f32.mxu1 %vm393_vm0, %v21156_v58 }
0x5ef8   : > { %v11853_v42 = vpop.permute.xlu1 %11852 }
0x5ef9   : > { %v11865_v2 = vsel %vm570_vm1, %v11693_v11, %v11853_v42 }
0x5efa   : > { %v11851_v12 = vpop.permute.xlu0 %11850 }
0x5efb   : > { %v11864_v24 = vsel %vm570_vm1, %v11692_v60, %v11851_v12 }
0x5f4a   : > { %v16953_v17 = vpop.f32.mrf.mxu1 }
0x5f4b   : > { %v11845_v32 = vmul.f32 2.0, %v16953_v17  ;;  %v11962_v17 = vmul.f32 %v21622_v0, %v21439_v1 }
0x5f4c   : > { %v11835_v54 = vpop.f32.mrf.mxu1 }
0x5f4d   : > { %v11847_v36 = vsub.f32 %v11845_v32, %v11693_v11  ;;  %v11844_v39 = vmul.f32 2.0, %v11835_v54 }
0x5f4e   : > { %v21652_v16 = vpop.f32.mrf.mxu1 }
0x5f4f   : > { %v11846_v23 = vsub.f32 %v11844_v39, %v11692_v60  ;;  %11860 = vrot.lane.b32.xlu1 %v11847_v36, %s17767_s26  ;;  %16988 = vmatprep.subr.mxu1 %v21652_v16  ;;  %v11964_v60 = vsub.f32 1.0, %v21622_v0 }
0x5f50   : > { %v21656_v9 = vpop.f32.mrf.mxu1  ;;  %16989 = vmatpush3.msra.mxu1 %v21652_v16 }
0x5f51   : > { %16990 = vmatprep.subr.mxu1 %v21656_v9  ;;  %11858 = vrot.lane.b32.xlu0 %v11846_v23, %s17767_s26 }
0x5f52   : > { %16991 = vmatpush3.msra.mxu1 %v21656_v9 }
0x5f53   : > { %16993 = vmatmul.mubr.msk.f32.vlgmr.msra.gmra.mxu1 %vm393_vm0, %v21152_v21  ;;  %v21676_v21 = vld [vmem:[%s22276_s4 + $0xb0] sm:$0xff] }
0x5f54   : > { %16999 = vmatprep.mubr.msk.f32.mxu1 %vm393_vm0, %v21156_v58  ;;  %v21683_v58 = vld [vmem:[%s22276_s4 + $0xa8] sm:$0xff] }
0x5fc1   : > { %v11861_v59 = vpop.permute.xlu1 %11860 }
0x5fc2   : > { %v11867_v53 = vsel %vm573_vm2, %v11865_v2, %v11861_v59  ;;  %v21797_v59 = vld [vmem:[#allocation3] sm:$0xff] }
0x5fc3   : > { %v11859_v61 = vpop.permute.xlu0 %11858 }
0x5fc4   : > { %v11866_v27 = vsel %vm573_vm2, %v11864_v24, %v11859_v61 }
0x5fc5   : > { %16978 = vmatprep.mubr.msk.f32.mxu0 %vm756_vm3, %v11866_v27 }
0x5fc6   : > { %16979 = vmatmul.mubr.msk.f32.vlgmr.msra.gmra.mxu0 %vm756_vm3, %v11867_v53 }
0x5fc7   : > { %17037 = vmatpush3.msra.mxu0 %v21403_v20 }
0x5fc8   : > { %17038 = vmatprep.subr.mxu0 %v21676_v21 }
0x5fc9   : > { %17039 = vmatpush3.msra.mxu0 %v21676_v21 }
0x5fca   : > { %17040 = vmatprep.subr.mxu0 %v21683_v58 }
0x5fcb   : > { %17041 = vmatpush3.msra.mxu0 %v21683_v58 }
0x5fcc   : > { %17042 = vmatprep.subr.mxu0 %v21690_v63 }
0x5fcd   : > { %17043 = vmatpush3.msra.mxu0 %v21690_v63 }
0x5fce   : > { %17044 = vmatprep.subr.mxu0 %v21697_v6 }
0x5fcf   : > { %17045 = vmatpush3.msra.mxu0 %v21697_v6 }
0x5fd0   : > { %17046 = vmatprep.subr.mxu0 %v21704_v28 }
0x5fd1   : > { %17047 = vmatpush3.msra.mxu0 %v21704_v28 }
0x5fd2   : > { %17048 = vmatprep.subr.mxu0 %v21711_v40 }
0x5fd3   : > { %17049 = vmatpush3.msra.mxu0 %v21711_v40 }
0x5fd4   : > { %17050 = vmatprep.subr.mxu0 %v21718_v35 }
0x5fd5   : > { %17051 = vmatpush3.msra.mxu0 %v21718_v35 }
0x5fd6   : > { %17052 = vmatprep.subr.mxu0 %v21725_v19 }
0x5fd7   : > { %17053 = vmatpush3.msra.mxu0 %v21725_v19 }
0x5fd8   : > { %17054 = vmatprep.subr.mxu0 %v21732_v38 }
0x5fd9   : > { %17055 = vmatpush3.msra.mxu0 %v21732_v38 }
0x5fda   : > { %17056 = vmatprep.subr.mxu0 %v21739_v7 }
0x5fdb   : > { %17057 = vmatpush3.msra.mxu0 %v21739_v7 }
0x5fdc   : > { %17058 = vmatprep.subr.mxu0 %v21746_v14 }
0x5fdd   : > { %17059 = vmatpush3.msra.mxu0 %v21746_v14 }
0x5fde   : > { %17077 = vmatprep.subr.mxu0 %v21588_v29 }
0x6013   : > { %v16994_v25 = vpop.f32.mrf.mxu1 }
0x6014   : > { %v12141_v1 = vmul.f32 2.0, %v16994_v25 }
0x6015   : > { %v12131_v23 = vpop.f32.mrf.mxu1 }
0x6016   : > { %v12140_v12 = vmul.f32 2.0, %v12131_v23  ;;  %v21855_v23 = vld [vmem:[%s22277_s5 + $0xb0] sm:$0xff] }
0x6018   : > { %v12142_v0 = vsub.f32 %v12140_v12, %v21642_v49  ;;  %v21862_v12 = vld [vmem:[%s22277_s5 + $0xa8] sm:$0xff] }
0x6086   : > { %v16980_v52 = vpop.f32.mrf.mxu0 }
0x6087   : > { %11953 = vrot.lane.b32.xlu0 %v16980_v52, %s17767_s26 }
0x6088   : > { %v11940_v26 = vpop.f32.mrf.mxu0 }
0x6089   : > { %11951 = vrot.lane.b32.xlu1 %v11940_v26, %s17767_s26 }
0x60f9   : > { %v11954_v46 = vpop.permute.xlu0 %11953 }
0x60fa   : > { %v11958_v5 = vadd.f32 %v11954_v46, %v21615_v50  ;;  %v11963_v50 = vsub.f32 1.0, %v21626_v41 }
0x60fb   : > { %v11952_v22 = vpop.permute.xlu1 %11951 }
0x60fc   : > { %17449 = vtanh.f32 %v11958_v5  ;;  %v11957_v57 = vadd.f32 %v11952_v22, %v21618_v34  ;;  %v11961_v34 = vmul.f32 %v21626_v41, %v21443_v56  ;;  %v12143_v56 = vsub.f32 %v12141_v1, %v21636_v45  ;;  %v21869_v1 = vld [vmem:[%s22277_s5 + $0xa0] sm:$0xff] }
0x60fe   : > { %17451 = vtanh.f32 %v11957_v57 }
0x6109   : > { %v17450_v30 = vpop.eup %17449 }
0x610a   : > { %11969 = vrot.lane.b32.xlu0 %v17450_v30, %s17768_s22 }
0x610b   : > { %v17452_v11 = vpop.eup %17451 }
0x610c   : > { %11967 = vrot.lane.b32.xlu1 %v17452_v11, %s17768_s22 }
0x617c   : > { %v11970_v4 = vpop.permute.xlu0 %11969 }
0x617d   : > { %v11974_v32 = vmul.f32 %v11970_v4, %v11964_v60 }
0x617e   : > { %v11968_v54 = vpop.permute.xlu1 %11967 }
0x617f   : > { %v21761_v36 = vadd.f32 %v11974_v32, %v11962_v17  ;;  %v11973_v39 = vmul.f32 %v11968_v54, %v11963_v50 }
0x6181   : > { %v21765_v42 = vadd.f32 %v11973_v39, %v11961_v34  ;;  %11981 = vrot.lane.b32.xlu0 %v21761_v36, %s17768_s22 }
0x6183   : > { %11979 = vrot.lane.b32.xlu1 %v21765_v42, %s17768_s22 }
0x6185   : > { %12146 = vrot.lane.b32.xlu0 %v21656_v9, %s17766_s21 }
0x6187   : > { %12148 = vrot.lane.b32.xlu1 %v21652_v16, %s17766_s21  ;;  %v21793_v16 = vld [vmem:[#allocation3 + $0x8] sm:$0xff] }
0x6189   : > { %12154 = vrot.lane.b32.xlu0 %v12142_v0, %s17767_s26  ;;  %v21876_v0 = vld [vmem:[%s22277_s5 + $0x98] sm:$0xff] }
0x618b   : > { %12156 = vrot.lane.b32.xlu1 %v12143_v56, %s17767_s26  ;;  %v21883_v56 = vld [vmem:[%s22277_s5 + $0x90] sm:$0xff] }
0x61f3   : > { %v21779_v41 = vpop.permute.xlu0 %11981 }
0x61f4   : > { %14144 = vst.msk [vmem:[%s20452_s23 + $0x58] sm:$0xff] %vm570_vm1, %v21779_v41  ;;  %16995 = vmatprep.subr.mxu1 %v21779_v41 }
0x61f5   : > { %16996 = vmatpush3.msra.mxu1 %v21779_v41  ;;  %v21786_v9 = vpop.permute.xlu1 %11979 }
0x61f6   : > { %14143 = vst.msk [vmem:[%s20452_s23 + $0x50] sm:$0xff] %vm570_vm1, %v21786_v9  ;;  %16997 = vmatprep.subr.mxu1 %v21786_v9 }
0x61f7   : > { %16998 = vmatpush3.msra.mxu1 %v21786_v9  ;;  %v12147_v24 = vpop.permute.xlu0 %12146 }
0x61f8   : > { %17000 = vmatmul.mubr.msk.f32.vlgmr.msra.gmra.mxu1 %vm393_vm0, %v21793_v16  ;;  %v12160_v53 = vsel %vm570_vm1, %v21642_v49, %v12147_v24  ;;  %v21890_v24 = vld [vmem:[%s22277_s5 + $0x88] sm:$0xff] }
0x61f9   : > { %17006 = vmatprep.mubr.msk.f32.mxu1 %vm393_vm0, %v21797_v59  ;;  %v12149_v49 = vpop.permute.xlu1 %12148 }
0x61fa   : > { %v12161_v46 = vsel %vm570_vm1, %v21636_v45, %v12149_v49 }
0x61fb   : > { %v12155_v2 = vpop.permute.xlu0 %12154 }
0x61fc   : > { %v12162_v52 = vsel %vm573_vm2, %v12160_v53, %v12155_v2  ;;  %v21904_v2 = vld [vmem:[%s22277_s5 + $0x78] sm:$0xff]  ;;  %v21918_v53 = vld [vmem:[%s22277_s5 + $0x68] sm:$0xff] }
0x61fd   : > { %v12157_v26 = vpop.permute.xlu1 %12156 }
0x61fe   : > { %v12163_v5 = vsel %vm573_vm2, %v12161_v46, %v12157_v26  ;;  %v21933_v46 = vld [vmem:[%s22278_s6 + $0x1] ss:$0 sm:$0xff] }
0x62b8   : > { %v17001_v61 = vpop.f32.mrf.mxu1 }
0x62b9   : > { %12322 = vrot.lane.b32.xlu1 %v17001_v61, %s17766_s21  ;;  %17002 = vmatprep.subr.mxu1 %v17001_v61 }
0x62ba   : > { %v12230_v27 = vpop.f32.mrf.mxu1  ;;  %17003 = vmatpush3.msra.mxu1 %v17001_v61  ;;  %v21897_v61 = vld [vmem:[%s22277_s5 + $0x80] sm:$0xff] }
0x62bb   : > { %12320 = vrot.lane.b32.xlu0 %v12230_v27, %s17766_s21  ;;  %17004 = vmatprep.subr.mxu1 %v12230_v27 }
0x62bc   : > { %17005 = vmatpush3.msra.mxu1 %v12230_v27  ;;  %v21911_v27 = vld [vmem:[%s22277_s5 + $0x70] sm:$0xff] }
0x62bd   : > { %17007 = vmatmul.mubr.msk.f32.vlgmr.msra.gmra.mxu1 %vm393_vm0, %v21793_v16  ;;  %17009 = vmatprep.subr.mxu1 %v21485_v37 }
0x62be   : > { %17010 = vmatpush3.msra.mxu1 %v21485_v37  ;;  %17033 = vmatprep.mubr.msk.f32.mxu1 %vm756_vm3, %v12162_v52  ;;  %v21925_v52 = vld [vmem:[%s22277_s5 + $0x60] sm:$0xff] }
0x62bf   : > { %17011 = vmatprep.subr.mxu1 %v21493_v13 }
0x62c0   : > { %17012 = vmatpush3.msra.mxu1 %v21493_v13 }
0x62c1   : > { %17013 = vmatprep.subr.mxu1 %v21500_v43 }
0x62c2   : > { %17014 = vmatpush3.msra.mxu1 %v21500_v43 }
0x62c3   : > { %17015 = vmatprep.subr.mxu1 %v21507_v47 }
0x62c4   : > { %17016 = vmatpush3.msra.mxu1 %v21507_v47 }
0x62c5   : > { %17017 = vmatprep.subr.mxu1 %v21514_v18 }
0x62c6   : > { %17018 = vmatpush3.msra.mxu1 %v21514_v18 }
0x62c7   : > { %17019 = vmatprep.subr.mxu1 %v21521_v48 }
0x62c8   : > { %17020 = vmatpush3.msra.mxu1 %v21521_v48 }
0x62c9   : > { %17021 = vmatprep.subr.mxu1 %v21528_v33 }
0x62ca   : > { %17022 = vmatpush3.msra.mxu1 %v21528_v33 }
0x62cb   : > { %17023 = vmatprep.subr.mxu1 %v21535_v62 }
0x62cc   : > { %17024 = vmatpush3.msra.mxu1 %v21535_v62 }
0x62cd   : > { %17025 = vmatprep.subr.mxu1 %v21542_v10 }
0x62ce   : > { %17026 = vmatpush3.msra.mxu1 %v21542_v10 }
0x62cf   : > { %17027 = vmatprep.subr.mxu1 %v21549_v8 }
0x62d0   : > { %17028 = vmatpush3.msra.mxu1 %v21549_v8 }
0x62d1   : > { %17029 = vmatprep.subr.mxu1 %v21556_v44 }
0x62d2   : > { %17030 = vmatpush3.msra.mxu1 %v21556_v44 }
0x62d3   : > { %17031 = vmatprep.subr.mxu1 %v21565_v55 }
0x62d4   : > { %17032 = vmatpush3.msra.mxu1 %v21565_v55 }
0x62d5   : > { %17034 = vmatmul.mubr.msk.f32.vlgmr.msra.gmra.mxu1 %vm756_vm3, %v12163_v5 }
0x62d6   : > { %17067 = vmatprep.mubr.msk.f32.mxu1 %vm393_vm0, %v21797_v59 }
0x632b   : > { %v12323_v45 = vpop.permute.xlu1 %12322 }
0x632c   : > { %v12335_v54 = vsel %vm570_vm1, %v21779_v41, %v12323_v45 }
0x632d   : > { %v12321_v4 = vpop.permute.xlu0 %12320 }
0x632e   : > { %v12334_v32 = vsel %vm570_vm1, %v21786_v9, %v12321_v4 }
0x637d   : > { %v17008_v22 = vpop.f32.mrf.mxu1 }
0x637e   : > { %v12315_v57 = vmul.f32 2.0, %v17008_v22 }
0x637f   : > { %v12305_v30 = vpop.f32.mrf.mxu1 }
0x6380   : > { %v12317_v11 = vsub.f32 %v12315_v57, %v21779_v41  ;;  %v12314_v60 = vmul.f32 2.0, %v12305_v30 }
0x6382   : > { %v12316_v25 = vsub.f32 %v12314_v60, %v21786_v9  ;;  %12330 = vrot.lane.b32.xlu1 %v12317_v11, %s17767_s26 }
0x6384   : > { %12328 = vrot.lane.b32.xlu0 %v12316_v25, %s17767_s26 }
0x6395   : > { %v17035_v49 = vpop.f32.mrf.mxu1 }
0x6396   : > { %v21936_v5 = vadd.f32 %v21933_v46, %v17035_v49 }
0x6397   : > { %v12410_v26 = vpop.f32.mrf.mxu1 }
0x6398   : > { %v21939_v57 = vadd.f32 %v21933_v46, %v12410_v26 }
0x63f4   : > { %v12331_v17 = vpop.permute.xlu1 %12330 }
0x63f5   : > { %v12337_v39 = vsel %vm573_vm2, %v12335_v54, %v12331_v17 }
0x63f6   : > { %v12329_v50 = vpop.permute.xlu0 %12328 }
0x63f7   : > { %v12336_v34 = vsel %vm573_vm2, %v12334_v32, %v12329_v50 }
0x63f8   : > { %17060 = vmatprep.mubr.msk.f32.mxu0 %vm756_vm3, %v12336_v34 }
0x63f9   : > { %17061 = vmatmul.mubr.msk.f32.vlgmr.msra.gmra.mxu0 %vm756_vm3, %v12337_v39 }
0x63fa   : > { %17078 = vmatpush3.msra.mxu0 %v21588_v29 }
0x63fb   : > { %17079 = vmatprep.subr.mxu0 %v21855_v23 }
0x63fc   : > { %17080 = vmatpush3.msra.mxu0 %v21855_v23 }
0x63fd   : > { %17081 = vmatprep.subr.mxu0 %v21862_v12 }
0x63fe   : > { %17082 = vmatpush3.msra.mxu0 %v21862_v12 }
0x63ff   : > { %17083 = vmatprep.subr.mxu0 %v21869_v1 }
0x6400   : > { %17084 = vmatpush3.msra.mxu0 %v21869_v1 }
0x6401   : > { %17085 = vmatprep.subr.mxu0 %v21876_v0 }
0x6402   : > { %17086 = vmatpush3.msra.mxu0 %v21876_v0 }
0x6403   : > { %17087 = vmatprep.subr.mxu0 %v21883_v56 }
0x6404   : > { %17088 = vmatpush3.msra.mxu0 %v21883_v56 }
0x6405   : > { %17089 = vmatprep.subr.mxu0 %v21890_v24 }
0x6406   : > { %17090 = vmatpush3.msra.mxu0 %v21890_v24 }
0x6407   : > { %17091 = vmatprep.subr.mxu0 %v21897_v61 }
0x6408   : > { %17092 = vmatpush3.msra.mxu0 %v21897_v61 }
0x6409   : > { %17093 = vmatprep.subr.mxu0 %v21904_v2 }
0x640a   : > { %17094 = vmatpush3.msra.mxu0 %v21904_v2 }
0x640b   : > { %17095 = vmatprep.subr.mxu0 %v21911_v27 }
0x640c   : > { %17096 = vmatpush3.msra.mxu0 %v21911_v27 }
0x640d   : > { %17097 = vmatprep.subr.mxu0 %v21918_v53 }
0x640e   : > { %17098 = vmatpush3.msra.mxu0 %v21918_v53 }
0x640f   : > { %17099 = vmatprep.subr.mxu0 %v21925_v52 }
0x6410   : > { %17100 = vmatpush3.msra.mxu0 %v21925_v52 }
0x6411   : > { %17159 = vmatprep.subr.mxu0 %v21403_v20 }
0x64b9   : > { %v17062_v22 = vpop.f32.mrf.mxu0 }
0x64ba   : > { %v12501_v30 = vadd.f32 %v17062_v22, %v21936_v5 }
0x64bb   : > { %v12491_v11 = vpop.f32.mrf.mxu0 }
0x64bc   : > { %v14158_v60 = vmul.f32 -1.442695, %v12501_v30  ;;  %v12500_v25 = vadd.f32 %v12491_v11, %v21939_v57 }
0x64be   : > { %17453 = vpow2.f32 %v14158_v60  ;;  %v14157_v45 = vmul.f32 -1.442695, %v12500_v25 }
0x64c0   : > { %17455 = vpow2.f32 %v14157_v45 }
0x64cb   : > { %v17454_v4 = vpop.eup %17453 }
0x64cc   : > { %v12509_v17 = vadd.f32 1.0, %v17454_v4 }
0x64cd   : > { %v17456_v32 = vpop.eup %17455 }
0x64ce   : > { %17457 = vrcp.f32 %v12509_v17  ;;  %v12508_v50 = vadd.f32 1.0, %v17456_v32 }
0x64d0   : > { %17459 = vrcp.f32 %v12508_v50 }
0x64db   : > { %v21943_v54 = vpop.eup %17457 }
0x64dc   : > { %v12515_v34 = vmul.f32 %v21943_v54, %v21779_v41 }
0x64dd   : > { %v21947_v39 = vpop.eup %17459 }
0x64de   : > { %17063 = vmatprep.subr.mxu1 %v12515_v34  ;;  %v12514_v49 = vmul.f32 %v21947_v39, %v21786_v9 }
0x64df   : > { %17064 = vmatpush3.msra.mxu1 %v12515_v34 }
0x64e0   : > { %17065 = vmatprep.subr.mxu1 %v12514_v49 }
0x64e1   : > { %17066 = vmatpush3.msra.mxu1 %v12514_v49 }
0x64e2   : > { %17068 = vmatmul.mubr.msk.f32.vlgmr.msra.gmra.mxu1 %vm393_vm0, %v21793_v16 }
0x64e3   : > { %17074 = vmatprep.mubr.msk.f32.mxu1 %vm393_vm0, %v21797_v59 }
0x65a2   : > { %v17069_v26 = vpop.f32.mrf.mxu1 }
0x65a3   : > { %12674 = vrot.lane.b32.xlu1 %v17069_v26, %s17766_s21  ;;  %17070 = vmatprep.subr.mxu1 %v17069_v26 }
0x65a4   : > { %v12582_v41 = vpop.f32.mrf.mxu1  ;;  %17071 = vmatpush3.msra.mxu1 %v17069_v26 }
0x65a5   : > { %12672 = vrot.lane.b32.xlu0 %v12582_v41, %s17766_s21  ;;  %17072 = vmatprep.subr.mxu1 %v12582_v41 }
0x65a6   : > { %17073 = vmatpush3.msra.mxu1 %v12582_v41 }
0x65a7   : > { %17075 = vmatmul.mubr.msk.f32.vlgmr.msra.gmra.mxu1 %vm393_vm0, %v21793_v16 }
0x65a8   : > { %17108 = vmatprep.mubr.msk.f32.mxu1 %vm393_vm0, %v21797_v59 }
0x6615   : > { %v12675_v45 = vpop.permute.xlu1 %12674 }
0x6616   : > { %v12687_v26 = vsel %vm570_vm1, %v12515_v34, %v12675_v45 }
0x6617   : > { %v12673_v4 = vpop.permute.xlu0 %12672 }
0x6618   : > { %v12686_v32 = vsel %vm570_vm1, %v12514_v49, %v12673_v4 }
0x6667   : > { %v17076_v9 = vpop.f32.mrf.mxu1 }
0x6668   : > { %v12667_v22 = vmul.f32 2.0, %v17076_v9 }
0x6669   : > { %v12657_v30 = vpop.f32.mrf.mxu1 }
0x666a   : > { %v12669_v11 = vsub.f32 %v12667_v22, %v12515_v34  ;;  %v12666_v60 = vmul.f32 2.0, %v12657_v30  ;;  %v22299_v34 = vld [vmem:[#allocation12_spill] sm:$0xff] }
0x666c   : > { %v12668_v25 = vsub.f32 %v12666_v60, %v12514_v49  ;;  %12682 = vrot.lane.b32.xlu1 %v12669_v11, %s17767_s26 }
0x666e   : > { %12680 = vrot.lane.b32.xlu0 %v12668_v25, %s17767_s26 }
0x6670   : > { %6960 = vrot.lane.b32.xlu1 %v20234_v15, %s17767_s26 }
0x6672   : > { %6962 = vrot.lane.b32.xlu0 %v20227_v3, %s17767_s26 }
0x66de   : > { %v12683_v17 = vpop.permute.xlu1 %12682 }
0x66df   : > { %v12689_v9 = vsel %vm573_vm2, %v12687_v26, %v12683_v17 }
0x66e0   : > { %v12681_v50 = vpop.permute.xlu0 %12680 }
0x66e1   : > { %v12688_v41 = vsel %vm573_vm2, %v12686_v32, %v12681_v50 }
0x66e2   : > { %v6961_v22 = vpop.permute.xlu1 %6960  ;;  %17101 = vmatprep.mubr.msk.f32.mxu0 %vm756_vm3, %v12688_v41 }
0x66e3   : > { %v6966_v15 = vadd.f32 %v6961_v22, %v19967_v31  ;;  %17102 = vmatmul.mubr.msk.f32.vlgmr.msra.gmra.mxu0 %vm756_vm3, %v12689_v9 }
0x66e4   : > { %v6963_v3 = vpop.permute.xlu0 %6962  ;;  %17160 = vmatpush3.msra.mxu0 %v21403_v20  ;;  %v22296_v20 = vld [vmem:[#allocation15_spill] sm:$0xff] }
0x66e5   : > { %17461 = vtanh.f32 %v6966_v15  ;;  %v6967_v49 = vadd.f32 %v6963_v3, %v19964_v51  ;;  %17161 = vmatprep.subr.mxu0 %v21676_v21  ;;  %v12786_v15 = vsub.f32 1.0, %v21943_v54 }
0x66e6   : > { %17162 = vmatpush3.msra.mxu0 %v21676_v21  ;;  %v6972_v21 = vsub.f32 1.0, %v22296_v20 }
0x66e7   : > { %17463 = vtanh.f32 %v6967_v49  ;;  %17163 = vmatprep.subr.mxu0 %v21683_v58  ;;  %v12784_v49 = vmul.f32 %v21943_v54, %v21761_v36 }
0x66e8   : > { %17164 = vmatpush3.msra.mxu0 %v21683_v58 }
0x66e9   : > { %17165 = vmatprep.subr.mxu0 %v21690_v63 }
0x66ea   : > { %17166 = vmatpush3.msra.mxu0 %v21690_v63  ;;  %v22297_v63 = vld [vmem:[#allocation13_spill] sm:$0xff] }
0x66eb   : > { %17167 = vmatprep.subr.mxu0 %v21697_v6 }
0x66ec   : > { %17168 = vmatpush3.msra.mxu0 %v21697_v6  ;;  %v6970_v6 = vmul.f32 %v22296_v20, %v22297_v63 }
0x66ed   : > { %17169 = vmatprep.subr.mxu0 %v21704_v28 }
0x66ee   : > { %17170 = vmatpush3.msra.mxu0 %v21704_v28 }
0x66ef   : > { %17171 = vmatprep.subr.mxu0 %v21711_v40 }
0x66f0   : > { %17172 = vmatpush3.msra.mxu0 %v21711_v40  ;;  %v22298_v40 = vld [vmem:[#allocation14_spill] sm:$0xff] }
0x66f1   : > { %17173 = vmatprep.subr.mxu0 %v21718_v35 }
0x66f2   : > { %v17462_v51 = vpop.eup %17461  ;;  %17174 = vmatpush3.msra.mxu0 %v21718_v35  ;;  %v6973_v35 = vsub.f32 1.0, %v22298_v40 }
0x66f3   : > { %6976 = vrot.lane.b32.xlu1 %v17462_v51, %s17768_s22  ;;  %17175 = vmatprep.subr.mxu0 %v21725_v19 }
0x66f4   : > { %v17464_v31 = vpop.eup %17463  ;;  %17176 = vmatpush3.msra.mxu0 %v21725_v19 }
0x66f5   : > { %6978 = vrot.lane.b32.xlu0 %v17464_v31, %s17768_s22  ;;  %17177 = vmatprep.subr.mxu0 %v21732_v38 }
0x66f6   : > { %17178 = vmatpush3.msra.mxu0 %v21732_v38 }
0x66f7   : > { %17179 = vmatprep.subr.mxu0 %v21739_v7 }
0x66f8   : > { %17180 = vmatpush3.msra.mxu0 %v21739_v7  ;;  %v6971_v7 = vmul.f32 %v22298_v40, %v22299_v34 }
0x66f9   : > { %17181 = vmatprep.subr.mxu0 %v21746_v14 }
0x66fa   : > { %17182 = vmatpush3.msra.mxu0 %v21746_v14 }
0x66fb   : > { %17200 = vmatprep.subr.mxu0 %v21588_v29 }
0x6765   : > { %v6977_v58 = vpop.permute.xlu1 %6976 }
0x6766   : > { %v6982_v28 = vmul.f32 %v6977_v58, %v6972_v21 }
0x6767   : > { %v6979_v19 = vpop.permute.xlu0 %6978 }
0x6768   : > { %v6984_v38 = vadd.f32 %v6982_v28, %v6970_v6  ;;  %v6983_v30 = vmul.f32 %v6979_v19, %v6973_v35 }
0x676a   : > { %v6985_v11 = vadd.f32 %v6983_v30, %v6971_v7  ;;  %6988 = vrot.lane.b32.xlu1 %v6984_v38, %s17768_s22 }
0x676c   : > { %6990 = vrot.lane.b32.xlu0 %v6985_v11, %s17768_s22 }
0x67a3   : > { %v17103_v14 = vpop.f32.mrf.mxu0 }
0x67a4   : > { %12775 = vrot.lane.b32.xlu0 %v17103_v14, %s17767_s26 }
0x67a5   : > { %v12762_v60 = vpop.f32.mrf.mxu0 }
0x67a6   : > { %12773 = vrot.lane.b32.xlu1 %v12762_v60, %s17767_s26 }
0x67dc   : > { %v6989_v25 = vpop.permute.xlu1 %6988 }
0x67dd   : > { %6995 = vst.msk [vmem:[#allocation2 + $0x70] sm:$0xff] %vm570_vm1, %v6989_v25  ;;  %6997 = vst.msk [vmem:[%s22013_s12] sm:$0xff] %vm570_vm1, %v6989_v25 }
0x67de   : > { %v6991_v45 = vpop.permute.xlu0 %6990 }
0x67df   : > { %6996 = vst.msk [vmem:[#allocation2 + $0x78] sm:$0xff] %vm570_vm1, %v6991_v45  ;;  %6998 = vst.msk [vmem:[%s22013_s12 + $0x8] sm:$0xff] %vm570_vm1, %v6991_v45 }
0x67e4   : > { %v22024_v17 = vld [vmem:[#allocation2 + $0x70] sm:$0xff] }
0x67e6   : > { %v22020_v4 = vld [vmem:[#allocation2 + $0x78] sm:$0xff] }
0x67e7   : > { %17104 = vmatprep.subr.mxu1 %v22020_v4 }
0x67e8   : > { %17105 = vmatpush3.msra.mxu1 %v22020_v4 }
0x67e9   : > { %17106 = vmatprep.subr.mxu1 %v22024_v17 }
0x67ea   : > { %17107 = vmatpush3.msra.mxu1 %v22024_v17 }
0x67eb   : > { %17109 = vmatmul.mubr.msk.f32.vlgmr.msra.gmra.mxu1 %vm393_vm0, %v21793_v16 }
0x67ec   : > { %17115 = vmatprep.mubr.msk.f32.mxu1 %vm393_vm0, %v21797_v59 }
0x6816   : > { %v12776_v32 = vpop.permute.xlu0 %12775 }
0x6817   : > { %v12780_v50 = vadd.f32 %v12776_v32, %v21936_v5  ;;  %v12785_v5 = vsub.f32 1.0, %v21947_v39 }
0x6818   : > { %v12774_v26 = vpop.permute.xlu1 %12773 }
0x6819   : > { %17465 = vtanh.f32 %v12780_v50  ;;  %v12779_v41 = vadd.f32 %v12774_v26, %v21939_v57  ;;  %v12783_v57 = vmul.f32 %v21947_v39, %v21765_v42 }
0x681b   : > { %17467 = vtanh.f32 %v12779_v41 }
0x6826   : > { %v17466_v9 = vpop.eup %17465 }
0x6827   : > { %12791 = vrot.lane.b32.xlu0 %v17466_v9, %s17768_s22 }
0x6828   : > { %v17468_v22 = vpop.eup %17467 }
0x6829   : > { %12789 = vrot.lane.b32.xlu1 %v17468_v22, %s17768_s22 }
0x6899   : > { %v12792_v3 = vpop.permute.xlu0 %12791 }
0x689a   : > { %v12796_v51 = vmul.f32 %v12792_v3, %v12786_v15 }
0x689b   : > { %v12790_v31 = vpop.permute.xlu1 %12789 }
0x689c   : > { %v22040_v20 = vadd.f32 %v12796_v51, %v12784_v49  ;;  %v12795_v21 = vmul.f32 %v12790_v31, %v12785_v5 }
0x689e   : > { %v22044_v58 = vadd.f32 %v12795_v21, %v12783_v57  ;;  %12803 = vrot.lane.b32.xlu0 %v22040_v20, %s17768_s22 }
0x68a0   : > { %12801 = vrot.lane.b32.xlu1 %v22044_v58, %s17768_s22 }
0x68ab   : > { %v17110_v36 = vpop.f32.mrf.mxu1 }
0x68ac   : > { %12970 = vrot.lane.b32.xlu1 %v17110_v36, %s17766_s21  ;;  %17111 = vmatprep.subr.mxu1 %v17110_v36 }
0x68ad   : > { %v12878_v54 = vpop.f32.mrf.mxu1  ;;  %17112 = vmatpush3.msra.mxu1 %v17110_v36 }
0x68ae   : > { %17113 = vmatprep.subr.mxu1 %v12878_v54  ;;  %12968 = vrot.lane.b32.xlu0 %v12878_v54, %s17766_s21 }
0x68af   : > { %17114 = vmatpush3.msra.mxu1 %v12878_v54 }
0x68b0   : > { %17116 = vmatmul.mubr.msk.f32.vlgmr.msra.gmra.mxu1 %vm393_vm0, %v21793_v16 }
0x68b1   : > { %17122 = vmatprep.mubr.msk.f32.mxu1 %vm393_vm0, %v21797_v59 }
0x6910   : > { %v22056_v42 = vpop.permute.xlu0 %12803 }
0x6911   : > { %14166 = vst.msk [vmem:[%s20452_s23 + $0x68] sm:$0xff] %vm570_vm1, %v22056_v42  ;;  %17118 = vmatprep.subr.mxu1 %v22056_v42 }
0x6912   : > { %v22062_v39 = vpop.permute.xlu1 %12801  ;;  %17119 = vmatpush3.msra.mxu1 %v22056_v42 }
0x6913   : > { %14165 = vst.msk [vmem:[%s20452_s23 + $0x60] sm:$0xff] %vm570_vm1, %v22062_v39  ;;  %17120 = vmatprep.subr.mxu1 %v22062_v39 }
0x6914   : > { %17121 = vmatpush3.msra.mxu1 %v22062_v39 }
0x6915   : > { %17123 = vmatmul.mubr.msk.f32.vlgmr.msra.gmra.mxu1 %vm393_vm0, %v21793_v16 }
0x6916   : > { %17129 = vmatprep.mubr.msk.f32.mxu1 %vm393_vm0, %v21797_v59 }
0x6920   : > { %v12969_v7 = vpop.permute.xlu0 %12968 }
0x6970   : > { %v17117_v63 = vpop.f32.mrf.mxu1 }
0x6971   : > { %v12963_v6 = vmul.f32 2.0, %v17117_v63 }
0x6972   : > { %v12953_v28 = vpop.f32.mrf.mxu1 }
0x6973   : > { %v12965_v40 = vsub.f32 %v12963_v6, %v22020_v4  ;;  %v12962_v35 = vmul.f32 2.0, %v12953_v28 }
0x6975   : > { %v12964_v19 = vsub.f32 %v12962_v35, %v22024_v17  ;;  %12978 = vrot.lane.b32.xlu1 %v12965_v40, %s17767_s26 }
0x6977   : > { %12976 = vrot.lane.b32.xlu0 %v12964_v19, %s17767_s26 }
0x69d5   : > { %v17124_v38 = vpop.f32.mrf.mxu1 }
0x69d6   : > { %13144 = vrot.lane.b32.xlu1 %v17124_v38, %s17766_s21  ;;  %17125 = vmatprep.subr.mxu1 %v17124_v38 }
0x69d7   : > { %v13052_v34 = vpop.f32.mrf.mxu1  ;;  %17126 = vmatpush3.msra.mxu1 %v17124_v38 }
0x69d8   : > { %13142 = vrot.lane.b32.xlu0 %v13052_v34, %s17766_s21  ;;  %17127 = vmatprep.subr.mxu1 %v13052_v34 }
0x69d9   : > { %17128 = vmatpush3.msra.mxu1 %v13052_v34 }
0x69da   : > { %17130 = vmatmul.mubr.msk.f32.vlgmr.msra.gmra.mxu1 %vm393_vm0, %v21793_v16  ;;  %17132 = vmatprep.subr.mxu1 %v21485_v37 }
0x69db   : > { %17133 = vmatpush3.msra.mxu1 %v21485_v37  ;;  %v12982_v37 = vsel %vm570_vm1, %v22024_v17, %v12969_v7 }
0x69dc   : > { %17134 = vmatprep.subr.mxu1 %v21493_v13 }
0x69dd   : > { %17135 = vmatpush3.msra.mxu1 %v21493_v13 }
0x69de   : > { %17136 = vmatprep.subr.mxu1 %v21500_v43 }
0x69df   : > { %17137 = vmatpush3.msra.mxu1 %v21500_v43  ;;  %v12971_v43 = vpop.permute.xlu1 %12970 }
0x69e0   : > { %17138 = vmatprep.subr.mxu1 %v21507_v47 }
0x69e1   : > { %17139 = vmatpush3.msra.mxu1 %v21507_v47 }
0x69e2   : > { %17140 = vmatprep.subr.mxu1 %v21514_v18 }
0x69e3   : > { %17141 = vmatpush3.msra.mxu1 %v21514_v18 }
0x69e4   : > { %17142 = vmatprep.subr.mxu1 %v21521_v48 }
0x69e5   : > { %17143 = vmatpush3.msra.mxu1 %v21521_v48  ;;  %v12983_v48 = vsel %vm570_vm1, %v22020_v4, %v12971_v43 }
0x69e6   : > { %17144 = vmatprep.subr.mxu1 %v21528_v33 }
0x69e7   : > { %17145 = vmatpush3.msra.mxu1 %v21528_v33  ;;  %v12979_v18 = vpop.permute.xlu1 %12978 }
0x69e8   : > { %17146 = vmatprep.subr.mxu1 %v21535_v62  ;;  %v12985_v33 = vsel %vm573_vm2, %v12983_v48, %v12979_v18 }
0x69e9   : > { %17147 = vmatpush3.msra.mxu1 %v21535_v62  ;;  %v12977_v13 = vpop.permute.xlu0 %12976 }
0x69ea   : > { %v12984_v47 = vsel %vm573_vm2, %v12982_v37, %v12977_v13  ;;  %17148 = vmatprep.subr.mxu1 %v21542_v10 }
0x69eb   : > { %17149 = vmatpush3.msra.mxu1 %v21542_v10  ;;  %17156 = vmatprep.mubr.msk.f32.mxu1 %vm756_vm3, %v12984_v47 }
0x69ec   : > { %17150 = vmatprep.subr.mxu1 %v21549_v8 }
0x69ed   : > { %17151 = vmatpush3.msra.mxu1 %v21549_v8 }
0x69ee   : > { %17152 = vmatprep.subr.mxu1 %v21556_v44 }
0x69ef   : > { %17153 = vmatpush3.msra.mxu1 %v21556_v44 }
0x69f0   : > { %17154 = vmatprep.subr.mxu1 %v21565_v55 }
0x69f1   : > { %17155 = vmatpush3.msra.mxu1 %v21565_v55 }
0x69f2   : > { %17157 = vmatmul.mubr.msk.f32.vlgmr.msra.gmra.mxu1 %vm756_vm3, %v12985_v33 }
0x69f3   : > { %17190 = vmatprep.mubr.msk.f32.mxu1 %vm393_vm0, %v21797_v59 }
0x6a48   : > { %v13145_v14 = vpop.permute.xlu1 %13144 }
0x6a49   : > { %v13157_v4 = vsel %vm570_vm1, %v22056_v42, %v13145_v14 }
0x6a4a   : > { %v13143_v60 = vpop.permute.xlu0 %13142 }
0x6a4b   : > { %v13156_v25 = vsel %vm570_vm1, %v22062_v39, %v13143_v60 }
0x6a9a   : > { %v17131_v62 = vpop.f32.mrf.mxu1 }
0x6a9b   : > { %v13137_v10 = vmul.f32 2.0, %v17131_v62 }
0x6a9c   : > { %v13127_v8 = vpop.f32.mrf.mxu1 }
0x6a9d   : > { %v13139_v30 = vsub.f32 %v13137_v10, %v22056_v42  ;;  %v13136_v44 = vmul.f32 2.0, %v13127_v8 }
0x6a9f   : > { %v13138_v11 = vsub.f32 %v13136_v44, %v22062_v39  ;;  %13152 = vrot.lane.b32.xlu1 %v13139_v30, %s17767_s26 }
0x6aa1   : > { %13150 = vrot.lane.b32.xlu0 %v13138_v11, %s17767_s26 }
0x6b11   : > { %v13153_v55 = vpop.permute.xlu1 %13152 }
0x6b12   : > { %v13159_v32 = vsel %vm573_vm2, %v13157_v4, %v13153_v55 }
0x6b13   : > { %v13151_v45 = vpop.permute.xlu0 %13150 }
0x6b14   : > { %v13158_v17 = vsel %vm573_vm2, %v13156_v25, %v13151_v45 }
0x6b15   : > { %17183 = vmatprep.mubr.msk.f32.mxu0 %vm756_vm3, %v13158_v17 }
0x6b16   : > { %17184 = vmatmul.mubr.msk.f32.vlgmr.msra.gmra.mxu0 %vm756_vm3, %v13159_v32 }
0x6b17   : > { %17201 = vmatpush3.msra.mxu0 %v21588_v29  ;;  %v17158_v29 = vpop.f32.mrf.mxu1 }
0x6b18   : > { %17202 = vmatprep.subr.mxu0 %v21855_v23 }
0x6b19   : > { %17203 = vmatpush3.msra.mxu0 %v21855_v23  ;;  %v13232_v23 = vpop.f32.mrf.mxu1 }
0x6b1a   : > { %17204 = vmatprep.subr.mxu0 %v21862_v12 }
0x6b1b   : > { %17205 = vmatpush3.msra.mxu0 %v21862_v12  ;;  %v13238_v12 = vadd.f32 %v21933_v46, %v17158_v29 }
0x6b1c   : > { %17206 = vmatprep.subr.mxu0 %v21869_v1 }
0x6b1d   : > { %17207 = vmatpush3.msra.mxu0 %v21869_v1 }
0x6b1e   : > { %17208 = vmatprep.subr.mxu0 %v21876_v0 }
0x6b1f   : > { %17209 = vmatpush3.msra.mxu0 %v21876_v0  ;;  %v13233_v0 = vadd.f32 %v21933_v46, %v13232_v23 }
0x6b20   : > { %17210 = vmatprep.subr.mxu0 %v21883_v56 }
0x6b21   : > { %17211 = vmatpush3.msra.mxu0 %v21883_v56 }
0x6b22   : > { %17212 = vmatprep.subr.mxu0 %v21890_v24 }
0x6b23   : > { %17213 = vmatpush3.msra.mxu0 %v21890_v24 }
0x6b24   : > { %17214 = vmatprep.subr.mxu0 %v21897_v61 }
0x6b25   : > { %17215 = vmatpush3.msra.mxu0 %v21897_v61 }
0x6b26   : > { %17216 = vmatprep.subr.mxu0 %v21904_v2 }
0x6b27   : > { %17217 = vmatpush3.msra.mxu0 %v21904_v2 }
0x6b28   : > { %17218 = vmatprep.subr.mxu0 %v21911_v27 }
0x6b29   : > { %17219 = vmatpush3.msra.mxu0 %v21911_v27 }
0x6b2a   : > { %17220 = vmatprep.subr.mxu0 %v21918_v53 }
0x6b2b   : > { %17221 = vmatpush3.msra.mxu0 %v21918_v53 }
0x6b2c   : > { %17222 = vmatprep.subr.mxu0 %v21925_v52 }
0x6b2d   : > { %17223 = vmatpush3.msra.mxu0 %v21925_v52 }
0x6bd6   : > { %v17185_v1 = vpop.f32.mrf.mxu0 }
0x6bd7   : > { %v13323_v56 = vadd.f32 %v17185_v1, %v13238_v12 }
0x6bd8   : > { %v13313_v24 = vpop.f32.mrf.mxu0 }
0x6bd9   : > { %v14180_v61 = vmul.f32 -1.442695, %v13323_v56  ;;  %v13322_v2 = vadd.f32 %v13313_v24, %v13233_v0 }
0x6bdb   : > { %17469 = vpow2.f32 %v14180_v61  ;;  %v14179_v27 = vmul.f32 -1.442695, %v13322_v2 }
0x6bdd   : > { %17471 = vpow2.f32 %v14179_v27 }
0x6be8   : > { %v17470_v50 = vpop.eup %17469 }
0x6be9   : > { %v13331_v53 = vadd.f32 1.0, %v17470_v50 }
0x6bea   : > { %v17472_v26 = vpop.eup %17471 }
0x6beb   : > { %17473 = vrcp.f32 %v13331_v53  ;;  %v13330_v41 = vadd.f32 1.0, %v17472_v26 }
0x6bed   : > { %17475 = vrcp.f32 %v13330_v41 }
0x6bf8   : > { %v17474_v52 = vpop.eup %17473 }
0x6bf9   : > { %v13337_v9 = vmul.f32 %v17474_v52, %v22056_v42  ;;  %v13608_v13 = vsub.f32 1.0, %v17474_v52  ;;  %v13606_v47 = vmul.f32 %v17474_v52, %v22040_v20 }
0x6bfa   : > { %v17476_v22 = vpop.eup %17475 }
0x6bfb   : > { %17186 = vmatprep.subr.mxu1 %v13337_v9  ;;  %v13336_v46 = vmul.f32 %v17476_v22, %v22062_v39  ;;  %v13607_v48 = vsub.f32 1.0, %v17476_v22  ;;  %v13605_v10 = vmul.f32 %v17476_v22, %v22044_v58 }
0x6bfc   : > { %17187 = vmatpush3.msra.mxu1 %v13337_v9 }
0x6bfd   : > { %17188 = vmatprep.subr.mxu1 %v13336_v46 }
0x6bfe   : > { %17189 = vmatpush3.msra.mxu1 %v13336_v46 }
0x6bff   : > { %17191 = vmatmul.mubr.msk.f32.vlgmr.msra.gmra.mxu1 %vm393_vm0, %v21793_v16 }
0x6c00   : > { %17197 = vmatprep.mubr.msk.f32.mxu1 %vm393_vm0, %v21797_v59 }
0x6cbf   : > { %v17192_v15 = vpop.f32.mrf.mxu1 }
0x6cc0   : > { %13496 = vrot.lane.b32.xlu1 %v17192_v15, %s17766_s21  ;;  %17193 = vmatprep.subr.mxu1 %v17192_v15 }
0x6cc1   : > { %v13404_v3 = vpop.f32.mrf.mxu1  ;;  %17194 = vmatpush3.msra.mxu1 %v17192_v15 }
0x6cc2   : > { %13494 = vrot.lane.b32.xlu0 %v13404_v3, %s17766_s21  ;;  %17195 = vmatprep.subr.mxu1 %v13404_v3  ;;  %s13670_s21 = sshll.u32 %s22013_s12, 4  ;;  %s22182_s21 = int_to_ptr.vmem [resolvable:$true] %s13670_s21 }
0x6cc3   : > { %17196 = vmatpush3.msra.mxu1 %v13404_v3 }
0x6cc4   : > { %17198 = vmatmul.mubr.msk.f32.vlgmr.msra.gmra.mxu1 %vm393_vm0, %v21793_v16 }
0x6d32   : > { %v13497_v59 = vpop.permute.xlu1 %13496 }
0x6d33   : > { %v13509_v63 = vsel %vm570_vm1, %v13337_v9, %v13497_v59 }
0x6d34   : > { %v13495_v36 = vpop.permute.xlu0 %13494 }
0x6d35   : > { %v13508_v42 = vsel %vm570_vm1, %v13336_v46, %v13495_v36 }
0x6d84   : > { %v17199_v49 = vpop.f32.mrf.mxu1 }
0x6d85   : > { %v13489_v51 = vmul.f32 2.0, %v17199_v49 }
0x6d86   : > { %v13479_v5 = vpop.f32.mrf.mxu1 }
0x6d87   : > { %v13491_v31 = vsub.f32 %v13489_v51, %v13337_v9  ;;  %v13488_v57 = vmul.f32 2.0, %v13479_v5 }
0x6d89   : > { %v13490_v21 = vsub.f32 %v13488_v57, %v13336_v46  ;;  %13504 = vrot.lane.b32.xlu1 %v13491_v31, %s17767_s26 }
0x6d8b   : > { %13502 = vrot.lane.b32.xlu0 %v13490_v21, %s17767_s26 }
0x6dfb   : > { %v13505_v54 = vpop.permute.xlu1 %13504 }
0x6dfc   : > { %v13511_v6 = vsel %vm573_vm2, %v13509_v63, %v13505_v54 }
0x6dfd   : > { %v13503_v39 = vpop.permute.xlu0 %13502 }
0x6dfe   : > { %v13510_v16 = vsel %vm573_vm2, %v13508_v42, %v13503_v39 }
0x6dff   : > { %17224 = vmatprep.mubr.msk.f32.mxu0 %vm756_vm3, %v13510_v16 }
0x6e00   : > { %17225 = vmatmul.mubr.msk.f32.vlgmr.msra.gmra.mxu0 %vm756_vm3, %v13511_v6 }
0x6ec0   : > { %v17226_v28 = vpop.f32.mrf.mxu0 }
0x6ec1   : > { %13597 = vrot.lane.b32.xlu1 %v17226_v28, %s17767_s26 }
0x6ec2   : > { %v13584_v40 = vpop.f32.mrf.mxu0 }
0x6ec3   : > { %13595 = vrot.lane.b32.xlu0 %v13584_v40, %s17767_s26  ;;  %s14201_s26 = sshll.u32 %s17839_s9, 11  ;;  %s22199_s9 = scalar_lea.hbm %s22280_s8, %s14202_s19 }
0x6ec4   : > { %s22188_s10 = scalar_lea.hbm %s22279_s7, %s14201_s26  ;;  %s17667_s26 = scalar_lea.vmem %s22190_s17, 2048 }
0x6ec5   : > { %p17668_p6 = scmp.ne.s32.totalorder %s22190_s17, %s17667_s26  ;;  %p17675_p12 = scmp.lt.s32.totalorder %s17673_s0, %s17667_s26 }
0x6ec7   : > { %p17669_p9 = pnand %p17668_p6, %p17856_p5  ;;  %p17676_p13 = por %p17675_p12, %p17674_p11 }
0x6ec9   : > { %p17670_p10 = pneg %p17669_p9 }
0x6ecb   : > { %p17677_p0 = pnand %p17676_p13, %p17670_p10 }
0x6f33   : > { %v13598_v35 = vpop.permute.xlu1 %13597 }
0x6f34   : > { %v13602_v19 = vadd.f32 %v13598_v35, %v13238_v12 }
0x6f35   : > { %v13596_v38 = vpop.permute.xlu0 %13595 }
0x6f36   : > { %17477 = vtanh.f32 %v13602_v19  ;;  %v13601_v34 = vadd.f32 %v13596_v38, %v13233_v0 }
0x6f38   : > { %17479 = vtanh.f32 %v13601_v34 }
0x6f43   : > { %v17478_v7 = vpop.eup %17477 }
0x6f44   : > { %13613 = vrot.lane.b32.xlu1 %v17478_v7, %s17768_s22 }
0x6f45   : > { %v17480_v37 = vpop.eup %17479 }
0x6f46   : > { %13611 = vrot.lane.b32.xlu0 %v17480_v37, %s17768_s22 }
0x6fb6   : > { %v13614_v43 = vpop.permute.xlu1 %13613 }
0x6fb7   : > { %v13618_v18 = vmul.f32 %v13614_v43, %v13608_v13 }
0x6fb8   : > { %v13612_v33 = vpop.permute.xlu0 %13611 }
0x6fb9   : > { %v13620_v62 = vadd.f32 %v13618_v18, %v13606_v47  ;;  %v13617_v8 = vmul.f32 %v13612_v33, %v13607_v48 }
0x6fbb   : > { %v13619_v30 = vadd.f32 %v13617_v8, %v13605_v10  ;;  %13625 = vrot.lane.b32.xlu1 %v13620_v62, %s17768_s22 }
0x6fbd   : > { %13623 = vrot.lane.b32.xlu0 %v13619_v30, %s17768_s22 }
0x702d   : > { %v13626_v20 = vpop.permute.xlu1 %13625 }
0x702e   : > { %14188 = vst.msk [vmem:[%s20452_s23 + $0x78] sm:$0xff] %vm570_vm1, %v13626_v20  ;;  %14190 = vst.msk [vmem:[%s22013_s12 + $0x18] sm:$0xff] %vm570_vm1, %v13626_v20 }
0x702f   : > { %v13624_v58 = vpop.permute.xlu0 %13623 }
0x7030   : > { %14187 = vst.msk [vmem:[%s20452_s23 + $0x70] sm:$0xff] %vm570_vm1, %v13624_v58  ;;  %14189 = vst.msk [vmem:[%s22013_s12 + $0x10] sm:$0xff] %vm570_vm1, %v13624_v58 }
0x7031   : > { %17680 = shalt.err (!%p17677_p0)
}
0x7032   : > { %s17681_s23 = scalar_lea.hbm %s22188_s10, 2048  ;;  %s17685_s22 = scalar_lea.hbm %s22279_s7, 4096 }
0x7033   : > { %p17682_p1 = scmp.ne.s32.totalorder %s22188_s10, %s17681_s23  ;;  %p17686_p4 = scmp.lt.s32.totalorder %s22188_s10, %s22279_s7 }
0x7034   : > { %p17687_p7 = scmp.lt.s32.totalorder %s17685_s22, %s17681_s23 }
0x7035   : > { %p17683_p2 = pnand %p17682_p1, %p17856_p5 }
0x7036   : > { %p17688_p8 = por %p17687_p7, %p17686_p4 }
0x7037   : > { %p17684_p3 = pneg %p17683_p2 }
0x7039   : > { %p17689_p6 = pnand %p17688_p8, %p17684_p3 }
0x703b   : > { %17692 = shalt.err (!%p17689_p6)
}
0x703c   : > { %s17770_s0 = smov 128   ;;  %s17771_s26 = smov 8  }
0x703d   : > { %17231 = dma.vmem_to_hbm [thread:$0]  (%p17856_p5), %s22190_s17, 2048, %s22188_s10, %s13636_s20, %s17770_s0, %s17770_s0, %s17771_s26  }
0x703e   : > { %s13641_s25 = scalar_lea.sflag [#allocation8], %s20446_s18  ;;  %s17693_s23 = scalar_lea.vmem %s22182_s21, 512 }
0x703f   : > { %p17694_p9 = scmp.ne.s32.totalorder %s22182_s21, %s17693_s23  ;;  %s17772_s12 = smov [#allocation7]  }
0x7040   : > { %s17697_s19 = sshll.u32 %s17772_s12, 4  ;;  %s17698_s19 = int_to_ptr.vmem [resolvable:$false] %s17697_s19 }
0x7041   : > { %p17695_p10 = pnand %p17694_p9, %p17856_p5  ;;  %s17699_s22 = scalar_lea.vmem %s17698_s19, 1024 }
0x7042   : > { %p17700_p12 = scmp.lt.s32.totalorder %s22182_s21, %s17698_s19  ;;  %p17701_p13 = scmp.lt.s32.totalorder %s17699_s22, %s17693_s23 }
0x7043   : > { %p17696_p11 = pneg %p17695_p10 }
0x7044   : > { %p17702_p0 = por %p17701_p13, %p17700_p12 }
0x7046   : > { %p17703_p1 = pnand %p17702_p0, %p17696_p11 }
0x7048   : > { %17706 = shalt.err (!%p17703_p1)
}
0x7049   : > { %s17707_s17 = scalar_lea.hbm %s22199_s9, 512  ;;  %s17711_s20 = scalar_lea.hbm %s22280_s8, 1024 }
0x704a   : > { %p17708_p2 = scmp.ne.s32.totalorder %s22199_s9, %s17707_s17  ;;  %p17712_p7 = scmp.lt.s32.totalorder %s22199_s9, %s22280_s8 }
0x704b   : > { %p17713_p8 = scmp.lt.s32.totalorder %s17711_s20, %s17707_s17 }
0x704c   : > { %p17709_p3 = pnand %p17708_p2, %p17856_p5 }
0x704d   : > { %p17714_p6 = por %p17713_p8, %p17712_p7 }
0x704e   : > { %p17710_p4 = pneg %p17709_p3 }
0x7050   : > { %p17715_p9 = pnand %p17714_p6, %p17710_p4 }
0x7052   : > { %17718 = shalt.err (!%p17715_p9)
}
0x7053   : > { %17232 = dma.vmem_to_hbm [thread:$0]  (%p17856_p5), %s22182_s21, 512, %s22199_s9, %s13641_s25, %s17770_s0, %s17770_s0, %s17771_s26  }
0x7054 PF: > { %p17248_p10 = scmp.ge.s32.totalorder %s17761_s30, 2  ;;  %s13685_s23 = sand.u32 1, %s17749_s27  }
0x7055   : > { %p22300_p11 = scmp.ne.s32.totalorder %s22289_s16, 0  ;;  %s13686_s12 = scalar_lea.sflag [#allocation5], %s13685_s23 }
0x7057   : > { %p17240_p12 = pnand %p17248_p10, %p22300_p11 }
0x7059   : > { %p17241_p13 = pneg %p17240_p12 }
0x705b   : > { %17740 = dma.done.wait (%p17241_p13), %s13686_s12, 2048  }
0x705c   : > { %17742 = vsyncadd (%p17241_p13), %s13686_s12, 4294965248  ;;  %s13695_s19 = scalar_lea.sflag [#allocation8], %s13685_s23 }
0x705d   : > { %17744 = dma.done.wait (%p17241_p13), %s13695_s19, 512  }
0x705e   : > { %17746 = vsyncadd (%p17241_p13), %s13695_s19, 4294966784  ;;  %p23_p5 = scmp.ge.s32.totalorder %s17843_s11, 4   ;;  %s22301_s27 = smov %s17753_s28 }
0x705f   : > { %s22302_s28 = smov %s17757_s29  ;;  %s22303_s29 = smov %s17854_s14 }
0x7060   : > { %s22304_s30 = smov %s17843_s11  ;;  %25 = sbr.rel (!%p23_p5) target bundleno = 8 (0x8), region = 135 }
0x7065   :  { %13700 = vsyncpa [#allocation4], 1 }
0x7066   :  { %13702 = vsyncpa [#allocation4 + $0x1], 1 }
0x7067   :  { %13703 = vsyncpa [#allocation5], 1 }
0x7068   :  { %13705 = vsyncpa [#allocation5 + $0x1], 1 }
0x7069   :  { %13706 = vsyncpa [#allocation8], 1 }
0x706a   :  { %13708 = vsyncpa [#allocation8 + $0x1], 1 }

</bundles_post_ra>
